<compile_context>
chip_gen: v6e
topology: v6e:2x2x1
jax: 0.10.0
libtpu: 0.0.40
codegen_flags: <defaults>
</compile_context>

<pallas_src>
import functools

import jax
import jax.numpy as jnp
from jax.experimental import pallas as pl
from jax.experimental.pallas import tpu as pltpu

EPS = 1e-5  # nn.InstanceNorm3d default


def _round_up(v, m):
    return (v + m - 1) // m * m


def _resnet_block_kernel(x_ref, w1_ref, w2_ref, mask_ref, o_ref, *,
                         So, margin, rels, inv_cnt):
    """One grid step = one instance n.

    x_ref:    (C, margin + So + margin) f32, channels-first, zero-padded,
              flattened (Dp*Hp*Wp, rounded up to So=multiple of 128) spatial
              with 128-aligned lane margins on both sides.
    w*_ref:   (C_out, 27*C_in) f32, tap-major then input-channel.
    mask_ref: (1, So) f32, 1.0 at interior (valid conv output) positions.
    o_ref:    (C, So) f32; only interior columns are meaningful.
    """
    x = x_ref[...]
    w1 = w1_ref[...]
    w2 = w2_ref[...]
    mask = mask_ref[...]
    C = x.shape[0]

    def conv_cols(buf):
        # 27 shifted views of the flat padded volume stacked along the
        # contraction axis -> single (C, 27C) @ (27C, So) MXU matmul.
        taps = [buf[:, margin + r: margin + r + So] for r in rels]
        return jnp.concatenate(taps, axis=0)                      # (27C, So)

    def inorm(y):
        # Masked single-pass instance norm (biased variance), per (c) row.
        ym = y * mask
        s1 = jnp.sum(ym, axis=-1, keepdims=True)
        s2 = jnp.sum(ym * y, axis=-1, keepdims=True)
        mean = s1 * inv_cnt
        var = s2 * inv_cnt - mean * mean
        return (y - mean) * jax.lax.rsqrt(var + EPS)

    # block 1: conv -> IN -> ReLU   (bias omitted: cancels under IN)
    y1 = jnp.dot(w1, conv_cols(x), preferred_element_type=jnp.float32)
    h = jnp.maximum(inorm(y1), 0.0) * mask      # mask == zero padding for conv2

    # re-attach 128-aligned lane margins so block-2 tap slices stay in bounds
    # (margin values only ever feed discarded boundary columns).
    zpad = jnp.zeros((C, margin), jnp.float32)
    hbuf = jnp.concatenate([zpad, h, zpad], axis=1)

    # block 2: conv -> IN -> residual add
    y2 = jnp.dot(w2, conv_cols(hbuf), preferred_element_type=jnp.float32)
    z = inorm(y2)
    xres = x[:, margin:margin + So]             # original x (0 at pad positions)
    o_ref[...] = (xres + z).astype(o_ref.dtype)


def resnet_block_forward(x, params, padding_type="zero"):
    """x: (N, D, H, W, C) float32 (NDHWC layout)."""
    if padding_type != "zero":
        raise NotImplementedError(
            "only padding_type='zero' is implemented in the fused kernel")

    N, D, H, W, C = x.shape
    Dp, Hp, Wp = D + 2, H + 2, W + 2
    S = Dp * Hp * Wp
    So = _round_up(S, 128)                 # lane-dense / unmasked stores
    max_rel = Hp * Wp + Wp + 1
    margin = _round_up(max_rel, 128)       # 128-aligned margins
    Stot = margin + So + margin            # multiple of 128

    # Channels-first, zero-pad spatial, flatten, add lane margins (one cheap
    # fused XLA transpose+pad on ~64 KiB; all heavy work stays in the kernel).
    xt = jnp.transpose(x, (0, 4, 1, 2, 3)).astype(jnp.float32)   # (N,C,D,H,W)
    xp = jnp.pad(xt, ((0, 0), (0, 0), (1, 1), (1, 1), (1, 1)))
    xb = jnp.pad(xp.reshape(N, C, S),
                 ((0, 0), (0, 0), (margin, margin + So - S)))

    # (3,3,3,Cin,Cout) -> (Cout, 27*Cin), tap-major then input channel.
    w1t = params["w1"].reshape(27 * C, C).T.astype(jnp.float32)
    w2t = params["w2"].reshape(27 * C, C).T.astype(jnp.float32)

    mask3 = jnp.zeros((Dp, Hp, Wp), jnp.float32)
    mask3 = mask3.at[1:1 + D, 1:1 + H, 1:1 + W].set(1.0)
    mask = jnp.pad(mask3.reshape(1, S), ((0, 0), (0, So - S)))

    # static tap offsets in flat padded spatial index space
    rels = tuple((a - 1) * Hp * Wp + (b - 1) * Wp + (c - 1)
                 for a in range(3) for b in range(3) for c in range(3))

    kernel = functools.partial(
        _resnet_block_kernel, So=So, margin=margin, rels=rels,
        inv_cnt=1.0 / float(D * H * W))

    out_flat = pl.pallas_call(
        kernel,
        out_shape=jax.ShapeDtypeStruct((N, C, So), jnp.float32),
        grid=(N,),
        in_specs=[
            pl.BlockSpec((None, C, Stot), lambda n: (n, 0, 0)),
            pl.BlockSpec((C, 27 * C), lambda n: (0, 0)),
            pl.BlockSpec((C, 27 * C), lambda n: (0, 0)),
            pl.BlockSpec((1, So), lambda n: (0, 0)),
        ],
        out_specs=pl.BlockSpec((None, C, So), lambda n: (n, 0, 0)),
        compiler_params=pltpu.CompilerParams(
            dimension_semantics=("parallel",)),
    )(xb, w1t, w2t, mask)

    # back to NDHWC: drop lane padding + the spatial padding ring, channels last.
    out = out_flat[:, :, :S].reshape(N, C, Dp, Hp, Wp)[
        :, :, 1:1 + D, 1:1 + H, 1:1 + W]
    return jnp.transpose(out, (0, 2, 3, 4, 1)).astype(x.dtype)


def _reference_forward(x, params):
    """Pure-JAX reference (matches PyTorch semantics, NDHWC, zero padding)."""
    def conv(a, w, b):
        out = jax.lax.conv_general_dilated(
            a, w, window_strides=(1, 1, 1),
            padding=((1, 1), (1, 1), (1, 1)),
            dimension_numbers=("NDHWC", "DHWIO", "NDHWC"),
            precision=jax.lax.Precision.HIGHEST)
        return out + b.reshape(1, 1, 1, 1, -1)

    def inorm(y):
        m = y.mean(axis=(1, 2, 3), keepdims=True)
        v = ((y - m) ** 2).mean(axis=(1, 2, 3), keepdims=True)
        return (y - m) / jnp.sqrt(v + EPS)

    h = jnp.maximum(inorm(conv(x, params["w1"], params["b1"])), 0.0)
    return x + inorm(conv(h, params["w2"], params["b2"]))


if __name__ == "__main__":
    key = jax.random.PRNGKey(0)
    dim = 8          # channels
    N, D, H, W = 2, 8, 8, 8

    kx, kw1, kb1, kw2, kb2 = jax.random.split(key, 5)
    x = jax.random.normal(kx, (N, D, H, W, dim), jnp.float32)

    fan_in = 27.0 * dim
    scale = 1.0 / jnp.sqrt(fan_in)
    params = {
        "w1": jax.random.normal(kw1, (3, 3, 3, dim, dim), jnp.float32) * scale,
        "b1": jax.random.normal(kb1, (dim,), jnp.float32) * 0.01,
        "w2": jax.random.normal(kw2, (3, 3, 3, dim, dim), jnp.float32) * scale,
        "b2": jax.random.normal(kb2, (dim,), jnp.float32) * 0.01,
    }

    out = jax.block_until_ready(resnet_block_forward(x, params))
    ref = jax.block_until_ready(_reference_forward(x, params))

    assert out.shape == (N, D, H, W, dim)
    max_diff = float(jnp.max(jnp.abs(out - ref)))
    assert jnp.allclose(out, ref, rtol=1e-2, atol=1e-2), max_diff

    print("KERNEL_OK")
</pallas_src>

<mosaic_0001>
module attributes {stable_mosaic.version = 11 : i64} {
  func.func @_resnet_block_kernel(%arg0: i32, %arg1: memref<1x8x1280xf32, #tpu.memory_space<vmem>>, %arg2: memref<8x216xf32, #tpu.memory_space<vmem>>, %arg3: memref<8x216xf32, #tpu.memory_space<vmem>>, %arg4: memref<1x1024xf32, #tpu.memory_space<vmem>>, %arg5: memref<1x8x1024xf32, #tpu.memory_space<vmem>>) attributes {dimension_semantics = [#tpu.dimension_semantics<parallel>], iteration_bounds = array<i64: 2>, scalar_prefetch = 0 : i64, scratch_operands = 0 : i64, tpu.core_type = #tpu.core_type<tc>, window_params = [{transform_indices = @transform_0, window_bounds = array<i64: 1, 8, 1280>}, {pipeline_mode = #tpu.pipeline_mode<synchronous>, transform_indices = @transform_1, window_bounds = array<i64: 8, 216>}, {pipeline_mode = #tpu.pipeline_mode<synchronous>, transform_indices = @transform_2, window_bounds = array<i64: 8, 216>}, {pipeline_mode = #tpu.pipeline_mode<synchronous>, transform_indices = @transform_3, window_bounds = array<i64: 1, 1024>}, {transform_indices = @transform_4, window_bounds = array<i64: 1, 8, 1024>}]} {
    %c0 = arith.constant 0 : index
    %c0_0 = arith.constant 0 : index
    %c0_1 = arith.constant 0 : index
    %0 = vector.load %arg1[%c0, %c0_0, %c0_1] : memref<1x8x1280xf32, #tpu.memory_space<vmem>>, vector<1x8x1280xf32>
    %1 = vector.shape_cast %0 : vector<1x8x1280xf32> to vector<8x1280xf32>
    %c0_2 = arith.constant 0 : index
    %c0_3 = arith.constant 0 : index
    %2 = vector.load %arg2[%c0_2, %c0_3] : memref<8x216xf32, #tpu.memory_space<vmem>>, vector<8x216xf32>
    %c0_4 = arith.constant 0 : index
    %c0_5 = arith.constant 0 : index
    %3 = vector.load %arg3[%c0_4, %c0_5] : memref<8x216xf32, #tpu.memory_space<vmem>>, vector<8x216xf32>
    %c0_6 = arith.constant 0 : index
    %c0_7 = arith.constant 0 : index
    %4 = vector.load %arg4[%c0_6, %c0_7] : memref<1x1024xf32, #tpu.memory_space<vmem>>, vector<1x1024xf32>
    %5 = vector.extract_strided_slice %1 {offsets = [0, 17], sizes = [8, 1024], strides = [1, 1]} : vector<8x1280xf32> to vector<8x1024xf32>
    %6 = vector.extract_strided_slice %1 {offsets = [0, 18], sizes = [8, 1024], strides = [1, 1]} : vector<8x1280xf32> to vector<8x1024xf32>
    %7 = vector.extract_strided_slice %1 {offsets = [0, 19], sizes = [8, 1024], strides = [1, 1]} : vector<8x1280xf32> to vector<8x1024xf32>
    %8 = vector.extract_strided_slice %1 {offsets = [0, 27], sizes = [8, 1024], strides = [1, 1]} : vector<8x1280xf32> to vector<8x1024xf32>
    %9 = vector.extract_strided_slice %1 {offsets = [0, 28], sizes = [8, 1024], strides = [1, 1]} : vector<8x1280xf32> to vector<8x1024xf32>
    %10 = vector.extract_strided_slice %1 {offsets = [0, 29], sizes = [8, 1024], strides = [1, 1]} : vector<8x1280xf32> to vector<8x1024xf32>
    %11 = vector.extract_strided_slice %1 {offsets = [0, 37], sizes = [8, 1024], strides = [1, 1]} : vector<8x1280xf32> to vector<8x1024xf32>
    %12 = vector.extract_strided_slice %1 {offsets = [0, 38], sizes = [8, 1024], strides = [1, 1]} : vector<8x1280xf32> to vector<8x1024xf32>
    %13 = vector.extract_strided_slice %1 {offsets = [0, 39], sizes = [8, 1024], strides = [1, 1]} : vector<8x1280xf32> to vector<8x1024xf32>
    %14 = vector.extract_strided_slice %1 {offsets = [0, 117], sizes = [8, 1024], strides = [1, 1]} : vector<8x1280xf32> to vector<8x1024xf32>
    %15 = vector.extract_strided_slice %1 {offsets = [0, 118], sizes = [8, 1024], strides = [1, 1]} : vector<8x1280xf32> to vector<8x1024xf32>
    %16 = vector.extract_strided_slice %1 {offsets = [0, 119], sizes = [8, 1024], strides = [1, 1]} : vector<8x1280xf32> to vector<8x1024xf32>
    %17 = vector.extract_strided_slice %1 {offsets = [0, 127], sizes = [8, 1024], strides = [1, 1]} : vector<8x1280xf32> to vector<8x1024xf32>
    %18 = vector.extract_strided_slice %1 {offsets = [0, 128], sizes = [8, 1024], strides = [1, 1]} : vector<8x1280xf32> to vector<8x1024xf32>
    %19 = vector.extract_strided_slice %1 {offsets = [0, 129], sizes = [8, 1024], strides = [1, 1]} : vector<8x1280xf32> to vector<8x1024xf32>
    %20 = vector.extract_strided_slice %1 {offsets = [0, 137], sizes = [8, 1024], strides = [1, 1]} : vector<8x1280xf32> to vector<8x1024xf32>
    %21 = vector.extract_strided_slice %1 {offsets = [0, 138], sizes = [8, 1024], strides = [1, 1]} : vector<8x1280xf32> to vector<8x1024xf32>
    %22 = vector.extract_strided_slice %1 {offsets = [0, 139], sizes = [8, 1024], strides = [1, 1]} : vector<8x1280xf32> to vector<8x1024xf32>
    %23 = vector.extract_strided_slice %1 {offsets = [0, 217], sizes = [8, 1024], strides = [1, 1]} : vector<8x1280xf32> to vector<8x1024xf32>
    %24 = vector.extract_strided_slice %1 {offsets = [0, 218], sizes = [8, 1024], strides = [1, 1]} : vector<8x1280xf32> to vector<8x1024xf32>
    %25 = vector.extract_strided_slice %1 {offsets = [0, 219], sizes = [8, 1024], strides = [1, 1]} : vector<8x1280xf32> to vector<8x1024xf32>
    %26 = vector.extract_strided_slice %1 {offsets = [0, 227], sizes = [8, 1024], strides = [1, 1]} : vector<8x1280xf32> to vector<8x1024xf32>
    %27 = vector.extract_strided_slice %1 {offsets = [0, 228], sizes = [8, 1024], strides = [1, 1]} : vector<8x1280xf32> to vector<8x1024xf32>
    %28 = vector.extract_strided_slice %1 {offsets = [0, 229], sizes = [8, 1024], strides = [1, 1]} : vector<8x1280xf32> to vector<8x1024xf32>
    %29 = vector.extract_strided_slice %1 {offsets = [0, 237], sizes = [8, 1024], strides = [1, 1]} : vector<8x1280xf32> to vector<8x1024xf32>
    %30 = vector.extract_strided_slice %1 {offsets = [0, 238], sizes = [8, 1024], strides = [1, 1]} : vector<8x1280xf32> to vector<8x1024xf32>
    %31 = vector.extract_strided_slice %1 {offsets = [0, 239], sizes = [8, 1024], strides = [1, 1]} : vector<8x1280xf32> to vector<8x1024xf32>
    %32 = tpu.concatenate %5, %6, %7, %8, %9, %10, %11, %12, %13, %14, %15, %16, %17, %18, %19, %20 in 0 : vector<8x1024xf32>, vector<8x1024xf32>, vector<8x1024xf32>, vector<8x1024xf32>, vector<8x1024xf32>, vector<8x1024xf32>, vector<8x1024xf32>, vector<8x1024xf32>, vector<8x1024xf32>, vector<8x1024xf32>, vector<8x1024xf32>, vector<8x1024xf32>, vector<8x1024xf32>, vector<8x1024xf32>, vector<8x1024xf32>, vector<8x1024xf32> -> vector<128x1024xf32>
    %33 = tpu.concatenate %21, %22, %23, %24, %25, %26, %27, %28, %29, %30, %31 in 0 : vector<8x1024xf32>, vector<8x1024xf32>, vector<8x1024xf32>, vector<8x1024xf32>, vector<8x1024xf32>, vector<8x1024xf32>, vector<8x1024xf32>, vector<8x1024xf32>, vector<8x1024xf32>, vector<8x1024xf32>, vector<8x1024xf32> -> vector<88x1024xf32>
    %34 = tpu.concatenate %32, %33 in 0 : vector<128x1024xf32>, vector<88x1024xf32> -> vector<216x1024xf32>
    %cst = arith.constant dense<0.000000e+00> : vector<8x1024xf32>
    %35 = tpu.matmul %2, %34, %cst {dimension_numbers = #tpu.dot_dimension_numbers<[1], [0], [0], [1], [0, 0, 1, 1], [], []>} : vector<8x216xf32>, vector<216x1024xf32>, vector<8x1024xf32> -> vector<8x1024xf32>
    %36 = vector.broadcast %4 : vector<1x1024xf32> to vector<8x1024xf32>
    %37 = arith.mulf %35, %36 : vector<8x1024xf32>
    %cst_8 = arith.constant dense<0.000000e+00> : vector<8xf32>
    %38 = vector.multi_reduction <add>, %37, %cst_8 [1] : vector<8x1024xf32> to vector<8xf32>
    %39 = vector.shape_cast %38 : vector<8xf32> to vector<8x1xf32>
    %40 = arith.mulf %37, %35 : vector<8x1024xf32>
    %cst_9 = arith.constant dense<0.000000e+00> : vector<8xf32>
    %41 = vector.multi_reduction <add>, %40, %cst_9 [1] : vector<8x1024xf32> to vector<8xf32>
    %42 = vector.shape_cast %41 : vector<8xf32> to vector<8x1xf32>
    %cst_10 = arith.constant 0.001953125 : f32
    %43 = vector.broadcast %cst_10 : f32 to vector<8x1xf32>
    %44 = arith.mulf %39, %43 : vector<8x1xf32>
    %cst_11 = arith.constant 0.001953125 : f32
    %45 = vector.broadcast %cst_11 : f32 to vector<8x1xf32>
    %46 = arith.mulf %42, %45 : vector<8x1xf32>
    %47 = arith.mulf %44, %44 : vector<8x1xf32>
    %48 = arith.subf %46, %47 : vector<8x1xf32>
    %49 = vector.broadcast %44 : vector<8x1xf32> to vector<8x1024xf32>
    %50 = arith.subf %35, %49 : vector<8x1024xf32>
    %cst_12 = arith.constant 9.99999974E-6 : f32
    %51 = vector.broadcast %cst_12 : f32 to vector<8x1xf32>
    %52 = arith.addf %48, %51 : vector<8x1xf32>
    %53 = math.rsqrt %52 : vector<8x1xf32>
    %54 = vector.broadcast %53 : vector<8x1xf32> to vector<8x1024xf32>
    %55 = arith.mulf %50, %54 : vector<8x1024xf32>
    %cst_13 = arith.constant 0.000000e+00 : f32
    %56 = vector.broadcast %cst_13 : f32 to vector<8x1024xf32>
    %57 = arith.maximumf %55, %56 : vector<8x1024xf32>
    %58 = vector.broadcast %4 : vector<1x1024xf32> to vector<8x1024xf32>
    %59 = arith.mulf %57, %58 : vector<8x1024xf32>
    %cst_14 = arith.constant 0.000000e+00 : f32
    %60 = vector.broadcast %cst_14 : f32 to vector<8x128xf32>
    %61 = tpu.concatenate %60, %59, %60 in 1 : vector<8x128xf32>, vector<8x1024xf32>, vector<8x128xf32> -> vector<8x1280xf32>
    %62 = vector.extract_strided_slice %61 {offsets = [0, 17], sizes = [8, 1024], strides = [1, 1]} : vector<8x1280xf32> to vector<8x1024xf32>
    %63 = vector.extract_strided_slice %61 {offsets = [0, 18], sizes = [8, 1024], strides = [1, 1]} : vector<8x1280xf32> to vector<8x1024xf32>
    %64 = vector.extract_strided_slice %61 {offsets = [0, 19], sizes = [8, 1024], strides = [1, 1]} : vector<8x1280xf32> to vector<8x1024xf32>
    %65 = vector.extract_strided_slice %61 {offsets = [0, 27], sizes = [8, 1024], strides = [1, 1]} : vector<8x1280xf32> to vector<8x1024xf32>
    %66 = vector.extract_strided_slice %61 {offsets = [0, 28], sizes = [8, 1024], strides = [1, 1]} : vector<8x1280xf32> to vector<8x1024xf32>
    %67 = vector.extract_strided_slice %61 {offsets = [0, 29], sizes = [8, 1024], strides = [1, 1]} : vector<8x1280xf32> to vector<8x1024xf32>
    %68 = vector.extract_strided_slice %61 {offsets = [0, 37], sizes = [8, 1024], strides = [1, 1]} : vector<8x1280xf32> to vector<8x1024xf32>
    %69 = vector.extract_strided_slice %61 {offsets = [0, 38], sizes = [8, 1024], strides = [1, 1]} : vector<8x1280xf32> to vector<8x1024xf32>
    %70 = vector.extract_strided_slice %61 {offsets = [0, 39], sizes = [8, 1024], strides = [1, 1]} : vector<8x1280xf32> to vector<8x1024xf32>
    %71 = vector.extract_strided_slice %61 {offsets = [0, 117], sizes = [8, 1024], strides = [1, 1]} : vector<8x1280xf32> to vector<8x1024xf32>
    %72 = vector.extract_strided_slice %61 {offsets = [0, 118], sizes = [8, 1024], strides = [1, 1]} : vector<8x1280xf32> to vector<8x1024xf32>
    %73 = vector.extract_strided_slice %61 {offsets = [0, 119], sizes = [8, 1024], strides = [1, 1]} : vector<8x1280xf32> to vector<8x1024xf32>
    %74 = vector.extract_strided_slice %61 {offsets = [0, 127], sizes = [8, 1024], strides = [1, 1]} : vector<8x1280xf32> to vector<8x1024xf32>
    %75 = vector.extract_strided_slice %61 {offsets = [0, 128], sizes = [8, 1024], strides = [1, 1]} : vector<8x1280xf32> to vector<8x1024xf32>
    %76 = vector.extract_strided_slice %61 {offsets = [0, 129], sizes = [8, 1024], strides = [1, 1]} : vector<8x1280xf32> to vector<8x1024xf32>
    %77 = vector.extract_strided_slice %61 {offsets = [0, 137], sizes = [8, 1024], strides = [1, 1]} : vector<8x1280xf32> to vector<8x1024xf32>
    %78 = vector.extract_strided_slice %61 {offsets = [0, 138], sizes = [8, 1024], strides = [1, 1]} : vector<8x1280xf32> to vector<8x1024xf32>
    %79 = vector.extract_strided_slice %61 {offsets = [0, 139], sizes = [8, 1024], strides = [1, 1]} : vector<8x1280xf32> to vector<8x1024xf32>
    %80 = vector.extract_strided_slice %61 {offsets = [0, 217], sizes = [8, 1024], strides = [1, 1]} : vector<8x1280xf32> to vector<8x1024xf32>
    %81 = vector.extract_strided_slice %61 {offsets = [0, 218], sizes = [8, 1024], strides = [1, 1]} : vector<8x1280xf32> to vector<8x1024xf32>
    %82 = vector.extract_strided_slice %61 {offsets = [0, 219], sizes = [8, 1024], strides = [1, 1]} : vector<8x1280xf32> to vector<8x1024xf32>
    %83 = vector.extract_strided_slice %61 {offsets = [0, 227], sizes = [8, 1024], strides = [1, 1]} : vector<8x1280xf32> to vector<8x1024xf32>
    %84 = vector.extract_strided_slice %61 {offsets = [0, 228], sizes = [8, 1024], strides = [1, 1]} : vector<8x1280xf32> to vector<8x1024xf32>
    %85 = vector.extract_strided_slice %61 {offsets = [0, 229], sizes = [8, 1024], strides = [1, 1]} : vector<8x1280xf32> to vector<8x1024xf32>
    %86 = vector.extract_strided_slice %61 {offsets = [0, 237], sizes = [8, 1024], strides = [1, 1]} : vector<8x1280xf32> to vector<8x1024xf32>
    %87 = vector.extract_strided_slice %61 {offsets = [0, 238], sizes = [8, 1024], strides = [1, 1]} : vector<8x1280xf32> to vector<8x1024xf32>
    %88 = vector.extract_strided_slice %61 {offsets = [0, 239], sizes = [8, 1024], strides = [1, 1]} : vector<8x1280xf32> to vector<8x1024xf32>
    %89 = tpu.concatenate %62, %63, %64, %65, %66, %67, %68, %69, %70, %71, %72, %73, %74, %75, %76, %77 in 0 : vector<8x1024xf32>, vector<8x1024xf32>, vector<8x1024xf32>, vector<8x1024xf32>, vector<8x1024xf32>, vector<8x1024xf32>, vector<8x1024xf32>, vector<8x1024xf32>, vector<8x1024xf32>, vector<8x1024xf32>, vector<8x1024xf32>, vector<8x1024xf32>, vector<8x1024xf32>, vector<8x1024xf32>, vector<8x1024xf32>, vector<8x1024xf32> -> vector<128x1024xf32>
    %90 = tpu.concatenate %78, %79, %80, %81, %82, %83, %84, %85, %86, %87, %88 in 0 : vector<8x1024xf32>, vector<8x1024xf32>, vector<8x1024xf32>, vector<8x1024xf32>, vector<8x1024xf32>, vector<8x1024xf32>, vector<8x1024xf32>, vector<8x1024xf32>, vector<8x1024xf32>, vector<8x1024xf32>, vector<8x1024xf32> -> vector<88x1024xf32>
    %91 = tpu.concatenate %89, %90 in 0 : vector<128x1024xf32>, vector<88x1024xf32> -> vector<216x1024xf32>
    %cst_15 = arith.constant dense<0.000000e+00> : vector<8x1024xf32>
    %92 = tpu.matmul %3, %91, %cst_15 {dimension_numbers = #tpu.dot_dimension_numbers<[1], [0], [0], [1], [0, 0, 1, 1], [], []>} : vector<8x216xf32>, vector<216x1024xf32>, vector<8x1024xf32> -> vector<8x1024xf32>
    %93 = vector.broadcast %4 : vector<1x1024xf32> to vector<8x1024xf32>
    %94 = arith.mulf %92, %93 : vector<8x1024xf32>
    %cst_16 = arith.constant dense<0.000000e+00> : vector<8xf32>
    %95 = vector.multi_reduction <add>, %94, %cst_16 [1] : vector<8x1024xf32> to vector<8xf32>
    %96 = vector.shape_cast %95 : vector<8xf32> to vector<8x1xf32>
    %97 = arith.mulf %94, %92 : vector<8x1024xf32>
    %cst_17 = arith.constant dense<0.000000e+00> : vector<8xf32>
    %98 = vector.multi_reduction <add>, %97, %cst_17 [1] : vector<8x1024xf32> to vector<8xf32>
    %99 = vector.shape_cast %98 : vector<8xf32> to vector<8x1xf32>
    %cst_18 = arith.constant 0.001953125 : f32
    %100 = vector.broadcast %cst_18 : f32 to vector<8x1xf32>
    %101 = arith.mulf %96, %100 : vector<8x1xf32>
    %cst_19 = arith.constant 0.001953125 : f32
    %102 = vector.broadcast %cst_19 : f32 to vector<8x1xf32>
    %103 = arith.mulf %99, %102 : vector<8x1xf32>
    %104 = arith.mulf %101, %101 : vector<8x1xf32>
    %105 = arith.subf %103, %104 : vector<8x1xf32>
    %106 = vector.broadcast %101 : vector<8x1xf32> to vector<8x1024xf32>
    %107 = arith.subf %92, %106 : vector<8x1024xf32>
    %cst_20 = arith.constant 9.99999974E-6 : f32
    %108 = vector.broadcast %cst_20 : f32 to vector<8x1xf32>
    %109 = arith.addf %105, %108 : vector<8x1xf32>
    %110 = math.rsqrt %109 : vector<8x1xf32>
    %111 = vector.broadcast %110 : vector<8x1xf32> to vector<8x1024xf32>
    %112 = arith.mulf %107, %111 : vector<8x1024xf32>
    %113 = vector.extract_strided_slice %1 {offsets = [0, 128], sizes = [8, 1024], strides = [1, 1]} : vector<8x1280xf32> to vector<8x1024xf32>
    %114 = arith.addf %113, %112 : vector<8x1024xf32>
    %c0_21 = arith.constant 0 : index
    %c0_22 = arith.constant 0 : index
    %c0_23 = arith.constant 0 : index
    %115 = vector.load %arg5[%c0_21, %c0_22, %c0_23] : memref<1x8x1024xf32, #tpu.memory_space<vmem>>, vector<1x8x1024xf32>
    %116 = vector.shape_cast %115 : vector<1x8x1024xf32> to vector<8x1024xf32>
    %117 = vector.shape_cast %114 : vector<8x1024xf32> to vector<1x8x1024xf32>
    tpu.vector_store %arg5[%c0_21, %c0_22, %c0_23], %117 {strides = array<i32>} : memref<1x8x1024xf32, #tpu.memory_space<vmem>>, vector<1x8x1024xf32>,
    return
  }
  func.func @transform_0(%arg0: i32) -> (i32, i32, i32) {
    %c0_i32 = arith.constant 0 : i32
    %c0_i32_0 = arith.constant 0 : i32
    %c0_i32_1 = arith.constant 0 : i32
    return %arg0, %c0_i32, %c0_i32_0 : i32, i32, i32
  }
  func.func @transform_1(%arg0: i32) -> (i32, i32) {
    %c0_i32 = arith.constant 0 : i32
    %c0_i32_0 = arith.constant 0 : i32
    %c0_i32_1 = arith.constant 0 : i32
    return %c0_i32, %c0_i32_0 : i32, i32
  }
  func.func @transform_2(%arg0: i32) -> (i32, i32) {
    %c0_i32 = arith.constant 0 : i32
    %c0_i32_0 = arith.constant 0 : i32
    %c0_i32_1 = arith.constant 0 : i32
    return %c0_i32, %c0_i32_0 : i32, i32
  }
  func.func @transform_3(%arg0: i32) -> (i32, i32) {
    %c0_i32 = arith.constant 0 : i32
    %c0_i32_0 = arith.constant 0 : i32
    %c0_i32_1 = arith.constant 0 : i32
    return %c0_i32, %c0_i32_0 : i32, i32
  }
  func.func @transform_4(%arg0: i32) -> (i32, i32, i32) {
    %c0_i32 = arith.constant 0 : i32
    %c0_i32_0 = arith.constant 0 : i32
    %c0_i32_1 = arith.constant 0 : i32
    return %arg0, %c0_i32, %c0_i32_0 : i32, i32, i32
  }
}

</mosaic_0001>

<bundles_post_ra>
// kernel: tpu_custom_call.1
= control target key start
LH: loop header
LB: loop body
LE: loop exit
PB: predicated region body
PF: predicated region fallthrough
CT: control target
= control target key end

     0   :  { %9 = vsyncpa [#allocation3], 0  ;;  %s11418_s0 = inlined_call_operand.hbm [shape: f32[2,8,1280], index: 0, kind: input, shape index: {}]   ;;  %s11419_s1 = inlined_call_operand.hbm [shape: f32[8,216], index: 1, kind: input, shape index: {}]   ;;  %s11420_s2 = inlined_call_operand.hbm [shape: f32[8,216], index: 2, kind: input, shape index: {}]   ;;  %s11421_s3 = inlined_call_operand.hbm [shape: f32[1,1024], index: 3, kind: input, shape index: {}]   ;;  %s11422_s4 = inlined_call_operand.hbm [shape: f32[2,8,1024], index: 4, kind: output, shape index: {}]  }
   0x1   :  { %11 = vsyncpa [#allocation3 + $0x1], 0 }
   0x2   :  { %12 = vsyncpa [#allocation6], 0 }
   0x3   :  { %13 = vsyncpa [#allocation9], 0 }
   0x4   :  { %14 = vsyncpa [#allocation4], 0 }
   0x5   :  { %16 = vsyncpa [#allocation4 + $0x1], 0  ;;  %s5154_s15 = smov 0   ;;  %s5156_s16 = smov 0  }
   0x6   :  { %s5158_s17 = smov 0   ;;  %s5160_s18 = smov 0  }
   0x7 LB: > { %s5175_s19 = sadd.s32 4294967295, %s5097_s18   ;;  %s4742_s20 = sadd.s32 4294967294, %s5097_s18   ;;  %s5097_s18 = sphi %s5160_s18, %s13023_s18   ;;  %s5093_s17 = sphi %s5158_s17, %s13022_s17   ;;  %s5089_s16 = sphi %s5156_s16, %s13021_s16   ;;  %s5085_s15 = sphi %s5154_s15, %s13020_s15  }
   0x8   : > { %p42_p0 = scmp.ne.s32.totalorder %s5089_s16, %s5085_s15  ;;  %p11423_p1 = scmp.eq.s32.totalorder %s5175_s19, 0 }
   0x9   : > { %p135_p3 = scmp.eq.s32.totalorder %s4742_s20, 1  ;;  %p4743_p5 = scmp.ge.s32.totalorder %s5097_s18, 1 }
   0xa   : > { %p5184_p4 = por %p11423_p1, %p42_p0  ;;  %p142_p7 = scmp.lt.s32.totalorder %s5097_s18, 3 }
   0xb   : > { %p5189_p6 = por %p135_p3, %p42_p0  ;;  %s5099_s24 = smov [#allocation5]  }
   0xc   : > { %s11895_s21 = scalar_select %p5184_p4, 1, 0 }
   0xd   : > { %s11896_s22 = scalar_select %p5189_p6, 1, 0 }
   0xe   : > { %p5194_p8 = pnand %p4743_p5, %p142_p7  ;;  %s155_s25 = sshll.u32 %s5099_s24, 4  ;;  %s156_s25 = int_to_ptr.vmem [resolvable:$true] %s155_s25 }
   0xf   : > { %s5100_s26 = smov [#allocation7]   ;;  %s5101_s29 = smov [#allocation8]  }
  0x10   : > { %s11897_s23 = scalar_select %p5194_p8, 1, 0 }
  0x11   : > { %p4787_p10 = pneg %p5194_p8  ;;  %s166_s27 = sshll.u32 %s5100_s26, 4  ;;  %s167_s27 = int_to_ptr.vmem [resolvable:$true] %s166_s27 }
  0x12   : > { %s177_s30 = sshll.u32 %s5101_s29, 4  ;;  %s4930_s5 = scalar_lea.vmem %s156_s25, 256  ;;  %s5207_s30 = int_to_ptr.vmem [resolvable:$true] %s177_s30 }
  0x13   : > { %p5203_p11 = pnand %p4787_p10, %p11423_p1  ;;  %p4931_p13 = scmp.ne.s32.totalorder %s156_s25, %s4930_s5 }
  0x14   : > { %p4938_p5 = scmp.lt.s32.totalorder %s156_s25, %s156_s25  ;;  %p4939_p7 = scmp.lt.s32.totalorder %s4930_s5, %s4930_s5 }
  0x15   : > { %p4921_p12 = pneg %p5203_p11 }
  0x16   : > { %p4940_p10 = por %p4939_p7, %p4938_p5 }
  0x17   : > { %p4933_p0 = pnand %p4931_p13, %p4921_p12 }
  0x19   : > { %p4934_p3 = pneg %p4933_p0 }
  0x1b   : > { %p4941_p9 = pnand %p4940_p10, %p4934_p3 }
  0x1d   : > { %4944 = shalt.err (!%p4941_p9)
}
  0x1e   : > { %4790 = dma.hbm_to_vmem [thread:$0]  (!%p5203_p11), %s11419_s1, 256, %s156_s25, [#allocation6]  }
  0x1f   : > { %s4956_s8 = scalar_lea.vmem %s167_s27, 256  ;;  %p4964_p13 = scmp.lt.s32.totalorder %s167_s27, %s167_s27 }
  0x20   : > { %p4957_p1 = scmp.ne.s32.totalorder %s167_s27, %s4956_s8  ;;  %p4965_p0 = scmp.lt.s32.totalorder %s4956_s8, %s4956_s8 }
  0x22   : > { %p4959_p2 = pnand %p4957_p1, %p4921_p12  ;;  %p4966_p4 = por %p4965_p0, %p4964_p13 }
  0x24   : > { %p4960_p6 = pneg %p4959_p2 }
  0x26   : > { %p4967_p8 = pnand %p4966_p4, %p4960_p6 }
  0x28   : > { %4970 = shalt.err (!%p4967_p8)
}
  0x29   : > { %4793 = dma.hbm_to_vmem [thread:$0]  (!%p5203_p11), %s11420_s2, 256, %s167_s27, [#allocation6]  }
  0x2a   : > { %s4982_s11 = scalar_lea.vmem %s5207_s30, 128  ;;  %p4990_p3 = scmp.lt.s32.totalorder %s5207_s30, %s5207_s30 }
  0x2b   : > { %p4983_p9 = scmp.ne.s32.totalorder %s5207_s30, %s4982_s11  ;;  %p4991_p4 = scmp.lt.s32.totalorder %s4982_s11, %s4982_s11 }
  0x2d   : > { %p4985_p1 = pnand %p4983_p9, %p4921_p12  ;;  %p4992_p6 = por %p4991_p4, %p4990_p3 }
  0x2f   : > { %p4986_p2 = pneg %p4985_p1 }
  0x31   : > { %p4993_p8 = pnand %p4992_p6, %p4986_p2 }
  0x33   : > { %4996 = shalt.err (!%p4993_p8)
}
  0x34   : > { %4796 = dma.hbm_to_vmem [thread:$0]  (!%p5203_p11), %s11421_s3, 128, %s5207_s30, [#allocation9]  }
  0x35   : > { %s5241_s14 = sadd.s32 1, %s5097_s18   ;;  %s29_s24 = sadd.s32 1, %s5093_s17 }
  0x36   : > { %s26_s20 = ssub.s32 %s5097_s18, %s5241_s14  ;;  %p36_p5 = scmp.ne.s32.totalorder %s5093_s17, %s5089_s16 }
  0x37   : > { %p27_p12 = scmp.eq.s32.totalorder %s26_s20, 0  ;;  %p37_p7 = scmp.eq.s32.totalorder %s5097_s18, 0 }
  0x38   : > { %p4808_p10 = scmp.lt.s32.totalorder %s5097_s18, 2  ;;  %p11899_p0 = scmp.eq.s32.totalorder %s5175_s19, 1 }
  0x39   : > { %s5251_s25 = scalar_select %p27_p12, %s5093_s17, %s29_s24  }
  0x3a   : > { %p38_p13 = por %p37_p7, %p36_p5  ;;  %p5255_p9 = por %p11899_p0, %p36_p5 }
  0x3b   : > { %s188_s27 = sand.u32 1, %s5093_s17   ;;  %s4769_s28 = smul.u32 1280, %s5097_s18 }
  0x3c   : > { %s11900_s26 = scalar_select %p5255_p9, 1, 0 }
  0x3d   : > { %s4768_s29 = smul.u32 80, %s188_s27  ;;  %p5261_p11 = pnand %p4808_p10, %p38_p13 }
  0x3e   : > { %s5268_s7 = scalar_lea.hbm %s11418_s0, %s4769_s28  ;;  %s189_s10 = scalar_lea.sflag [#allocation3], %s188_s27 }
  0x3f   : > { %s192_s8 = scalar_lea.vmem [#allocation2], %s4768_s29  ;;  %s4997_s11 = scalar_lea.hbm %s5268_s7, 1280 }
  0x40   : > { %s200_s9 = sshll.u32 %s192_s8, 4  ;;  %p4998_p1 = scmp.ne.s32.totalorder %s5268_s7, %s4997_s11  ;;  %s201_s9 = int_to_ptr.vmem [resolvable:$true] %s200_s9 }
  0x41   : > { %p4999_p2 = pneg %p5261_p11  ;;  %s5002_s20 = scalar_lea.hbm %s11418_s0, 2560 }
  0x42   : > { %p5003_p6 = scmp.lt.s32.totalorder %s5268_s7, %s11418_s0  ;;  %p5004_p8 = scmp.lt.s32.totalorder %s5002_s20, %s4997_s11 }
  0x43   : > { %p5000_p3 = pnand %p4999_p2, %p4998_p1 }
  0x44   : > { %p5005_p12 = por %p5004_p8, %p5003_p6 }
  0x45   : > { %p5001_p4 = pneg %p5000_p3 }
  0x47   : > { %p5006_p5 = pnand %p5005_p12, %p5001_p4 }
  0x49   : > { %5009 = shalt.err (!%p5006_p5)
}
  0x4a   : > { %s5010_s29 = scalar_lea.vmem %s201_s9, 1280  ;;  %s5102_s27 = smov [#allocation2]  }
  0x4b   : > { %p5011_p7 = scmp.ne.s32.totalorder %s201_s9, %s5010_s29  ;;  %s5015_s5 = sshll.u32 %s5102_s27, 4  ;;  %s5016_s5 = int_to_ptr.vmem [resolvable:$false] %s5015_s5 }
  0x4c   : > { %s5017_s6 = scalar_lea.vmem %s5016_s5, 2560  ;;  %p5018_p0 = scmp.lt.s32.totalorder %s201_s9, %s5016_s5 }
  0x4d   : > { %p5013_p10 = pnand %p5011_p7, %p4999_p2  ;;  %p5019_p1 = scmp.lt.s32.totalorder %s5017_s6, %s5010_s29 }
  0x4f   : > { %p5014_p13 = pneg %p5013_p10  ;;  %p5020_p3 = por %p5019_p1, %p5018_p0 }
  0x51   : > { %p5021_p9 = pnand %p5020_p3, %p5014_p13 }
  0x53   : > { %5024 = shalt.err (!%p5021_p9)
}
  0x54   : > { %4800 = dma.hbm_to_vmem [thread:$0]  (!%p5261_p11), %s5268_s7, 1280, %s201_s9, %s189_s10  }
  0x55   : > { %p11902_p4 = scmp.ne.s32.totalorder %s11897_s23, 0 }
  0x57   : > { %209 = sbr.rel (%p11902_p4) target bundleno = 3304 (0xce8), region = 36 }
  0x5c   : > { %s5287_s8 = sand.u32 1, %s5089_s16   ;;  %p11903_p2 = scmp.ne.s32.totalorder %s11895_s21, 0 }
  0x5d   : > { %s4770_s11 = smul.u32 80, %s5287_s8  ;;  %s212_s12 = scalar_lea.sflag [#allocation3], %s5287_s8 }
  0x5f   : > { %s5291_s13 = scalar_lea.vmem [#allocation2], %s4770_s11 }
  0x60   : > { %5068 = dma.done.wait (%p11903_p2), %s212_s12, 1280  }
  0x61   : > { %5070 = vsyncadd (%p11903_p2), %s212_s12, 4294966016  ;;  %p11904_p9 = scmp.eq.s32.totalorder %s5175_s19, 0 }
  0x63   : > { %5072 = dma.done.wait (%p11904_p9), [#allocation6], 512   ;;  %p11905_p11 = pmov %p11904_p9 }
  0x64   : > { %p11906_p6 = pmov %p11904_p9 }
  0x65   : > { %5074 = vsyncadd (%p11905_p11), [#allocation6], 4294966784 }
  0x66   : > { %5076 = dma.done.wait (%p11906_p6), [#allocation9], 128   ;;  %p11907_p8 = pmov %p11906_p6 }
  0x67   : > { %v5306_v0 = vld [vmem:[%s5291_s13 + $0x10] sm:$0xff]  ;;  %v5309_v1 = vld [vmem:[%s5291_s13] sm:$0xff]  ;;  %s5103_s21 = smov 127   ;;  %v5316_v2 = vld [vmem:[%s5291_s13 + $0x18] sm:$0xff]  ;;  %s5104_s23 = smov 126   ;;  %vm294_vm0 = vcmask 1039360  }
  0x68   : > { %5078 = vsyncadd (%p11907_p8), [#allocation9], 4294967168  ;;  %280 = vrot.lane.b32.xlu1 %v5306_v0, %s5103_s21  ;;  %276 = vrot.lane.b32.xlu0 %v5309_v1, %s5103_s21  ;;  %v5319_v3 = vld [vmem:[%s5291_s13 + $0x8] sm:$0xff]  ;;  %v5329_v5 = vld [vmem:[%s5291_s13 + $0x20] sm:$0xff]  ;;  %s5105_s30 = smov 118   ;;  %s5106_s7 = smov 117  }
  0x69   : > { %v5326_v4 = vld [vmem:[%s5291_s13 + $0x28] sm:$0xff]  ;;  %v5336_v6 = vld [vmem:[%s5291_s13 + $0x38] sm:$0xff]  ;;  %v5339_v7 = vld [vmem:[%s5291_s13 + $0x30] sm:$0xff]  ;;  %s5107_s9 = smov 116   ;;  %s5108_s10 = smov 108   ;;  %vm700_vm1 = vcmask 400384  }
  0x6a   : > { %v5346_v8 = vld [vmem:[%s5291_s13 + $0x40] sm:$0xff]  ;;  %s5109_s20 = smov 107   ;;  %s5110_s24 = smov 106   ;;  %vm727_vm2 = vcmask 392192   ;;  %vm754_vm3 = vcmask 384000   ;;  %vm781_vm4 = vcmask 318464  }
  0x6b   : > { %s5111_s28 = smov 28   ;;  %s5112_s29 = smov 27   ;;  %vm808_vm5 = vcmask 310272   ;;  %vm835_vm6 = vcmask 302080   ;;  %vm862_vm7 = vcmask 236544   ;;  %vm510_vm8 = vcmask 228352  }
  0x6c   : > { %282 = vrot.lane.b32.xlu1 %v5316_v2, %s5103_s21  ;;  %278 = vrot.lane.b32.xlu0 %v5319_v3, %s5103_s21  ;;  %s5113_s27 = smov 26   ;;  %s5114_s5 = smov 18   ;;  %vm537_vm9 = vcmask 220160   ;;  %vm321_vm10 = vcmask 1031168   ;;  %vm11601_vm11 = vcmask 965632   ;;  %vm11609_vm12 = vcmask 957440  }
  0x6d   : > { %s5115_s6 = smov 17   ;;  %s11448_s11 = smov 16   ;;  %vm11616_vm13 = vcmask 949248   ;;  %vm11624_vm14 = vcmask 883712   ;;  %vm11634_vm15 = vcmask 875520  }
  0x6e   : > { %s11457_s12 = smov 8   ;;  %p13017_p5 = scmp.ne.s32.totalorder %s11900_s26, 0 }
  0x70   : > { %286 = vrot.lane.b32.xlu1 %v5326_v4, %s5103_s21  ;;  %284 = vrot.lane.b32.xlu0 %v5329_v5, %s5103_s21 }
  0x74   : > { %290 = vrot.lane.b32.xlu1 %v5336_v6, %s5103_s21  ;;  %288 = vrot.lane.b32.xlu0 %v5339_v7, %s5103_s21 }
  0x78   : > { %303 = vrot.lane.b32.xlu1 %v5309_v1, %s5104_s23  ;;  %292 = vrot.lane.b32.xlu0 %v5346_v8, %s5103_s21 }
  0x7c   : > { %307 = vrot.lane.b32.xlu1 %v5306_v0, %s5104_s23  ;;  %305 = vrot.lane.b32.xlu0 %v5319_v3, %s5104_s23 }
  0x80   : > { %311 = vrot.lane.b32.xlu1 %v5329_v5, %s5104_s23  ;;  %309 = vrot.lane.b32.xlu0 %v5316_v2, %s5104_s23 }
  0x84   : > { %315 = vrot.lane.b32.xlu1 %v5339_v7, %s5104_s23  ;;  %313 = vrot.lane.b32.xlu0 %v5326_v4, %s5104_s23 }
  0x88   : > { %319 = vrot.lane.b32.xlu1 %v5346_v8, %s5104_s23  ;;  %317 = vrot.lane.b32.xlu0 %v5336_v6, %s5104_s23 }
  0x8c   : > { %332 = vrot.lane.b32.xlu1 %v5319_v3, %s5105_s30  ;;  %330 = vrot.lane.b32.xlu0 %v5309_v1, %s5105_s30 }
  0x90   : > { %336 = vrot.lane.b32.xlu1 %v5316_v2, %s5105_s30  ;;  %334 = vrot.lane.b32.xlu0 %v5306_v0, %s5105_s30 }
  0x94   : > { %340 = vrot.lane.b32.xlu1 %v5326_v4, %s5105_s30  ;;  %338 = vrot.lane.b32.xlu0 %v5329_v5, %s5105_s30 }
  0x98   : > { %344 = vrot.lane.b32.xlu1 %v5336_v6, %s5105_s30  ;;  %342 = vrot.lane.b32.xlu0 %v5339_v7, %s5105_s30 }
  0x9c   : > { %357 = vrot.lane.b32.xlu1 %v5309_v1, %s5106_s7  ;;  %346 = vrot.lane.b32.xlu0 %v5346_v8, %s5105_s30 }
  0xa0   : > { %361 = vrot.lane.b32.xlu1 %v5306_v0, %s5106_s7  ;;  %359 = vrot.lane.b32.xlu0 %v5319_v3, %s5106_s7 }
  0xa4   : > { %365 = vrot.lane.b32.xlu1 %v5329_v5, %s5106_s7  ;;  %363 = vrot.lane.b32.xlu0 %v5316_v2, %s5106_s7 }
  0xa8   : > { %369 = vrot.lane.b32.xlu1 %v5339_v7, %s5106_s7  ;;  %367 = vrot.lane.b32.xlu0 %v5326_v4, %s5106_s7 }
  0xac   : > { %373 = vrot.lane.b32.xlu1 %v5346_v8, %s5106_s7  ;;  %371 = vrot.lane.b32.xlu0 %v5336_v6, %s5106_s7 }
  0xb0   : > { %386 = vrot.lane.b32.xlu1 %v5319_v3, %s5107_s9  ;;  %384 = vrot.lane.b32.xlu0 %v5309_v1, %s5107_s9 }
  0xb4   : > { %390 = vrot.lane.b32.xlu1 %v5316_v2, %s5107_s9  ;;  %388 = vrot.lane.b32.xlu0 %v5306_v0, %s5107_s9 }
  0xb8   : > { %394 = vrot.lane.b32.xlu1 %v5326_v4, %s5107_s9  ;;  %392 = vrot.lane.b32.xlu0 %v5329_v5, %s5107_s9 }
  0xbc   : > { %398 = vrot.lane.b32.xlu1 %v5336_v6, %s5107_s9  ;;  %396 = vrot.lane.b32.xlu0 %v5339_v7, %s5107_s9 }
  0xc0   : > { %411 = vrot.lane.b32.xlu1 %v5309_v1, %s5108_s10  ;;  %400 = vrot.lane.b32.xlu0 %v5346_v8, %s5107_s9 }
  0xc4   : > { %415 = vrot.lane.b32.xlu1 %v5306_v0, %s5108_s10  ;;  %413 = vrot.lane.b32.xlu0 %v5319_v3, %s5108_s10 }
  0xc8   : > { %419 = vrot.lane.b32.xlu1 %v5329_v5, %s5108_s10  ;;  %417 = vrot.lane.b32.xlu0 %v5316_v2, %s5108_s10 }
  0xcc   : > { %423 = vrot.lane.b32.xlu1 %v5339_v7, %s5108_s10  ;;  %421 = vrot.lane.b32.xlu0 %v5326_v4, %s5108_s10 }
  0xd0   : > { %427 = vrot.lane.b32.xlu1 %v5346_v8, %s5108_s10  ;;  %425 = vrot.lane.b32.xlu0 %v5336_v6, %s5108_s10 }
  0xd4   : > { %440 = vrot.lane.b32.xlu1 %v5319_v3, %s5109_s20  ;;  %438 = vrot.lane.b32.xlu0 %v5309_v1, %s5109_s20 }
  0xd8   : > { %444 = vrot.lane.b32.xlu1 %v5316_v2, %s5109_s20  ;;  %442 = vrot.lane.b32.xlu0 %v5306_v0, %s5109_s20 }
  0xda   : > { %v5448_v9 = vpop.permute.xlu1 %280  ;;  %v5450_v10 = vpop.permute.xlu0 %276 }
  0xdc   : > { %448 = vrot.lane.b32.xlu1 %v5326_v4, %s5109_s20  ;;  %446 = vrot.lane.b32.xlu0 %v5329_v5, %s5109_s20 }
  0xde   : > { %v5456_v11 = vpop.permute.xlu1 %282  ;;  %v5458_v12 = vpop.permute.xlu0 %278 }
  0xe0   : > { %452 = vrot.lane.b32.xlu1 %v5336_v6, %s5109_s20  ;;  %450 = vrot.lane.b32.xlu0 %v5339_v7, %s5109_s20 }
  0xe2   : > { %v5464_v13 = vpop.permute.xlu1 %286  ;;  %v5466_v14 = vpop.permute.xlu0 %284 }
  0xe4   : > { %465 = vrot.lane.b32.xlu1 %v5309_v1, %s5110_s24  ;;  %454 = vrot.lane.b32.xlu0 %v5346_v8, %s5109_s20 }
  0xe6   : > { %v5472_v15 = vpop.permute.xlu1 %290  ;;  %v5474_v16 = vpop.permute.xlu0 %288 }
  0xe8   : > { %469 = vrot.lane.b32.xlu1 %v5306_v0, %s5110_s24  ;;  %467 = vrot.lane.b32.xlu0 %v5319_v3, %s5110_s24 }
  0xea   : > { %v5480_v17 = vpop.permute.xlu1 %303  ;;  %v5482_v18 = vpop.permute.xlu0 %292 }
  0xec   : > { %473 = vrot.lane.b32.xlu1 %v5329_v5, %s5110_s24  ;;  %471 = vrot.lane.b32.xlu0 %v5316_v2, %s5110_s24 }
  0xee   : > { %v5488_v19 = vpop.permute.xlu1 %307  ;;  %v5490_v20 = vpop.permute.xlu0 %305 }
  0xf0   : > { %477 = vrot.lane.b32.xlu1 %v5339_v7, %s5110_s24  ;;  %475 = vrot.lane.b32.xlu0 %v5326_v4, %s5110_s24 }
  0xf2   : > { %v5496_v21 = vpop.permute.xlu1 %311  ;;  %v5498_v22 = vpop.permute.xlu0 %309 }
  0xf3   : > { %11908 = vst [vmem:[#allocation15_spill] sm:$0xff] %v5496_v21 }
  0xf4   : > { %481 = vrot.lane.b32.xlu1 %v5346_v8, %s5110_s24  ;;  %479 = vrot.lane.b32.xlu0 %v5336_v6, %s5110_s24 }
  0xf6   : > { %v5504_v23 = vpop.permute.xlu1 %315  ;;  %v5506_v24 = vpop.permute.xlu0 %313 }
  0xf7   : > { %11909 = vst [vmem:[#allocation16_spill] sm:$0xff] %v5504_v23 }
  0xf8   : > { %494 = vrot.lane.b32.xlu1 %v5319_v3, %s5111_s28  ;;  %492 = vrot.lane.b32.xlu0 %v5309_v1, %s5111_s28 }
  0xfa   : > { %v5512_v25 = vpop.permute.xlu1 %319  ;;  %v5514_v26 = vpop.permute.xlu0 %317 }
  0xfb   : > { %11910 = vst [vmem:[#allocation17_spill] sm:$0xff] %v5512_v25  ;;  %11911 = vst [vmem:[#allocation18_spill] sm:$0xff] %v5514_v26 }
  0xfc   : > { %498 = vrot.lane.b32.xlu1 %v5316_v2, %s5111_s28  ;;  %496 = vrot.lane.b32.xlu0 %v5306_v0, %s5111_s28 }
  0xfe   : > { %v5520_v27 = vpop.permute.xlu1 %332  ;;  %v5522_v28 = vpop.permute.xlu0 %330 }
  0xff   : > { %11912 = vst [vmem:[#allocation19_spill] sm:$0xff] %v5520_v27  ;;  %11913 = vst [vmem:[#allocation20_spill] sm:$0xff] %v5522_v28 }
 0x100   : > { %502 = vrot.lane.b32.xlu1 %v5326_v4, %s5111_s28  ;;  %500 = vrot.lane.b32.xlu0 %v5329_v5, %s5111_s28 }
 0x102   : > { %v5528_v29 = vpop.permute.xlu1 %336  ;;  %v5530_v30 = vpop.permute.xlu0 %334 }
 0x103   : > { %11914 = vst [vmem:[#allocation21_spill] sm:$0xff] %v5528_v29  ;;  %11915 = vst [vmem:[#allocation22_spill] sm:$0xff] %v5530_v30  ;;  %v6085_v29 = vsel %vm294_vm0, %v5464_v13, %v5474_v16  ;;  %v6103_v30 = vsel %vm294_vm0, %v5472_v15, %v5482_v18 }
 0x104   : > { %506 = vrot.lane.b32.xlu1 %v5336_v6, %s5111_s28  ;;  %504 = vrot.lane.b32.xlu0 %v5339_v7, %s5111_s28 }
 0x106   : > { %v5536_v31 = vpop.permute.xlu1 %340  ;;  %v5538_v32 = vpop.permute.xlu0 %338 }
 0x107   : > { %11916 = vst [vmem:[#allocation23_spill] sm:$0xff] %v5536_v31  ;;  %11917 = vst [vmem:[#allocation24_spill] sm:$0xff] %v5538_v32  ;;  %v6072_v31 = vsel %vm294_vm0, %v5448_v9, %v5456_v11 }
 0x108   : > { %519 = vrot.lane.b32.xlu1 %v5309_v1, %s5112_s29  ;;  %508 = vrot.lane.b32.xlu0 %v5346_v8, %s5111_s28 }
 0x10a   : > { %v5544_v33 = vpop.permute.xlu1 %344  ;;  %v5546_v34 = vpop.permute.xlu0 %342 }
 0x10b   : > { %11918 = vst [vmem:[#allocation25_spill] sm:$0xff] %v5544_v33  ;;  %11919 = vst [vmem:[#allocation26_spill] sm:$0xff] %v5546_v34 }
 0x10c   : > { %523 = vrot.lane.b32.xlu1 %v5306_v0, %s5112_s29  ;;  %521 = vrot.lane.b32.xlu0 %v5319_v3, %s5112_s29 }
 0x10e   : > { %v5552_v35 = vpop.permute.xlu1 %357  ;;  %v5554_v36 = vpop.permute.xlu0 %346 }
 0x10f   : > { %11920 = vst [vmem:[#allocation27_spill] sm:$0xff] %v5552_v35  ;;  %11921 = vst [vmem:[#allocation28_spill] sm:$0xff] %v5554_v36 }
 0x110   : > { %527 = vrot.lane.b32.xlu1 %v5329_v5, %s5112_s29  ;;  %525 = vrot.lane.b32.xlu0 %v5316_v2, %s5112_s29 }
 0x112   : > { %v5560_v37 = vpop.permute.xlu1 %361  ;;  %v5562_v38 = vpop.permute.xlu0 %359 }
 0x113   : > { %11922 = vst [vmem:[#allocation29_spill] sm:$0xff] %v5560_v37  ;;  %11923 = vst [vmem:[#allocation30_spill] sm:$0xff] %v5562_v38 }
 0x114   : > { %531 = vrot.lane.b32.xlu1 %v5339_v7, %s5112_s29  ;;  %529 = vrot.lane.b32.xlu0 %v5326_v4, %s5112_s29 }
 0x116   : > { %v5568_v39 = vpop.permute.xlu1 %365  ;;  %v5570_v40 = vpop.permute.xlu0 %363 }
 0x117   : > { %11924 = vst [vmem:[#allocation31_spill] sm:$0xff] %v5568_v39  ;;  %11925 = vst [vmem:[#allocation32_spill] sm:$0xff] %v5570_v40 }
 0x118   : > { %535 = vrot.lane.b32.xlu1 %v5346_v8, %s5112_s29  ;;  %533 = vrot.lane.b32.xlu0 %v5336_v6, %s5112_s29 }
 0x11a   : > { %v5576_v41 = vpop.permute.xlu1 %369  ;;  %v5578_v42 = vpop.permute.xlu0 %367 }
 0x11b   : > { %11926 = vst [vmem:[#allocation33_spill] sm:$0xff] %v5576_v41  ;;  %11927 = vst [vmem:[#allocation34_spill] sm:$0xff] %v5578_v42 }
 0x11c   : > { %548 = vrot.lane.b32.xlu1 %v5319_v3, %s5113_s27  ;;  %546 = vrot.lane.b32.xlu0 %v5309_v1, %s5113_s27 }
 0x11e   : > { %v5584_v43 = vpop.permute.xlu1 %373  ;;  %v5586_v44 = vpop.permute.xlu0 %371 }
 0x11f   : > { %11928 = vst [vmem:[#allocation35_spill] sm:$0xff] %v5584_v43  ;;  %11929 = vst [vmem:[#allocation36_spill] sm:$0xff] %v5586_v44 }
 0x120   : > { %552 = vrot.lane.b32.xlu1 %v5316_v2, %s5113_s27  ;;  %550 = vrot.lane.b32.xlu0 %v5306_v0, %s5113_s27 }
 0x122   : > { %v5592_v45 = vpop.permute.xlu1 %386  ;;  %v5594_v46 = vpop.permute.xlu0 %384 }
 0x123   : > { %11930 = vst [vmem:[#allocation37_spill] sm:$0xff] %v5592_v45  ;;  %11931 = vst [vmem:[#allocation38_spill] sm:$0xff] %v5594_v46 }
 0x124   : > { %556 = vrot.lane.b32.xlu1 %v5326_v4, %s5113_s27  ;;  %554 = vrot.lane.b32.xlu0 %v5329_v5, %s5113_s27 }
 0x126   : > { %v5600_v47 = vpop.permute.xlu1 %390  ;;  %v5602_v48 = vpop.permute.xlu0 %388 }
 0x127   : > { %11932 = vst [vmem:[#allocation39_spill] sm:$0xff] %v5600_v47  ;;  %11933 = vst [vmem:[#allocation40_spill] sm:$0xff] %v5602_v48 }
 0x128   : > { %560 = vrot.lane.b32.xlu1 %v5336_v6, %s5113_s27  ;;  %558 = vrot.lane.b32.xlu0 %v5339_v7, %s5113_s27 }
 0x12a   : > { %v5608_v49 = vpop.permute.xlu1 %394  ;;  %v5610_v50 = vpop.permute.xlu0 %392 }
 0x12b   : > { %11934 = vst [vmem:[#allocation41_spill] sm:$0xff] %v5608_v49  ;;  %11935 = vst [vmem:[#allocation42_spill] sm:$0xff] %v5610_v50 }
 0x12c   : > { %573 = vrot.lane.b32.xlu1 %v5309_v1, %s5114_s5  ;;  %562 = vrot.lane.b32.xlu0 %v5346_v8, %s5113_s27 }
 0x12e   : > { %v5616_v51 = vpop.permute.xlu1 %398  ;;  %v5618_v52 = vpop.permute.xlu0 %396 }
 0x12f   : > { %11936 = vst [vmem:[#allocation43_spill] sm:$0xff] %v5616_v51  ;;  %11937 = vst [vmem:[#allocation44_spill] sm:$0xff] %v5618_v52 }
 0x130   : > { %577 = vrot.lane.b32.xlu1 %v5306_v0, %s5114_s5  ;;  %575 = vrot.lane.b32.xlu0 %v5319_v3, %s5114_s5 }
 0x132   : > { %v5624_v53 = vpop.permute.xlu1 %411  ;;  %v5626_v54 = vpop.permute.xlu0 %400 }
 0x133   : > { %11938 = vst [vmem:[#allocation45_spill] sm:$0xff] %v5624_v53  ;;  %11939 = vst [vmem:[#allocation46_spill] sm:$0xff] %v5626_v54 }
 0x134   : > { %581 = vrot.lane.b32.xlu1 %v5329_v5, %s5114_s5  ;;  %579 = vrot.lane.b32.xlu0 %v5316_v2, %s5114_s5 }
 0x136   : > { %v5632_v55 = vpop.permute.xlu1 %415  ;;  %v5634_v56 = vpop.permute.xlu0 %413 }
 0x137   : > { %11940 = vst [vmem:[#allocation47_spill] sm:$0xff] %v5632_v55  ;;  %11941 = vst [vmem:[#allocation48_spill] sm:$0xff] %v5634_v56 }
 0x138   : > { %585 = vrot.lane.b32.xlu1 %v5339_v7, %s5114_s5  ;;  %583 = vrot.lane.b32.xlu0 %v5326_v4, %s5114_s5 }
 0x13a   : > { %v5640_v57 = vpop.permute.xlu1 %419  ;;  %v5642_v58 = vpop.permute.xlu0 %417 }
 0x13b   : > { %11942 = vst [vmem:[#allocation49_spill] sm:$0xff] %v5640_v57  ;;  %11943 = vst [vmem:[#allocation50_spill] sm:$0xff] %v5642_v58 }
 0x13c   : > { %589 = vrot.lane.b32.xlu1 %v5346_v8, %s5114_s5  ;;  %587 = vrot.lane.b32.xlu0 %v5336_v6, %s5114_s5 }
 0x13e   : > { %v5648_v59 = vpop.permute.xlu1 %423  ;;  %v5650_v60 = vpop.permute.xlu0 %421 }
 0x13f   : > { %11944 = vst [vmem:[#allocation51_spill] sm:$0xff] %v5648_v59  ;;  %11945 = vst [vmem:[#allocation52_spill] sm:$0xff] %v5650_v60 }
 0x140   : > { %602 = vrot.lane.b32.xlu1 %v5306_v0, %s5115_s6  ;;  %600 = vrot.lane.b32.xlu0 %v5319_v3, %s5115_s6 }
 0x142   : > { %v5656_v61 = vpop.permute.xlu1 %427  ;;  %v5658_v62 = vpop.permute.xlu0 %425 }
 0x143   : > { %11946 = vst [vmem:[#allocation53_spill] sm:$0xff] %v5656_v61  ;;  %11947 = vst [vmem:[#allocation54_spill] sm:$0xff] %v5658_v62 }
 0x144   : > { %606 = vrot.lane.b32.xlu1 %v5329_v5, %s5115_s6  ;;  %604 = vrot.lane.b32.xlu0 %v5316_v2, %s5115_s6 }
 0x146   : > { %v5664_v63 = vpop.permute.xlu1 %440  ;;  %v5666_v1 = vpop.permute.xlu0 %438 }
 0x147   : > { %11948 = vst [vmem:[#allocation55_spill] sm:$0xff] %v5664_v63  ;;  %11949 = vst [vmem:[#allocation56_spill] sm:$0xff] %v5666_v1 }
 0x148   : > { %610 = vrot.lane.b32.xlu1 %v5339_v7, %s5115_s6  ;;  %608 = vrot.lane.b32.xlu0 %v5326_v4, %s5115_s6 }
 0x14a   : > { %v5672_v59 = vpop.permute.xlu1 %444  ;;  %v5674_v61 = vpop.permute.xlu0 %442 }
 0x14b   : > { %11950 = vst [vmem:[#allocation57_spill] sm:$0xff] %v5672_v59  ;;  %11951 = vst [vmem:[#allocation58_spill] sm:$0xff] %v5674_v61 }
 0x14c   : > { %614 = vrot.lane.b32.xlu1 %v5346_v8, %s5115_s6  ;;  %612 = vrot.lane.b32.xlu0 %v5336_v6, %s5115_s6 }
 0x14e   : > { %v5680_v62 = vpop.permute.xlu1 %448  ;;  %v5682_v63 = vpop.permute.xlu0 %446 }
 0x14f   : > { %11952 = vst [vmem:[#allocation59_spill] sm:$0xff] %v5680_v62  ;;  %11953 = vst [vmem:[#allocation60_spill] sm:$0xff] %v5682_v63 }
 0x150   : > { %627 = vrot.lane.b32.xlu1 %v5306_v0, %s11448_s11  ;;  %625 = vrot.lane.b32.xlu0 %v5319_v3, %s11448_s11 }
 0x152   : > { %v5688_v59 = vpop.permute.xlu1 %452  ;;  %v5690_v61 = vpop.permute.xlu0 %450 }
 0x153   : > { %11954 = vst [vmem:[#allocation61_spill] sm:$0xff] %v5688_v59  ;;  %11955 = vst [vmem:[#allocation62_spill] sm:$0xff] %v5690_v61  ;;  %v5713_v61 = vld [vmem:[%s5291_s13 + $0x48] sm:$0xff] }
 0x154   : > { %631 = vrot.lane.b32.xlu1 %v5329_v5, %s11448_s11  ;;  %629 = vrot.lane.b32.xlu0 %v5316_v2, %s11448_s11 }
 0x156   : > { %v5696_v62 = vpop.permute.xlu1 %465  ;;  %v5698_v63 = vpop.permute.xlu0 %454 }
 0x157   : > { %11956 = vst [vmem:[#allocation63_spill] sm:$0xff] %v5696_v62  ;;  %11957 = vst [vmem:[#allocation64_spill] sm:$0xff] %v5698_v63 }
 0x158   : > { %635 = vrot.lane.b32.xlu1 %v5339_v7, %s11448_s11  ;;  %633 = vrot.lane.b32.xlu0 %v5326_v4, %s11448_s11 }
 0x15a   : > { %v5704_v1 = vpop.permute.xlu1 %469  ;;  %v5706_v59 = vpop.permute.xlu0 %467 }
 0x15b   : > { %11958 = vst [vmem:[#allocation65_spill] sm:$0xff] %v5704_v1  ;;  %11959 = vst [vmem:[#allocation66_spill] sm:$0xff] %v5706_v59 }
 0x15c   : > { %639 = vrot.lane.b32.xlu1 %v5346_v8, %s11448_s11  ;;  %637 = vrot.lane.b32.xlu0 %v5336_v6, %s11448_s11 }
 0x15e   : > { %v5715_v62 = vpop.permute.xlu1 %473  ;;  %v5717_v63 = vpop.permute.xlu0 %471 }
 0x15f   : > { %11960 = vst [vmem:[#allocation67_spill] sm:$0xff] %v5715_v62  ;;  %11961 = vst [vmem:[#allocation68_spill] sm:$0xff] %v5717_v63 }
 0x160   : > { %652 = vrot.lane.b32.xlu1 %v5319_v3, %s11457_s12  ;;  %641 = vrot.lane.b32.xlu0 %v5713_v61, %s11448_s11  ;;  %s11466_s11 = smov 49  }
 0x162   : > { %v5723_v1 = vpop.permute.xlu1 %477  ;;  %v5725_v59 = vpop.permute.xlu0 %475 }
 0x163   : > { %11962 = vst [vmem:[#allocation69_spill] sm:$0xff] %v5723_v1  ;;  %11963 = vst [vmem:[#allocation70_spill] sm:$0xff] %v5725_v59 }
 0x164   : > { %656 = vrot.lane.b32.xlu1 %v5316_v2, %s11457_s12  ;;  %654 = vrot.lane.b32.xlu0 %v5306_v0, %s11457_s12 }
 0x166   : > { %v5731_v62 = vpop.permute.xlu1 %481  ;;  %v5733_v63 = vpop.permute.xlu0 %479 }
 0x167   : > { %11964 = vst [vmem:[#allocation71_spill] sm:$0xff] %v5731_v62  ;;  %11965 = vst [vmem:[#allocation72_spill] sm:$0xff] %v5733_v63 }
 0x168   : > { %660 = vrot.lane.b32.xlu1 %v5326_v4, %s11457_s12  ;;  %658 = vrot.lane.b32.xlu0 %v5329_v5, %s11457_s12 }
 0x16a   : > { %v5739_v57 = vpop.permute.xlu1 %494  ;;  %v5741_v1 = vpop.permute.xlu0 %492 }
 0x16b   : > { %11966 = vst [vmem:[#allocation73_spill] sm:$0xff] %v5741_v1 }
 0x16c   : > { %664 = vrot.lane.b32.xlu1 %v5336_v6, %s11457_s12  ;;  %662 = vrot.lane.b32.xlu0 %v5339_v7, %s11457_s12 }
 0x16e   : > { %v5747_v59 = vpop.permute.xlu1 %498  ;;  %v5749_v62 = vpop.permute.xlu0 %496 }
 0x170   : > { %668 = vrot.lane.b32.xlu1 %v5713_v61, %s11457_s12  ;;  %666 = vrot.lane.b32.xlu0 %v5346_v8, %s11457_s12  ;;  %s11476_s12 = smov 48  }
 0x172   : > { %v5755_v63 = vpop.permute.xlu1 %502  ;;  %v5757_v60 = vpop.permute.xlu0 %500 }
 0x174   : > { %682 = vrot.lane.b32.xlu1 %v5319_v3, %s11466_s11  ;;  %679 = vrot.lane.b32.xlu0 %v5713_v61, %s5103_s21 }
 0x176   : > { %v5763_v1 = vpop.permute.xlu1 %506  ;;  %v5765_v55 = vpop.permute.xlu0 %504 }
 0x178   : > { %686 = vrot.lane.b32.xlu1 %v5316_v2, %s11466_s11  ;;  %684 = vrot.lane.b32.xlu0 %v5306_v0, %s11466_s11 }
 0x17a   : > { %v5771_v58 = vpop.permute.xlu1 %519  ;;  %v5773_v53 = vpop.permute.xlu0 %508 }
 0x17b   : > { %11967 = vst [vmem:[#allocation74_spill] sm:$0xff] %v5771_v58 }
 0x17c   : > { %690 = vrot.lane.b32.xlu1 %v5326_v4, %s11466_s11  ;;  %688 = vrot.lane.b32.xlu0 %v5329_v5, %s11466_s11 }
 0x17e   : > { %v5779_v56 = vpop.permute.xlu1 %523  ;;  %v5781_v51 = vpop.permute.xlu0 %521 }
 0x180   : > { %694 = vrot.lane.b32.xlu1 %v5336_v6, %s11466_s11  ;;  %692 = vrot.lane.b32.xlu0 %v5339_v7, %s11466_s11 }
 0x182   : > { %v5787_v54 = vpop.permute.xlu1 %527  ;;  %v5789_v58 = vpop.permute.xlu0 %525 }
 0x184   : > { %698 = vrot.lane.b32.xlu1 %v5713_v61, %s11466_s11  ;;  %696 = vrot.lane.b32.xlu0 %v5346_v8, %s11466_s11  ;;  %s11486_s11 = smov 47  }
 0x186   : > { %v5795_v49 = vpop.permute.xlu1 %531  ;;  %v5797_v52 = vpop.permute.xlu0 %529 }
 0x188   : > { %711 = vrot.lane.b32.xlu1 %v5306_v0, %s11476_s12  ;;  %709 = vrot.lane.b32.xlu0 %v5319_v3, %s11476_s12 }
 0x18a   : > { %v5803_v47 = vpop.permute.xlu1 %535  ;;  %v5805_v50 = vpop.permute.xlu0 %533 }
 0x18c   : > { %715 = vrot.lane.b32.xlu1 %v5329_v5, %s11476_s12  ;;  %713 = vrot.lane.b32.xlu0 %v5316_v2, %s11476_s12 }
 0x18e   : > { %v5811_v48 = vpop.permute.xlu1 %548  ;;  %v5813_v46 = vpop.permute.xlu0 %546 }
 0x18f   : > { %11968 = vst [vmem:[#allocation75_spill] sm:$0xff] %v5811_v48  ;;  %11969 = vst [vmem:[#allocation76_spill] sm:$0xff] %v5813_v46 }
 0x190   : > { %719 = vrot.lane.b32.xlu1 %v5339_v7, %s11476_s12  ;;  %717 = vrot.lane.b32.xlu0 %v5326_v4, %s11476_s12 }
 0x192   : > { %v5819_v45 = vpop.permute.xlu1 %552  ;;  %v5821_v43 = vpop.permute.xlu0 %550 }
 0x193   : > { %11970 = vst [vmem:[#allocation77_spill] sm:$0xff] %v5819_v45  ;;  %11971 = vst [vmem:[#allocation78_spill] sm:$0xff] %v5821_v43 }
 0x194   : > { %723 = vrot.lane.b32.xlu1 %v5346_v8, %s11476_s12  ;;  %721 = vrot.lane.b32.xlu0 %v5336_v6, %s11476_s12 }
 0x196   : > { %v5827_v41 = vpop.permute.xlu1 %556  ;;  %v5829_v48 = vpop.permute.xlu0 %554 }
 0x197   : > { %11972 = vst [vmem:[#allocation79_spill] sm:$0xff] %v5827_v41  ;;  %11973 = vst [vmem:[#allocation80_spill] sm:$0xff] %v5829_v48 }
 0x198   : > { %736 = vrot.lane.b32.xlu1 %v5319_v3, %s11486_s11  ;;  %725 = vrot.lane.b32.xlu0 %v5713_v61, %s11476_s12  ;;  %s11498_s12 = smov 39  }
 0x19a   : > { %v5835_v45 = vpop.permute.xlu1 %560  ;;  %v5837_v43 = vpop.permute.xlu0 %558 }
 0x19b   : > { %11974 = vst [vmem:[#allocation81_spill] sm:$0xff] %v5835_v45  ;;  %11975 = vst [vmem:[#allocation82_spill] sm:$0xff] %v5837_v43 }
 0x19c   : > { %740 = vrot.lane.b32.xlu1 %v5316_v2, %s11486_s11  ;;  %738 = vrot.lane.b32.xlu0 %v5306_v0, %s11486_s11 }
 0x19e   : > { %v5843_v41 = vpop.permute.xlu1 %573  ;;  %v5845_v48 = vpop.permute.xlu0 %562 }
 0x19f   : > { %11976 = vst [vmem:[#allocation83_spill] sm:$0xff] %v5843_v41  ;;  %11977 = vst [vmem:[#allocation84_spill] sm:$0xff] %v5845_v48 }
 0x1a0   : > { %744 = vrot.lane.b32.xlu1 %v5326_v4, %s11486_s11  ;;  %742 = vrot.lane.b32.xlu0 %v5329_v5, %s11486_s11 }
 0x1a2   : > { %v5851_v46 = vpop.permute.xlu1 %577  ;;  %v5853_v45 = vpop.permute.xlu0 %575 }
 0x1a3   : > { %11978 = vst [vmem:[#allocation85_spill] sm:$0xff] %v5851_v46  ;;  %11979 = vst [vmem:[#allocation86_spill] sm:$0xff] %v5853_v45 }
 0x1a4   : > { %748 = vrot.lane.b32.xlu1 %v5336_v6, %s11486_s11  ;;  %746 = vrot.lane.b32.xlu0 %v5339_v7, %s11486_s11 }
 0x1a6   : > { %v5859_v43 = vpop.permute.xlu1 %581  ;;  %v5861_v41 = vpop.permute.xlu0 %579 }
 0x1a7   : > { %11980 = vst [vmem:[#allocation87_spill] sm:$0xff] %v5859_v43  ;;  %11981 = vst [vmem:[#allocation88_spill] sm:$0xff] %v5861_v41 }
 0x1a8   : > { %752 = vrot.lane.b32.xlu1 %v5713_v61, %s11486_s11  ;;  %750 = vrot.lane.b32.xlu0 %v5346_v8, %s11486_s11  ;;  %s11507_s11 = smov 38  }
 0x1aa   : > { %v5867_v48 = vpop.permute.xlu1 %585  ;;  %v5869_v46 = vpop.permute.xlu0 %583 }
 0x1ab   : > { %11982 = vst [vmem:[#allocation89_spill] sm:$0xff] %v5867_v48  ;;  %11983 = vst [vmem:[#allocation90_spill] sm:$0xff] %v5869_v46 }
 0x1ac   : > { %765 = vrot.lane.b32.xlu1 %v5306_v0, %s11498_s12  ;;  %763 = vrot.lane.b32.xlu0 %v5319_v3, %s11498_s12 }
 0x1ae   : > { %v5875_v43 = vpop.permute.xlu1 %589  ;;  %v5877_v41 = vpop.permute.xlu0 %587 }
 0x1af   : > { %11984 = vst [vmem:[#allocation91_spill] sm:$0xff] %v5875_v43  ;;  %11985 = vst [vmem:[#allocation92_spill] sm:$0xff] %v5877_v41 }
 0x1b0   : > { %769 = vrot.lane.b32.xlu1 %v5329_v5, %s11498_s12  ;;  %767 = vrot.lane.b32.xlu0 %v5316_v2, %s11498_s12 }
 0x1b2   : > { %v5883_v48 = vpop.permute.xlu1 %602  ;;  %v5885_v46 = vpop.permute.xlu0 %600 }
 0x1b3   : > { %11986 = vst [vmem:[#allocation93_spill] sm:$0xff] %v5883_v48  ;;  %11987 = vst [vmem:[#allocation94_spill] sm:$0xff] %v5885_v46 }
 0x1b4   : > { %773 = vrot.lane.b32.xlu1 %v5339_v7, %s11498_s12  ;;  %771 = vrot.lane.b32.xlu0 %v5326_v4, %s11498_s12 }
 0x1b6   : > { %v5891_v45 = vpop.permute.xlu1 %606  ;;  %v5893_v43 = vpop.permute.xlu0 %604 }
 0x1b7   : > { %11988 = vst [vmem:[#allocation95_spill] sm:$0xff] %v5891_v45  ;;  %11989 = vst [vmem:[#allocation96_spill] sm:$0xff] %v5893_v43 }
 0x1b8   : > { %777 = vrot.lane.b32.xlu1 %v5346_v8, %s11498_s12  ;;  %775 = vrot.lane.b32.xlu0 %v5336_v6, %s11498_s12 }
 0x1ba   : > { %v5899_v41 = vpop.permute.xlu1 %610  ;;  %v5901_v48 = vpop.permute.xlu0 %608 }
 0x1bb   : > { %11990 = vst [vmem:[#allocation97_spill] sm:$0xff] %v5899_v41  ;;  %11991 = vst [vmem:[#allocation98_spill] sm:$0xff] %v5901_v48 }
 0x1bc   : > { %790 = vrot.lane.b32.xlu1 %v5319_v3, %s11507_s11  ;;  %779 = vrot.lane.b32.xlu0 %v5713_v61, %s11498_s12  ;;  %s11520_s12 = smov 37  }
 0x1be   : > { %v5907_v45 = vpop.permute.xlu1 %614  ;;  %v5909_v43 = vpop.permute.xlu0 %612 }
 0x1bf   : > { %11992 = vst [vmem:[#allocation99_spill] sm:$0xff] %v5907_v45  ;;  %11993 = vst [vmem:[#allocation100_spill] sm:$0xff] %v5909_v43 }
 0x1c0   : > { %794 = vrot.lane.b32.xlu1 %v5316_v2, %s11507_s11  ;;  %792 = vrot.lane.b32.xlu0 %v5306_v0, %s11507_s11 }
 0x1c2   : > { %v5915_v41 = vpop.permute.xlu1 %627  ;;  %v5917_v48 = vpop.permute.xlu0 %625 }
 0x1c3   : > { %11994 = vst [vmem:[#allocation101_spill] sm:$0xff] %v5915_v41  ;;  %11995 = vst [vmem:[#allocation102_spill] sm:$0xff] %v5917_v48 }
 0x1c4   : > { %798 = vrot.lane.b32.xlu1 %v5326_v4, %s11507_s11  ;;  %796 = vrot.lane.b32.xlu0 %v5329_v5, %s11507_s11 }
 0x1c6   : > { %v5923_v46 = vpop.permute.xlu1 %631  ;;  %v5925_v45 = vpop.permute.xlu0 %629 }
 0x1c7   : > { %11996 = vst [vmem:[#allocation103_spill] sm:$0xff] %v5923_v46  ;;  %11997 = vst [vmem:[#allocation104_spill] sm:$0xff] %v5925_v45 }
 0x1c8   : > { %802 = vrot.lane.b32.xlu1 %v5336_v6, %s11507_s11  ;;  %800 = vrot.lane.b32.xlu0 %v5339_v7, %s11507_s11 }
 0x1ca   : > { %v5931_v43 = vpop.permute.xlu1 %635  ;;  %v5933_v41 = vpop.permute.xlu0 %633 }
 0x1cb   : > { %11998 = vst [vmem:[#allocation105_spill] sm:$0xff] %v5931_v43  ;;  %11999 = vst [vmem:[#allocation106_spill] sm:$0xff] %v5933_v41 }
 0x1cc   : > { %806 = vrot.lane.b32.xlu1 %v5713_v61, %s11507_s11  ;;  %804 = vrot.lane.b32.xlu0 %v5346_v8, %s11507_s11  ;;  %s11548_s11 = smov 29  }
 0x1ce   : > { %v5939_v48 = vpop.permute.xlu1 %639  ;;  %v5941_v46 = vpop.permute.xlu0 %637 }
 0x1cf   : > { %12000 = vst [vmem:[#allocation107_spill] sm:$0xff] %v5939_v48  ;;  %12001 = vst [vmem:[#allocation108_spill] sm:$0xff] %v5941_v46 }
 0x1d0   : > { %819 = vrot.lane.b32.xlu1 %v5306_v0, %s11520_s12  ;;  %817 = vrot.lane.b32.xlu0 %v5319_v3, %s11520_s12 }
 0x1d2   : > { %v5947_v43 = vpop.permute.xlu1 %652  ;;  %v5949_v41 = vpop.permute.xlu0 %641 }
 0x1d3   : > { %12002 = vst [vmem:[#allocation109_spill] sm:$0xff] %v5947_v43  ;;  %12003 = vst [vmem:[#allocation110_spill] sm:$0xff] %v5949_v41 }
 0x1d4   : > { %823 = vrot.lane.b32.xlu1 %v5329_v5, %s11520_s12  ;;  %821 = vrot.lane.b32.xlu0 %v5316_v2, %s11520_s12 }
 0x1d6   : > { %v5955_v48 = vpop.permute.xlu1 %656  ;;  %v5957_v46 = vpop.permute.xlu0 %654 }
 0x1d7   : > { %12004 = vst [vmem:[#allocation111_spill] sm:$0xff] %v5955_v48  ;;  %12005 = vst [vmem:[#allocation112_spill] sm:$0xff] %v5957_v46 }
 0x1d8   : > { %827 = vrot.lane.b32.xlu1 %v5339_v7, %s11520_s12  ;;  %825 = vrot.lane.b32.xlu0 %v5326_v4, %s11520_s12 }
 0x1da   : > { %v5963_v45 = vpop.permute.xlu1 %660  ;;  %v5965_v43 = vpop.permute.xlu0 %658 }
 0x1db   : > { %12006 = vst [vmem:[#allocation113_spill] sm:$0xff] %v5963_v45  ;;  %12007 = vst [vmem:[#allocation114_spill] sm:$0xff] %v5965_v43 }
 0x1dc   : > { %831 = vrot.lane.b32.xlu1 %v5346_v8, %s11520_s12  ;;  %829 = vrot.lane.b32.xlu0 %v5336_v6, %s11520_s12 }
 0x1de   : > { %v5971_v41 = vpop.permute.xlu1 %664  ;;  %v5973_v48 = vpop.permute.xlu0 %662 }
 0x1df   : > { %12008 = vst [vmem:[#allocation115_spill] sm:$0xff] %v5971_v41  ;;  %12009 = vst [vmem:[#allocation116_spill] sm:$0xff] %v5973_v48 }
 0x1e0   : > { %844 = vrot.lane.b32.xlu1 %v5319_v3, %s11548_s11  ;;  %833 = vrot.lane.b32.xlu0 %v5713_v61, %s11520_s12  ;;  %s5125_s12 = smov 7  }
 0x1e2   : > { %v5979_v45 = vpop.permute.xlu1 %668  ;;  %v5981_v43 = vpop.permute.xlu0 %666 }
 0x1e3   : > { %12010 = vst [vmem:[#allocation117_spill] sm:$0xff] %v5979_v45  ;;  %12011 = vst [vmem:[#allocation118_spill] sm:$0xff] %v5981_v43 }
 0x1e4   : > { %848 = vrot.lane.b32.xlu1 %v5316_v2, %s11548_s11  ;;  %846 = vrot.lane.b32.xlu0 %v5306_v0, %s11548_s11 }
 0x1e6   : > { %v5987_v41 = vpop.permute.xlu1 %682  ;;  %v680_v48 = vpop.permute.xlu0 %679 }
 0x1e7   : > { %v681_v27 = vsel %vm294_vm0, %v5482_v18, %v680_v48 }
 0x1e8   : > { %852 = vrot.lane.b32.xlu1 %v5326_v4, %s11548_s11  ;;  %850 = vrot.lane.b32.xlu0 %v5329_v5, %s11548_s11 }
 0x1ea   : > { %v5993_v46 = vpop.permute.xlu1 %686  ;;  %v685_v45 = vpop.permute.xlu0 %684 }
 0x1eb   : > { %v702_v25 = vsel %vm700_vm1, %v685_v45, %v5993_v46  ;;  %v701_v23 = vsel %vm700_vm1, %v5987_v41, %v685_v45 }
 0x1ec   : > { %856 = vrot.lane.b32.xlu1 %v5336_v6, %s11548_s11  ;;  %854 = vrot.lane.b32.xlu0 %v5339_v7, %s11548_s11 }
 0x1ee   : > { %v5999_v43 = vpop.permute.xlu1 %690  ;;  %v6001_v44 = vpop.permute.xlu0 %688 }
 0x1ef   : > { %v703_v21 = vsel %vm700_vm1, %v5993_v46, %v6001_v44 }
 0x1f0   : > { %860 = vrot.lane.b32.xlu1 %v5713_v61, %s11548_s11  ;;  %858 = vrot.lane.b32.xlu0 %v5346_v8, %s11548_s11  ;;  %s5126_s11 = smov 111  }
 0x1f2   : > { %v6007_v39 = vpop.permute.xlu1 %694  ;;  %v6009_v42 = vpop.permute.xlu0 %692 }
 0x1f3   : > { %v705_v45 = vsel %vm700_vm1, %v5999_v43, %v6009_v42 }
 0x1f4   : > { %874 = vrot.lane.b32.xlu1 %v5713_v61, %s5112_s29  ;;  %871 = vrot.lane.b32.xlu0 %v5713_v61, %s5111_s28 }
 0x1f6   : > { %v6015_v37 = vpop.permute.xlu1 %698  ;;  %v6017_v40 = vpop.permute.xlu0 %696 }
 0x1f8   : > { %879 = vrot.lane.b32.xlu1 %v5306_v0, %s5125_s12  ;;  %877 = vrot.lane.b32.xlu0 %v5319_v3, %s5125_s12 }
 0x1fa   : > { %v6023_v35 = vpop.permute.xlu1 %711  ;;  %v6025_v38 = vpop.permute.xlu0 %709 }
 0x1fc   : > { %883 = vrot.lane.b32.xlu1 %v5329_v5, %s5125_s12  ;;  %881 = vrot.lane.b32.xlu0 %v5316_v2, %s5125_s12 }
 0x1fe   : > { %v6031_v33 = vpop.permute.xlu1 %715  ;;  %v6033_v36 = vpop.permute.xlu0 %713 }
 0x200   : > { %887 = vrot.lane.b32.xlu1 %v5339_v7, %s5125_s12  ;;  %885 = vrot.lane.b32.xlu0 %v5326_v4, %s5125_s12  ;;  %v6054_v7 = vsel %vm294_vm0, %v5458_v12, %v5448_v9  ;;  %v6090_v9 = vsel %vm294_vm0, %v5466_v14, %v5464_v13  ;;  %v6108_v13 = vsel %vm294_vm0, %v5474_v16, %v5472_v15 }
 0x202   : > { %v6039_v0 = vpop.permute.xlu1 %719  ;;  %v6041_v3 = vpop.permute.xlu0 %717 }
 0x204   : > { %891 = vrot.lane.b32.xlu1 %v5346_v8, %s5125_s12  ;;  %889 = vrot.lane.b32.xlu0 %v5336_v6, %s5125_s12  ;;  %v6067_v6 = vsel %vm294_vm0, %v5456_v11, %v5466_v14 }
 0x206   : > { %v6047_v2 = vpop.permute.xlu1 %723  ;;  %v6049_v5 = vpop.permute.xlu0 %721 }
 0x208   : > { %895 = vrot.lane.b32.xlu1 %v6054_v7, %s5125_s12  ;;  %893 = vrot.lane.b32.xlu0 %v5713_v61, %s5125_s12 }
 0x20a   : > { %v6060_v4 = vpop.permute.xlu1 %736  ;;  %v6062_v8 = vpop.permute.xlu0 %725 }
 0x20c   : > { %899 = vrot.lane.b32.xlu1 %v6067_v6, %s5125_s12  ;;  %897 = vrot.lane.b32.xlu0 %v6072_v31, %s5125_s12 }
 0x20e   : > { %v6078_v61 = vpop.permute.xlu1 %740  ;;  %v6080_v34 = vpop.permute.xlu0 %738 }
 0x210   : > { %903 = vrot.lane.b32.xlu1 %v6085_v29, %s5125_s12  ;;  %901 = vrot.lane.b32.xlu0 %v6090_v9, %s5125_s12 }
 0x212   : > { %v6096_v11 = vpop.permute.xlu1 %744  ;;  %v6098_v32 = vpop.permute.xlu0 %742 }
 0x214   : > { %907 = vrot.lane.b32.xlu1 %v6103_v30, %s5125_s12  ;;  %905 = vrot.lane.b32.xlu0 %v6108_v13, %s5125_s12 }
 0x216   : > { %v6114_v14 = vpop.permute.xlu1 %748  ;;  %v6116_v28 = vpop.permute.xlu0 %746 }
 0x218   : > { %909 = vrot.lane.b32.xlu0 %v681_v27, %s5125_s12  ;;  %911 = vrot.lane.b32.xlu1 %v680_v48, %s5125_s12  ;;  %v704_v48 = vsel %vm700_vm1, %v6001_v44, %v5999_v43 }
 0x21a   : > { %v6122_v15 = vpop.permute.xlu1 %752  ;;  %v6124_v16 = vpop.permute.xlu0 %750 }
 0x21c   : > { %915 = vrot.lane.b32.xlu1 %v702_v25, %s5125_s12  ;;  %913 = vrot.lane.b32.xlu0 %v701_v23, %s5125_s12  ;;  %v706_v23 = vsel %vm700_vm1, %v6009_v42, %v6007_v39 }
 0x21e   : > { %v6132_v26 = vpop.permute.xlu1 %765  ;;  %v6134_v27 = vpop.permute.xlu0 %763 }
 0x220   : > { %919 = vrot.lane.b32.xlu1 %v704_v48, %s5125_s12  ;;  %917 = vrot.lane.b32.xlu0 %v703_v21, %s5125_s12  ;;  %v708_v21 = vsel %vm700_vm1, %v6017_v40, %v6015_v37  ;;  %v707_v48 = vsel %vm700_vm1, %v6007_v39, %v6017_v40  ;;  %v730_v40 = vsel %vm727_vm2, %v6033_v36, %v6031_v33 }
 0x222   : > { %v6144_v41 = vpop.permute.xlu1 %769  ;;  %v6146_v25 = vpop.permute.xlu0 %767 }
 0x224   : > { %923 = vrot.lane.b32.xlu1 %v706_v23, %s5125_s12  ;;  %921 = vrot.lane.b32.xlu0 %v705_v45, %s5125_s12  ;;  %v728_v23 = vsel %vm727_vm2, %v6025_v38, %v6023_v35 }
 0x226   : > { %v6156_v44 = vpop.permute.xlu1 %773  ;;  %v6158_v46 = vpop.permute.xlu0 %771 }
 0x228   : > { %927 = vrot.lane.b32.xlu1 %v708_v21, %s5125_s12  ;;  %925 = vrot.lane.b32.xlu0 %v707_v48, %s5125_s12  ;;  %v729_v21 = vsel %vm727_vm2, %v6023_v35, %v6033_v36  ;;  %v732_v48 = vsel %vm727_vm2, %v6041_v3, %v6039_v0 }
 0x22a   : > { %v6168_v42 = vpop.permute.xlu1 %777  ;;  %v6170_v43 = vpop.permute.xlu0 %775 }
 0x22c   : > { %929 = vrot.lane.b32.xlu0 %v6015_v37, %s5125_s12  ;;  %931 = vrot.lane.b32.xlu1 %v728_v23, %s5125_s12  ;;  %v731_v23 = vsel %vm727_vm2, %v6031_v33, %v6041_v3 }
 0x22e   : > { %v6178_v45 = vpop.permute.xlu1 %790  ;;  %v6180_v39 = vpop.permute.xlu0 %779 }
 0x230   : > { %935 = vrot.lane.b32.xlu1 %v730_v40, %s5125_s12  ;;  %933 = vrot.lane.b32.xlu0 %v729_v21, %s5125_s12  ;;  %v734_v40 = vsel %vm727_vm2, %v6049_v5, %v6047_v2  ;;  %v733_v21 = vsel %vm727_vm2, %v6039_v0, %v6049_v5  ;;  %v756_v5 = vsel %vm754_vm3, %v6080_v34, %v6078_v61 }
 0x232   : > { %v6190_v38 = vpop.permute.xlu1 %794  ;;  %v6192_v37 = vpop.permute.xlu0 %792 }
 0x234   : > { %939 = vrot.lane.b32.xlu1 %v732_v48, %s5125_s12  ;;  %937 = vrot.lane.b32.xlu0 %v731_v23, %s5125_s12  ;;  %v735_v48 = vsel %vm727_vm2, %v6047_v2, %v6062_v8 }
 0x236   : > { %v6202_v35 = vpop.permute.xlu1 %798  ;;  %v6204_v36 = vpop.permute.xlu0 %796 }
 0x238   : > { %943 = vrot.lane.b32.xlu1 %v734_v40, %s5125_s12  ;;  %941 = vrot.lane.b32.xlu0 %v733_v21, %s5125_s12  ;;  %v755_v40 = vsel %vm754_vm3, %v6060_v4, %v6080_v34  ;;  %v758_v21 = vsel %vm754_vm3, %v6098_v32, %v6096_v11 }
 0x23a   : > { %v6214_v33 = vpop.permute.xlu1 %802  ;;  %v6216_v3 = vpop.permute.xlu0 %800 }
 0x23c   : > { %945 = vrot.lane.b32.xlu0 %v735_v48, %s5125_s12  ;;  %947 = vrot.lane.b32.xlu1 %v6062_v8, %s5125_s12  ;;  %v757_v48 = vsel %vm754_vm3, %v6078_v61, %v6098_v32 }
 0x23e   : > { %v6224_v23 = vpop.permute.xlu1 %806  ;;  %v6226_v0 = vpop.permute.xlu0 %804 }
 0x240   : > { %951 = vrot.lane.b32.xlu1 %v756_v5, %s5125_s12  ;;  %949 = vrot.lane.b32.xlu0 %v755_v40, %s5125_s12  ;;  %v760_v5 = vsel %vm754_vm3, %v6116_v28, %v6114_v14  ;;  %v759_v40 = vsel %vm754_vm3, %v6096_v11, %v6116_v28 }
 0x242   : > { %v6236_v2 = vpop.permute.xlu1 %819  ;;  %v6238_v8 = vpop.permute.xlu0 %817 }
 0x244   : > { %955 = vrot.lane.b32.xlu1 %v758_v21, %s5125_s12  ;;  %953 = vrot.lane.b32.xlu0 %v757_v48, %s5125_s12  ;;  %v762_v21 = vsel %vm754_vm3, %v6124_v16, %v6122_v15  ;;  %v761_v48 = vsel %vm754_vm3, %v6114_v14, %v6124_v16  ;;  %v784_v16 = vsel %vm781_vm4, %v6146_v25, %v6144_v41 }
 0x246   : > { %v6248_v34 = vpop.permute.xlu1 %823  ;;  %v6250_v4 = vpop.permute.xlu0 %821 }
 0x248   : > { %959 = vrot.lane.b32.xlu1 %v760_v5, %s5125_s12  ;;  %957 = vrot.lane.b32.xlu0 %v759_v40, %s5125_s12  ;;  %v782_v5 = vsel %vm781_vm4, %v6134_v27, %v6132_v26 }
 0x24a   : > { %v6260_v32 = vpop.permute.xlu1 %827  ;;  %v6262_v61 = vpop.permute.xlu0 %825 }
 0x24c   : > { %963 = vrot.lane.b32.xlu1 %v762_v21, %s5125_s12  ;;  %961 = vrot.lane.b32.xlu0 %v761_v48, %s5125_s12  ;;  %v783_v21 = vsel %vm781_vm4, %v6132_v26, %v6146_v25  ;;  %v786_v48 = vsel %vm781_vm4, %v6158_v46, %v6156_v44 }
 0x24e   : > { %v6272_v28 = vpop.permute.xlu1 %831  ;;  %v6274_v11 = vpop.permute.xlu0 %829 }
 0x250   : > { %965 = vrot.lane.b32.xlu0 %v6122_v15, %s5125_s12  ;;  %967 = vrot.lane.b32.xlu1 %v782_v5, %s5125_s12  ;;  %v785_v5 = vsel %vm781_vm4, %v6144_v41, %v6158_v46 }
 0x252   : > { %v6282_v40 = vpop.permute.xlu1 %844  ;;  %v6284_v14 = vpop.permute.xlu0 %833 }
 0x254   : > { %971 = vrot.lane.b32.xlu1 %v784_v16, %s5125_s12  ;;  %969 = vrot.lane.b32.xlu0 %v783_v21, %s5125_s12  ;;  %v788_v16 = vsel %vm781_vm4, %v6170_v43, %v6168_v42  ;;  %v787_v21 = vsel %vm781_vm4, %v6156_v44, %v6170_v43  ;;  %v810_v43 = vsel %vm808_vm5, %v6192_v37, %v6190_v38 }
 0x256   : > { %v6294_v27 = vpop.permute.xlu1 %848  ;;  %v6296_v15 = vpop.permute.xlu0 %846 }
 0x258   : > { %975 = vrot.lane.b32.xlu1 %v786_v48, %s5125_s12  ;;  %973 = vrot.lane.b32.xlu0 %v785_v5, %s5125_s12  ;;  %v789_v48 = vsel %vm781_vm4, %v6168_v42, %v6180_v39 }
 0x25a   : > { %v6306_v26 = vpop.permute.xlu1 %852  ;;  %v6308_v25 = vpop.permute.xlu0 %850 }
 0x25c   : > { %979 = vrot.lane.b32.xlu1 %v788_v16, %s5125_s12  ;;  %977 = vrot.lane.b32.xlu0 %v787_v21, %s5125_s12  ;;  %v809_v16 = vsel %vm808_vm5, %v6178_v45, %v6192_v37  ;;  %v812_v21 = vsel %vm808_vm5, %v6204_v36, %v6202_v35 }
 0x25e   : > { %v6318_v41 = vpop.permute.xlu1 %856  ;;  %v6320_v46 = vpop.permute.xlu0 %854 }
 0x260   : > { %981 = vrot.lane.b32.xlu0 %v789_v48, %s5125_s12  ;;  %983 = vrot.lane.b32.xlu1 %v6180_v39, %s5125_s12  ;;  %v811_v48 = vsel %vm808_vm5, %v6190_v38, %v6204_v36 }
 0x262   : > { %v6328_v5 = vpop.permute.xlu1 %860  ;;  %v6330_v44 = vpop.permute.xlu0 %858 }
 0x264   : > { %987 = vrot.lane.b32.xlu1 %v810_v43, %s5125_s12  ;;  %985 = vrot.lane.b32.xlu0 %v809_v16, %s5125_s12  ;;  %v814_v43 = vsel %vm808_vm5, %v6216_v3, %v6214_v33  ;;  %v813_v16 = vsel %vm808_vm5, %v6202_v35, %v6216_v3 }
 0x266   : > { %v6340_v42 = vpop.permute.xlu1 %874  ;;  %v6342_v39 = vpop.permute.xlu0 %871 }
 0x268   : > { %991 = vrot.lane.b32.xlu1 %v812_v21, %s5125_s12  ;;  %989 = vrot.lane.b32.xlu0 %v811_v48, %s5125_s12  ;;  %v816_v21 = vsel %vm808_vm5, %v6226_v0, %v6224_v23  ;;  %v815_v48 = vsel %vm808_vm5, %v6214_v33, %v6226_v0  ;;  %v838_v0 = vsel %vm835_vm6, %v6250_v4, %v6248_v34 }
 0x26a   : > { %v6352_v45 = vpop.permute.xlu1 %879  ;;  %v6354_v37 = vpop.permute.xlu0 %877 }
 0x26c   : > { %995 = vrot.lane.b32.xlu1 %v814_v43, %s5125_s12  ;;  %993 = vrot.lane.b32.xlu0 %v813_v16, %s5125_s12  ;;  %v836_v43 = vsel %vm835_vm6, %v6238_v8, %v6236_v2 }
 0x26e   : > { %v6364_v38 = vpop.permute.xlu1 %883  ;;  %v6366_v36 = vpop.permute.xlu0 %881 }
 0x270   : > { %999 = vrot.lane.b32.xlu1 %v816_v21, %s5125_s12  ;;  %997 = vrot.lane.b32.xlu0 %v815_v48, %s5125_s12  ;;  %v837_v21 = vsel %vm835_vm6, %v6236_v2, %v6250_v4  ;;  %v840_v48 = vsel %vm835_vm6, %v6262_v61, %v6260_v32 }
 0x272   : > { %v6376_v35 = vpop.permute.xlu1 %887  ;;  %v6378_v3 = vpop.permute.xlu0 %885 }
 0x274   : > { %1001 = vrot.lane.b32.xlu0 %v6224_v23, %s5125_s12  ;;  %1003 = vrot.lane.b32.xlu1 %v836_v43, %s5125_s12  ;;  %v839_v43 = vsel %vm835_vm6, %v6248_v34, %v6262_v61 }
 0x276   : > { %v6386_v16 = vpop.permute.xlu1 %891  ;;  %v6388_v33 = vpop.permute.xlu0 %889 }
 0x278   : > { %1007 = vrot.lane.b32.xlu1 %v838_v0, %s5125_s12  ;;  %1005 = vrot.lane.b32.xlu0 %v837_v21, %s5125_s12  ;;  %v842_v0 = vsel %vm835_vm6, %v6274_v11, %v6272_v28  ;;  %v841_v21 = vsel %vm835_vm6, %v6260_v32, %v6274_v11  ;;  %v864_v11 = vsel %vm862_vm7, %v6296_v15, %v6294_v27 }
 0x27a   : > { %v6398_v8 = vpop.permute.xlu1 %895  ;;  %v6400_v23 = vpop.permute.xlu0 %893 }
 0x27c   : > { %1011 = vrot.lane.b32.xlu1 %v840_v48, %s5125_s12  ;;  %1009 = vrot.lane.b32.xlu0 %v839_v43, %s5125_s12  ;;  %v843_v48 = vsel %vm835_vm6, %v6272_v28, %v6284_v14 }
 0x27e   : > { %v6410_v2 = vpop.permute.xlu1 %899  ;;  %v6412_v4 = vpop.permute.xlu0 %897 }
 0x280   : > { %1015 = vrot.lane.b32.xlu1 %v842_v0, %s5125_s12  ;;  %1013 = vrot.lane.b32.xlu0 %v841_v21, %s5125_s12  ;;  %v863_v0 = vsel %vm862_vm7, %v6282_v40, %v6296_v15  ;;  %v866_v21 = vsel %vm862_vm7, %v6308_v25, %v6306_v26 }
 0x282   : > { %v6422_v34 = vpop.permute.xlu1 %903  ;;  %v6424_v61 = vpop.permute.xlu0 %901 }
 0x284   : > { %1017 = vrot.lane.b32.xlu0 %v843_v48, %s5125_s12  ;;  %1019 = vrot.lane.b32.xlu1 %v6284_v14, %s5125_s12  ;;  %v865_v48 = vsel %vm862_vm7, %v6294_v27, %v6308_v25 }
 0x286   : > { %v6432_v43 = vpop.permute.xlu1 %907  ;;  %v6434_v32 = vpop.permute.xlu0 %905 }
 0x288   : > { %1023 = vrot.lane.b32.xlu1 %v864_v11, %s5125_s12  ;;  %1021 = vrot.lane.b32.xlu0 %v863_v0, %s5125_s12  ;;  %v868_v11 = vsel %vm862_vm7, %v6320_v46, %v6318_v41  ;;  %v867_v0 = vsel %vm862_vm7, %v6306_v26, %v6320_v46 }
 0x28a   : > { %v6444_v28 = vpop.permute.xlu1 %911  ;;  %v6446_v14 = vpop.permute.xlu0 %909 }
 0x28c   : > { %1027 = vrot.lane.b32.xlu1 %v866_v21, %s5125_s12  ;;  %1025 = vrot.lane.b32.xlu0 %v865_v48, %s5125_s12  ;;  %v870_v21 = vsel %vm862_vm7, %v6330_v44, %v6328_v5  ;;  %v869_v48 = vsel %vm862_vm7, %v6318_v41, %v6330_v44 }
 0x28e   : > { %v6456_v40 = vpop.permute.xlu1 %915  ;;  %v6458_v15 = vpop.permute.xlu0 %913 }
 0x290   : > { %1031 = vrot.lane.b32.xlu1 %v868_v11, %s5125_s12  ;;  %1029 = vrot.lane.b32.xlu0 %v867_v0, %s5125_s12  ;;  %v6487_v11 = vsel %vm510_vm8, %v5739_v57, %v5749_v62  ;;  %v6500_v0 = vsel %vm510_vm8, %v5747_v59, %v5757_v60 }
 0x292   : > { %v6468_v27 = vpop.permute.xlu1 %919  ;;  %v6470_v25 = vpop.permute.xlu0 %917 }
 0x293   : > { %12012 = vst [vmem:[#allocation119_spill] sm:$0xff] %v6468_v27  ;;  %v4908_v27 = vld [vmem:[%s5291_s13 + $0x28] sm:$0xff] }
 0x294   : > { %1035 = vrot.lane.b32.xlu1 %v870_v21, %s5125_s12  ;;  %1033 = vrot.lane.b32.xlu0 %v869_v48, %s5125_s12  ;;  %v6505_v21 = vsel %vm510_vm8, %v5749_v62, %v5747_v59  ;;  %v6523_v59 = vsel %vm510_vm8, %v5757_v60, %v5755_v63  ;;  %v6541_v60 = vsel %vm510_vm8, %v5765_v55, %v5763_v1 }
 0x296   : > { %v6480_v26 = vpop.permute.xlu1 %923  ;;  %v6482_v46 = vpop.permute.xlu0 %921 }
 0x297   : > { %12013 = vst [vmem:[#allocation120_spill] sm:$0xff] %v6480_v26 }
 0x298   : > { %1039 = vrot.lane.b32.xlu1 %v6487_v11, %s5125_s12  ;;  %1037 = vrot.lane.b32.xlu0 %v6328_v5, %s5125_s12 }
 0x29a   : > { %v6493_v41 = vpop.permute.xlu1 %927  ;;  %v6495_v44 = vpop.permute.xlu0 %925 }
 0x29b   : > { %12014 = vst [vmem:[#allocation121_spill] sm:$0xff] %v6493_v41  ;;  %12015 = vst [vmem:[#allocation122_spill] sm:$0xff] %v6495_v44  ;;  %v6518_v41 = vsel %vm510_vm8, %v5755_v63, %v5765_v55  ;;  %v4903_v44 = vld [vmem:[%s5291_s13 + $0x10] sm:$0xff] }
 0x29c   : > { %1043 = vrot.lane.b32.xlu1 %v6500_v0, %s5125_s12  ;;  %1041 = vrot.lane.b32.xlu0 %v6505_v21, %s5125_s12 }
 0x29e   : > { %v6511_v5 = vpop.permute.xlu1 %931  ;;  %v6513_v48 = vpop.permute.xlu0 %929 }
 0x29f   : > { %12016 = vst [vmem:[#allocation123_spill] sm:$0xff] %v6511_v5  ;;  %12017 = vst [vmem:[#allocation124_spill] sm:$0xff] %v6513_v48  ;;  %v6536_v48 = vsel %vm510_vm8, %v5763_v1, %v5773_v53 }
 0x2a0   : > { %1047 = vrot.lane.b32.xlu1 %v6518_v41, %s5125_s12  ;;  %1045 = vrot.lane.b32.xlu0 %v6523_v59, %s5125_s12 }
 0x2a2   : > { %v6529_v62 = vpop.permute.xlu1 %935  ;;  %v6531_v5 = vpop.permute.xlu0 %933 }
 0x2a3   : > { %12018 = vst [vmem:[#allocation125_spill] sm:$0xff] %v6529_v62  ;;  %12019 = vst [vmem:[#allocation126_spill] sm:$0xff] %v6531_v5  ;;  %v873_v5 = vsel %vm510_vm8, %v5773_v53, %v6342_v39 }
 0x2a4   : > { %1051 = vrot.lane.b32.xlu1 %v6536_v48, %s5125_s12  ;;  %1049 = vrot.lane.b32.xlu0 %v6541_v60, %s5125_s12 }
 0x2a6   : > { %v6547_v63 = vpop.permute.xlu1 %939  ;;  %v6549_v62 = vpop.permute.xlu0 %937 }
 0x2a7   : > { %12020 = vst [vmem:[#allocation127_spill] sm:$0xff] %v6547_v63  ;;  %12021 = vst [vmem:[#allocation128_spill] sm:$0xff] %v6549_v62  ;;  %v6564_v63 = vsel %vm537_vm9, %v5781_v51, %v5779_v56  ;;  %v6569_v62 = vsel %vm537_vm9, %v5779_v56, %v5789_v58  ;;  %v6587_v56 = vsel %vm537_vm9, %v5787_v54, %v5797_v52 }
 0x2a8   : > { %1053 = vrot.lane.b32.xlu0 %v873_v5, %s5125_s12  ;;  %1055 = vrot.lane.b32.xlu1 %v6342_v39, %s5125_s12 }
 0x2aa   : > { %v6557_v55 = vpop.permute.xlu1 %943  ;;  %v6559_v1 = vpop.permute.xlu0 %941 }
 0x2ab   : > { %12022 = vst [vmem:[#allocation129_spill] sm:$0xff] %v6557_v55  ;;  %12023 = vst [vmem:[#allocation130_spill] sm:$0xff] %v6559_v1  ;;  %v6582_v55 = vsel %vm537_vm9, %v5789_v58, %v5787_v54  ;;  %v6600_v58 = vsel %vm537_vm9, %v5797_v52, %v5795_v49  ;;  %v6605_v54 = vsel %vm537_vm9, %v5795_v49, %v5805_v50 }
 0x2ac   : > { %1057 = vrot.lane.b32.xlu0 %v6564_v63, %s5125_s12  ;;  %1059 = vrot.lane.b32.xlu1 %v6569_v62, %s5125_s12  ;;  %v6618_v52 = vsel %vm537_vm9, %v5805_v50, %v5803_v47  ;;  %v876_v49 = vsel %vm537_vm9, %v5803_v47, %v6340_v42 }
 0x2ae   : > { %v6575_v39 = vpop.permute.xlu1 %947  ;;  %v6577_v5 = vpop.permute.xlu0 %945 }
 0x2af   : > { %12024 = vst [vmem:[#allocation131_spill] sm:$0xff] %v6575_v39  ;;  %12025 = vst [vmem:[#allocation132_spill] sm:$0xff] %v6577_v5 }
 0x2b0   : > { %1061 = vrot.lane.b32.xlu0 %v6582_v55, %s5125_s12  ;;  %1063 = vrot.lane.b32.xlu1 %v6587_v56, %s5125_s12 }
 0x2b2   : > { %v6593_v39 = vpop.permute.xlu1 %951  ;;  %v6595_v5 = vpop.permute.xlu0 %949 }
 0x2b3   : > { %12026 = vst [vmem:[#allocation133_spill] sm:$0xff] %v6593_v39  ;;  %12027 = vst [vmem:[#allocation134_spill] sm:$0xff] %v6595_v5 }
 0x2b4   : > { %1065 = vrot.lane.b32.xlu0 %v6600_v58, %s5125_s12  ;;  %1067 = vrot.lane.b32.xlu1 %v6605_v54, %s5125_s12 }
 0x2b6   : > { %v6611_v39 = vpop.permute.xlu1 %955  ;;  %v6613_v5 = vpop.permute.xlu0 %953 }
 0x2b7   : > { %12028 = vst [vmem:[#allocation135_spill] sm:$0xff] %v6611_v39  ;;  %12029 = vst [vmem:[#allocation136_spill] sm:$0xff] %v6613_v5  ;;  %v4902_v5 = vld [vmem:[%s5291_s13] sm:$0xff] }
 0x2b8   : > { %1069 = vrot.lane.b32.xlu0 %v6618_v52, %s5125_s12  ;;  %1071 = vrot.lane.b32.xlu1 %v876_v49, %s5125_s12  ;;  %v4904_v49 = vld [vmem:[%s5291_s13 + $0x8] sm:$0xff] }
 0x2ba   : > { %v6626_v1 = vpop.permute.xlu1 %959  ;;  %v6628_v39 = vpop.permute.xlu0 %957 }
 0x2bb   : > { %12030 = vst [vmem:[#allocation137_spill] sm:$0xff] %v6626_v1  ;;  %12031 = vst [vmem:[#allocation138_spill] sm:$0xff] %v6628_v39  ;;  %v4905_v39 = vld [vmem:[%s5291_s13 + $0x20] sm:$0xff] }
 0x2bc   : > { %1164 = vrot.lane.b32.xlu1 %v4902_v5, %s5126_s11  ;;  %1073 = vrot.lane.b32.xlu0 %v6340_v42, %s5125_s12  ;;  %v4906_v42 = vld [vmem:[%s5291_s13 + $0x18] sm:$0xff] }
 0x2be   : > { %v6634_v50 = vpop.permute.xlu1 %963  ;;  %v6636_v26 = vpop.permute.xlu0 %961 }
 0x2bf   : > { %12032 = vst [vmem:[#allocation139_spill] sm:$0xff] %v6634_v50  ;;  %12033 = vst [vmem:[#allocation140_spill] sm:$0xff] %v6636_v26 }
 0x2c0   : > { %1168 = vrot.lane.b32.xlu1 %v4903_v44, %s5126_s11  ;;  %1166 = vrot.lane.b32.xlu0 %v4904_v49, %s5126_s11  ;;  %v4907_v44 = vld [vmem:[%s5291_s13 + $0x30] sm:$0xff] }
 0x2c2   : > { %v6642_v1 = vpop.permute.xlu1 %967  ;;  %v6644_v5 = vpop.permute.xlu0 %965 }
 0x2c3   : > { %12034 = vst [vmem:[#allocation141_spill] sm:$0xff] %v6642_v1  ;;  %12035 = vst [vmem:[#allocation142_spill] sm:$0xff] %v6644_v5  ;;  %v4909_v5 = vld [vmem:[%s5291_s13 + $0x40] sm:$0xff] }
 0x2c4   : > { %1172 = vrot.lane.b32.xlu1 %v4905_v39, %s5126_s11  ;;  %1170 = vrot.lane.b32.xlu0 %v4906_v42, %s5126_s11  ;;  %v4910_v39 = vld [vmem:[%s5291_s13 + $0x38] sm:$0xff] }
 0x2c6   : > { %v6650_v50 = vpop.permute.xlu1 %971  ;;  %v6652_v26 = vpop.permute.xlu0 %969 }
 0x2c7   : > { %12036 = vst [vmem:[#allocation143_spill] sm:$0xff] %v6650_v50 }
 0x2c8   : > { %1176 = vrot.lane.b32.xlu1 %v4907_v44, %s5126_s11  ;;  %1174 = vrot.lane.b32.xlu0 %v4908_v27, %s5126_s11  ;;  %v295_v44 = vsel %vm294_vm0, %v5450_v10, %v5458_v12 }
 0x2ca   : > { %v6658_v49 = vpop.permute.xlu1 %975  ;;  %v6660_v1 = vpop.permute.xlu0 %973 }
 0x2cb   : > { %12037 = vst [vmem:[#allocation144_spill] sm:$0xff] %v6658_v49 }
 0x2cc   : > { %1180 = vrot.lane.b32.xlu1 %v4909_v5, %s5126_s11  ;;  %1178 = vrot.lane.b32.xlu0 %v4910_v39, %s5126_s11 }
 0x2ce   : > { %v6666_v42 = vpop.permute.xlu1 %979  ;;  %v6668_v50 = vpop.permute.xlu0 %977 }
 0x2d0   : > { %1184 = vrot.lane.b32.xlu1 %v6054_v7, %s5126_s11  ;;  %1182 = vrot.lane.b32.xlu0 %v295_v44, %s5126_s11 }
 0x2d2   : > { %v6676_v27 = vpop.permute.xlu1 %983  ;;  %v6678_v49 = vpop.permute.xlu0 %981 }
 0x2d4   : > { %1188 = vrot.lane.b32.xlu1 %v6067_v6, %s5126_s11  ;;  %1186 = vrot.lane.b32.xlu0 %v6072_v31, %s5126_s11 }
 0x2d6   : > { %v6684_v5 = vpop.permute.xlu1 %987  ;;  %v6686_v39 = vpop.permute.xlu0 %985 }
 0x2d8   : > { %1192 = vrot.lane.b32.xlu1 %v6085_v29, %s5126_s11  ;;  %1190 = vrot.lane.b32.xlu0 %v6090_v9, %s5126_s11  ;;  %v322_v29 = vsel %vm321_vm10, %v5480_v17, %v5490_v20  ;;  %v324_v9 = vsel %vm321_vm10, %v5488_v19, %v5498_v22 }
 0x2da   : > { %v6692_v10 = vpop.permute.xlu1 %991  ;;  %v6694_v12 = vpop.permute.xlu0 %989 }
 0x2dc   : > { %1196 = vrot.lane.b32.xlu1 %v6103_v30, %s5126_s11  ;;  %1194 = vrot.lane.b32.xlu0 %v6108_v13, %s5126_s11  ;;  %v323_v13 = vsel %vm321_vm10, %v5490_v20, %v5488_v19 }
 0x2de   : > { %v6700_v31 = vpop.permute.xlu1 %995  ;;  %v6702_v7 = vpop.permute.xlu0 %993 }
 0x2e0   : > { %1200 = vrot.lane.b32.xlu1 %v322_v29, %s5126_s11  ;;  %1198 = vrot.lane.b32.xlu0 %v5482_v18, %s5126_s11  ;;  %v12041_v18 = vld [vmem:[#allocation15_spill] sm:$0xff] }
 0x2e1   : > { %v326_v29 = vsel %vm321_vm10, %v12041_v18, %v5506_v24 }
 0x2e2   : > { %v6710_v6 = vpop.permute.xlu1 %999  ;;  %v6712_v30 = vpop.permute.xlu0 %997 }
 0x2e3   : > { %12038 = vst [vmem:[#allocation145_spill] sm:$0xff] %v6710_v6  ;;  %v325_v6 = vsel %vm321_vm10, %v5498_v22, %v12041_v18 }
 0x2e4   : > { %1204 = vrot.lane.b32.xlu1 %v324_v9, %s5126_s11  ;;  %1202 = vrot.lane.b32.xlu0 %v323_v13, %s5126_s11  ;;  %v12044_v9 = vld [vmem:[#allocation18_spill] sm:$0xff]  ;;  %v12045_v13 = vld [vmem:[#allocation16_spill] sm:$0xff] }
 0x2e6   : > { %v6722_v17 = vpop.permute.xlu1 %1003  ;;  %v6724_v44 = vpop.permute.xlu0 %1001 }
 0x2e7   : > { %12039 = vst [vmem:[#allocation146_spill] sm:$0xff] %v6722_v17  ;;  %12040 = vst [vmem:[#allocation147_spill] sm:$0xff] %v6724_v44  ;;  %v328_v17 = vsel %vm321_vm10, %v12045_v13, %v12044_v9  ;;  %v327_v44 = vsel %vm321_vm10, %v5506_v24, %v12045_v13 }
 0x2e8   : > { %1208 = vrot.lane.b32.xlu1 %v326_v29, %s5126_s11  ;;  %1206 = vrot.lane.b32.xlu0 %v325_v6, %s5126_s11  ;;  %v12048_v6 = vld [vmem:[#allocation17_spill] sm:$0xff] }
 0x2e9   : > { %v329_v29 = vsel %vm321_vm10, %v12044_v9, %v12048_v6 }
 0x2ea   : > { %v6734_v19 = vpop.permute.xlu1 %1007  ;;  %v6736_v20 = vpop.permute.xlu0 %1005 }
 0x2eb   : > { %12042 = vst [vmem:[#allocation15_spill] sm:$0xff] %v6734_v19  ;;  %12043 = vst [vmem:[#allocation148_spill] sm:$0xff] %v6736_v20 }
 0x2ec   : > { %1212 = vrot.lane.b32.xlu1 %v328_v17, %s5126_s11  ;;  %1210 = vrot.lane.b32.xlu0 %v327_v44, %s5126_s11  ;;  %v12051_v17 = vld [vmem:[#allocation19_spill] sm:$0xff]  ;;  %v12052_v44 = vld [vmem:[#allocation20_spill] sm:$0xff] }
 0x2ed   : > { %v349_v13 = vsel %vm11601_vm11, %v12052_v44, %v12051_v17 }
 0x2ee   : > { %v6746_v22 = vpop.permute.xlu1 %1011  ;;  %v6748_v18 = vpop.permute.xlu0 %1009 }
 0x2ef   : > { %12046 = vst [vmem:[#allocation18_spill] sm:$0xff] %v6746_v22  ;;  %12047 = vst [vmem:[#allocation16_spill] sm:$0xff] %v6748_v18  ;;  %v12053_v22 = vld [vmem:[#allocation22_spill] sm:$0xff] }
 0x2f0   : > { %1216 = vrot.lane.b32.xlu1 %v12048_v6, %s5126_s11  ;;  %1214 = vrot.lane.b32.xlu0 %v329_v29, %s5126_s11  ;;  %v350_v18 = vsel %vm11601_vm11, %v12051_v17, %v12053_v22  ;;  %v12056_v29 = vld [vmem:[#allocation24_spill] sm:$0xff] }
 0x2f2   : > { %v6756_v19 = vpop.permute.xlu1 %1015  ;;  %v6758_v24 = vpop.permute.xlu0 %1013 }
 0x2f3   : > { %12049 = vst [vmem:[#allocation17_spill] sm:$0xff] %v6756_v19  ;;  %12050 = vst [vmem:[#allocation149_spill] sm:$0xff] %v6758_v24  ;;  %v12057_v19 = vld [vmem:[#allocation21_spill] sm:$0xff] }
 0x2f4   : > { %1220 = vrot.lane.b32.xlu1 %v350_v18, %s5126_s11  ;;  %1218 = vrot.lane.b32.xlu0 %v349_v13, %s5126_s11  ;;  %v352_v24 = vsel %vm11601_vm11, %v12057_v19, %v12056_v29  ;;  %v351_v44 = vsel %vm11601_vm11, %v12053_v22, %v12057_v19  ;;  %v12060_v13 = vld [vmem:[#allocation26_spill] sm:$0xff] }
 0x2f6   : > { %v6768_v9 = vpop.permute.xlu1 %1019  ;;  %v6770_v6 = vpop.permute.xlu0 %1017 }
 0x2f7   : > { %12054 = vst [vmem:[#allocation19_spill] sm:$0xff] %v6768_v9  ;;  %12055 = vst [vmem:[#allocation20_spill] sm:$0xff] %v6770_v6  ;;  %v12061_v9 = vld [vmem:[#allocation23_spill] sm:$0xff] }
 0x2f8   : > { %1224 = vrot.lane.b32.xlu1 %v352_v24, %s5126_s11  ;;  %1222 = vrot.lane.b32.xlu0 %v351_v44, %s5126_s11  ;;  %v354_v6 = vsel %vm11601_vm11, %v12061_v9, %v12060_v13  ;;  %v353_v20 = vsel %vm11601_vm11, %v12056_v29, %v12061_v9  ;;  %v12064_v24 = vld [vmem:[#allocation28_spill] sm:$0xff]  ;;  %v12065_v44 = vld [vmem:[#allocation25_spill] sm:$0xff]  ;;  %v12069_v29 = vld [vmem:[#allocation27_spill] sm:$0xff] }
 0x2fa   : > { %v6780_v17 = vpop.permute.xlu1 %1023  ;;  %v6782_v18 = vpop.permute.xlu0 %1021 }
 0x2fb   : > { %12058 = vst [vmem:[#allocation22_spill] sm:$0xff] %v6780_v17  ;;  %12059 = vst [vmem:[#allocation24_spill] sm:$0xff] %v6782_v18  ;;  %v356_v17 = vsel %vm11601_vm11, %v12065_v44, %v12064_v24  ;;  %v355_v18 = vsel %vm11601_vm11, %v12060_v13, %v12065_v44  ;;  %vm11642_vm11 = vcmask 867328  }
 0x2fc   : > { %1228 = vrot.lane.b32.xlu1 %v354_v6, %s5126_s11  ;;  %1226 = vrot.lane.b32.xlu0 %v353_v20, %s5126_s11  ;;  %v12068_v6 = vld [vmem:[#allocation30_spill] sm:$0xff] }
 0x2fe   : > { %v6792_v19 = vpop.permute.xlu1 %1027  ;;  %v6794_v22 = vpop.permute.xlu0 %1025 }
 0x2ff   : > { %12062 = vst [vmem:[#allocation21_spill] sm:$0xff] %v6792_v19  ;;  %12063 = vst [vmem:[#allocation26_spill] sm:$0xff] %v6794_v22  ;;  %v376_v19 = vsel %vm11609_vm12, %v12069_v29, %v12068_v6 }
 0x300   : > { %1232 = vrot.lane.b32.xlu1 %v356_v17, %s5126_s11  ;;  %1230 = vrot.lane.b32.xlu0 %v355_v18, %s5126_s11  ;;  %v12072_v17 = vld [vmem:[#allocation32_spill] sm:$0xff]  ;;  %v12073_v18 = vld [vmem:[#allocation29_spill] sm:$0xff] }
 0x301   : > { %v378_v44 = vsel %vm11609_vm12, %v12073_v18, %v12072_v17 }
 0x302   : > { %v6804_v9 = vpop.permute.xlu1 %1031  ;;  %v6806_v20 = vpop.permute.xlu0 %1029 }
 0x303   : > { %12066 = vst [vmem:[#allocation23_spill] sm:$0xff] %v6804_v9  ;;  %12067 = vst [vmem:[#allocation28_spill] sm:$0xff] %v6806_v20  ;;  %v377_v9 = vsel %vm11609_vm12, %v12068_v6, %v12073_v18 }
 0x304   : > { %1236 = vrot.lane.b32.xlu1 %v376_v19, %s5126_s11  ;;  %1234 = vrot.lane.b32.xlu0 %v12064_v24, %s5126_s11  ;;  %v12076_v24 = vld [vmem:[#allocation34_spill] sm:$0xff] }
 0x306   : > { %v6814_v22 = vpop.permute.xlu1 %1035  ;;  %v6816_v13 = vpop.permute.xlu0 %1033 }
 0x307   : > { %12070 = vst [vmem:[#allocation25_spill] sm:$0xff] %v6814_v22  ;;  %12071 = vst [vmem:[#allocation30_spill] sm:$0xff] %v6816_v13  ;;  %v12077_v22 = vld [vmem:[#allocation31_spill] sm:$0xff] }
 0x308   : > { %1240 = vrot.lane.b32.xlu1 %v378_v44, %s5126_s11  ;;  %1238 = vrot.lane.b32.xlu0 %v377_v9, %s5126_s11  ;;  %v380_v13 = vsel %vm11609_vm12, %v12077_v22, %v12076_v24  ;;  %v379_v20 = vsel %vm11609_vm12, %v12072_v17, %v12077_v22  ;;  %v12080_v9 = vld [vmem:[#allocation36_spill] sm:$0xff]  ;;  %v12081_v44 = vld [vmem:[#allocation33_spill] sm:$0xff] }
 0x30a   : > { %v6826_v19 = vpop.permute.xlu1 %1039  ;;  %v6828_v29 = vpop.permute.xlu0 %1037 }
 0x30b   : > { %12074 = vst [vmem:[#allocation27_spill] sm:$0xff] %v6826_v19  ;;  %12075 = vst [vmem:[#allocation32_spill] sm:$0xff] %v6828_v29  ;;  %v382_v19 = vsel %vm11609_vm12, %v12081_v44, %v12080_v9  ;;  %v381_v29 = vsel %vm11609_vm12, %v12076_v24, %v12081_v44 }
 0x30c   : > { %1244 = vrot.lane.b32.xlu1 %v380_v13, %s5126_s11  ;;  %1242 = vrot.lane.b32.xlu0 %v379_v20, %s5126_s11  ;;  %v12084_v20 = vld [vmem:[#allocation35_spill] sm:$0xff] }
 0x30d   : > { %v383_v17 = vsel %vm11609_vm12, %v12080_v9, %v12084_v20  ;;  %vm11650_vm12 = vcmask 211968  }
 0x30e   : > { %v6838_v6 = vpop.permute.xlu1 %1043  ;;  %v6840_v18 = vpop.permute.xlu0 %1041 }
 0x30f   : > { %12078 = vst [vmem:[#allocation29_spill] sm:$0xff] %v6838_v6  ;;  %12079 = vst [vmem:[#allocation34_spill] sm:$0xff] %v6840_v18 }
 0x310   : > { %1248 = vrot.lane.b32.xlu1 %v382_v19, %s5126_s11  ;;  %1246 = vrot.lane.b32.xlu0 %v381_v29, %s5126_s11  ;;  %v12087_v19 = vld [vmem:[#allocation37_spill] sm:$0xff]  ;;  %v12088_v29 = vld [vmem:[#allocation38_spill] sm:$0xff] }
 0x311   : > { %v403_v44 = vsel %vm11616_vm13, %v12088_v29, %v12087_v19 }
 0x312   : > { %v6850_v22 = vpop.permute.xlu1 %1047  ;;  %v6852_v13 = vpop.permute.xlu0 %1045 }
 0x313   : > { %12082 = vst [vmem:[#allocation31_spill] sm:$0xff] %v6850_v22  ;;  %12083 = vst [vmem:[#allocation36_spill] sm:$0xff] %v6852_v13  ;;  %v12089_v22 = vld [vmem:[#allocation40_spill] sm:$0xff] }
 0x314   : > { %1252 = vrot.lane.b32.xlu1 %v12084_v20, %s5126_s11  ;;  %1250 = vrot.lane.b32.xlu0 %v383_v17, %s5126_s11  ;;  %v404_v13 = vsel %vm11616_vm13, %v12087_v19, %v12089_v22  ;;  %v12092_v17 = vld [vmem:[#allocation42_spill] sm:$0xff] }
 0x316   : > { %v6860_v6 = vpop.permute.xlu1 %1051  ;;  %v6862_v24 = vpop.permute.xlu0 %1049 }
 0x317   : > { %12085 = vst [vmem:[#allocation33_spill] sm:$0xff] %v6860_v6  ;;  %12086 = vst [vmem:[#allocation35_spill] sm:$0xff] %v6862_v24  ;;  %v12093_v6 = vld [vmem:[#allocation39_spill] sm:$0xff] }
 0x318   : > { %1256 = vrot.lane.b32.xlu1 %v404_v13, %s5126_s11  ;;  %1254 = vrot.lane.b32.xlu0 %v403_v44, %s5126_s11  ;;  %v406_v24 = vsel %vm11616_vm13, %v12093_v6, %v12092_v17  ;;  %v405_v29 = vsel %vm11616_vm13, %v12089_v22, %v12093_v6  ;;  %v12096_v44 = vld [vmem:[#allocation44_spill] sm:$0xff] }
 0x31a   : > { %v6872_v9 = vpop.permute.xlu1 %1055  ;;  %v6874_v20 = vpop.permute.xlu0 %1053 }
 0x31b   : > { %12090 = vst [vmem:[#allocation37_spill] sm:$0xff] %v6872_v9  ;;  %12091 = vst [vmem:[#allocation38_spill] sm:$0xff] %v6874_v20  ;;  %v12097_v9 = vld [vmem:[#allocation41_spill] sm:$0xff] }
 0x31c   : > { %1260 = vrot.lane.b32.xlu1 %v406_v24, %s5126_s11  ;;  %1258 = vrot.lane.b32.xlu0 %v405_v29, %s5126_s11  ;;  %v408_v20 = vsel %vm11616_vm13, %v12097_v9, %v12096_v44  ;;  %v407_v18 = vsel %vm11616_vm13, %v12092_v17, %v12097_v9  ;;  %v12100_v24 = vld [vmem:[#allocation46_spill] sm:$0xff]  ;;  %v12101_v29 = vld [vmem:[#allocation43_spill] sm:$0xff]  ;;  %v12105_v17 = vld [vmem:[#allocation45_spill] sm:$0xff] }
 0x31e   : > { %v6884_v19 = vpop.permute.xlu1 %1059  ;;  %v6886_v13 = vpop.permute.xlu0 %1057 }
 0x31f   : > { %12094 = vst [vmem:[#allocation40_spill] sm:$0xff] %v6884_v19  ;;  %12095 = vst [vmem:[#allocation42_spill] sm:$0xff] %v6886_v13  ;;  %v410_v19 = vsel %vm11616_vm13, %v12101_v29, %v12100_v24  ;;  %v409_v13 = vsel %vm11616_vm13, %v12096_v44, %v12101_v29  ;;  %vm11672_vm13 = vcmask 146432  }
 0x320   : > { %1264 = vrot.lane.b32.xlu1 %v408_v20, %s5126_s11  ;;  %1262 = vrot.lane.b32.xlu0 %v407_v18, %s5126_s11  ;;  %v12104_v20 = vld [vmem:[#allocation48_spill] sm:$0xff] }
 0x322   : > { %v6896_v6 = vpop.permute.xlu1 %1063  ;;  %v6898_v22 = vpop.permute.xlu0 %1061 }
 0x323   : > { %12098 = vst [vmem:[#allocation39_spill] sm:$0xff] %v6896_v6  ;;  %12099 = vst [vmem:[#allocation44_spill] sm:$0xff] %v6898_v22  ;;  %v430_v6 = vsel %vm11624_vm14, %v12105_v17, %v12104_v20 }
 0x324   : > { %1268 = vrot.lane.b32.xlu1 %v410_v19, %s5126_s11  ;;  %1266 = vrot.lane.b32.xlu0 %v409_v13, %s5126_s11  ;;  %v12108_v19 = vld [vmem:[#allocation50_spill] sm:$0xff]  ;;  %v12109_v13 = vld [vmem:[#allocation47_spill] sm:$0xff] }
 0x325   : > { %v432_v29 = vsel %vm11624_vm14, %v12109_v13, %v12108_v19 }
 0x326   : > { %v6908_v9 = vpop.permute.xlu1 %1067  ;;  %v6910_v18 = vpop.permute.xlu0 %1065 }
 0x327   : > { %12102 = vst [vmem:[#allocation41_spill] sm:$0xff] %v6908_v9  ;;  %12103 = vst [vmem:[#allocation46_spill] sm:$0xff] %v6910_v18  ;;  %v431_v9 = vsel %vm11624_vm14, %v12104_v20, %v12109_v13 }
 0x328   : > { %1272 = vrot.lane.b32.xlu1 %v430_v6, %s5126_s11  ;;  %1270 = vrot.lane.b32.xlu0 %v12100_v24, %s5126_s11  ;;  %v12112_v24 = vld [vmem:[#allocation52_spill] sm:$0xff] }
 0x32a   : > { %v6918_v22 = vpop.permute.xlu1 %1071  ;;  %v6920_v44 = vpop.permute.xlu0 %1069 }
 0x32b   : > { %12106 = vst [vmem:[#allocation43_spill] sm:$0xff] %v6918_v22  ;;  %12107 = vst [vmem:[#allocation48_spill] sm:$0xff] %v6920_v44  ;;  %v12113_v22 = vld [vmem:[#allocation49_spill] sm:$0xff] }
 0x32c   : > { %1276 = vrot.lane.b32.xlu1 %v432_v29, %s5126_s11  ;;  %1274 = vrot.lane.b32.xlu0 %v431_v9, %s5126_s11  ;;  %v434_v44 = vsel %vm11624_vm14, %v12113_v22, %v12112_v24  ;;  %v433_v18 = vsel %vm11624_vm14, %v12108_v19, %v12113_v22  ;;  %v12116_v9 = vld [vmem:[#allocation54_spill] sm:$0xff]  ;;  %v12117_v29 = vld [vmem:[#allocation51_spill] sm:$0xff] }
 0x32e   : > { %v6930_v6 = vpop.permute.xlu1 %1164  ;;  %v6932_v17 = vpop.permute.xlu0 %1073 }
 0x32f   : > { %12110 = vst [vmem:[#allocation45_spill] sm:$0xff] %v6930_v6  ;;  %12111 = vst [vmem:[#allocation50_spill] sm:$0xff] %v6932_v17  ;;  %v436_v17 = vsel %vm11624_vm14, %v12117_v29, %v12116_v9  ;;  %v435_v6 = vsel %vm11624_vm14, %v12112_v24, %v12117_v29 }
 0x330   : > { %1280 = vrot.lane.b32.xlu1 %v434_v44, %s5126_s11  ;;  %1278 = vrot.lane.b32.xlu0 %v433_v18, %s5126_s11  ;;  %v12120_v18 = vld [vmem:[#allocation53_spill] sm:$0xff] }
 0x331   : > { %v437_v19 = vsel %vm11624_vm14, %v12116_v9, %v12120_v18  ;;  %vm11678_vm14 = vcmask 138240  }
 0x332   : > { %v6942_v20 = vpop.permute.xlu1 %1168  ;;  %v6944_v13 = vpop.permute.xlu0 %1166 }
 0x333   : > { %12114 = vst [vmem:[#allocation47_spill] sm:$0xff] %v6942_v20  ;;  %12115 = vst [vmem:[#allocation52_spill] sm:$0xff] %v6944_v13 }
 0x334   : > { %1284 = vrot.lane.b32.xlu1 %v436_v17, %s5126_s11  ;;  %1282 = vrot.lane.b32.xlu0 %v435_v6, %s5126_s11  ;;  %v12123_v17 = vld [vmem:[#allocation55_spill] sm:$0xff]  ;;  %v12124_v6 = vld [vmem:[#allocation56_spill] sm:$0xff] }
 0x335   : > { %v457_v29 = vsel %vm11634_vm15, %v12124_v6, %v12123_v17 }
 0x336   : > { %v6954_v22 = vpop.permute.xlu1 %1172  ;;  %v6956_v44 = vpop.permute.xlu0 %1170 }
 0x337   : > { %12118 = vst [vmem:[#allocation49_spill] sm:$0xff] %v6954_v22  ;;  %12119 = vst [vmem:[#allocation54_spill] sm:$0xff] %v6956_v44  ;;  %v12125_v22 = vld [vmem:[#allocation58_spill] sm:$0xff] }
 0x338   : > { %1288 = vrot.lane.b32.xlu1 %v12120_v18, %s5126_s11  ;;  %1286 = vrot.lane.b32.xlu0 %v437_v19, %s5126_s11  ;;  %v458_v44 = vsel %vm11634_vm15, %v12123_v17, %v12125_v22  ;;  %v12128_v19 = vld [vmem:[#allocation60_spill] sm:$0xff] }
 0x33a   : > { %v6964_v13 = vpop.permute.xlu1 %1176  ;;  %v6966_v24 = vpop.permute.xlu0 %1174 }
 0x33b   : > { %12121 = vst [vmem:[#allocation51_spill] sm:$0xff] %v6964_v13  ;;  %12122 = vst [vmem:[#allocation53_spill] sm:$0xff] %v6966_v24  ;;  %v12129_v13 = vld [vmem:[#allocation57_spill] sm:$0xff] }
 0x33c   : > { %1292 = vrot.lane.b32.xlu1 %v458_v44, %s5126_s11  ;;  %1290 = vrot.lane.b32.xlu0 %v457_v29, %s5126_s11  ;;  %v460_v24 = vsel %vm11634_vm15, %v12129_v13, %v12128_v19  ;;  %v459_v6 = vsel %vm11634_vm15, %v12125_v22, %v12129_v13  ;;  %v12132_v29 = vld [vmem:[#allocation62_spill] sm:$0xff] }
 0x33e   : > { %v6976_v9 = vpop.permute.xlu1 %1180  ;;  %v6978_v18 = vpop.permute.xlu0 %1178 }
 0x33f   : > { %12126 = vst [vmem:[#allocation55_spill] sm:$0xff] %v6976_v9  ;;  %12127 = vst [vmem:[#allocation56_spill] sm:$0xff] %v6978_v18  ;;  %v12133_v9 = vld [vmem:[#allocation59_spill] sm:$0xff] }
 0x340   : > { %1296 = vrot.lane.b32.xlu1 %v460_v24, %s5126_s11  ;;  %1294 = vrot.lane.b32.xlu0 %v459_v6, %s5126_s11  ;;  %v462_v18 = vsel %vm11634_vm15, %v12133_v9, %v12132_v29  ;;  %v461_v20 = vsel %vm11634_vm15, %v12128_v19, %v12133_v9  ;;  %v12136_v24 = vld [vmem:[#allocation64_spill] sm:$0xff]  ;;  %v12137_v6 = vld [vmem:[#allocation61_spill] sm:$0xff]  ;;  %v12141_v19 = vld [vmem:[#allocation63_spill] sm:$0xff] }
 0x342   : > { %v6988_v17 = vpop.permute.xlu1 %1184  ;;  %v6990_v44 = vpop.permute.xlu0 %1182 }
 0x343   : > { %12130 = vst [vmem:[#allocation58_spill] sm:$0xff] %v6988_v17  ;;  %12131 = vst [vmem:[#allocation60_spill] sm:$0xff] %v6990_v44  ;;  %v464_v44 = vsel %vm11634_vm15, %v12137_v6, %v12136_v24  ;;  %v463_v17 = vsel %vm11634_vm15, %v12132_v29, %v12137_v6  ;;  %vm643_vm15 = vcmask 130048  }
 0x344   : > { %1300 = vrot.lane.b32.xlu1 %v462_v18, %s5126_s11  ;;  %1298 = vrot.lane.b32.xlu0 %v461_v20, %s5126_s11  ;;  %v12140_v18 = vld [vmem:[#allocation66_spill] sm:$0xff] }
 0x346   : > { %v7000_v13 = vpop.permute.xlu1 %1188  ;;  %v7002_v22 = vpop.permute.xlu0 %1186 }
 0x347   : > { %12134 = vst [vmem:[#allocation57_spill] sm:$0xff] %v7000_v13  ;;  %12135 = vst [vmem:[#allocation62_spill] sm:$0xff] %v7002_v22  ;;  %v484_v13 = vsel %vm11642_vm11, %v12141_v19, %v12140_v18 }
 0x348   : > { %1304 = vrot.lane.b32.xlu1 %v464_v44, %s5126_s11  ;;  %1302 = vrot.lane.b32.xlu0 %v463_v17, %s5126_s11  ;;  %v12144_v44 = vld [vmem:[#allocation68_spill] sm:$0xff]  ;;  %v12145_v17 = vld [vmem:[#allocation65_spill] sm:$0xff] }
 0x349   : > { %v486_v6 = vsel %vm11642_vm11, %v12145_v17, %v12144_v44 }
 0x34a   : > { %v7012_v9 = vpop.permute.xlu1 %1192  ;;  %v7014_v20 = vpop.permute.xlu0 %1190 }
 0x34b   : > { %12138 = vst [vmem:[#allocation59_spill] sm:$0xff] %v7012_v9  ;;  %12139 = vst [vmem:[#allocation64_spill] sm:$0xff] %v7014_v20  ;;  %v485_v9 = vsel %vm11642_vm11, %v12140_v18, %v12145_v17 }
 0x34c   : > { %1308 = vrot.lane.b32.xlu1 %v484_v13, %s5126_s11  ;;  %1306 = vrot.lane.b32.xlu0 %v12136_v24, %s5126_s11  ;;  %v12148_v24 = vld [vmem:[#allocation70_spill] sm:$0xff] }
 0x34e   : > { %v7022_v22 = vpop.permute.xlu1 %1196  ;;  %v7024_v29 = vpop.permute.xlu0 %1194 }
 0x34f   : > { %12142 = vst [vmem:[#allocation61_spill] sm:$0xff] %v7022_v22  ;;  %12143 = vst [vmem:[#allocation66_spill] sm:$0xff] %v7024_v29  ;;  %v12149_v22 = vld [vmem:[#allocation67_spill] sm:$0xff] }
 0x350   : > { %1312 = vrot.lane.b32.xlu1 %v486_v6, %s5126_s11  ;;  %1310 = vrot.lane.b32.xlu0 %v485_v9, %s5126_s11  ;;  %v488_v29 = vsel %vm11642_vm11, %v12149_v22, %v12148_v24  ;;  %v487_v20 = vsel %vm11642_vm11, %v12144_v44, %v12149_v22  ;;  %v12152_v9 = vld [vmem:[#allocation72_spill] sm:$0xff]  ;;  %v12153_v6 = vld [vmem:[#allocation69_spill] sm:$0xff] }
 0x352   : > { %v7034_v13 = vpop.permute.xlu1 %1200  ;;  %v7036_v19 = vpop.permute.xlu0 %1198 }
 0x353   : > { %12146 = vst [vmem:[#allocation63_spill] sm:$0xff] %v7034_v13  ;;  %12147 = vst [vmem:[#allocation68_spill] sm:$0xff] %v7036_v19  ;;  %v490_v19 = vsel %vm11642_vm11, %v12153_v6, %v12152_v9  ;;  %v489_v13 = vsel %vm11642_vm11, %v12148_v24, %v12153_v6 }
 0x354   : > { %1316 = vrot.lane.b32.xlu1 %v488_v29, %s5126_s11  ;;  %1314 = vrot.lane.b32.xlu0 %v487_v20, %s5126_s11  ;;  %v12156_v20 = vld [vmem:[#allocation71_spill] sm:$0xff] }
 0x355   : > { %v491_v44 = vsel %vm11642_vm11, %v12152_v9, %v12156_v20  ;;  %vm670_vm11 = vcmask 64512  }
 0x356   : > { %v7046_v18 = vpop.permute.xlu1 %1204  ;;  %v7048_v17 = vpop.permute.xlu0 %1202 }
 0x357   : > { %12150 = vst [vmem:[#allocation65_spill] sm:$0xff] %v7046_v18  ;;  %12151 = vst [vmem:[#allocation70_spill] sm:$0xff] %v7048_v17 }
 0x358   : > { %1320 = vrot.lane.b32.xlu1 %v490_v19, %s5126_s11  ;;  %1318 = vrot.lane.b32.xlu0 %v489_v13, %s5126_s11  ;;  %v12159_v19 = vld [vmem:[#allocation73_spill] sm:$0xff] }
 0x359   : > { %v511_v13 = vsel %vm510_vm8, %v12159_v19, %v5739_v57  ;;  %v12168_v19 = vld [vmem:[#allocation74_spill] sm:$0xff] }
 0x35a   : > { %v7058_v22 = vpop.permute.xlu1 %1208  ;;  %v7060_v29 = vpop.permute.xlu0 %1206 }
 0x35b   : > { %12154 = vst [vmem:[#allocation67_spill] sm:$0xff] %v7058_v22  ;;  %12155 = vst [vmem:[#allocation72_spill] sm:$0xff] %v7060_v29 }
 0x35c   : > { %1324 = vrot.lane.b32.xlu1 %v12156_v20, %s5126_s11  ;;  %1322 = vrot.lane.b32.xlu0 %v491_v44, %s5126_s11 }
 0x35e   : > { %v7068_v17 = vpop.permute.xlu1 %1212  ;;  %v7070_v24 = vpop.permute.xlu0 %1210 }
 0x35f   : > { %12157 = vst [vmem:[#allocation69_spill] sm:$0xff] %v7068_v17  ;;  %12158 = vst [vmem:[#allocation71_spill] sm:$0xff] %v7070_v24 }
 0x360   : > { %1328 = vrot.lane.b32.xlu1 %v6487_v11, %s5126_s11  ;;  %1326 = vrot.lane.b32.xlu0 %v511_v13, %s5126_s11 }
 0x362   : > { %v7078_v6 = vpop.permute.xlu1 %1216  ;;  %v7080_v9 = vpop.permute.xlu0 %1214 }
 0x363   : > { %12160 = vst [vmem:[#allocation73_spill] sm:$0xff] %v7078_v6  ;;  %12161 = vst [vmem:[#allocation150_spill] sm:$0xff] %v7080_v9 }
 0x364   : > { %1332 = vrot.lane.b32.xlu1 %v6500_v0, %s5126_s11  ;;  %1330 = vrot.lane.b32.xlu0 %v6505_v21, %s5126_s11 }
 0x366   : > { %v7086_v20 = vpop.permute.xlu1 %1220  ;;  %v7088_v44 = vpop.permute.xlu0 %1218 }
 0x367   : > { %12162 = vst [vmem:[#allocation151_spill] sm:$0xff] %v7086_v20  ;;  %12163 = vst [vmem:[#allocation152_spill] sm:$0xff] %v7088_v44 }
 0x368   : > { %1336 = vrot.lane.b32.xlu1 %v6518_v41, %s5126_s11  ;;  %1334 = vrot.lane.b32.xlu0 %v6523_v59, %s5126_s11  ;;  %v538_v41 = vsel %vm537_vm9, %v12168_v19, %v5781_v51  ;;  %v12179_v19 = vld [vmem:[#allocation75_spill] sm:$0xff] }
 0x36a   : > { %v7094_v57 = vpop.permute.xlu1 %1224  ;;  %v7096_v11 = vpop.permute.xlu0 %1222 }
 0x36b   : > { %12164 = vst [vmem:[#allocation153_spill] sm:$0xff] %v7094_v57  ;;  %12165 = vst [vmem:[#allocation154_spill] sm:$0xff] %v7096_v11 }
 0x36c   : > { %1340 = vrot.lane.b32.xlu1 %v6536_v48, %s5126_s11  ;;  %1338 = vrot.lane.b32.xlu0 %v6541_v60, %s5126_s11 }
 0x36e   : > { %v7102_v0 = vpop.permute.xlu1 %1228  ;;  %v7104_v21 = vpop.permute.xlu0 %1226 }
 0x36f   : > { %12166 = vst [vmem:[#allocation155_spill] sm:$0xff] %v7102_v0  ;;  %12167 = vst [vmem:[#allocation156_spill] sm:$0xff] %v7104_v21 }
 0x370   : > { %1344 = vrot.lane.b32.xlu1 %v538_v41, %s5126_s11  ;;  %1342 = vrot.lane.b32.xlu0 %v5773_v53, %s5126_s11 }
 0x372   : > { %v7112_v59 = vpop.permute.xlu1 %1232  ;;  %v7114_v13 = vpop.permute.xlu0 %1230 }
 0x373   : > { %12169 = vst [vmem:[#allocation74_spill] sm:$0xff] %v7112_v59  ;;  %12170 = vst [vmem:[#allocation157_spill] sm:$0xff] %v7114_v13  ;;  %v12185_v59 = vld [vmem:[#allocation77_spill] sm:$0xff] }
 0x374   : > { %1348 = vrot.lane.b32.xlu1 %v6569_v62, %s5126_s11  ;;  %1346 = vrot.lane.b32.xlu0 %v6564_v63, %s5126_s11 }
 0x376   : > { %v7120_v48 = vpop.permute.xlu1 %1236  ;;  %v7122_v60 = vpop.permute.xlu0 %1234 }
 0x377   : > { %12171 = vst [vmem:[#allocation158_spill] sm:$0xff] %v7120_v48  ;;  %12172 = vst [vmem:[#allocation159_spill] sm:$0xff] %v7122_v60 }
 0x378   : > { %1352 = vrot.lane.b32.xlu1 %v6587_v56, %s5126_s11  ;;  %1350 = vrot.lane.b32.xlu0 %v6582_v55, %s5126_s11 }
 0x37a   : > { %v7128_v51 = vpop.permute.xlu1 %1240  ;;  %v7130_v53 = vpop.permute.xlu0 %1238 }
 0x37b   : > { %12173 = vst [vmem:[#allocation160_spill] sm:$0xff] %v7128_v51  ;;  %12174 = vst [vmem:[#allocation161_spill] sm:$0xff] %v7130_v53 }
 0x37c   : > { %1356 = vrot.lane.b32.xlu1 %v6605_v54, %s5126_s11  ;;  %1354 = vrot.lane.b32.xlu0 %v6600_v58, %s5126_s11  ;;  %v12180_v54 = vld [vmem:[#allocation76_spill] sm:$0xff]  ;;  %v12181_v58 = vld [vmem:[#allocation78_spill] sm:$0xff] }
 0x37d   : > { %v565_v41 = vsel %vm11650_vm12, %v12180_v54, %v12179_v19  ;;  %v566_v9 = vsel %vm11650_vm12, %v12179_v19, %v12181_v58  ;;  %v567_v54 = vsel %vm11650_vm12, %v12181_v58, %v12185_v59  ;;  %v12191_v58 = vld [vmem:[#allocation84_spill] sm:$0xff] }
 0x37e   : > { %v7136_v62 = vpop.permute.xlu1 %1244  ;;  %v7138_v63 = vpop.permute.xlu0 %1242 }
 0x37f   : > { %12175 = vst [vmem:[#allocation162_spill] sm:$0xff] %v7136_v62  ;;  %12176 = vst [vmem:[#allocation163_spill] sm:$0xff] %v7138_v63 }
 0x380   : > { %1360 = vrot.lane.b32.xlu1 %v5803_v47, %s5126_s11  ;;  %1358 = vrot.lane.b32.xlu0 %v6618_v52, %s5126_s11  ;;  %v12184_v52 = vld [vmem:[#allocation80_spill] sm:$0xff] }
 0x381   : > { %v568_v60 = vsel %vm11650_vm12, %v12185_v59, %v12184_v52 }
 0x382   : > { %v7144_v55 = vpop.permute.xlu1 %1248  ;;  %v7146_v56 = vpop.permute.xlu0 %1246 }
 0x383   : > { %12177 = vst [vmem:[#allocation164_spill] sm:$0xff] %v7144_v55  ;;  %12178 = vst [vmem:[#allocation165_spill] sm:$0xff] %v7146_v56 }
 0x384   : > { %1364 = vrot.lane.b32.xlu1 %v566_v9, %s5126_s11  ;;  %1362 = vrot.lane.b32.xlu0 %v565_v41, %s5126_s11  ;;  %v12188_v41 = vld [vmem:[#allocation82_spill] sm:$0xff] }
 0x386   : > { %v7156_v47 = vpop.permute.xlu1 %1252  ;;  %v7158_v6 = vpop.permute.xlu0 %1250 }
 0x387   : > { %12182 = vst [vmem:[#allocation75_spill] sm:$0xff] %v7156_v47  ;;  %12183 = vst [vmem:[#allocation76_spill] sm:$0xff] %v7158_v6  ;;  %v12189_v47 = vld [vmem:[#allocation79_spill] sm:$0xff] }
 0x388   : > { %1368 = vrot.lane.b32.xlu1 %v568_v60, %s5126_s11  ;;  %1366 = vrot.lane.b32.xlu0 %v567_v54, %s5126_s11  ;;  %v570_v6 = vsel %vm11650_vm12, %v12189_v47, %v12188_v41  ;;  %v569_v24 = vsel %vm11650_vm12, %v12184_v52, %v12189_v47  ;;  %v12192_v54 = vld [vmem:[#allocation81_spill] sm:$0xff]  ;;  %v12195_v47 = vld [vmem:[#allocation86_spill] sm:$0xff]  ;;  %v12196_v52 = vld [vmem:[#allocation83_spill] sm:$0xff] }
 0x389   : > { %v572_v17 = vsel %vm11650_vm12, %v12192_v54, %v12191_v58  ;;  %v571_v0 = vsel %vm11650_vm12, %v12188_v41, %v12192_v54  ;;  %v592_v13 = vsel %vm11672_vm13, %v12196_v52, %v12195_v47  ;;  %vm1075_vm12 = vcmask 56320  }
 0x38a   : > { %v7168_v19 = vpop.permute.xlu1 %1256  ;;  %v7170_v9 = vpop.permute.xlu0 %1254 }
 0x38b   : > { %12186 = vst [vmem:[#allocation78_spill] sm:$0xff] %v7168_v19  ;;  %12187 = vst [vmem:[#allocation80_spill] sm:$0xff] %v7170_v9 }
 0x38c   : > { %1372 = vrot.lane.b32.xlu1 %v570_v6, %s5126_s11  ;;  %1370 = vrot.lane.b32.xlu0 %v569_v24, %s5126_s11 }
 0x38e   : > { %v7180_v59 = vpop.permute.xlu1 %1260  ;;  %v7182_v60 = vpop.permute.xlu0 %1258 }
 0x38f   : > { %12190 = vst [vmem:[#allocation77_spill] sm:$0xff] %v7180_v59 }
 0x390   : > { %1376 = vrot.lane.b32.xlu1 %v572_v17, %s5126_s11  ;;  %1374 = vrot.lane.b32.xlu0 %v571_v0, %s5126_s11  ;;  %v12199_v17 = vld [vmem:[#allocation88_spill] sm:$0xff]  ;;  %v12200_v0 = vld [vmem:[#allocation85_spill] sm:$0xff] }
 0x391   : > { %v594_v54 = vsel %vm11672_vm13, %v12200_v0, %v12199_v17  ;;  %v593_v55 = vsel %vm11672_vm13, %v12195_v47, %v12200_v0 }
 0x392   : > { %v7192_v6 = vpop.permute.xlu1 %1264  ;;  %v7194_v24 = vpop.permute.xlu0 %1262 }
 0x393   : > { %12193 = vst [vmem:[#allocation82_spill] sm:$0xff] %v7192_v6  ;;  %12194 = vst [vmem:[#allocation79_spill] sm:$0xff] %v7194_v24 }
 0x394   : > { %1380 = vrot.lane.b32.xlu1 %v592_v13, %s5126_s11  ;;  %1378 = vrot.lane.b32.xlu0 %v12191_v58, %s5126_s11  ;;  %v12202_v58 = vld [vmem:[#allocation90_spill] sm:$0xff] }
 0x396   : > { %v7202_v56 = vpop.permute.xlu1 %1268  ;;  %v7204_v41 = vpop.permute.xlu0 %1266 }
 0x397   : > { %12197 = vst [vmem:[#allocation84_spill] sm:$0xff] %v7202_v56  ;;  %12198 = vst [vmem:[#allocation81_spill] sm:$0xff] %v7204_v41  ;;  %v12203_v56 = vld [vmem:[#allocation87_spill] sm:$0xff] }
 0x398   : > { %1384 = vrot.lane.b32.xlu1 %v594_v54, %s5126_s11  ;;  %1382 = vrot.lane.b32.xlu0 %v593_v55, %s5126_s11  ;;  %v596_v6 = vsel %vm11672_vm13, %v12203_v56, %v12202_v58  ;;  %v595_v41 = vsel %vm11672_vm13, %v12199_v17, %v12203_v56  ;;  %v12204_v55 = vld [vmem:[#allocation92_spill] sm:$0xff]  ;;  %v12205_v54 = vld [vmem:[#allocation89_spill] sm:$0xff] }
 0x399   : > { %v597_v29 = vsel %vm11672_vm13, %v12202_v58, %v12205_v54 }
 0x39a   : > { %v7214_v13 = vpop.permute.xlu1 %1272  ;;  %v7216_v52 = vpop.permute.xlu0 %1270 }
 0x39b   : > { %12201 = vst [vmem:[#allocation86_spill] sm:$0xff] %v7216_v52  ;;  %v598_v52 = vsel %vm11672_vm13, %v12205_v54, %v12204_v55 }
 0x39c   : > { %1388 = vrot.lane.b32.xlu1 %v596_v6, %s5126_s11  ;;  %1386 = vrot.lane.b32.xlu0 %v595_v41, %s5126_s11  ;;  %v12208_v41 = vld [vmem:[#allocation91_spill] sm:$0xff] }
 0x39d   : > { %v599_v17 = vsel %vm11672_vm13, %v12204_v55, %v12208_v41  ;;  %vm1650_vm13 = vcmask 908288  }
 0x39e   : > { %v7226_v47 = vpop.permute.xlu1 %1276  ;;  %v7228_v0 = vpop.permute.xlu0 %1274 }
 0x3a0   : > { %1392 = vrot.lane.b32.xlu1 %v598_v52, %s5126_s11  ;;  %1390 = vrot.lane.b32.xlu0 %v597_v29, %s5126_s11  ;;  %v12211_v52 = vld [vmem:[#allocation93_spill] sm:$0xff]  ;;  %v12212_v29 = vld [vmem:[#allocation94_spill] sm:$0xff] }
 0x3a1   : > { %v617_v54 = vsel %vm11678_vm14, %v12212_v29, %v12211_v52 }
 0x3a2   : > { %v7238_v56 = vpop.permute.xlu1 %1280  ;;  %v7240_v6 = vpop.permute.xlu0 %1278 }
 0x3a3   : > { %12206 = vst [vmem:[#allocation83_spill] sm:$0xff] %v7238_v56  ;;  %12207 = vst [vmem:[#allocation88_spill] sm:$0xff] %v7240_v6 }
 0x3a4   : > { %1396 = vrot.lane.b32.xlu1 %v12208_v41, %s5126_s11  ;;  %1394 = vrot.lane.b32.xlu0 %v599_v17, %s5126_s11  ;;  %v12215_v41 = vld [vmem:[#allocation95_spill] sm:$0xff]  ;;  %v12216_v17 = vld [vmem:[#allocation96_spill] sm:$0xff] }
 0x3a5   : > { %v619_v21 = vsel %vm11678_vm14, %v12216_v17, %v12215_v41 }
 0x3a6   : > { %v7248_v22 = vpop.permute.xlu1 %1284  ;;  %v7250_v58 = vpop.permute.xlu0 %1282 }
 0x3a7   : > { %12209 = vst [vmem:[#allocation85_spill] sm:$0xff] %v7248_v22  ;;  %12210 = vst [vmem:[#allocation90_spill] sm:$0xff] %v7250_v58  ;;  %v618_v58 = vsel %vm11678_vm14, %v12211_v52, %v12216_v17  ;;  %v12221_v17 = vld [vmem:[#allocation100_spill] sm:$0xff] }
 0x3a8   : > { %1400 = vrot.lane.b32.xlu1 %v617_v54, %s5126_s11  ;;  %1398 = vrot.lane.b32.xlu0 %v12212_v29, %s5126_s11  ;;  %v12217_v29 = vld [vmem:[#allocation97_spill] sm:$0xff] }
 0x3a9   : > { %v622_v18 = vsel %vm11678_vm14, %v12217_v29, %v12221_v17 }
 0x3aa   : > { %v7258_v55 = vpop.permute.xlu1 %1288  ;;  %v7260_v57 = vpop.permute.xlu0 %1286 }
 0x3ab   : > { %12213 = vst [vmem:[#allocation87_spill] sm:$0xff] %v7258_v55  ;;  %12214 = vst [vmem:[#allocation92_spill] sm:$0xff] %v7260_v57  ;;  %v12218_v55 = vld [vmem:[#allocation98_spill] sm:$0xff] }
 0x3ac   : > { %1404 = vrot.lane.b32.xlu1 %v619_v21, %s5126_s11  ;;  %1402 = vrot.lane.b32.xlu0 %v618_v58, %s5126_s11  ;;  %v621_v57 = vsel %vm11678_vm14, %v12218_v55, %v12217_v29  ;;  %v620_v63 = vsel %vm11678_vm14, %v12215_v41, %v12218_v55  ;;  %v12220_v58 = vld [vmem:[#allocation99_spill] sm:$0xff]  ;;  %v12227_v29 = vld [vmem:[#allocation104_spill] sm:$0xff] }
 0x3ad   : > { %v623_v62 = vsel %vm11678_vm14, %v12221_v17, %v12220_v58  ;;  %v12228_v17 = vld [vmem:[#allocation101_spill] sm:$0xff]  ;;  %vm2083_vm14 = vcmask 719872  }
 0x3ae   : > { %v7270_v54 = vpop.permute.xlu1 %1292  ;;  %v7272_v22 = vpop.permute.xlu0 %1290 }
 0x3b0   : > { %1408 = vrot.lane.b32.xlu1 %v621_v57, %s5126_s11  ;;  %1406 = vrot.lane.b32.xlu0 %v620_v63, %s5126_s11  ;;  %v12224_v63 = vld [vmem:[#allocation102_spill] sm:$0xff] }
 0x3b2   : > { %v7282_v52 = vpop.permute.xlu1 %1296  ;;  %v7284_v21 = vpop.permute.xlu0 %1294 }
 0x3b3   : > { %12219 = vst [vmem:[#allocation89_spill] sm:$0xff] %v7282_v52 }
 0x3b4   : > { %1412 = vrot.lane.b32.xlu1 %v623_v62, %s5126_s11  ;;  %1410 = vrot.lane.b32.xlu0 %v622_v18, %s5126_s11  ;;  %v645_v62 = vsel %vm643_vm15, %v12228_v17, %v12227_v29  ;;  %v644_v18 = vsel %vm643_vm15, %v12224_v63, %v12228_v17 }
 0x3b6   : > { %v7294_v55 = vpop.permute.xlu1 %1300  ;;  %v7296_v57 = vpop.permute.xlu0 %1298 }
 0x3b7   : > { %12222 = vst [vmem:[#allocation91_spill] sm:$0xff] %v7294_v55  ;;  %12223 = vst [vmem:[#allocation93_spill] sm:$0xff] %v7296_v57 }
 0x3b8   : > { %1416 = vrot.lane.b32.xlu1 %v12224_v63, %s5126_s11  ;;  %1414 = vrot.lane.b32.xlu0 %v12220_v58, %s5126_s11  ;;  %v12230_v58 = vld [vmem:[#allocation106_spill] sm:$0xff] }
 0x3ba   : > { %v7302_v41 = vpop.permute.xlu1 %1304  ;;  %v7304_v44 = vpop.permute.xlu0 %1302 }
 0x3bb   : > { %12225 = vst [vmem:[#allocation94_spill] sm:$0xff] %v7302_v41  ;;  %12226 = vst [vmem:[#allocation95_spill] sm:$0xff] %v7304_v44  ;;  %v12231_v41 = vld [vmem:[#allocation103_spill] sm:$0xff] }
 0x3bc   : > { %1420 = vrot.lane.b32.xlu1 %v645_v62, %s5126_s11  ;;  %1418 = vrot.lane.b32.xlu0 %v644_v18, %s5126_s11  ;;  %v647_v44 = vsel %vm643_vm15, %v12231_v41, %v12230_v58  ;;  %v646_v24 = vsel %vm643_vm15, %v12227_v29, %v12231_v41  ;;  %v12232_v62 = vld [vmem:[#allocation108_spill] sm:$0xff]  ;;  %v12233_v18 = vld [vmem:[#allocation105_spill] sm:$0xff]  ;;  %v12236_v29 = vld [vmem:[#allocation107_spill] sm:$0xff] }
 0x3bd   : > { %v648_v20 = vsel %vm643_vm15, %v12230_v58, %v12233_v18  ;;  %v650_v48 = vsel %vm643_vm15, %v12232_v62, %v12236_v29  ;;  %v12239_v58 = vld [vmem:[#allocation112_spill] sm:$0xff] }
 0x3be   : > { %v7314_v55 = vpop.permute.xlu1 %1308  ;;  %v7316_v59 = vpop.permute.xlu0 %1306 }
 0x3bf   : > { %12229 = vst [vmem:[#allocation96_spill] sm:$0xff] %v7316_v59  ;;  %v649_v59 = vsel %vm643_vm15, %v12233_v18, %v12232_v62  ;;  %v12240_v18 = vld [vmem:[#allocation109_spill] sm:$0xff] }
 0x3c0   : > { %1424 = vrot.lane.b32.xlu1 %v647_v44, %s5126_s11  ;;  %1422 = vrot.lane.b32.xlu0 %v646_v24, %s5126_s11  ;;  %v12235_v24 = vld [vmem:[#allocation110_spill] sm:$0xff]  ;;  %v671_v6 = vsel %vm670_vm11, %v12240_v18, %v12239_v58 }
 0x3c1   : > { %v651_v11 = vsel %vm643_vm15, %v12236_v29, %v12235_v24 }
 0x3c2   : > { %v7326_v63 = vpop.permute.xlu1 %1312  ;;  %v7328_v17 = vpop.permute.xlu0 %1310 }
 0x3c4   : > { %1428 = vrot.lane.b32.xlu1 %v649_v59, %s5126_s11  ;;  %1426 = vrot.lane.b32.xlu0 %v648_v20, %s5126_s11 }
 0x3c6   : > { %v7338_v41 = vpop.permute.xlu1 %1316  ;;  %v7340_v44 = vpop.permute.xlu0 %1314 }
 0x3c7   : > { %12234 = vst [vmem:[#allocation97_spill] sm:$0xff] %v7338_v41 }
 0x3c8   : > { %1432 = vrot.lane.b32.xlu1 %v651_v11, %s5126_s11  ;;  %1430 = vrot.lane.b32.xlu0 %v650_v48, %s5126_s11  ;;  %v12243_v11 = vld [vmem:[#allocation114_spill] sm:$0xff]  ;;  %v12244_v48 = vld [vmem:[#allocation111_spill] sm:$0xff] }
 0x3c9   : > { %v673_v29 = vsel %vm670_vm11, %v12244_v48, %v12243_v11 }
 0x3ca   : > { %v7350_v59 = vpop.permute.xlu1 %1320  ;;  %v7352_v20 = vpop.permute.xlu0 %1318 }
 0x3cb   : > { %12237 = vst [vmem:[#allocation98_spill] sm:$0xff] %v7350_v59  ;;  %12238 = vst [vmem:[#allocation99_spill] sm:$0xff] %v7352_v20  ;;  %v672_v20 = vsel %vm670_vm11, %v12239_v58, %v12244_v48 }
 0x3cc   : > { %1436 = vrot.lane.b32.xlu1 %v671_v6, %s5126_s11  ;;  %1434 = vrot.lane.b32.xlu0 %v12240_v18, %s5126_s11  ;;  %v12245_v18 = vld [vmem:[#allocation116_spill] sm:$0xff] }
 0x3ce   : > { %v7360_v24 = vpop.permute.xlu1 %1324  ;;  %v7362_v62 = vpop.permute.xlu0 %1322 }
 0x3cf   : > { %12241 = vst [vmem:[#allocation100_spill] sm:$0xff] %v7360_v24  ;;  %12242 = vst [vmem:[#allocation102_spill] sm:$0xff] %v7362_v62  ;;  %v12246_v24 = vld [vmem:[#allocation113_spill] sm:$0xff] }
 0x3d0   : > { %1440 = vrot.lane.b32.xlu1 %v673_v29, %s5126_s11  ;;  %1438 = vrot.lane.b32.xlu0 %v672_v20, %s5126_s11  ;;  %v675_v62 = vsel %vm670_vm11, %v12246_v24, %v12245_v18  ;;  %v674_v56 = vsel %vm670_vm11, %v12243_v11, %v12246_v24  ;;  %v12247_v20 = vld [vmem:[#allocation118_spill] sm:$0xff]  ;;  %v12248_v29 = vld [vmem:[#allocation115_spill] sm:$0xff] }
 0x3d1   : > { %v677_v53 = vsel %vm670_vm11, %v12248_v29, %v12247_v20  ;;  %v676_v51 = vsel %vm670_vm11, %v12245_v18, %v12248_v29 }
 0x3d2   : > { %v7372_v6 = vpop.permute.xlu1 %1328  ;;  %v7374_v59 = vpop.permute.xlu0 %1326 }
 0x3d4   : > { %1444 = vrot.lane.b32.xlu1 %v675_v62, %s5126_s11  ;;  %1442 = vrot.lane.b32.xlu0 %v674_v56, %s5126_s11  ;;  %v12251_v56 = vld [vmem:[#allocation117_spill] sm:$0xff] }
 0x3d5   : > { %v678_v11 = vsel %vm670_vm11, %v12247_v20, %v12251_v56  ;;  %v1079_v56 = vsel %vm1075_vm12, %v6364_v38, %v6378_v3 }
 0x3d6   : > { %v7384_v58 = vpop.permute.xlu1 %1332  ;;  %v7386_v48 = vpop.permute.xlu0 %1330 }
 0x3d8   : > { %1448 = vrot.lane.b32.xlu1 %v677_v53, %s5126_s11  ;;  %1446 = vrot.lane.b32.xlu0 %v676_v51, %s5126_s11  ;;  %v1077_v51 = vsel %vm1075_vm12, %v6352_v45, %v6366_v36  ;;  %v1076_v53 = vsel %vm1075_vm12, %v6354_v37, %v6352_v45 }
 0x3da   : > { %v7396_v24 = vpop.permute.xlu1 %1336  ;;  %v7398_v62 = vpop.permute.xlu0 %1334 }
 0x3db   : > { %12249 = vst [vmem:[#allocation104_spill] sm:$0xff] %v7396_v24  ;;  %12250 = vst [vmem:[#allocation101_spill] sm:$0xff] %v7398_v62 }
 0x3dc   : > { %1452 = vrot.lane.b32.xlu1 %v6354_v37, %s5126_s11  ;;  %1450 = vrot.lane.b32.xlu0 %v678_v11, %s5126_s11  ;;  %v1078_v11 = vsel %vm1075_vm12, %v6366_v36, %v6364_v38 }
 0x3de   : > { %v7406_v9 = vpop.permute.xlu1 %1340  ;;  %v7408_v18 = vpop.permute.xlu0 %1338 }
 0x3df   : > { %12252 = vst [vmem:[#allocation106_spill] sm:$0xff] %v7406_v9  ;;  %12253 = vst [vmem:[#allocation103_spill] sm:$0xff] %v7408_v18 }
 0x3e0   : > { %1456 = vrot.lane.b32.xlu1 %v1077_v51, %s5126_s11  ;;  %1454 = vrot.lane.b32.xlu0 %v1076_v53, %s5126_s11  ;;  %v1081_v51 = vsel %vm1075_vm12, %v6376_v35, %v6388_v33  ;;  %v1080_v53 = vsel %vm1075_vm12, %v6378_v3, %v6376_v35 }
 0x3e2   : > { %v7418_v20 = vpop.permute.xlu1 %1344  ;;  %v7420_v29 = vpop.permute.xlu0 %1342 }
 0x3e3   : > { %12254 = vst [vmem:[#allocation108_spill] sm:$0xff] %v7420_v29 }
 0x3e4   : > { %1460 = vrot.lane.b32.xlu1 %v1079_v56, %s5126_s11  ;;  %1458 = vrot.lane.b32.xlu0 %v1078_v11, %s5126_s11  ;;  %v1083_v56 = vsel %vm1075_vm12, %v6386_v16, %v6400_v23  ;;  %v1082_v11 = vsel %vm1075_vm12, %v6388_v33, %v6386_v16  ;;  %v1086_v33 = vsel %vm1075_vm12, %v6410_v2, %v6424_v61 }
 0x3e6   : > { %v7430_v45 = vpop.permute.xlu1 %1348  ;;  %v7432_v37 = vpop.permute.xlu0 %1346 }
 0x3e8   : > { %1464 = vrot.lane.b32.xlu1 %v1081_v51, %s5126_s11  ;;  %1462 = vrot.lane.b32.xlu0 %v1080_v53, %s5126_s11  ;;  %v1084_v51 = vsel %vm1075_vm12, %v6398_v8, %v6412_v4  ;;  %v1085_v53 = vsel %vm1075_vm12, %v6412_v4, %v6410_v2 }
 0x3ea   : > { %v7442_v38 = vpop.permute.xlu1 %1352  ;;  %v7444_v36 = vpop.permute.xlu0 %1350 }
 0x3eb   : > { %12255 = vst [vmem:[#allocation105_spill] sm:$0xff] %v7442_v38 }
 0x3ec   : > { %1468 = vrot.lane.b32.xlu1 %v1083_v56, %s5126_s11  ;;  %1466 = vrot.lane.b32.xlu0 %v1082_v11, %s5126_s11 }
 0x3ee   : > { %v7454_v35 = vpop.permute.xlu1 %1356  ;;  %v7456_v3 = vpop.permute.xlu0 %1354 }
 0x3ef   : > { %12256 = vst [vmem:[#allocation110_spill] sm:$0xff] %v7454_v35  ;;  %12257 = vst [vmem:[#allocation107_spill] sm:$0xff] %v7456_v3 }
 0x3f0   : > { %1472 = vrot.lane.b32.xlu1 %v1084_v51, %s5126_s11  ;;  %1470 = vrot.lane.b32.xlu0 %v6398_v8, %s5126_s11  ;;  %v1088_v8 = vsel %vm1075_vm12, %v6422_v34, %v6434_v32  ;;  %v1087_v51 = vsel %vm1075_vm12, %v6424_v61, %v6422_v34 }
 0x3f2   : > { %v7464_v23 = vpop.permute.xlu1 %1360  ;;  %v7466_v16 = vpop.permute.xlu0 %1358 }
 0x3f3   : > { %12258 = vst [vmem:[#allocation112_spill] sm:$0xff] %v7464_v23  ;;  %12259 = vst [vmem:[#allocation109_spill] sm:$0xff] %v7466_v16 }
 0x3f4   : > { %1476 = vrot.lane.b32.xlu1 %v1086_v33, %s5126_s11  ;;  %1474 = vrot.lane.b32.xlu0 %v1085_v53, %s5126_s11  ;;  %v1090_v33 = vsel %vm1075_vm12, %v6432_v43, %v6446_v14  ;;  %v1089_v53 = vsel %vm1075_vm12, %v6434_v32, %v6432_v43  ;;  %v1093_v32 = vsel %vm1075_vm12, %v6456_v40, %v6470_v25 }
 0x3f6   : > { %v7476_v56 = vpop.permute.xlu1 %1364  ;;  %v7478_v11 = vpop.permute.xlu0 %1362 }
 0x3f8   : > { %1480 = vrot.lane.b32.xlu1 %v1088_v8, %s5126_s11  ;;  %1478 = vrot.lane.b32.xlu0 %v1087_v51, %s5126_s11  ;;  %v1091_v8 = vsel %vm1075_vm12, %v6446_v14, %v6444_v28 }
 0x3fa   : > { %v7488_v2 = vpop.permute.xlu1 %1368  ;;  %v7490_v4 = vpop.permute.xlu0 %1366 }
 0x3fc   : > { %1484 = vrot.lane.b32.xlu1 %v1090_v33, %s5126_s11  ;;  %1482 = vrot.lane.b32.xlu0 %v1089_v53, %s5126_s11  ;;  %v1092_v33 = vsel %vm1075_vm12, %v6458_v15, %v6456_v40  ;;  %v12265_v53 = vld [vmem:[#allocation119_spill] sm:$0xff] }
 0x3fd   : > { %v1094_v9 = vsel %vm1075_vm12, %v6470_v25, %v12265_v53 }
 0x3fe   : > { %v7500_v34 = vpop.permute.xlu1 %1372  ;;  %v7502_v61 = vpop.permute.xlu0 %1370 }
 0x3ff   : > { %12260 = vst [vmem:[#allocation114_spill] sm:$0xff] %v7500_v34  ;;  %12261 = vst [vmem:[#allocation111_spill] sm:$0xff] %v7502_v61 }
 0x400   : > { %1488 = vrot.lane.b32.xlu1 %v6458_v15, %s5126_s11  ;;  %1486 = vrot.lane.b32.xlu0 %v1091_v8, %s5126_s11  ;;  %v1095_v8 = vsel %vm1075_vm12, %v12265_v53, %v6482_v46 }
 0x402   : > { %v7510_v51 = vpop.permute.xlu1 %1376  ;;  %v7512_v43 = vpop.permute.xlu0 %1374 }
 0x403   : > { %12262 = vst [vmem:[#allocation116_spill] sm:$0xff] %v7510_v51  ;;  %12263 = vst [vmem:[#allocation113_spill] sm:$0xff] %v7512_v43  ;;  %v12286_v43 = vld [vmem:[#allocation134_spill] sm:$0xff] }
 0x404   : > { %1492 = vrot.lane.b32.xlu1 %v1093_v32, %s5126_s11  ;;  %1490 = vrot.lane.b32.xlu0 %v1092_v33, %s5126_s11  ;;  %v12266_v32 = vld [vmem:[#allocation122_spill] sm:$0xff]  ;;  %v12267_v33 = vld [vmem:[#allocation120_spill] sm:$0xff] }
 0x405   : > { %v1097_v29 = vsel %vm1075_vm12, %v12267_v33, %v12266_v32  ;;  %v1096_v16 = vsel %vm1075_vm12, %v6482_v46, %v12267_v33  ;;  %v12274_v33 = vld [vmem:[#allocation123_spill] sm:$0xff] }
 0x406   : > { %v7522_v28 = vpop.permute.xlu1 %1380  ;;  %v7524_v14 = vpop.permute.xlu0 %1378 }
 0x407   : > { %12264 = vst [vmem:[#allocation118_spill] sm:$0xff] %v7524_v14 }
 0x408   : > { %1496 = vrot.lane.b32.xlu1 %v1095_v8, %s5126_s11  ;;  %1494 = vrot.lane.b32.xlu0 %v1094_v9, %s5126_s11  ;;  %v12269_v9 = vld [vmem:[#allocation124_spill] sm:$0xff]  ;;  %v12270_v8 = vld [vmem:[#allocation121_spill] sm:$0xff] }
 0x409   : > { %v1099_v23 = vsel %vm1075_vm12, %v12270_v8, %v12269_v9  ;;  %v1098_v51 = vsel %vm1075_vm12, %v12266_v32, %v12270_v8  ;;  %v12278_v8 = vld [vmem:[#allocation125_spill] sm:$0xff] }
 0x40a   : > { %v7534_v40 = vpop.permute.xlu1 %1384  ;;  %v7536_v15 = vpop.permute.xlu0 %1382 }
 0x40c   : > { %1500 = vrot.lane.b32.xlu1 %v1097_v29, %s5126_s11  ;;  %1498 = vrot.lane.b32.xlu0 %v1096_v16, %s5126_s11  ;;  %v12273_v16 = vld [vmem:[#allocation126_spill] sm:$0xff] }
 0x40d   : > { %v1100_v14 = vsel %vm1075_vm12, %v12274_v33, %v12273_v16  ;;  %v1101_v24 = vsel %vm1075_vm12, %v12273_v16, %v12278_v8 }
 0x40e   : > { %v7546_v25 = vpop.permute.xlu1 %1388  ;;  %v7548_v53 = vpop.permute.xlu0 %1386 }
 0x40f   : > { %12268 = vst [vmem:[#allocation115_spill] sm:$0xff] %v7546_v25 }
 0x410   : > { %1504 = vrot.lane.b32.xlu1 %v1099_v23, %s5126_s11  ;;  %1502 = vrot.lane.b32.xlu0 %v1098_v51, %s5126_s11  ;;  %v12277_v23 = vld [vmem:[#allocation128_spill] sm:$0xff] }
 0x411   : > { %v1102_v51 = vsel %vm1075_vm12, %v12278_v8, %v12277_v23 }
 0x412   : > { %v7558_v46 = vpop.permute.xlu1 %1392  ;;  %v7560_v29 = vpop.permute.xlu0 %1390 }
 0x413   : > { %12271 = vst [vmem:[#allocation117_spill] sm:$0xff] %v7558_v46  ;;  %12272 = vst [vmem:[#allocation119_spill] sm:$0xff] %v7560_v29 }
 0x414   : > { %1508 = vrot.lane.b32.xlu1 %v1100_v14, %s5126_s11  ;;  %1506 = vrot.lane.b32.xlu0 %v12274_v33, %s5126_s11  ;;  %v12279_v33 = vld [vmem:[#allocation130_spill] sm:$0xff] }
 0x416   : > { %v7568_v9 = vpop.permute.xlu1 %1396  ;;  %v7570_v32 = vpop.permute.xlu0 %1394 }
 0x417   : > { %12275 = vst [vmem:[#allocation122_spill] sm:$0xff] %v7568_v9  ;;  %12276 = vst [vmem:[#allocation120_spill] sm:$0xff] %v7570_v32  ;;  %v12280_v9 = vld [vmem:[#allocation127_spill] sm:$0xff] }
 0x418   : > { %1512 = vrot.lane.b32.xlu1 %v1102_v51, %s5126_s11  ;;  %1510 = vrot.lane.b32.xlu0 %v1101_v24, %s5126_s11  ;;  %v1104_v32 = vsel %vm1075_vm12, %v12280_v9, %v12279_v33  ;;  %v1103_v3 = vsel %vm1075_vm12, %v12277_v23, %v12280_v9  ;;  %v12281_v24 = vld [vmem:[#allocation132_spill] sm:$0xff]  ;;  %v12282_v51 = vld [vmem:[#allocation129_spill] sm:$0xff] }
 0x419   : > { %v1106_v35 = vsel %vm1075_vm12, %v12282_v51, %v12281_v24  ;;  %v1105_v34 = vsel %vm1075_vm12, %v12279_v33, %v12282_v51  ;;  %v12290_v51 = vld [vmem:[#allocation133_spill] sm:$0xff] }
 0x41a   : > { %v7580_v14 = vpop.permute.xlu1 %1400  ;;  %v7582_v18 = vpop.permute.xlu0 %1398  ;;  %v1108_v46 = vsel %vm1075_vm12, %v12286_v43, %v12290_v51 }
 0x41c   : > { %1516 = vrot.lane.b32.xlu1 %v1104_v32, %s5126_s11  ;;  %1514 = vrot.lane.b32.xlu0 %v1103_v3, %s5126_s11  ;;  %v12285_v3 = vld [vmem:[#allocation131_spill] sm:$0xff] }
 0x41d   : > { %v1107_v23 = vsel %vm1075_vm12, %v12281_v24, %v12285_v3 }
 0x41e   : > { %v7592_v16 = vpop.permute.xlu1 %1404  ;;  %v7594_v8 = vpop.permute.xlu0 %1402 }
 0x420   : > { %1520 = vrot.lane.b32.xlu1 %v1106_v35, %s5126_s11  ;;  %1518 = vrot.lane.b32.xlu0 %v1105_v34, %s5126_s11  ;;  %v12289_v35 = vld [vmem:[#allocation136_spill] sm:$0xff] }
 0x421   : > { %v1109_v34 = vsel %vm1075_vm12, %v12290_v51, %v12289_v35 }
 0x422   : > { %v7604_v9 = vpop.permute.xlu1 %1408  ;;  %v7606_v32 = vpop.permute.xlu0 %1406 }
 0x423   : > { %12283 = vst [vmem:[#allocation124_spill] sm:$0xff] %v7604_v9  ;;  %12284 = vst [vmem:[#allocation121_spill] sm:$0xff] %v7606_v32  ;;  %v12293_v9 = vld [vmem:[#allocation135_spill] sm:$0xff] }
 0x424   : > { %1524 = vrot.lane.b32.xlu1 %v12286_v43, %s5126_s11  ;;  %1522 = vrot.lane.b32.xlu0 %v1107_v23, %s5126_s11  ;;  %v12292_v23 = vld [vmem:[#allocation138_spill] sm:$0xff] }
 0x426   : > { %v7614_v29 = vpop.permute.xlu1 %1412  ;;  %v7616_v33 = vpop.permute.xlu0 %1410 }
 0x427   : > { %12287 = vst [vmem:[#allocation126_spill] sm:$0xff] %v7614_v29  ;;  %12288 = vst [vmem:[#allocation123_spill] sm:$0xff] %v7616_v33  ;;  %v1111_v29 = vsel %vm1075_vm12, %v12293_v9, %v12292_v23  ;;  %v1110_v33 = vsel %vm1075_vm12, %v12289_v35, %v12293_v9  ;;  %v12297_v35 = vld [vmem:[#allocation142_spill] sm:$0xff] }
 0x428   : > { %1528 = vrot.lane.b32.xlu1 %v1109_v34, %s5126_s11  ;;  %1526 = vrot.lane.b32.xlu0 %v1108_v46, %s5126_s11  ;;  %v12294_v34 = vld [vmem:[#allocation140_spill] sm:$0xff]  ;;  %v12295_v46 = vld [vmem:[#allocation137_spill] sm:$0xff] }
 0x429   : > { %v1113_v52 = vsel %vm1075_vm12, %v12295_v46, %v12294_v34 }
 0x42a   : > { %v1417_v24 = vpop.permute.xlu1 %1416  ;;  %v7626_v3 = vpop.permute.xlu0 %1414 }
 0x42b   : > { %12291 = vst [vmem:[#allocation128_spill] sm:$0xff] %v7626_v3  ;;  %v1112_v3 = vsel %vm1075_vm12, %v12292_v23, %v12295_v46 }
 0x42c   : > { %1532 = vrot.lane.b32.xlu1 %v1111_v29, %s5126_s11  ;;  %1530 = vrot.lane.b32.xlu0 %v1110_v33, %s5126_s11  ;;  %v12298_v33 = vld [vmem:[#allocation139_spill] sm:$0xff] }
 0x42d   : > { %v1115_v57 = vsel %vm1075_vm12, %v12298_v33, %v12297_v35  ;;  %v1114_v19 = vsel %vm1075_vm12, %v12294_v34, %v12298_v33 }
 0x42e   : > { %v7636_v43 = vpop.permute.xlu1 %1420  ;;  %v1419_v51 = vpop.permute.xlu0 %1418 }
 0x430   : > { %1536 = vrot.lane.b32.xlu1 %v1113_v52, %s5126_s11  ;;  %1534 = vrot.lane.b32.xlu0 %v1112_v3, %s5126_s11  ;;  %v12301_v3 = vld [vmem:[#allocation141_spill] sm:$0xff] }
 0x431   : > { %v1116_v46 = vsel %vm1075_vm12, %v12301_v3, %v6652_v26 }
 0x432   : > { %v7646_v9 = vpop.permute.xlu1 %1424  ;;  %v1423_v29 = vpop.permute.xlu0 %1422 }
 0x433   : > { %12296 = vst [vmem:[#allocation125_spill] sm:$0xff] %v7646_v9 }
 0x434   : > { %1540 = vrot.lane.b32.xlu1 %v1115_v57, %s5126_s11  ;;  %1538 = vrot.lane.b32.xlu0 %v1114_v19, %s5126_s11  ;;  %v12304_v57 = vld [vmem:[#allocation143_spill] sm:$0xff] }
 0x435   : > { %v1118_v19 = vsel %vm1075_vm12, %v12304_v57, %v6660_v1  ;;  %v1117_v33 = vsel %vm1075_vm12, %v6652_v26, %v12304_v57  ;;  %v1122_v57 = vsel %vm1075_vm12, %v6666_v42, %v6678_v49 }
 0x436   : > { %v7656_v23 = vpop.permute.xlu1 %1428  ;;  %v7658_v52 = vpop.permute.xlu0 %1426 }
 0x437   : > { %12299 = vst [vmem:[#allocation130_spill] sm:$0xff] %v7656_v23  ;;  %12300 = vst [vmem:[#allocation127_spill] sm:$0xff] %v7658_v52 }
 0x438   : > { %1544 = vrot.lane.b32.xlu1 %v1116_v46, %s5126_s11  ;;  %1542 = vrot.lane.b32.xlu0 %v12301_v3, %s5126_s11  ;;  %v12305_v3 = vld [vmem:[#allocation144_spill] sm:$0xff] }
 0x43a   : > { %v7666_v35 = vpop.permute.xlu1 %1432  ;;  %v7668_v34 = vpop.permute.xlu0 %1430 }
 0x43b   : > { %12302 = vst [vmem:[#allocation132_spill] sm:$0xff] %v7666_v35  ;;  %12303 = vst [vmem:[#allocation129_spill] sm:$0xff] %v7668_v34  ;;  %v1120_v35 = vsel %vm1075_vm12, %v12305_v3, %v6668_v50  ;;  %v1119_v34 = vsel %vm1075_vm12, %v6660_v1, %v12305_v3 }
 0x43c   : > { %1548 = vrot.lane.b32.xlu1 %v1118_v19, %s5126_s11  ;;  %1546 = vrot.lane.b32.xlu0 %v1117_v33, %s5126_s11  ;;  %v1121_v19 = vsel %vm1075_vm12, %v6668_v50, %v6666_v42  ;;  %v1763_v50 = vsel %vm1650_vm13, %v1417_v24, %v1419_v51  ;;  %v1755_v24 = vsel %vm1650_vm13, %v7582_v18, %v7580_v14 }
 0x43d   : > { %v1747_v18 = vsel %vm1650_vm13, %v7522_v28, %v7536_v15  ;;  %v1740_v28 = vsel %vm1650_vm13, %v7476_v56, %v7490_v4 }
 0x43e   : > { %v1437_v46 = vpop.permute.xlu1 %1436  ;;  %v1435_v52 = vpop.permute.xlu0 %1434 }
 0x43f   : > { %v1771_v1 = vsel %vm1650_vm13, %v1435_v52, %v1437_v46  ;;  %v1123_v52 = vsel %vm1075_vm12, %v6678_v49, %v6676_v27  ;;  %v1748_v49 = vsel %vm1650_vm13, %v7536_v15, %v7534_v40  ;;  %v1758_v15 = vsel %vm1650_vm13, %v7592_v16, %v7606_v32 }
 0x440   : > { %1552 = vrot.lane.b32.xlu1 %v1120_v35, %s5126_s11  ;;  %1550 = vrot.lane.b32.xlu0 %v1119_v34, %s5126_s11  ;;  %v1764_v34 = vsel %vm1650_vm13, %v1419_v51, %v7636_v43 }
 0x442   : > { %v1441_v23 = vpop.permute.xlu1 %1440  ;;  %v1439_v26 = vpop.permute.xlu0 %1438 }
 0x443   : > { %v1772_v33 = vsel %vm1650_vm13, %v1437_v46, %v1439_v26  ;;  %v1756_v46 = vsel %vm1650_vm13, %v7580_v14, %v7594_v8  ;;  %v1773_v51 = vsel %vm1650_vm13, %v1439_v26, %v1441_v23  ;;  %v1765_v14 = vsel %vm1650_vm13, %v7636_v43, %v1423_v29 }
 0x444   : > { %1556 = vrot.lane.b32.xlu1 %v1122_v57, %s5126_s11  ;;  %1554 = vrot.lane.b32.xlu0 %v1121_v19, %s5126_s11  ;;  %v1766_v19 = vsel %vm1650_vm13, %v1423_v29, %v7646_v9  ;;  %v1124_v26 = vsel %vm1075_vm12, %v6686_v39, %v6684_v5  ;;  %v1739_v43 = vsel %vm1650_vm13, %v7478_v11, %v7476_v56 }
 0x445   : > { %2087 = vmatprep.subr.mxu0 %v1772_v33  ;;  %v1750_v56 = vsel %vm1650_vm13, %v7548_v53, %v7546_v25  ;;  %v1731_v11 = vsel %vm1650_vm13, %v7418_v20, %v7432_v37  ;;  %v1724_v20 = vsel %vm1650_vm13, %v7372_v6, %v7386_v48 }
 0x446   : > { %2088 = vmatpush1.msra.mxu0 %v1771_v1  ;;  %v7696_v35 = vpop.permute.xlu1 %1444  ;;  %v7700_v3 = vpop.permute.xlu0 %1442  ;;  %v1126_v1 = vsel %vm1075_vm12, %v6694_v12, %v6692_v10 }
 0x447   : > { %2089 = vmatprep.subr.mxu0 %v1764_v34  ;;  %v1774_v42 = vsel %vm1650_vm13, %v1441_v23, %v7700_v3  ;;  %v1125_v23 = vsel %vm1075_vm12, %v6684_v5, %v6694_v12  ;;  %v1757_v5 = vsel %vm1650_vm13, %v7594_v8, %v7592_v16  ;;  %v1749_v16 = vsel %vm1650_vm13, %v7534_v40, %v7548_v53 }
 0x448   : > { %2090 = vmatpush1.msra.mxu0 %v1763_v50  ;;  %1560 = vrot.lane.b32.xlu1 %v6686_v39, %s5126_s11  ;;  %v1732_v39 = vsel %vm1650_vm13, %v7432_v37, %v7430_v45  ;;  %v1127_v8 = vsel %vm1075_vm12, %v6692_v10, %v6702_v7  ;;  %v1742_v40 = vsel %vm1650_vm13, %v7488_v2, %v7502_v61 }
 0x449   : > { %1558 = vrot.lane.b32.xlu0 %v1123_v52, %s5126_s11  ;;  %2091 = vmatprep.subr.mxu0 %v1756_v46  ;;  %v1723_v53 = vsel %vm1650_vm13, %v7374_v59, %v7372_v6  ;;  %v1741_v10 = vsel %vm1650_vm13, %v7490_v4, %v7488_v2  ;;  %v1716_v12 = vsel %vm1650_vm13, %v7328_v17, %v7326_v63 }
 0x44a   : > { %2158 = vmatprep.subr.mxu1 %v1774_v42  ;;  %2092 = vmatpush1.msra.mxu0 %v1755_v24  ;;  %v7718_v57 = vpop.permute.xlu1 %1448  ;;  %v7723_v27 = vpop.permute.xlu0 %1446  ;;  %v1734_v50 = vsel %vm1650_vm13, %v7444_v36, %v7442_v38  ;;  %v1715_v59 = vsel %vm1650_vm13, %v7314_v55, %v7328_v17  ;;  %v1733_v6 = vsel %vm1650_vm13, %v7430_v45, %v7444_v36  ;;  %v12311_v24 = vld [vmem:[#allocation147_spill] sm:$0xff] }
 0x44b   : > { %12306 = vst [vmem:[#allocation131_spill] sm:$0xff] %v7718_v57  ;;  %2159 = vmatpush1.msra.mxu1 %v1773_v51  ;;  %2093 = vmatprep.subr.mxu0 %v1748_v49  ;;  %v1129_v2 = vsel %vm1075_vm12, %v6700_v31, %v6712_v30  ;;  %v1128_v55 = vsel %vm1075_vm12, %v6702_v7, %v6700_v31 }
 0x44c   : > { %2160 = vmatprep.subr.mxu1 %v1766_v19  ;;  %2094 = vmatpush1.msra.mxu0 %v1747_v18  ;;  %v1708_v17 = vsel %vm1650_vm13, %v7270_v54, %v7284_v21  ;;  %v1726_v45 = vsel %vm1650_vm13, %v7384_v58, %v7398_v62  ;;  %v1707_v36 = vsel %vm1650_vm13, %v7272_v22, %v7270_v54  ;;  %v12314_v19 = vld [vmem:[#allocation93_spill] sm:$0xff] }
 0x44d   : > { %2161 = vmatpush1.msra.mxu1 %v1765_v14  ;;  %1564 = vrot.lane.b32.xlu1 %v1125_v23, %s5126_s11  ;;  %v1725_v31 = vsel %vm1650_vm13, %v7386_v48, %v7384_v58  ;;  %v1700_v7 = vsel %vm1650_vm13, %v7228_v0, %v7226_v47  ;;  %v1718_v52 = vsel %vm1650_vm13, %v7340_v44, %v7338_v41  ;;  %v12312_v58 = vld [vmem:[#allocation145_spill] sm:$0xff]  ;;  %v12317_v23 = vld [vmem:[#allocation160_spill] sm:$0xff] }
 0x44e   : > { %1562 = vrot.lane.b32.xlu0 %v1124_v26, %s5126_s11  ;;  %2095 = vmatprep.subr.mxu0 %v1740_v28  ;;  %v7749_v29 = vpop.permute.xlu1 %1452  ;;  %v7751_v33 = vpop.permute.xlu0 %1450  ;;  %v1699_v22 = vsel %vm1650_vm13, %v7214_v13, %v7228_v0  ;;  %v1131_v48 = vsel %vm1075_vm12, %v12312_v58, %v12311_v24  ;;  %v1717_v51 = vsel %vm1650_vm13, %v7326_v63, %v7340_v44  ;;  %v12313_v0 = vld [vmem:[#allocation78_spill] sm:$0xff]  ;;  %v12315_v18 = vld [vmem:[#allocation89_spill] sm:$0xff]  ;;  %v12316_v63 = vld [vmem:[#allocation80_spill] sm:$0xff] }
 0x44f   : > { %12307 = vst [vmem:[#allocation134_spill] sm:$0xff] %v7751_v33  ;;  %2162 = vmatprep.subr.mxu1 %v1758_v15  ;;  %2096 = vmatpush1.msra.mxu0 %v1739_v43  ;;  %v1130_v13 = vsel %vm1075_vm12, %v6712_v30, %v12312_v58  ;;  %v1692_v49 = vsel %vm1650_vm13, %v12313_v0, %v7182_v60  ;;  %v12318_v26 = vld [vmem:[#allocation161_spill] sm:$0xff]  ;;  %v12335_v24 = vld [vmem:[#allocation63_spill] sm:$0xff] }
 0x450   : > { %2163 = vmatpush1.msra.mxu1 %v1757_v5  ;;  %2097 = vmatprep.subr.mxu0 %v1732_v39  ;;  %v1710_v14 = vsel %vm1650_vm13, %v12315_v18, %v12314_v19  ;;  %v1691_v44 = vsel %vm1650_vm13, %v12316_v63, %v12313_v0  ;;  %v1709_v30 = vsel %vm1650_vm13, %v7284_v21, %v12315_v18  ;;  %v12321_v5 = vld [vmem:[#allocation83_spill] sm:$0xff]  ;;  %v12322_v39 = vld [vmem:[#allocation88_spill] sm:$0xff]  ;;  %v12339_v18 = vld [vmem:[#allocation58_spill] sm:$0xff] }
 0x451   : > { %2164 = vmatprep.subr.mxu1 %v1750_v56  ;;  %2098 = vmatpush1.msra.mxu0 %v1731_v11  ;;  %v1684_v28 = vsel %vm1650_vm13, %v12318_v26, %v12317_v23  ;;  %v1702_v56 = vsel %vm1650_vm13, %v12322_v39, %v12321_v5  ;;  %v12323_v11 = vld [vmem:[#allocation158_spill] sm:$0xff]  ;;  %v1701_v21 = vsel %vm1650_vm13, %v7226_v47, %v12322_v39  ;;  %v12330_v47 = vld [vmem:[#allocation152_spill] sm:$0xff] }
 0x452   : > { %2165 = vmatpush1.msra.mxu1 %v1749_v16  ;;  %1568 = vrot.lane.b32.xlu1 %v1127_v8, %s5126_s11  ;;  %v7778_v37 = vpop.permute.xlu1 %1456  ;;  %v7780_v34 = vpop.permute.xlu0 %1454  ;;  %v1683_v16 = vsel %vm1650_vm13, %v12323_v11, %v12318_v26  ;;  %v12324_v8 = vld [vmem:[#allocation148_spill] sm:$0xff]  ;;  %v12343_v11 = vld [vmem:[#allocation47_spill] sm:$0xff] }
 0x453   : > { %1566 = vrot.lane.b32.xlu0 %v1126_v1, %s5126_s11  ;;  %2099 = vmatprep.subr.mxu0 %v1724_v20  ;;  %v12325_v1 = vld [vmem:[#allocation146_spill] sm:$0xff] }
 0x454   : > { %2166 = vmatprep.subr.mxu1 %v1742_v40  ;;  %2100 = vmatpush1.msra.mxu0 %v1723_v53  ;;  %v1132_v20 = vsel %vm1075_vm12, %v12325_v1, %v12324_v8  ;;  %v12326_v40 = vld [vmem:[#allocation154_spill] sm:$0xff]  ;;  %v12327_v53 = vld [vmem:[#allocation151_spill] sm:$0xff] }
 0x455   : > { %2167 = vmatpush1.msra.mxu1 %v1741_v10  ;;  %2101 = vmatprep.subr.mxu0 %v1716_v12  ;;  %v1676_v10 = vsel %vm1650_vm13, %v12327_v53, %v12326_v40  ;;  %v12328_v12 = vld [vmem:[#allocation79_spill] sm:$0xff] }
 0x456   : > { %2168 = vmatprep.subr.mxu1 %v1734_v50  ;;  %2102 = vmatpush1.msra.mxu0 %v1715_v59  ;;  %v7807_v4 = vpop.permute.xlu1 %1460  ;;  %v7809_v42 = vpop.permute.xlu0 %1458  ;;  %v12329_v50 = vld [vmem:[#allocation77_spill] sm:$0xff] }
 0x457   : > { %12308 = vst [vmem:[#allocation136_spill] sm:$0xff] %v7809_v42  ;;  %2169 = vmatpush1.msra.mxu1 %v1733_v6  ;;  %1572 = vrot.lane.b32.xlu1 %v1129_v2, %s5126_s11  ;;  %v1694_v59 = vsel %vm1650_vm13, %v12329_v50, %v12328_v12  ;;  %v1675_v6 = vsel %vm1650_vm13, %v12330_v47, %v12327_v53  ;;  %v12347_v53 = vld [vmem:[#allocation45_spill] sm:$0xff] }
 0x458   : > { %1570 = vrot.lane.b32.xlu0 %v1128_v55, %s5126_s11  ;;  %2103 = vmatprep.subr.mxu0 %v1708_v17  ;;  %v1693_v17 = vsel %vm1650_vm13, %v7182_v60, %v12329_v50  ;;  %v12348_v50 = vld [vmem:[#allocation149_spill] sm:$0xff] }
 0x459   : > { %2170 = vmatprep.subr.mxu1 %v1726_v45  ;;  %2104 = vmatpush1.msra.mxu0 %v1707_v36  ;;  %v12331_v45 = vld [vmem:[#allocation65_spill] sm:$0xff]  ;;  %v12332_v36 = vld [vmem:[#allocation70_spill] sm:$0xff] }
 0x45a   : > { %2171 = vmatpush1.msra.mxu1 %v1725_v31  ;;  %2105 = vmatprep.subr.mxu0 %v1700_v7  ;;  %v7837_v54 = vpop.permute.xlu1 %1464  ;;  %v7839_v46 = vpop.permute.xlu0 %1462  ;;  %v1668_v31 = vsel %vm1650_vm13, %v12332_v36, %v12331_v45  ;;  %v12333_v7 = vld [vmem:[#allocation162_spill] sm:$0xff]  ;;  %v1667_v58 = vsel %vm1650_vm13, %v12335_v24, %v12332_v36  ;;  %v12353_v24 = vld [vmem:[#allocation49_spill] sm:$0xff] }
 0x45b   : > { %12309 = vst [vmem:[#allocation133_spill] sm:$0xff] %v7837_v54  ;;  %12310 = vst [vmem:[#allocation138_spill] sm:$0xff] %v7839_v46  ;;  %2172 = vmatprep.subr.mxu1 %v1718_v52  ;;  %2106 = vmatpush1.msra.mxu0 %v1699_v22  ;;  %v12334_v52 = vld [vmem:[#allocation163_spill] sm:$0xff] }
 0x45c   : > { %2173 = vmatpush1.msra.mxu1 %v1717_v51  ;;  %1576 = vrot.lane.b32.xlu1 %v1131_v48, %s5126_s11  ;;  %v1686_v22 = vsel %vm1650_vm13, %v12334_v52, %v12333_v7  ;;  %v1685_v60 = vsel %vm1650_vm13, %v12317_v23, %v12334_v52  ;;  %v12336_v48 = vld [vmem:[#allocation16_spill] sm:$0xff]  ;;  %v12337_v51 = vld [vmem:[#allocation15_spill] sm:$0xff]  ;;  %v12341_v23 = vld [vmem:[#allocation153_spill] sm:$0xff] }
 0x45d   : > { %1574 = vrot.lane.b32.xlu0 %v1130_v13, %s5126_s11  ;;  %2107 = vmatprep.subr.mxu0 %v1692_v49  ;;  %v1134_v13 = vsel %vm1075_vm12, %v12337_v51, %v12336_v48  ;;  %v1133_v0 = vsel %vm1075_vm12, %v12324_v8, %v12337_v51  ;;  %v12338_v49 = vld [vmem:[#allocation62_spill] sm:$0xff]  ;;  %v12345_v8 = vld [vmem:[#allocation67_spill] sm:$0xff]  ;;  %v12352_v52 = vld [vmem:[#allocation57_spill] sm:$0xff] }
 0x45e   : > { %2174 = vmatprep.subr.mxu1 %v1710_v14  ;;  %2108 = vmatpush1.msra.mxu0 %v1691_v44  ;;  %v7867_v15 = vpop.permute.xlu1 %1468  ;;  %v7869_v43 = vpop.permute.xlu0 %1466  ;;  %v1660_v14 = vsel %vm1650_vm13, %v12339_v18, %v12338_v49  ;;  %v12355_v51 = vld [vmem:[#allocation20_spill] sm:$0xff]  ;;  %v8136_v54 = vld [vmem:[#allocation5 + $0x8] sm:$0xff] }
 0x45f   : > { %12319 = vst [vmem:[#allocation135_spill] sm:$0xff] %v7867_v15  ;;  %12320 = vst [vmem:[#allocation140_spill] sm:$0xff] %v7869_v43  ;;  %2175 = vmatpush1.msra.mxu1 %v1709_v30  ;;  %2109 = vmatprep.subr.mxu0 %v1684_v28  ;;  %v12340_v30 = vld [vmem:[#allocation156_spill] sm:$0xff] }
 0x460   : > { %2176 = vmatprep.subr.mxu1 %v1702_v56  ;;  %2110 = vmatpush1.msra.mxu0 %v1683_v16  ;;  %v1678_v26 = vsel %vm1650_vm13, %v12341_v23, %v12340_v30  ;;  %v12342_v28 = vld [vmem:[#allocation60_spill] sm:$0xff]  ;;  %v1677_v56 = vsel %vm1650_vm13, %v12326_v40, %v12341_v23  ;;  %12396 = vst [vmem:[#allocation158_spill] sm:$0xff] %v8136_v54 }
 0x461   : > { %2177 = vmatpush1.msra.mxu1 %v1701_v21  ;;  %1580 = vrot.lane.b32.xlu1 %v1132_v20, %s5126_s11  ;;  %v1659_v39 = vsel %vm1650_vm13, %v12342_v28, %v12339_v18  ;;  %v12344_v16 = vld [vmem:[#allocation52_spill] sm:$0xff] }
 0x462   : > { %1578 = vrot.lane.b32.xlu0 %v12325_v1, %s5126_s11  ;;  %2111 = vmatprep.subr.mxu0 %v1676_v10  ;;  %v7895_v2 = vpop.permute.xlu1 %1472  ;;  %v7897_v55 = vpop.permute.xlu0 %1470  ;;  %v1652_v21 = vsel %vm1650_vm13, %v12344_v16, %v12343_v11  ;;  %v12346_v1 = vld [vmem:[#allocation72_spill] sm:$0xff]  ;;  %v1651_v10 = vsel %vm1650_vm13, %v12347_v53, %v12344_v16  ;;  %v12363_v16 = vld [vmem:[#allocation22_spill] sm:$0xff] }
 0x463   : > { %2178 = vmatprep.subr.mxu1 %v1694_v59  ;;  %2112 = vmatpush1.msra.mxu0 %v1675_v6  ;;  %v1670_v20 = vsel %vm1650_vm13, %v12346_v1, %v12345_v8  ;;  %v1669_v40 = vsel %vm1650_vm13, %v12331_v45, %v12346_v1  ;;  %v12349_v59 = vld [vmem:[#allocation18_spill] sm:$0xff]  ;;  %v1661_v45 = vsel %vm1650_vm13, %v12338_v49, %v12352_v52  ;;  %v12360_v28 = vld [vmem:[#allocation24_spill] sm:$0xff] }
 0x464   : > { %2179 = vmatpush1.msra.mxu1 %v1693_v17  ;;  %2113 = vmatprep.subr.mxu0 %v1668_v31  ;;  %v1136_v47 = vsel %vm1075_vm12, %v12349_v59, %v12348_v50  ;;  %v1135_v36 = vsel %vm1075_vm12, %v12336_v48, %v12349_v59  ;;  %v12351_v31 = vld [vmem:[#allocation64_spill] sm:$0xff]  ;;  %v1140_v53 = vsel %vm1075_vm12, %v12360_v28, %v12363_v16 }
 0x465   : > { %2180 = vmatprep.subr.mxu1 %v1686_v22  ;;  %2114 = vmatpush1.msra.mxu0 %v1667_v58  ;;  %v1662_v22 = vsel %vm1650_vm13, %v12352_v52, %v12351_v31  ;;  %v12354_v58 = vld [vmem:[#allocation54_spill] sm:$0xff]  ;;  %v12389_v15 = vld [vmem:[#allocation40_spill] sm:$0xff] }
 0x466   : > { %2181 = vmatpush1.msra.mxu1 %v1685_v60  ;;  %1584 = vrot.lane.b32.xlu1 %v1134_v13, %s5126_s11  ;;  %v7924_v63 = vpop.permute.xlu1 %1476  ;;  %v7926_v44 = vpop.permute.xlu0 %1474  ;;  %v1654_v60 = vsel %vm1650_vm13, %v12354_v58, %v12353_v24  ;;  %v1653_v48 = vsel %vm1650_vm13, %v12343_v11, %v12354_v58  ;;  %v12356_v13 = vld [vmem:[#allocation17_spill] sm:$0xff]  ;;  %v12362_v11 = vld [vmem:[#allocation26_spill] sm:$0xff] }
 0x467   : > { %1582 = vrot.lane.b32.xlu0 %v1133_v0, %s5126_s11  ;;  %2115 = vmatprep.subr.mxu0 %v1660_v14  ;;  %v1138_v0 = vsel %vm1075_vm12, %v12356_v13, %v12355_v51  ;;  %v1137_v49 = vsel %vm1075_vm12, %v12348_v50, %v12356_v13  ;;  %v12366_v52 = vld [vmem:[#allocation30_spill] sm:$0xff]  ;;  %v12371_v13 = vld [vmem:[#allocation25_spill] sm:$0xff] }
 0x468   : > { %2182 = vmatprep.subr.mxu1 %v1678_v26  ;;  %2116 = vmatpush1.msra.mxu0 %v1659_v39  ;;  %v12361_v39 = vld [vmem:[#allocation19_spill] sm:$0xff] }
 0x469   : > { %2183 = vmatpush1.msra.mxu1 %v1677_v56  ;;  %2117 = vmatprep.subr.mxu0 %v1652_v21  ;;  %v1139_v56 = vsel %vm1075_vm12, %v12355_v51, %v12361_v39  ;;  %v1141_v21 = vsel %vm1075_vm12, %v12363_v16, %v12362_v11  ;;  %v12370_v51 = vld [vmem:[#allocation32_spill] sm:$0xff]  ;;  %v1146_v39 = vsel %vm1075_vm12, %v12366_v52, %v12371_v13 }
 0x46a   : > { %2184 = vmatprep.subr.mxu1 %v1670_v20  ;;  %2118 = vmatpush1.msra.mxu0 %v1651_v10  ;;  %v7953_v6 = vpop.permute.xlu1 %1480  ;;  %v7955_v17 = vpop.permute.xlu0 %1478  ;;  %v12364_v10 = vld [vmem:[#allocation28_spill] sm:$0xff] }
 0x46b   : > { %12350 = vst [vmem:[#allocation137_spill] sm:$0xff] %v7953_v6  ;;  %2185 = vmatpush1.msra.mxu1 %v1669_v40  ;;  %1588 = vrot.lane.b32.xlu1 %v1136_v47, %s5126_s11  ;;  %v12365_v40 = vld [vmem:[#allocation21_spill] sm:$0xff] }
 0x46c   : > { %1586 = vrot.lane.b32.xlu0 %v1135_v36, %s5126_s11  ;;  %2186 = vmatprep.subr.mxu1 %v1662_v22  ;;  %v1143_v50 = vsel %vm1075_vm12, %v12365_v40, %v12364_v10  ;;  %v1142_v36 = vsel %vm1075_vm12, %v12362_v11, %v12365_v40  ;;  %v12367_v22 = vld [vmem:[#allocation23_spill] sm:$0xff]  ;;  %v12377_v40 = vld [vmem:[#allocation29_spill] sm:$0xff] }
 0x46d   : > { %2187 = vmatpush1.msra.mxu1 %v1661_v45  ;;  %v1145_v45 = vsel %vm1075_vm12, %v12367_v22, %v12366_v52  ;;  %v12375_v11 = vld [vmem:[#allocation27_spill] sm:$0xff]  ;;  %4754 = vmatprep.mubr.msk.f32.mxu0 %vm2083_vm14, %v8136_v54 }
 0x46e   : > { %2188 = vmatprep.subr.mxu1 %v1654_v60  ;;  %v7977_v18 = vpop.permute.xlu1 %1484  ;;  %v7979_v14 = vpop.permute.xlu0 %1482  ;;  %4755 = vmatprep.mubr.msk.f32.mxu1 %vm2083_vm14, %v8136_v54 }
 0x46f   : > { %12357 = vst [vmem:[#allocation142_spill] sm:$0xff] %v7977_v18  ;;  %12358 = vst [vmem:[#allocation139_spill] sm:$0xff] %v7979_v14  ;;  %2189 = vmatpush1.msra.mxu1 %v1653_v48  ;;  %1592 = vrot.lane.b32.xlu1 %v1138_v0, %s5126_s11  ;;  %v1144_v48 = vsel %vm1075_vm12, %v12364_v10, %v12367_v22  ;;  %v1147_v0 = vsel %vm1075_vm12, %v12371_v13, %v12370_v51  ;;  %v12376_v10 = vld [vmem:[#allocation36_spill] sm:$0xff] }
 0x470   : > { %1590 = vrot.lane.b32.xlu0 %v1137_v49, %s5126_s11 }
 0x472   : > { %v7986_v23 = vpop.permute.xlu1 %1488  ;;  %v7988_v26 = vpop.permute.xlu0 %1486 }
 0x473   : > { %12359 = vst [vmem:[#allocation141_spill] sm:$0xff] %v7988_v26  ;;  %1596 = vrot.lane.b32.xlu1 %v12360_v28, %s5126_s11  ;;  %v12390_v26 = vld [vmem:[#allocation46_spill] sm:$0xff] }
 0x474   : > { %1594 = vrot.lane.b32.xlu0 %v1139_v56, %s5126_s11  ;;  %v12374_v56 = vld [vmem:[#allocation34_spill] sm:$0xff] }
 0x475   : > { %v1148_v16 = vsel %vm1075_vm12, %v12375_v11, %v12374_v56  ;;  %v1149_v22 = vsel %vm1075_vm12, %v12374_v56, %v12377_v40  ;;  %v12382_v56 = vld [vmem:[#allocation33_spill] sm:$0xff] }
 0x476   : > { %v7999_v1 = vpop.permute.xlu1 %1492  ;;  %v8001_v20 = vpop.permute.xlu0 %1490 }
 0x477   : > { %1600 = vrot.lane.b32.xlu1 %v1141_v21, %s5126_s11 }
 0x478   : > { %1598 = vrot.lane.b32.xlu0 %v1140_v53, %s5126_s11 }
 0x47a   : > { %v8011_v59 = vpop.permute.xlu1 %1496  ;;  %v8013_v47 = vpop.permute.xlu0 %1494 }
 0x47b   : > { %1604 = vrot.lane.b32.xlu1 %v1143_v50, %s5126_s11  ;;  %v1150_v50 = vsel %vm1075_vm12, %v12377_v40, %v12376_v10 }
 0x47c   : > { %1602 = vrot.lane.b32.xlu0 %v1142_v36, %s5126_s11 }
 0x47e   : > { %v8023_v58 = vpop.permute.xlu1 %1500  ;;  %v8025_v60 = vpop.permute.xlu0 %1498 }
 0x47f   : > { %12368 = vst [vmem:[#allocation143_spill] sm:$0xff] %v8023_v58  ;;  %12369 = vst [vmem:[#allocation144_spill] sm:$0xff] %v8025_v60  ;;  %1608 = vrot.lane.b32.xlu1 %v1145_v45, %s5126_s11  ;;  %v12378_v45 = vld [vmem:[#allocation35_spill] sm:$0xff] }
 0x480   : > { %1606 = vrot.lane.b32.xlu0 %v1144_v48, %s5126_s11  ;;  %v12379_v48 = vld [vmem:[#allocation31_spill] sm:$0xff] }
 0x481   : > { %v1152_v51 = vsel %vm1075_vm12, %v12379_v48, %v12378_v45 }
 0x482   : > { %v8035_v49 = vpop.permute.xlu1 %1504  ;;  %v8037_v28 = vpop.permute.xlu0 %1502 }
 0x483   : > { %12372 = vst [vmem:[#allocation147_spill] sm:$0xff] %v8035_v49  ;;  %12373 = vst [vmem:[#allocation145_spill] sm:$0xff] %v8037_v28  ;;  %1612 = vrot.lane.b32.xlu1 %v1147_v0, %s5126_s11  ;;  %v12392_v49 = vld [vmem:[#allocation48_spill] sm:$0xff] }
 0x484   : > { %1610 = vrot.lane.b32.xlu0 %v1146_v39, %s5126_s11  ;;  %v1151_v39 = vsel %vm1075_vm12, %v12376_v10, %v12379_v48  ;;  %v12386_v48 = vld [vmem:[#allocation42_spill] sm:$0xff] }
 0x486   : > { %v8047_v21 = vpop.permute.xlu1 %1508  ;;  %v8049_v53 = vpop.permute.xlu0 %1506 }
 0x487   : > { %1616 = vrot.lane.b32.xlu1 %v1148_v16, %s5126_s11 }
 0x488   : > { %1614 = vrot.lane.b32.xlu0 %v12375_v11, %s5126_s11  ;;  %v12381_v11 = vld [vmem:[#allocation38_spill] sm:$0xff] }
 0x489   : > { %v1154_v16 = vsel %vm1075_vm12, %v12382_v56, %v12381_v11 }
 0x48a   : > { %v8057_v36 = vpop.permute.xlu1 %1512  ;;  %v8059_v52 = vpop.permute.xlu0 %1510 }
 0x48b   : > { %1620 = vrot.lane.b32.xlu1 %v1150_v50, %s5126_s11 }
 0x48c   : > { %1618 = vrot.lane.b32.xlu0 %v1149_v22, %s5126_s11  ;;  %v1153_v22 = vsel %vm1075_vm12, %v12378_v45, %v12382_v56 }
 0x48e   : > { %v8069_v13 = vpop.permute.xlu1 %1516  ;;  %v8071_v0 = vpop.permute.xlu0 %1514 }
 0x48f   : > { %12380 = vst [vmem:[#allocation78_spill] sm:$0xff] %v8069_v13  ;;  %1624 = vrot.lane.b32.xlu1 %v1152_v51, %s5126_s11 }
 0x490   : > { %1622 = vrot.lane.b32.xlu0 %v1151_v39, %s5126_s11  ;;  %v12387_v39 = vld [vmem:[#allocation37_spill] sm:$0xff] }
 0x491   : > { %v1155_v43 = vsel %vm1075_vm12, %v12381_v11, %v12387_v39  ;;  %v12391_v11 = vld [vmem:[#allocation39_spill] sm:$0xff] }
 0x492   : > { %v8081_v40 = vpop.permute.xlu1 %1520  ;;  %v8083_v50 = vpop.permute.xlu0 %1518 }
 0x493   : > { %12383 = vst [vmem:[#allocation89_spill] sm:$0xff] %v8081_v40  ;;  %12384 = vst [vmem:[#allocation80_spill] sm:$0xff] %v8083_v50  ;;  %1628 = vrot.lane.b32.xlu1 %v1154_v16, %s5126_s11  ;;  %v12388_v16 = vld [vmem:[#allocation44_spill] sm:$0xff] }
 0x494   : > { %1626 = vrot.lane.b32.xlu0 %v1153_v22, %s5126_s11  ;;  %v1157_v18 = vsel %vm1075_vm12, %v12389_v15, %v12388_v16  ;;  %v1156_v22 = vsel %vm1075_vm12, %v12386_v48, %v12389_v15  ;;  %v12393_v15 = vld [vmem:[#allocation41_spill] sm:$0xff] }
 0x496   : > { %v8090_v51 = vpop.permute.xlu1 %1524  ;;  %v8092_v10 = vpop.permute.xlu0 %1522 }
 0x497   : > { %12385 = vst [vmem:[#allocation160_spill] sm:$0xff] %v8092_v10  ;;  %1632 = vrot.lane.b32.xlu1 %v12386_v48, %s5126_s11  ;;  %v1161_v48 = vsel %vm1075_vm12, %v12393_v15, %v12392_v49 }
 0x498   : > { %1630 = vrot.lane.b32.xlu0 %v1155_v43, %s5126_s11  ;;  %v1159_v43 = vsel %vm1075_vm12, %v12391_v11, %v12390_v26 }
 0x49a   : > { %v8103_v45 = vpop.permute.xlu1 %1528  ;;  %v8105_v56 = vpop.permute.xlu0 %1526 }
 0x49b   : > { %1636 = vrot.lane.b32.xlu1 %v1157_v18, %s5126_s11  ;;  %v1158_v18 = vsel %vm1075_vm12, %v12388_v16, %v12391_v11  ;;  %v12397_v16 = vld [vmem:[#allocation50_spill] sm:$0xff]  ;;  %v12398_v11 = vld [vmem:[#allocation43_spill] sm:$0xff] }
 0x49c   : > { %1634 = vrot.lane.b32.xlu0 %v1156_v22, %s5126_s11 }
 0x49e   : > { %v8115_v39 = vpop.permute.xlu1 %1532  ;;  %v8117_v28 = vpop.permute.xlu0 %1530 }
 0x49f   : > { %1640 = vrot.lane.b32.xlu1 %v1159_v43, %s5126_s11  ;;  %v1160_v43 = vsel %vm1075_vm12, %v12390_v26, %v12393_v15  ;;  %v1162_v26 = vsel %vm1075_vm12, %v12392_v49, %v12398_v11 }
 0x4a0   : > { %1638 = vrot.lane.b32.xlu0 %v1158_v18, %s5126_s11  ;;  %v1163_v18 = vsel %vm1075_vm12, %v12398_v11, %v12397_v16 }
 0x4a2   : > { %v8127_v22 = vpop.permute.xlu1 %1536  ;;  %v8129_v46 = vpop.permute.xlu0 %1534 }
 0x4a3   : > { %12394 = vst [vmem:[#allocation161_spill] sm:$0xff] %v8127_v22  ;;  %12395 = vst [vmem:[#allocation88_spill] sm:$0xff] %v8129_v46  ;;  %1644 = vrot.lane.b32.xlu1 %v1161_v48, %s5126_s11 }
 0x4a4   : > { %1642 = vrot.lane.b32.xlu0 %v1160_v43, %s5126_s11 }
 0x4a6   : > { %v8145_v48 = vpop.permute.xlu1 %1540  ;;  %v8147_v40 = vpop.permute.xlu0 %1538 }
 0x4a7   : > { %12399 = vst [vmem:[#allocation148_spill] sm:$0xff] %v8145_v48  ;;  %12400 = vst [vmem:[#allocation146_spill] sm:$0xff] %v8147_v40  ;;  %1648 = vrot.lane.b32.xlu1 %v1163_v18, %s5126_s11 }
 0x4a8   : > { %1646 = vrot.lane.b32.xlu0 %v1162_v26, %s5126_s11 }
 0x4aa   : > { %v8154_v15 = vpop.permute.xlu1 %1544  ;;  %v8156_v43 = vpop.permute.xlu0 %1542 }
 0x4ae   : > { %v8158_v54 = vpop.permute.xlu1 %1548  ;;  %v8160_v10 = vpop.permute.xlu0 %1546 }
 0x4b2   : > { %v8162_v16 = vpop.permute.xlu1 %1552  ;;  %v8164_v6 = vpop.permute.xlu0 %1550 }
 0x4b3   : > { %12401 = vst [vmem:[#allocation154_spill] sm:$0xff] %v8162_v16 }
 0x4b6   : > { %v8166_v14 = vpop.permute.xlu1 %1556  ;;  %v8168_v18 = vpop.permute.xlu0 %1554 }
 0x4b7   : > { %12402 = vst [vmem:[#allocation151_spill] sm:$0xff] %v8166_v14  ;;  %12403 = vst [vmem:[#allocation77_spill] sm:$0xff] %v8168_v18 }
 0x4ba   : > { %v8170_v40 = vpop.permute.xlu1 %1560 }
 0x4bb   : > { %v8172_v49 = vpop.permute.xlu0 %1558 }
 0x4bc   : > { %12404 = vst [vmem:[#allocation152_spill] sm:$0xff] %v8172_v49 }
 0x4bf   : > { %v8174_v11 = vpop.permute.xlu1 %1564 }
 0x4c0   : > { %v8176_v26 = vpop.permute.xlu0 %1562 }
 0x4c4   : > { %v8178_v48 = vpop.permute.xlu1 %1568 }
 0x4c5   : > { %v8180_v60 = vpop.permute.xlu0 %1566 }
 0x4c9   : > { %v8182_v58 = vpop.permute.xlu1 %1572 }
 0x4ca   : > { %12405 = vst [vmem:[#allocation65_spill] sm:$0xff] %v8182_v58  ;;  %v8184_v13 = vpop.permute.xlu0 %1570 }
 0x4cb   : > { %12406 = vst [vmem:[#allocation70_spill] sm:$0xff] %v8184_v13 }
 0x4ce   : > { %v8186_v50 = vpop.permute.xlu1 %1576 }
 0x4cf   : > { %12407 = vst [vmem:[#allocation163_spill] sm:$0xff] %v8186_v50  ;;  %v8188_v14 = vpop.permute.xlu0 %1574 }
 0x4d0   : > { %12408 = vst [vmem:[#allocation63_spill] sm:$0xff] %v8188_v14 }
 0x4d3   : > { %v1581_v46 = vpop.permute.xlu1 %1580 }
 0x4d4   : > { %v1579_v22 = vpop.permute.xlu0 %1578 }
 0x4d8   : > { %v8190_v16 = vpop.permute.xlu1 %1584 }
 0x4d9   : > { %v8192_v49 = vpop.permute.xlu0 %1582 }
 0x4dd   : > { %v8194_v18 = vpop.permute.xlu1 %1588 }
 0x4de   : > { %12409 = vst [vmem:[#allocation16_spill] sm:$0xff] %v8194_v18  ;;  %v8196_v24 = vpop.permute.xlu0 %1586 }
 0x4e1   : > { %v8198_v31 = vpop.permute.xlu1 %1592 }
 0x4e2   : > { %12410 = vst [vmem:[#allocation15_spill] sm:$0xff] %v8198_v31  ;;  %v8200_v8 = vpop.permute.xlu0 %1590 }
 0x4e3   : > { %12411 = vst [vmem:[#allocation62_spill] sm:$0xff] %v8200_v8 }
 0x4e5   : > { %v1597_v58 = vpop.permute.xlu1 %1596 }
 0x4e6   : > { %v8202_v13 = vpop.permute.xlu0 %1594 }
 0x4e7   : > { %12412 = vst [vmem:[#allocation58_spill] sm:$0xff] %v8202_v13 }
 0x4e9   : > { %v1601_v50 = vpop.permute.xlu1 %1600 }
 0x4ea   : > { %v1599_v30 = vpop.permute.xlu0 %1598 }
 0x4ed   : > { %v8204_v14 = vpop.permute.xlu1 %1604 }
 0x4ee   : > { %v1603_v7 = vpop.permute.xlu0 %1602 }
 0x4f1   : > { %v8206_v12 = vpop.permute.xlu1 %1608 }
 0x4f2   : > { %12413 = vst [vmem:[#allocation153_spill] sm:$0xff] %v8206_v12  ;;  %v8208_v5 = vpop.permute.xlu0 %1606 }
 0x4f3   : > { %12414 = vst [vmem:[#allocation60_spill] sm:$0xff] %v8208_v5 }
 0x4f5   : > { %v8210_v19 = vpop.permute.xlu1 %1612 }
 0x4f6   : > { %12415 = vst [vmem:[#allocation47_spill] sm:$0xff] %v8210_v19  ;;  %v8212_v18 = vpop.permute.xlu0 %1610 }
 0x4f7   : > { %12416 = vst [vmem:[#allocation52_spill] sm:$0xff] %v8212_v18 }
 0x4f9   : > { %v1617_v41 = vpop.permute.xlu1 %1616 }
 0x4fa   : > { %v1615_v31 = vpop.permute.xlu0 %1614 }
 0x4fd   : > { %v1621_v62 = vpop.permute.xlu1 %1620 }
 0x4fe   : > { %v1619_v8 = vpop.permute.xlu0 %1618 }
 0x501   : > { %v8214_v38 = vpop.permute.xlu1 %1624 }
 0x502   : > { %12417 = vst [vmem:[#allocation72_spill] sm:$0xff] %v8214_v38  ;;  %v8216_v13 = vpop.permute.xlu0 %1622  ;;  %v1852_v38 = vsel %vm1650_vm13, %v1617_v41, %v1619_v8 }
 0x505   : > { %v8218_v61 = vpop.permute.xlu1 %1628 }
 0x506   : > { %12418 = vst [vmem:[#allocation45_spill] sm:$0xff] %v8218_v61  ;;  %v8220_v25 = vpop.permute.xlu0 %1626  ;;  %v1851_v61 = vsel %vm1650_vm13, %v1615_v31, %v1617_v41  ;;  %v1854_v41 = vsel %vm1650_vm13, %v1621_v62, %v8216_v13  ;;  %v1829_v31 = vsel %vm1650_vm13, %v8174_v11, %v8180_v60 }
 0x507   : > { %12419 = vst [vmem:[#allocation149_spill] sm:$0xff] %v8220_v25  ;;  %v1844_v25 = vsel %vm1650_vm13, %v1599_v30, %v1601_v50 }
 0x509   : > { %v1633_v32 = vpop.permute.xlu1 %1632 }
 0x50a   : > { %v8222_v12 = vpop.permute.xlu0 %1630 }
 0x50b   : > { %12420 = vst [vmem:[#allocation18_spill] sm:$0xff] %v8222_v12 }
 0x50d   : > { %v1637_v5 = vpop.permute.xlu1 %1636 }
 0x50e   : > { %v1635_v57 = vpop.permute.xlu0 %1634 }
 0x50f   : > { %v1860_v19 = vsel %vm1650_vm13, %v1635_v57, %v1637_v5  ;;  %v1859_v18 = vsel %vm1650_vm13, %v1633_v32, %v1635_v57  ;;  %v1843_v32 = vsel %vm1650_vm13, %v1597_v58, %v1599_v30  ;;  %v1853_v57 = vsel %vm1650_vm13, %v1619_v8, %v1621_v62 }
 0x510   : > { %2129 = vmatprep.subr.mxu0 %v1860_v19  ;;  %v1845_v19 = vsel %vm1650_vm13, %v1601_v50, %v1603_v7  ;;  %v1820_v62 = vsel %vm1650_vm13, %v8154_v15, %v8160_v10  ;;  %v1830_v30 = vsel %vm1650_vm13, %v8180_v60, %v8178_v48  ;;  %v1811_v8 = vsel %vm1650_vm13, %v8090_v51, %v8105_v56 }
 0x511   : > { %2130 = vmatpush2.msra.mxu0 %v1859_v18  ;;  %v8226_v33 = vpop.permute.xlu1 %1640  ;;  %v1804_v58 = vsel %vm1650_vm13, %v8047_v21, %v8059_v52  ;;  %v1803_v50 = vsel %vm1650_vm13, %v8049_v53, %v8047_v21  ;;  %v1821_v60 = vsel %vm1650_vm13, %v8160_v10, %v8158_v54  ;;  %v1796_v51 = vsel %vm1650_vm13, %v8001_v20, %v7999_v1  ;;  %v12426_v18 = vld [vmem:[#allocation124_spill] sm:$0xff] }
 0x512   : > { %2131 = vmatprep.subr.mxu0 %v1852_v38  ;;  %v1639_v9 = vpop.permute.xlu0 %1638  ;;  %v1836_v38 = vsel %vm1650_vm13, %v1581_v46, %v8192_v49  ;;  %v1795_v21 = vsel %vm1650_vm13, %v7986_v23, %v8001_v20  ;;  %v1788_v53 = vsel %vm1650_vm13, %v7895_v2, %v7926_v44  ;;  %v1806_v10 = vsel %vm1650_vm13, %v8057_v36, %v8071_v0 }
 0x513   : > { %2132 = vmatpush2.msra.mxu0 %v1851_v61  ;;  %v1862_v12 = vsel %vm1650_vm13, %v1639_v9, %v8226_v33  ;;  %v1861_v42 = vsel %vm1650_vm13, %v1637_v5, %v1639_v9  ;;  %v1835_v61 = vsel %vm1650_vm13, %v1579_v22, %v1581_v46  ;;  %v1846_v9 = vsel %vm1650_vm13, %v1603_v7, %v8204_v14  ;;  %v8316_v22 = vld [vmem:[#allocation5] sm:$0xff] }
 0x514   : > { %2133 = vmatprep.subr.mxu0 %v1844_v25  ;;  %2200 = vmatprep.subr.mxu1 %v1862_v12  ;;  %v1828_v25 = vsel %vm1650_vm13, %v8176_v26, %v8174_v11  ;;  %v1838_v46 = vsel %vm1650_vm13, %v8190_v16, %v8196_v24  ;;  %v1819_v5 = vsel %vm1650_vm13, %v8156_v43, %v8154_v15  ;;  %v12422_v15 = vld [vmem:[#allocation130_spill] sm:$0xff]  ;;  %v12423_v43 = vld [vmem:[#allocation127_spill] sm:$0xff] }
 0x515   : > { %2134 = vmatpush2.msra.mxu0 %v1843_v32  ;;  %2201 = vmatpush2.msra.mxu1 %v1861_v42  ;;  %v1827_v42 = vsel %vm1650_vm13, %v8170_v40, %v8176_v26  ;;  %v1837_v12 = vsel %vm1650_vm13, %v8192_v49, %v8190_v16  ;;  %v1812_v7 = vsel %vm1650_vm13, %v8105_v56, %v8103_v45  ;;  %v12427_v11 = vld [vmem:[#allocation134_spill] sm:$0xff]  ;;  %v12428_v26 = vld [vmem:[#allocation131_spill] sm:$0xff] }
 0x516   : > { %2135 = vmatprep.subr.mxu0 %v1836_v38  ;;  %2202 = vmatprep.subr.mxu1 %v1854_v41  ;;  %v1822_v40 = vsel %vm1650_vm13, %v8158_v54, %v8164_v6  ;;  %v1814_v56 = vsel %vm1650_vm13, %v8117_v28, %v8115_v39  ;;  %v1813_v54 = vsel %vm1650_vm13, %v8103_v45, %v8117_v28 }
 0x517   : > { %2136 = vmatpush2.msra.mxu0 %v1835_v61  ;;  %2203 = vmatpush2.msra.mxu1 %v1853_v57  ;;  %v1787_v23 = vsel %vm1650_vm13, %v7897_v55, %v7895_v2  ;;  %v1805_v20 = vsel %vm1650_vm13, %v8059_v52, %v8057_v36  ;;  %v1780_v28 = vsel %vm1650_vm13, %v7780_v34, %v7778_v37  ;;  %v12430_v61 = vld [vmem:[#allocation117_spill] sm:$0xff]  ;;  %v12431_v57 = vld [vmem:[#allocation119_spill] sm:$0xff] }
 0x518   : > { %2137 = vmatprep.subr.mxu0 %v1828_v25  ;;  %2204 = vmatprep.subr.mxu1 %v1846_v9  ;;  %v1798_v45 = vsel %vm1650_vm13, %v8013_v47, %v8011_v59  ;;  %v1779_v2 = vsel %vm1650_vm13, %v7749_v29, %v7780_v34  ;;  %v1797_v55 = vsel %vm1650_vm13, %v7999_v1, %v8013_v47  ;;  %v12421_v1 = vld [vmem:[#allocation136_spill] sm:$0xff] }
 0x519   : > { %2138 = vmatpush2.msra.mxu0 %v1827_v42  ;;  %2205 = vmatpush2.msra.mxu1 %v1845_v19  ;;  %v1790_v36 = vsel %vm1650_vm13, %v7924_v63, %v7955_v17  ;;  %v1776_v52 = vsel %vm1650_vm13, %v7696_v35, %v7723_v27  ;;  %v1789_v29 = vsel %vm1650_vm13, %v7926_v44, %v7924_v63  ;;  %v12424_v44 = vld [vmem:[#allocation125_spill] sm:$0xff]  ;;  %v12432_v9 = vld [vmem:[#allocation132_spill] sm:$0xff] }
 0x51a   : > { %2139 = vmatprep.subr.mxu0 %v1820_v62  ;;  %2206 = vmatprep.subr.mxu1 %v1838_v46  ;;  %v1775_v34 = vsel %vm1650_vm13, %v7700_v3, %v7696_v35  ;;  %v1782_v47 = vsel %vm1650_vm13, %v12421_v1, %v7807_v4  ;;  %v1768_v16 = vsel %vm1650_vm13, %v12423_v43, %v12422_v15  ;;  %v12425_v3 = vld [vmem:[#allocation123_spill] sm:$0xff]  ;;  %v12433_v42 = vld [vmem:[#allocation129_spill] sm:$0xff] }
 0x51b   : > { %2140 = vmatpush2.msra.mxu0 %v1819_v5  ;;  %2207 = vmatpush2.msra.mxu1 %v1837_v12  ;;  %v1781_v63 = vsel %vm1650_vm13, %v7778_v37, %v12421_v1  ;;  %v1767_v35 = vsel %vm1650_vm13, %v12424_v44, %v12423_v43  ;;  %v1760_v49 = vsel %vm1650_vm13, %v12426_v18, %v12425_v3  ;;  %v12429_v37 = vld [vmem:[#allocation121_spill] sm:$0xff]  ;;  %v12434_v62 = vld [vmem:[#allocation115_spill] sm:$0xff]  ;;  %v12436_v12 = vld [vmem:[#allocation114_spill] sm:$0xff] }
 0x51c   : > { %2141 = vmatprep.subr.mxu0 %v1812_v7  ;;  %2208 = vmatprep.subr.mxu1 %v1830_v30  ;;  %v1778_v32 = vsel %vm1650_vm13, %v12428_v26, %v12427_v11  ;;  %v1759_v38 = vsel %vm1650_vm13, %v12429_v37, %v12426_v18  ;;  %v1777_v41 = vsel %vm1650_vm13, %v7723_v27, %v12428_v26  ;;  %v12435_v5 = vld [vmem:[#allocation113_spill] sm:$0xff]  ;;  %v12437_v30 = vld [vmem:[#allocation128_spill] sm:$0xff]  ;;  %v12456_v11 = vld [vmem:[#allocation91_spill] sm:$0xff] }
 0x51d   : > { %2142 = vmatpush2.msra.mxu0 %v1811_v8  ;;  %2209 = vmatpush2.msra.mxu1 %v1829_v31  ;;  %v1752_v25 = vsel %vm1650_vm13, %v12431_v57, %v12430_v61  ;;  %v1770_v19 = vsel %vm1650_vm13, %v12433_v42, %v12432_v9  ;;  %v1751_v46 = vsel %vm1650_vm13, %v12434_v62, %v12431_v57  ;;  %v12438_v8 = vld [vmem:[#allocation126_spill] sm:$0xff] }
 0x51e   : > { %2143 = vmatprep.subr.mxu0 %v1804_v58  ;;  %2210 = vmatprep.subr.mxu1 %v1822_v40  ;;  %v1769_v27 = vsel %vm1650_vm13, %v12422_v15, %v12433_v42  ;;  %v1744_v7 = vsel %vm1650_vm13, %v12436_v12, %v12435_v5  ;;  %v1762_v31 = vsel %vm1650_vm13, %v12438_v8, %v12437_v30  ;;  %v12439_v58 = vld [vmem:[#allocation111_spill] sm:$0xff]  ;;  %v12458_v37 = vld [vmem:[#allocation106_spill] sm:$0xff] }
 0x51f   : > { %2144 = vmatpush2.msra.mxu0 %v1803_v50  ;;  %2211 = vmatpush2.msra.mxu1 %v1821_v60  ;;  %v1743_v40 = vsel %vm1650_vm13, %v12439_v58, %v12436_v12  ;;  %v1761_v50 = vsel %vm1650_vm13, %v12425_v3, %v12438_v8  ;;  %v12440_v60 = vld [vmem:[#allocation110_spill] sm:$0xff]  ;;  %v12451_v15 = vld [vmem:[#allocation99_spill] sm:$0xff] }
 0x520   : > { %2145 = vmatprep.subr.mxu0 %v1796_v51  ;;  %2212 = vmatprep.subr.mxu1 %v1814_v56  ;;  %v12441_v51 = vld [vmem:[#allocation107_spill] sm:$0xff]  ;;  %v12461_v9 = vld [vmem:[#allocation90_spill] sm:$0xff] }
 0x521   : > { %2146 = vmatpush2.msra.mxu0 %v1795_v21  ;;  %2213 = vmatpush2.msra.mxu1 %v1813_v54  ;;  %v1736_v56 = vsel %vm1650_vm13, %v12441_v51, %v12440_v60  ;;  %v12442_v21 = vld [vmem:[#allocation122_spill] sm:$0xff]  ;;  %v12443_v54 = vld [vmem:[#allocation120_spill] sm:$0xff] }
 0x522   : > { %2147 = vmatprep.subr.mxu0 %v1788_v53  ;;  %2214 = vmatprep.subr.mxu1 %v1806_v10  ;;  %v1754_v53 = vsel %vm1650_vm13, %v12443_v54, %v12442_v21  ;;  %v12444_v10 = vld [vmem:[#allocation105_spill] sm:$0xff]  ;;  %v12463_v62 = vld [vmem:[#allocation102_spill] sm:$0xff] }
 0x523   : > { %2148 = vmatpush2.msra.mxu0 %v1787_v23  ;;  %2215 = vmatpush2.msra.mxu1 %v1805_v20  ;;  %v1735_v23 = vsel %vm1650_vm13, %v12444_v10, %v12441_v51  ;;  %v1753_v20 = vsel %vm1650_vm13, %v12430_v61, %v12443_v54  ;;  %v12466_v30 = vld [vmem:[#allocation82_spill] sm:$0xff]  ;;  %v12471_v21 = vld [vmem:[#allocation165_spill] sm:$0xff]  ;;  %v12473_v10 = vld [vmem:[#allocation92_spill] sm:$0xff] }
 0x524   : > { %2149 = vmatprep.subr.mxu0 %v1780_v28  ;;  %2216 = vmatprep.subr.mxu1 %v1798_v45  ;;  %v12445_v28 = vld [vmem:[#allocation103_spill] sm:$0xff]  ;;  %v12446_v45 = vld [vmem:[#allocation104_spill] sm:$0xff]  ;;  %v12468_v58 = vld [vmem:[#allocation94_spill] sm:$0xff] }
 0x525   : > { %2150 = vmatpush2.msra.mxu0 %v1779_v2  ;;  %2217 = vmatpush2.msra.mxu1 %v1797_v55  ;;  %v1728_v2 = vsel %vm1650_vm13, %v12446_v45, %v12445_v28  ;;  %v12447_v55 = vld [vmem:[#allocation118_spill] sm:$0xff]  ;;  %v1729_v57 = vsel %vm1650_vm13, %v12445_v28, %v12458_v37 }
 0x526   : > { %2152 = vmatmul.mubr.f32.vlgmr.msra.gmra.mxu0 %v8316_v22  ;;  %2218 = vmatprep.subr.mxu1 %v1790_v36  ;;  %v12448_v36 = vld [vmem:[#allocation116_spill] sm:$0xff] }
 0x527   : > { %2229 = vmatprep.subr.mxu0 %v1776_v52  ;;  %2219 = vmatpush2.msra.mxu1 %v1789_v29  ;;  %v1746_v52 = vsel %vm1650_vm13, %v12448_v36, %v12447_v55  ;;  %v12449_v29 = vld [vmem:[#allocation101_spill] sm:$0xff]  ;;  %v1745_v1 = vsel %vm1650_vm13, %v12435_v5, %v12448_v36  ;;  %v12476_v55 = vld [vmem:[#allocation155_spill] sm:$0xff] }
 0x528   : > { %2230 = vmatpush1.msra.mxu0 %v1775_v34  ;;  %2220 = vmatprep.subr.mxu1 %v1782_v47  ;;  %v1727_v34 = vsel %vm1650_vm13, %v12449_v29, %v12446_v45  ;;  %v12450_v47 = vld [vmem:[#allocation98_spill] sm:$0xff]  ;;  %v12478_v29 = vld [vmem:[#allocation84_spill] sm:$0xff] }
 0x529   : > { %2231 = vmatprep.subr.mxu0 %v1768_v16  ;;  %2221 = vmatpush2.msra.mxu1 %v1781_v63  ;;  %v1720_v43 = vsel %vm1650_vm13, %v12451_v15, %v12450_v47  ;;  %v12452_v16 = vld [vmem:[#allocation112_spill] sm:$0xff]  ;;  %v12453_v63 = vld [vmem:[#allocation109_spill] sm:$0xff]  ;;  %v1721_v12 = vsel %vm1650_vm13, %v12450_v47, %v12463_v62 }
 0x52a   : > { %2232 = vmatpush1.msra.mxu0 %v1767_v35  ;;  %2223 = vmatmul.mubr.f32.vlgmr.msra.gmra.mxu1 %v8316_v22  ;;  %v1738_v44 = vsel %vm1650_vm13, %v12453_v63, %v12452_v16  ;;  %v12454_v35 = vld [vmem:[#allocation97_spill] sm:$0xff]  ;;  %v1737_v18 = vsel %vm1650_vm13, %v12440_v60, %v12453_v63  ;;  %v12481_v16 = vld [vmem:[#allocation71_spill] sm:$0xff] }
 0x52b   : > { %2233 = vmatprep.subr.mxu0 %v1760_v49  ;;  %2300 = vmatprep.subr.mxu1 %v1778_v32  ;;  %v1719_v3 = vsel %vm1650_vm13, %v12454_v35, %v12451_v15  ;;  %v12455_v49 = vld [vmem:[#allocation95_spill] sm:$0xff]  ;;  %v12457_v32 = vld [vmem:[#allocation108_spill] sm:$0xff] }
 0x52c   : > { %2234 = vmatpush1.msra.mxu0 %v1759_v38  ;;  %2301 = vmatpush1.msra.mxu1 %v1777_v41  ;;  %v1712_v26 = vsel %vm1650_vm13, %v12456_v11, %v12455_v49  ;;  %v1730_v38 = vsel %vm1650_vm13, %v12458_v37, %v12457_v32  ;;  %v12459_v41 = vld [vmem:[#allocation93_spill] sm:$0xff]  ;;  %v1713_v51 = vsel %vm1650_vm13, %v12455_v49, %v12468_v58  ;;  %v12483_v35 = vld [vmem:[#allocation76_spill] sm:$0xff]  ;;  %v1643_v49 = vpop.permute.xlu0 %1642  ;;  %v12485_v37 = vld [vmem:[#allocation66_spill] sm:$0xff] }
 0x52d   : > { %2235 = vmatprep.subr.mxu0 %v1752_v25  ;;  %2302 = vmatprep.subr.mxu1 %v1770_v19  ;;  %v1711_v61 = vsel %vm1650_vm13, %v12459_v41, %v12456_v11  ;;  %v12460_v25 = vld [vmem:[#allocation85_spill] sm:$0xff]  ;;  %v12462_v19 = vld [vmem:[#allocation100_spill] sm:$0xff]  ;;  %v12484_v11 = vld [vmem:[#allocation67_spill] sm:$0xff] }
 0x52e   : > { %2236 = vmatpush1.msra.mxu0 %v1751_v46  ;;  %2303 = vmatpush1.msra.mxu1 %v1769_v27  ;;  %v1704_v42 = vsel %vm1650_vm13, %v12461_v9, %v12460_v25  ;;  %v1722_v46 = vsel %vm1650_vm13, %v12463_v62, %v12462_v19  ;;  %v12464_v27 = vld [vmem:[#allocation83_spill] sm:$0xff]  ;;  %v1705_v45 = vsel %vm1650_vm13, %v12460_v25, %v12473_v10 }
 0x52f   : > { %2237 = vmatprep.subr.mxu0 %v1744_v7  ;;  %2304 = vmatprep.subr.mxu1 %v1762_v31  ;;  %v1703_v5 = vsel %vm1650_vm13, %v12464_v27, %v12461_v9  ;;  %v12465_v7 = vld [vmem:[#allocation81_spill] sm:$0xff]  ;;  %v12467_v31 = vld [vmem:[#allocation96_spill] sm:$0xff]  ;;  %v12490_v62 = vld [vmem:[#allocation51_spill] sm:$0xff] }
 0x530   : > { %2238 = vmatpush1.msra.mxu0 %v1743_v40  ;;  %2305 = vmatpush1.msra.mxu1 %v1761_v50  ;;  %v1696_v8 = vsel %vm1650_vm13, %v12466_v30, %v12465_v7  ;;  %v1714_v40 = vsel %vm1650_vm13, %v12468_v58, %v12467_v31  ;;  %v12469_v50 = vld [vmem:[#allocation79_spill] sm:$0xff]  ;;  %v1697_v15 = vsel %vm1650_vm13, %v12465_v7, %v12478_v29  ;;  %v12489_v9 = vld [vmem:[#allocation64_spill] sm:$0xff] }
 0x531   : > { %2239 = vmatprep.subr.mxu0 %v1736_v56  ;;  %2306 = vmatprep.subr.mxu1 %v1754_v53  ;;  %v1695_v60 = vsel %vm1650_vm13, %v12469_v50, %v12466_v30  ;;  %v12470_v56 = vld [vmem:[#allocation164_spill] sm:$0xff]  ;;  %v12472_v53 = vld [vmem:[#allocation87_spill] sm:$0xff]  ;;  %v12494_v30 = vld [vmem:[#allocation49_spill] sm:$0xff] }
 0x532   : > { %2240 = vmatpush1.msra.mxu0 %v1735_v23  ;;  %2307 = vmatpush1.msra.mxu1 %v1753_v20  ;;  %v1688_v54 = vsel %vm1650_vm13, %v12471_v21, %v12470_v56  ;;  %v1706_v23 = vsel %vm1650_vm13, %v12473_v10, %v12472_v53  ;;  %v12474_v20 = vld [vmem:[#allocation162_spill] sm:$0xff]  ;;  %v1689_v32 = vsel %vm1650_vm13, %v12470_v56, %v12483_v35  ;;  %v12496_v50 = vld [vmem:[#allocation61_spill] sm:$0xff]  ;;  %v1647_v56 = vpop.permute.xlu0 %1646  ;;  %v12498_v10 = vld [vmem:[#allocation72_spill] sm:$0xff] }
 0x533   : > { %2241 = vmatprep.subr.mxu0 %v1728_v2  ;;  %2308 = vmatprep.subr.mxu1 %v1746_v52  ;;  %v1687_v28 = vsel %vm1650_vm13, %v12474_v20, %v12471_v21  ;;  %v12475_v2 = vld [vmem:[#allocation157_spill] sm:$0xff]  ;;  %v12477_v52 = vld [vmem:[#allocation86_spill] sm:$0xff]  ;;  %v1863_v21 = vsel %vm1650_vm13, %v8226_v33, %v1643_v49  ;;  %v12499_v20 = vld [vmem:[#allocation55_spill] sm:$0xff]  ;;  %v1855_v33 = vsel %vm1650_vm13, %v8216_v13, %v12498_v10 }
 0x534   : > { %2242 = vmatpush1.msra.mxu0 %v1727_v34  ;;  %2309 = vmatpush1.msra.mxu1 %v1745_v1  ;;  %v1680_v36 = vsel %vm1650_vm13, %v12476_v55, %v12475_v2  ;;  %v1698_v34 = vsel %vm1650_vm13, %v12478_v29, %v12477_v52  ;;  %v12479_v1 = vld [vmem:[#allocation156_spill] sm:$0xff]  ;;  %v12497_v53 = vld [vmem:[#allocation149_spill] sm:$0xff] }
 0x535   : > { %2243 = vmatprep.subr.mxu0 %v1720_v43  ;;  %2310 = vmatprep.subr.mxu1 %v1738_v44  ;;  %v1679_v47 = vsel %vm1650_vm13, %v12479_v1, %v12476_v55  ;;  %v12480_v43 = vld [vmem:[#allocation69_spill] sm:$0xff]  ;;  %v12482_v44 = vld [vmem:[#allocation75_spill] sm:$0xff]  ;;  %v12503_v1 = vld [vmem:[#allocation62_spill] sm:$0xff] }
 0x536   : > { %2244 = vmatpush1.msra.mxu0 %v1719_v3  ;;  %2311 = vmatpush1.msra.mxu1 %v1737_v18  ;;  %v1672_v63 = vsel %vm1650_vm13, %v12481_v16, %v12480_v43  ;;  %v1690_v3 = vsel %vm1650_vm13, %v12483_v35, %v12482_v44  ;;  %v1645_v18 = vpop.permute.xlu1 %1644  ;;  %v12501_v55 = vld [vmem:[#allocation153_spill] sm:$0xff] }
 0x537   : > { %2245 = vmatprep.subr.mxu0 %v1712_v26  ;;  %2312 = vmatprep.subr.mxu1 %v1730_v38  ;;  %v1671_v26 = vsel %vm1650_vm13, %v12484_v11, %v12481_v16  ;;  %v12486_v38 = vld [vmem:[#allocation59_spill] sm:$0xff]  ;;  %v1864_v58 = vsel %vm1650_vm13, %v1643_v49, %v1645_v18  ;;  %v1865_v13 = vsel %vm1650_vm13, %v1645_v18, %v1647_v56  ;;  %v12506_v16 = vld [vmem:[#allocation45_spill] sm:$0xff]  ;;  %v12510_v11 = vld [vmem:[#allocation52_spill] sm:$0xff] }
 0x538   : > { %2246 = vmatpush1.msra.mxu0 %v1711_v61  ;;  %2313 = vmatpush1.msra.mxu1 %v1729_v57  ;;  %v1664_v41 = vsel %vm1650_vm13, %v12486_v38, %v12485_v37  ;;  %v12487_v61 = vld [vmem:[#allocation159_spill] sm:$0xff]  ;;  %v12488_v57 = vld [vmem:[#allocation74_spill] sm:$0xff]  ;;  %v12507_v35 = vld [vmem:[#allocation65_spill] sm:$0xff] }
 0x539   : > { %2247 = vmatprep.subr.mxu0 %v1704_v42  ;;  %2314 = vmatprep.subr.mxu1 %v1722_v46  ;;  %v1682_v25 = vsel %vm1650_vm13, %v12488_v57, %v12487_v61  ;;  %v1663_v42 = vsel %vm1650_vm13, %v12489_v9, %v12486_v38  ;;  %v1681_v19 = vsel %vm1650_vm13, %v12475_v2, %v12488_v57  ;;  %v12491_v46 = vld [vmem:[#allocation53_spill] sm:$0xff]  ;;  %v12509_v49 = vld [vmem:[#allocation47_spill] sm:$0xff]  ;;  %v12512_v38 = vld [vmem:[#allocation154_spill] sm:$0xff] }
 0x53a   : > { %2248 = vmatpush1.msra.mxu0 %v1703_v5  ;;  %2315 = vmatpush1.msra.mxu1 %v1721_v12  ;;  %v1656_v27 = vsel %vm1650_vm13, %v12491_v46, %v12490_v62  ;;  %v12492_v5 = vld [vmem:[#allocation73_spill] sm:$0xff]  ;;  %v12493_v12 = vld [vmem:[#allocation150_spill] sm:$0xff]  ;;  %v12514_v57 = vld [vmem:[#allocation15_spill] sm:$0xff] }
 0x53b   : > { %2249 = vmatprep.subr.mxu0 %v1696_v8  ;;  %2316 = vmatprep.subr.mxu1 %v1714_v40  ;;  %v1674_v7 = vsel %vm1650_vm13, %v12493_v12, %v12492_v5  ;;  %v1655_v8 = vsel %vm1650_vm13, %v12494_v30, %v12491_v46  ;;  %v1673_v31 = vsel %vm1650_vm13, %v12480_v43, %v12493_v12  ;;  %v12495_v40 = vld [vmem:[#allocation68_spill] sm:$0xff]  ;;  %v12505_v43 = vld [vmem:[#allocation18_spill] sm:$0xff]  ;;  %v12517_v46 = vld [vmem:[#allocation163_spill] sm:$0xff] }
 0x53c   : > { %2250 = vmatpush1.msra.mxu0 %v1695_v60  ;;  %2317 = vmatpush1.msra.mxu1 %v1713_v51  ;;  %v1666_v60 = vsel %vm1650_vm13, %v12496_v50, %v12495_v40  ;;  %v1649_v51 = vpop.permute.xlu1 %1648  ;;  %v12513_v61 = vld [vmem:[#allocation58_spill] sm:$0xff]  ;;  %v1841_v9 = vsel %vm1650_vm13, %v12503_v1, %v12514_v57 }
 0x53d   : > { %2251 = vmatprep.subr.mxu0 %v1688_v54  ;;  %2318 = vmatprep.subr.mxu1 %v1706_v23  ;;  %v1665_v54 = vsel %vm1650_vm13, %v12485_v37, %v12496_v50  ;;  %v1856_v23 = vsel %vm1650_vm13, %v12498_v10, %v12497_v53  ;;  %v1866_v29 = vsel %vm1650_vm13, %v1647_v56, %v1649_v51  ;;  %v12511_v37 = vld [vmem:[#allocation77_spill] sm:$0xff]  ;;  %v12520_v30 = vld [vmem:[#allocation78_spill] sm:$0xff]  ;;  %v12524_v51 = vld [vmem:[#allocation144_spill] sm:$0xff] }
 0x53e   : > { %2252 = vmatpush1.msra.mxu0 %v1687_v28  ;;  %2319 = vmatpush1.msra.mxu1 %v1705_v45  ;;  %v12500_v28 = vld [vmem:[#allocation56_spill] sm:$0xff] }
 0x53f   : > { %2253 = vmatprep.subr.mxu0 %v1680_v36  ;;  %2320 = vmatprep.subr.mxu1 %v1698_v34  ;;  %v1658_v45 = vsel %vm1650_vm13, %v12500_v28, %v12499_v20  ;;  %v1657_v2 = vsel %vm1650_vm13, %v12490_v62, %v12500_v28  ;;  %v12502_v36 = vld [vmem:[#allocation60_spill] sm:$0xff]  ;;  %v12528_v20 = vld [vmem:[#allocation137_spill] sm:$0xff] }
 0x540   : > { %2254 = vmatpush1.msra.mxu0 %v1679_v47  ;;  %2321 = vmatpush1.msra.mxu1 %v1697_v15  ;;  %v1848_v52 = vsel %vm1650_vm13, %v12502_v36, %v12501_v55  ;;  %v1847_v34 = vsel %vm1650_vm13, %v8204_v14, %v12502_v36  ;;  %v12504_v47 = vld [vmem:[#allocation16_spill] sm:$0xff]  ;;  %v1857_v14 = vsel %vm1650_vm13, %v12497_v53, %v12506_v16  ;;  %v12531_v36 = vld [vmem:[#allocation133_spill] sm:$0xff] }
 0x541   : > { %2255 = vmatprep.subr.mxu0 %v1672_v63  ;;  %2322 = vmatprep.subr.mxu1 %v1690_v3  ;;  %v1840_v15 = vsel %vm1650_vm13, %v12504_v47, %v12503_v1  ;;  %v1858_v63 = vsel %vm1650_vm13, %v12506_v16, %v12505_v43  ;;  %v1839_v44 = vsel %vm1650_vm13, %v8196_v24, %v12504_v47  ;;  %v12508_v3 = vld [vmem:[#allocation70_spill] sm:$0xff]  ;;  %v12536_v43 = vld [vmem:[#allocation141_spill] sm:$0xff] }
 0x542   : > { %2256 = vmatpush1.msra.mxu0 %v1671_v26  ;;  %2323 = vmatpush1.msra.mxu1 %v1689_v32  ;;  %v1832_v18 = vsel %vm1650_vm13, %v12508_v3, %v12507_v35  ;;  %v1850_v26 = vsel %vm1650_vm13, %v12510_v11, %v12509_v49  ;;  %v1831_v24 = vsel %vm1650_vm13, %v8178_v48, %v12508_v3  ;;  %v12535_v47 = vld [vmem:[#allocation158_spill] sm:$0xff] }
 0x543   : > { %2257 = vmatprep.subr.mxu0 %v1664_v41  ;;  %2324 = vmatprep.subr.mxu1 %v1682_v25  ;;  %v1849_v32 = vsel %vm1650_vm13, %v12501_v55, %v12510_v11  ;;  %v1824_v41 = vsel %vm1650_vm13, %v12512_v38, %v12511_v37  ;;  %v1842_v25 = vsel %vm1650_vm13, %v12514_v57, %v12513_v61  ;;  %v12537_v16 = vld [vmem:[#allocation142_spill] sm:$0xff] }
 0x544   : > { %2258 = vmatpush1.msra.mxu0 %v1663_v42  ;;  %2325 = vmatpush1.msra.mxu1 %v1681_v19  ;;  %v1823_v48 = vsel %vm1650_vm13, %v8164_v6, %v12512_v38  ;;  %v12515_v42 = vld [vmem:[#allocation161_spill] sm:$0xff]  ;;  %v12516_v19 = vld [vmem:[#allocation88_spill] sm:$0xff] }
 0x545   : > { %2259 = vmatprep.subr.mxu0 %v1656_v27  ;;  %2326 = vmatprep.subr.mxu1 %v1674_v7  ;;  %v1816_v62 = vsel %vm1650_vm13, %v12516_v19, %v12515_v42  ;;  %v12518_v27 = vld [vmem:[#allocation63_spill] sm:$0xff]  ;;  %v1815_v6 = vsel %vm1650_vm13, %v8115_v39, %v12516_v19  ;;  %v12519_v7 = vld [vmem:[#allocation80_spill] sm:$0xff]  ;;  %v1807_v39 = vsel %vm1650_vm13, %v8071_v0, %v12520_v30 }
 0x546   : > { %2260 = vmatpush1.msra.mxu0 %v1655_v8  ;;  %2327 = vmatpush1.msra.mxu1 %v1673_v31  ;;  %v1834_v5 = vsel %vm1650_vm13, %v12518_v27, %v12517_v46  ;;  %v1833_v12 = vsel %vm1650_vm13, %v12507_v35, %v12518_v27  ;;  %v1808_v8 = vsel %vm1650_vm13, %v12520_v30, %v12519_v7  ;;  %v12521_v31 = vld [vmem:[#allocation152_spill] sm:$0xff] }
 0x547   : > { %2271 = vmatprep.subr.mxu0 %v1864_v58  ;;  %2328 = vmatprep.subr.mxu1 %v1666_v60  ;;  %v12522_v58 = vld [vmem:[#allocation151_spill] sm:$0xff]  ;;  %v1799_v0 = vsel %vm1650_vm13, %v8011_v59, %v12524_v51  ;;  %v1791_v59 = vsel %vm1650_vm13, %v7955_v17, %v12528_v20 }
 0x548   : > { %2272 = vmatpush2.msra.mxu0 %v1863_v21  ;;  %2329 = vmatpush1.msra.mxu1 %v1665_v54  ;;  %v1826_v40 = vsel %vm1650_vm13, %v12522_v58, %v12521_v31  ;;  %v1825_v50 = vsel %vm1650_vm13, %v12511_v37, %v12522_v58  ;;  %v12523_v60 = vld [vmem:[#allocation143_spill] sm:$0xff]  ;;  %v12525_v21 = vld [vmem:[#allocation148_spill] sm:$0xff]  ;;  %v12526_v54 = vld [vmem:[#allocation146_spill] sm:$0xff] }
 0x549   : > { %2273 = vmatprep.subr.mxu0 %v1856_v23  ;;  %2330 = vmatprep.subr.mxu1 %v1658_v45  ;;  %v1800_v56 = vsel %vm1650_vm13, %v12524_v51, %v12523_v60  ;;  %v1818_v53 = vsel %vm1650_vm13, %v12526_v54, %v12525_v21  ;;  %v1817_v10 = vsel %vm1650_vm13, %v12515_v42, %v12526_v54  ;;  %v12527_v23 = vld [vmem:[#allocation139_spill] sm:$0xff]  ;;  %v12529_v45 = vld [vmem:[#allocation160_spill] sm:$0xff] }
 0x54a   : > { %2274 = vmatpush2.msra.mxu0 %v1855_v33  ;;  %2331 = vmatpush1.msra.mxu1 %v1657_v2  ;;  %v1792_v28 = vsel %vm1650_vm13, %v12528_v20, %v12527_v23  ;;  %v12530_v33 = vld [vmem:[#allocation89_spill] sm:$0xff] }
 0x54b   : > { %2275 = vmatprep.subr.mxu0 %v1848_v52  ;;  %2342 = vmatprep.subr.mxu1 %v1866_v29  ;;  %v1810_v2 = vsel %vm1650_vm13, %v12530_v33, %v12529_v45  ;;  %v1809_v55 = vsel %vm1650_vm13, %v12519_v7, %v12530_v33  ;;  %v12532_v52 = vld [vmem:[#allocation138_spill] sm:$0xff] }
 0x54c   : > { %2276 = vmatpush2.msra.mxu0 %v1847_v34  ;;  %2343 = vmatpush2.msra.mxu1 %v1865_v13  ;;  %v1784_v29 = vsel %vm1650_vm13, %v12532_v52, %v12531_v36  ;;  %v12533_v34 = vld [vmem:[#allocation147_spill] sm:$0xff]  ;;  %v12534_v13 = vld [vmem:[#allocation145_spill] sm:$0xff]  ;;  %v1783_v17 = vsel %vm1650_vm13, %v7807_v4, %v12532_v52  ;;  %v1793_v4 = vsel %vm1650_vm13, %v12527_v23, %v12537_v16 }
 0x54d   : > { %2277 = vmatprep.subr.mxu0 %v1840_v15  ;;  %2344 = vmatprep.subr.mxu1 %v1858_v63  ;;  %v1802_v1 = vsel %vm1650_vm13, %v12534_v13, %v12533_v34  ;;  %v1801_v15 = vsel %vm1650_vm13, %v12523_v60, %v12534_v13  ;;  %v1794_v63 = vsel %vm1650_vm13, %v12537_v16, %v12536_v43  ;;  %v11715_v16 = vmov 0.0  }
 0x54e   : > { %2278 = vmatpush2.msra.mxu0 %v1839_v44  ;;  %2345 = vmatpush2.msra.mxu1 %v1857_v14  ;;  %v12538_v44 = vld [vmem:[#allocation135_spill] sm:$0xff]  ;;  %v12539_v14 = vld [vmem:[#allocation140_spill] sm:$0xff] }
 0x54f   : > { %2279 = vmatprep.subr.mxu0 %v1832_v18  ;;  %2346 = vmatprep.subr.mxu1 %v1850_v26  ;;  %v1786_v35 = vsel %vm1650_vm13, %v12539_v14, %v12538_v44  ;;  %v1785_v3 = vsel %vm1650_vm13, %v12531_v36, %v12539_v14  ;;  %v2372_v18 = vlaneseq }
 0x550   : > { %2280 = vmatpush2.msra.mxu0 %v1831_v24  ;;  %2347 = vmatpush2.msra.mxu1 %v1849_v32  ;;  %v266_v32 = vld [vmem:[#allocation8] sm:$0xff] }
 0x551   : > { %2281 = vmatprep.subr.mxu0 %v1824_v41  ;;  %2348 = vmatprep.subr.mxu1 %v1842_v25  ;;  %v2373_v49 = vshrl.u32 %v2372_v18, 7 }
 0x552   : > { %2282 = vmatpush2.msra.mxu0 %v1823_v48  ;;  %2349 = vmatpush2.msra.mxu1 %v1841_v9 }
 0x553   : > { %2283 = vmatprep.subr.mxu0 %v1816_v62  ;;  %2350 = vmatprep.subr.mxu1 %v1834_v5  ;;  %v2378_v11 = vsub.s32 1, %v2373_v49  ;;  %v2374_v24 = vsub.s32 0, %v2373_v49  ;;  %v2382_v38 = vsub.s32 2, %v2373_v49 }
 0x554   : > { %2284 = vmatpush2.msra.mxu0 %v1815_v6  ;;  %2351 = vmatpush2.msra.mxu1 %v1833_v12  ;;  %v2390_v6 = vsub.s32 4, %v2373_v49 }
 0x555   : > { %2285 = vmatprep.subr.mxu0 %v1808_v8  ;;  %2352 = vmatprep.subr.mxu1 %v1826_v40  ;;  %v8663_v37 = vrot.slane %v266_v32, %v2378_v11  ;;  %v8667_v61 = vrot.slane %v266_v32, %v2374_v24  ;;  %v8671_v25 = vrot.slane %v266_v32, %v2382_v38  ;;  %v2394_v8 = vsub.s32 5, %v2373_v49 }
 0x556   : > { %2286 = vmatpush2.msra.mxu0 %v1807_v39  ;;  %2353 = vmatpush2.msra.mxu1 %v1825_v50  ;;  %v8685_v58 = vrot.slane %v266_v32, %v2390_v6  ;;  %v2398_v40 = vsub.s32 6, %v2373_v49 }
 0x557   : > { %2287 = vmatprep.subr.mxu0 %v1800_v56  ;;  %2354 = vmatprep.subr.mxu1 %v1818_v53  ;;  %12540 = vst [vmem:[#allocation57_spill] sm:$0xff] %v8663_v37  ;;  %12541 = vst [vmem:[#allocation54_spill] sm:$0xff] %v8667_v61  ;;  %v8687_v60 = vrot.slane %v266_v32, %v2394_v8  ;;  %v2402_v56 = vsub.s32 7, %v2373_v49 }
 0x558   : > { %2288 = vmatpush2.msra.mxu0 %v1799_v0  ;;  %2355 = vmatpush2.msra.mxu1 %v1817_v10  ;;  %12542 = vst [vmem:[#allocation20_spill] sm:$0xff] %v8671_v25  ;;  %12544 = vst [vmem:[#allocation24_spill] sm:$0xff] %v8685_v58  ;;  %v8690_v0 = vrot.slane %v266_v32, %v2398_v40 }
 0x559   : > { %2289 = vmatprep.subr.mxu0 %v1792_v28  ;;  %2356 = vmatprep.subr.mxu1 %v1810_v2  ;;  %12545 = vst [vmem:[#allocation19_spill] sm:$0xff] %v8687_v60  ;;  %v8693_v45 = vrot.slane %v266_v32, %v2402_v56 }
 0x55a   : > { %2290 = vmatpush2.msra.mxu0 %v1791_v59  ;;  %2357 = vmatpush2.msra.mxu1 %v1809_v55  ;;  %12546 = vst [vmem:[#allocation26_spill] sm:$0xff] %v8690_v0 }
 0x55b   : > { %2291 = vmatprep.subr.mxu0 %v1784_v29  ;;  %2358 = vmatprep.subr.mxu1 %v1802_v1  ;;  %12547 = vst [vmem:[#allocation22_spill] sm:$0xff] %v8693_v45 }
 0x55c   : > { %2292 = vmatpush2.msra.mxu0 %v1783_v17  ;;  %4756 = vmatprep.mubr.msk.f32.mxu0 %vm2083_vm14, %v12535_v47 }
 0x55d   : > { %2359 = vmatpush2.msra.mxu1 %v1801_v15  ;;  %2294 = vmatmul.mubr.f32.vlgmr.msra.gmra.mxu0 %v8316_v22 }
 0x55e   : > { %2360 = vmatprep.subr.mxu1 %v1794_v63  ;;  %4757 = vmatprep.mubr.msk.f32.mxu1 %vm2083_vm14, %v12535_v47 }
 0x55f   : > { %2361 = vmatpush2.msra.mxu1 %v1793_v4 }
 0x560   : > { %2362 = vmatprep.subr.mxu1 %v1786_v35 }
 0x561   : > { %2363 = vmatpush2.msra.mxu1 %v1785_v3 }
 0x562   : > { %2365 = vmatmul.mubr.f32.vlgmr.msra.gmra.mxu1 %v8316_v22  ;;  %v2386_v22 = vsub.s32 3, %v2373_v49 }
 0x564   : > { %v8680_v62 = vrot.slane %v266_v32, %v2386_v22 }
 0x566   : > { %12543 = vst [vmem:[#allocation17_spill] sm:$0xff] %v8680_v62 }
 0x5e6   : > { %v8661_v26 = vpop.f32.mrf.mxu0 }
 0x5e7   : > { %v2412_v9 = vmul.f32 %v8667_v61, %v8661_v26 }
 0x5e8   : > { %v8665_v41 = vpop.f32.mrf.mxu0 }
 0x5e9   : > { %v2413_v57 = vmul.f32 %v8663_v37, %v8665_v41  ;;  %v2429_v27 = vmul.f32 %v2412_v9, %v8661_v26 }
 0x5ea   : > { %v8673_v48 = vpop.f32.mrf.mxu1 }
 0x5eb   : > { %v2430_v42 = vmul.f32 %v2413_v57, %v8665_v41  ;;  %v2414_v19 = vmul.f32 %v8671_v25, %v8673_v48  ;;  %v2420_v5 = vadd.f32 %v2413_v57, %v2412_v9 }
 0x5ec   : > { %v2226_v46 = vpop.f32.mrf.mxu1 }
 0x5ed   : > { %v2437_v12 = vadd.f32 %v2430_v42, %v2429_v27  ;;  %v2431_v7 = vmul.f32 %v2414_v19, %v8673_v48  ;;  %v2415_v30 = vmul.f32 %v8680_v62, %v2226_v46  ;;  %v2421_v31 = vadd.f32 %v2420_v5, %v2414_v19 }
 0x5ef   : > { %v2438_v39 = vadd.f32 %v2437_v12, %v2431_v7  ;;  %v2432_v50 = vmul.f32 %v2415_v30, %v2226_v46  ;;  %v2422_v21 = vadd.f32 %v2421_v31, %v2415_v30 }
 0x5f1   : > { %v2439_v10 = vadd.f32 %v2438_v39, %v2432_v50 }
 0x61d   : > { %v2295_v51 = vpop.f32.mrf.mxu0 }
 0x61e   : > { %v2416_v54 = vmul.f32 %v8685_v58, %v2295_v51 }
 0x61f   : > { %v2297_v53 = vpop.f32.mrf.mxu0 }
 0x620   : > { %v2423_v23 = vadd.f32 %v2422_v21, %v2416_v54  ;;  %v2433_v20 = vmul.f32 %v2416_v54, %v2295_v51  ;;  %v2417_v28 = vmul.f32 %v8687_v60, %v2297_v53 }
 0x622   : > { %v2440_v33 = vadd.f32 %v2439_v10, %v2433_v20  ;;  %v2424_v2 = vadd.f32 %v2423_v23, %v2417_v28  ;;  %v2434_v59 = vmul.f32 %v2417_v28, %v2297_v53  ;;  %v2366_v55 = vpop.f32.mrf.mxu1 }
 0x623   : > { %v2418_v36 = vmul.f32 %v8690_v0, %v2366_v55 }
 0x624   : > { %v2441_v52 = vadd.f32 %v2440_v33, %v2434_v59  ;;  %v2368_v29 = vpop.f32.mrf.mxu1 }
 0x625   : > { %v2425_v34 = vadd.f32 %v2424_v2, %v2418_v36  ;;  %v2435_v13 = vmul.f32 %v2418_v36, %v2366_v55  ;;  %v2419_v1 = vmul.f32 %v8693_v45, %v2368_v29 }
 0x627   : > { %v2442_v17 = vadd.f32 %v2441_v52, %v2435_v13  ;;  %v2436_v47 = vmul.f32 %v2419_v1, %v2368_v29  ;;  %v2426_v15 = vadd.f32 %v2425_v34, %v2419_v1 }
 0x629   : > { %2427 = vadd.xlane.f32.xlu0 %v2426_v15  ;;  %v2443_v43 = vadd.f32 %v2442_v17, %v2436_v47 }
 0x62b   : > { %2444 = vadd.xlane.f32.xlu1 %v2443_v43 }
 0x63f   : > { %2493 = vrot.lane.b32.xlu0 %v11715_v16, %s5103_s21 }
 0x6b2   : > { %v2428_v63 = vpop.xlane.xlu0 %2427 }
 0x6b3   : > { %v2446_v4 = vmul.f32 0.001953125, %v2428_v63 }
 0x6b4   : > { %v2445_v44 = vpop.xlane.xlu1 %2444 }
 0x6b5   : > { %v2447_v14 = vmul.f32 0.001953125, %v2445_v44  ;;  %v2448_v35 = vmul.f32 %v2446_v4, %v2446_v4  ;;  %v2450_v49 = vsub.f32 %v8661_v26, %v2446_v4  ;;  %v2451_v11 = vsub.f32 %v8665_v41, %v2446_v4 }
 0x6b6   : > { %v2452_v24 = vsub.f32 %v8673_v48, %v2446_v4  ;;  %v2453_v32 = vsub.f32 %v2226_v46, %v2446_v4  ;;  %v2454_v19 = vsub.f32 %v2295_v51, %v2446_v4  ;;  %v2455_v27 = vsub.f32 %v2297_v53, %v2446_v4  ;;  %v8838_v28 = vpop.permute.xlu0 %2493 }
 0x6b7   : > { %v2449_v3 = vsub.f32 %v2447_v14, %v2448_v35  ;;  %v2456_v48 = vsub.f32 %v2366_v55, %v2446_v4  ;;  %v2457_v46 = vsub.f32 %v2368_v29, %v2446_v4 }
 0x6b9   : > { %v2458_v18 = vadd.f32 1e-05, %v2449_v3 }
 0x6bb   : > { %4898 = vrsqrt.f32 %v2458_v18 }
 0x6c8   : > { %v4899_v38 = vpop.eup %4898 }
 0x6c9   : > { %v2460_v57 = vmul.f32 %v4899_v38, %v2450_v49  ;;  %v2461_v22 = vmul.f32 %v4899_v38, %v2451_v11  ;;  %v2462_v9 = vmul.f32 %v4899_v38, %v2452_v24  ;;  %v2463_v42 = vmul.f32 %v4899_v38, %v2453_v32 }
 0x6ca   : > { %v2464_v12 = vmul.f32 %v4899_v38, %v2454_v19  ;;  %v2465_v7 = vmul.f32 %v4899_v38, %v2455_v27  ;;  %v2466_v31 = vmul.f32 %v4899_v38, %v2456_v48  ;;  %v2467_v40 = vmul.f32 %v4899_v38, %v2457_v46 }
 0x6cb   : > { %v2468_v5 = vmax.f32 %v2460_v57, 0.0  ;;  %v2469_v6 = vmax.f32 %v2461_v22, 0.0  ;;  %v2470_v30 = vmax.f32 %v2462_v9, 0.0  ;;  %v2471_v8 = vmax.f32 %v2463_v42, 0.0 }
 0x6cc   : > { %v2472_v39 = vmax.f32 %v2464_v12, 0.0  ;;  %v2473_v50 = vmax.f32 %v2465_v7, 0.0  ;;  %v2474_v21 = vmax.f32 %v2466_v31, 0.0  ;;  %v2475_v54 = vmax.f32 %v2467_v40, 0.0 }
 0x6cd   : > { %v8703_v26 = vmul.f32 %v2468_v5, %v8667_v61  ;;  %v8706_v41 = vmul.f32 %v2469_v6, %v8663_v37  ;;  %v8713_v51 = vmul.f32 %v2470_v30, %v8671_v25  ;;  %v8716_v56 = vmul.f32 %v2471_v8, %v8680_v62 }
 0x6ce   : > { %v8723_v53 = vmul.f32 %v2472_v39, %v8685_v58  ;;  %v8726_v10 = vmul.f32 %v2473_v50, %v8687_v60  ;;  %v8733_v23 = vmul.f32 %v2474_v21, %v8690_v0  ;;  %v8736_v20 = vmul.f32 %v2475_v54, %v8693_v45 }
 0x6cf   : > { %2497 = vrot.lane.b32.xlu0 %v8706_v41, %s5103_s21  ;;  %2495 = vrot.lane.b32.xlu1 %v8703_v26, %s5103_s21 }
 0x6d3   : > { %2501 = vrot.lane.b32.xlu0 %v8716_v56, %s5103_s21  ;;  %2499 = vrot.lane.b32.xlu1 %v8713_v51, %s5103_s21 }
 0x6d7   : > { %2505 = vrot.lane.b32.xlu0 %v8726_v10, %s5103_s21  ;;  %2503 = vrot.lane.b32.xlu1 %v8723_v53, %s5103_s21 }
 0x6db   : > { %2509 = vrot.lane.b32.xlu0 %v8736_v20, %s5103_s21  ;;  %2507 = vrot.lane.b32.xlu1 %v8733_v23, %s5103_s21  ;;  %s12599_s21 = smov 16  }
 0x6df   : > { %2521 = vrot.lane.b32.xlu0 %v8703_v26, %s5104_s23  ;;  %2519 = vrot.lane.b32.xlu1 %v11715_v16, %s5104_s23 }
 0x6e3   : > { %2525 = vrot.lane.b32.xlu0 %v8713_v51, %s5104_s23  ;;  %2523 = vrot.lane.b32.xlu1 %v8706_v41, %s5104_s23 }
 0x6e7   : > { %2529 = vrot.lane.b32.xlu0 %v8723_v53, %s5104_s23  ;;  %2527 = vrot.lane.b32.xlu1 %v8716_v56, %s5104_s23 }
 0x6eb   : > { %2533 = vrot.lane.b32.xlu0 %v8733_v23, %s5104_s23  ;;  %2531 = vrot.lane.b32.xlu1 %v8726_v10, %s5104_s23 }
 0x6ef   : > { %2545 = vrot.lane.b32.xlu0 %v11715_v16, %s5105_s30  ;;  %2535 = vrot.lane.b32.xlu1 %v8736_v20, %s5104_s23  ;;  %s12611_s23 = smov 8  }
 0x6f3   : > { %2549 = vrot.lane.b32.xlu0 %v8706_v41, %s5105_s30  ;;  %2547 = vrot.lane.b32.xlu1 %v8703_v26, %s5105_s30 }
 0x6f7   : > { %2553 = vrot.lane.b32.xlu0 %v8716_v56, %s5105_s30  ;;  %2551 = vrot.lane.b32.xlu1 %v8713_v51, %s5105_s30 }
 0x6fb   : > { %2557 = vrot.lane.b32.xlu0 %v8726_v10, %s5105_s30  ;;  %2555 = vrot.lane.b32.xlu1 %v8723_v53, %s5105_s30 }
 0x6ff   : > { %2561 = vrot.lane.b32.xlu0 %v8736_v20, %s5105_s30  ;;  %2559 = vrot.lane.b32.xlu1 %v8733_v23, %s5105_s30  ;;  %s12615_s30 = smov 49  }
 0x703   : > { %2573 = vrot.lane.b32.xlu0 %v8703_v26, %s5106_s7  ;;  %2571 = vrot.lane.b32.xlu1 %v11715_v16, %s5106_s7 }
 0x707   : > { %2577 = vrot.lane.b32.xlu0 %v8713_v51, %s5106_s7  ;;  %2575 = vrot.lane.b32.xlu1 %v8706_v41, %s5106_s7 }
 0x70b   : > { %2581 = vrot.lane.b32.xlu0 %v8723_v53, %s5106_s7  ;;  %2579 = vrot.lane.b32.xlu1 %v8716_v56, %s5106_s7 }
 0x70f   : > { %2585 = vrot.lane.b32.xlu0 %v8733_v23, %s5106_s7  ;;  %2583 = vrot.lane.b32.xlu1 %v8726_v10, %s5106_s7 }
 0x713   : > { %2597 = vrot.lane.b32.xlu0 %v11715_v16, %s5107_s9  ;;  %2587 = vrot.lane.b32.xlu1 %v8736_v20, %s5106_s7  ;;  %s12617_s7 = smov 48  }
 0x717   : > { %2601 = vrot.lane.b32.xlu0 %v8706_v41, %s5107_s9  ;;  %2599 = vrot.lane.b32.xlu1 %v8703_v26, %s5107_s9 }
 0x71b   : > { %2605 = vrot.lane.b32.xlu0 %v8716_v56, %s5107_s9  ;;  %2603 = vrot.lane.b32.xlu1 %v8713_v51, %s5107_s9 }
 0x71f   : > { %2609 = vrot.lane.b32.xlu0 %v8726_v10, %s5107_s9  ;;  %2607 = vrot.lane.b32.xlu1 %v8723_v53, %s5107_s9 }
 0x723   : > { %2613 = vrot.lane.b32.xlu0 %v8736_v20, %s5107_s9  ;;  %2611 = vrot.lane.b32.xlu1 %v8733_v23, %s5107_s9  ;;  %s12624_s9 = smov 47  }
 0x727   : > { %2625 = vrot.lane.b32.xlu0 %v8703_v26, %s5108_s10  ;;  %2623 = vrot.lane.b32.xlu1 %v11715_v16, %s5108_s10 }
 0x72b   : > { %2629 = vrot.lane.b32.xlu0 %v8713_v51, %s5108_s10  ;;  %2627 = vrot.lane.b32.xlu1 %v8706_v41, %s5108_s10 }
 0x72f   : > { %2633 = vrot.lane.b32.xlu0 %v8723_v53, %s5108_s10  ;;  %2631 = vrot.lane.b32.xlu1 %v8716_v56, %s5108_s10 }
 0x733   : > { %2637 = vrot.lane.b32.xlu0 %v8733_v23, %s5108_s10  ;;  %2635 = vrot.lane.b32.xlu1 %v8726_v10, %s5108_s10 }
 0x737   : > { %2649 = vrot.lane.b32.xlu0 %v11715_v16, %s5109_s20  ;;  %2639 = vrot.lane.b32.xlu1 %v8736_v20, %s5108_s10  ;;  %s12635_s10 = smov 39  }
 0x73b   : > { %2653 = vrot.lane.b32.xlu0 %v8706_v41, %s5109_s20  ;;  %2651 = vrot.lane.b32.xlu1 %v8703_v26, %s5109_s20 }
 0x73f   : > { %2657 = vrot.lane.b32.xlu0 %v8716_v56, %s5109_s20  ;;  %2655 = vrot.lane.b32.xlu1 %v8713_v51, %s5109_s20 }
 0x741   : > { %v8844_v33 = vpop.permute.xlu1 %2495  ;;  %v8846_v2 = vpop.permute.xlu0 %2497 }
 0x743   : > { %2661 = vrot.lane.b32.xlu0 %v8726_v10, %s5109_s20  ;;  %2659 = vrot.lane.b32.xlu1 %v8723_v53, %s5109_s20 }
 0x745   : > { %v8852_v59 = vpop.permute.xlu1 %2499  ;;  %v8854_v55 = vpop.permute.xlu0 %2501 }
 0x747   : > { %2665 = vrot.lane.b32.xlu0 %v8736_v20, %s5109_s20  ;;  %2663 = vrot.lane.b32.xlu1 %v8733_v23, %s5109_s20  ;;  %s12644_s20 = smov 38  }
 0x749   : > { %v8860_v36 = vpop.permute.xlu1 %2503  ;;  %v8862_v52 = vpop.permute.xlu0 %2505 }
 0x74b   : > { %2677 = vrot.lane.b32.xlu0 %v8703_v26, %s5110_s24  ;;  %2675 = vrot.lane.b32.xlu1 %v11715_v16, %s5110_s24 }
 0x74d   : > { %v8868_v29 = vpop.permute.xlu1 %2507  ;;  %v8870_v34 = vpop.permute.xlu0 %2509 }
 0x74e   : > { %12548 = vst [vmem:[#allocation28_spill] sm:$0xff] %v8870_v34 }
 0x74f   : > { %2681 = vrot.lane.b32.xlu0 %v8713_v51, %s5110_s24  ;;  %2679 = vrot.lane.b32.xlu1 %v8706_v41, %s5110_s24 }
 0x751   : > { %v8876_v13 = vpop.permute.xlu1 %2519  ;;  %v8878_v1 = vpop.permute.xlu0 %2521 }
 0x752   : > { %12549 = vst [vmem:[#allocation21_spill] sm:$0xff] %v8876_v13  ;;  %12550 = vst [vmem:[#allocation30_spill] sm:$0xff] %v8878_v1 }
 0x753   : > { %2685 = vrot.lane.b32.xlu0 %v8723_v53, %s5110_s24  ;;  %2683 = vrot.lane.b32.xlu1 %v8716_v56, %s5110_s24 }
 0x755   : > { %v8884_v17 = vpop.permute.xlu1 %2523  ;;  %v8886_v47 = vpop.permute.xlu0 %2525 }
 0x756   : > { %12551 = vst [vmem:[#allocation23_spill] sm:$0xff] %v8884_v17  ;;  %12552 = vst [vmem:[#allocation32_spill] sm:$0xff] %v8886_v47 }
 0x757   : > { %2689 = vrot.lane.b32.xlu0 %v8733_v23, %s5110_s24  ;;  %2687 = vrot.lane.b32.xlu1 %v8726_v10, %s5110_s24 }
 0x759   : > { %v8892_v15 = vpop.permute.xlu1 %2527  ;;  %v8894_v43 = vpop.permute.xlu0 %2529 }
 0x75a   : > { %12553 = vst [vmem:[#allocation25_spill] sm:$0xff] %v8892_v15  ;;  %12554 = vst [vmem:[#allocation34_spill] sm:$0xff] %v8894_v43 }
 0x75b   : > { %2701 = vrot.lane.b32.xlu0 %v11715_v16, %s5111_s28  ;;  %2691 = vrot.lane.b32.xlu1 %v8736_v20, %s5110_s24  ;;  %s12655_s24 = smov 37  }
 0x75d   : > { %v8900_v63 = vpop.permute.xlu1 %2531  ;;  %v8902_v4 = vpop.permute.xlu0 %2533 }
 0x75e   : > { %12555 = vst [vmem:[#allocation27_spill] sm:$0xff] %v8900_v63  ;;  %12556 = vst [vmem:[#allocation36_spill] sm:$0xff] %v8902_v4 }
 0x75f   : > { %2705 = vrot.lane.b32.xlu0 %v8706_v41, %s5111_s28  ;;  %2703 = vrot.lane.b32.xlu1 %v8703_v26, %s5111_s28 }
 0x761   : > { %v8908_v44 = vpop.permute.xlu1 %2535  ;;  %v8910_v14 = vpop.permute.xlu0 %2545 }
 0x762   : > { %12557 = vst [vmem:[#allocation29_spill] sm:$0xff] %v8908_v44  ;;  %12558 = vst [vmem:[#allocation35_spill] sm:$0xff] %v8910_v14 }
 0x763   : > { %2709 = vrot.lane.b32.xlu0 %v8716_v56, %s5111_s28  ;;  %2707 = vrot.lane.b32.xlu1 %v8713_v51, %s5111_s28 }
 0x765   : > { %v8916_v35 = vpop.permute.xlu1 %2547  ;;  %v8918_v3 = vpop.permute.xlu0 %2549 }
 0x766   : > { %12559 = vst [vmem:[#allocation31_spill] sm:$0xff] %v8916_v35  ;;  %12560 = vst [vmem:[#allocation38_spill] sm:$0xff] %v8918_v3 }
 0x767   : > { %2713 = vrot.lane.b32.xlu0 %v8726_v10, %s5111_s28  ;;  %2711 = vrot.lane.b32.xlu1 %v8723_v53, %s5111_s28 }
 0x769   : > { %v8924_v18 = vpop.permute.xlu1 %2551  ;;  %v8926_v49 = vpop.permute.xlu0 %2553 }
 0x76a   : > { %12561 = vst [vmem:[#allocation33_spill] sm:$0xff] %v8924_v18  ;;  %12562 = vst [vmem:[#allocation42_spill] sm:$0xff] %v8926_v49 }
 0x76b   : > { %2717 = vrot.lane.b32.xlu0 %v8736_v20, %s5111_s28  ;;  %2715 = vrot.lane.b32.xlu1 %v8733_v23, %s5111_s28  ;;  %s12664_s28 = smov 29  }
 0x76d   : > { %v8932_v11 = vpop.permute.xlu1 %2555  ;;  %v8934_v24 = vpop.permute.xlu0 %2557 }
 0x76e   : > { %12563 = vst [vmem:[#allocation37_spill] sm:$0xff] %v8932_v11  ;;  %12564 = vst [vmem:[#allocation44_spill] sm:$0xff] %v8934_v24 }
 0x76f   : > { %2729 = vrot.lane.b32.xlu0 %v8703_v26, %s5112_s29  ;;  %2727 = vrot.lane.b32.xlu1 %v11715_v16, %s5112_s29 }
 0x771   : > { %v8940_v32 = vpop.permute.xlu1 %2559  ;;  %v8942_v38 = vpop.permute.xlu0 %2561 }
 0x772   : > { %12565 = vst [vmem:[#allocation40_spill] sm:$0xff] %v8940_v32  ;;  %12566 = vst [vmem:[#allocation46_spill] sm:$0xff] %v8942_v38 }
 0x773   : > { %2733 = vrot.lane.b32.xlu0 %v8713_v51, %s5112_s29  ;;  %2731 = vrot.lane.b32.xlu1 %v8706_v41, %s5112_s29 }
 0x775   : > { %v8948_v57 = vpop.permute.xlu1 %2571  ;;  %v8950_v22 = vpop.permute.xlu0 %2573 }
 0x776   : > { %12567 = vst [vmem:[#allocation39_spill] sm:$0xff] %v8948_v57  ;;  %12568 = vst [vmem:[#allocation48_spill] sm:$0xff] %v8950_v22 }
 0x777   : > { %2737 = vrot.lane.b32.xlu0 %v8723_v53, %s5112_s29  ;;  %2735 = vrot.lane.b32.xlu1 %v8716_v56, %s5112_s29 }
 0x779   : > { %v8956_v9 = vpop.permute.xlu1 %2575  ;;  %v8958_v42 = vpop.permute.xlu0 %2577 }
 0x77a   : > { %12569 = vst [vmem:[#allocation41_spill] sm:$0xff] %v8956_v9  ;;  %12570 = vst [vmem:[#allocation50_spill] sm:$0xff] %v8958_v42 }
 0x77b   : > { %2741 = vrot.lane.b32.xlu0 %v8733_v23, %s5112_s29  ;;  %2739 = vrot.lane.b32.xlu1 %v8726_v10, %s5112_s29 }
 0x77d   : > { %v8964_v19 = vpop.permute.xlu1 %2579  ;;  %v8966_v27 = vpop.permute.xlu0 %2581 }
 0x77e   : > { %12571 = vst [vmem:[#allocation43_spill] sm:$0xff] %v8964_v19  ;;  %12572 = vst [vmem:[#allocation136_spill] sm:$0xff] %v8966_v27 }
 0x77f   : > { %2753 = vrot.lane.b32.xlu0 %v11715_v16, %s5113_s27  ;;  %2743 = vrot.lane.b32.xlu1 %v8736_v20, %s5112_s29  ;;  %s4753_s29 = sshll.u32 %s5287_s8, 6 }
 0x781   : > { %v8972_v5 = vpop.permute.xlu1 %2583  ;;  %v8974_v6 = vpop.permute.xlu0 %2585 }
 0x782   : > { %12573 = vst [vmem:[#allocation130_spill] sm:$0xff] %v8972_v5  ;;  %12574 = vst [vmem:[#allocation127_spill] sm:$0xff] %v8974_v6 }
 0x783   : > { %2757 = vrot.lane.b32.xlu0 %v8706_v41, %s5113_s27  ;;  %2755 = vrot.lane.b32.xlu1 %v8703_v26, %s5113_s27 }
 0x785   : > { %v8980_v12 = vpop.permute.xlu1 %2587  ;;  %v8982_v7 = vpop.permute.xlu0 %2597 }
 0x786   : > { %12575 = vst [vmem:[#allocation125_spill] sm:$0xff] %v8980_v12  ;;  %12576 = vst [vmem:[#allocation123_spill] sm:$0xff] %v8982_v7 }
 0x787   : > { %2761 = vrot.lane.b32.xlu0 %v8716_v56, %s5113_s27  ;;  %2759 = vrot.lane.b32.xlu1 %v8713_v51, %s5113_s27 }
 0x789   : > { %v8988_v30 = vpop.permute.xlu1 %2599  ;;  %v8990_v8 = vpop.permute.xlu0 %2601 }
 0x78a   : > { %12577 = vst [vmem:[#allocation124_spill] sm:$0xff] %v8988_v30  ;;  %12578 = vst [vmem:[#allocation134_spill] sm:$0xff] %v8990_v8 }
 0x78b   : > { %2765 = vrot.lane.b32.xlu0 %v8726_v10, %s5113_s27  ;;  %2763 = vrot.lane.b32.xlu1 %v8723_v53, %s5113_s27 }
 0x78d   : > { %v8996_v48 = vpop.permute.xlu1 %2603  ;;  %v8998_v46 = vpop.permute.xlu0 %2605 }
 0x78e   : > { %12579 = vst [vmem:[#allocation131_spill] sm:$0xff] %v8996_v48  ;;  %12580 = vst [vmem:[#allocation121_spill] sm:$0xff] %v8998_v46 }
 0x78f   : > { %2767 = vrot.lane.b32.xlu1 %v8733_v23, %s5113_s27  ;;  %2769 = vrot.lane.b32.xlu0 %v8736_v20, %s5113_s27  ;;  %s4767_s27 = sshll.u32 %s5175_s19, 10 }
 0x791   : > { %v9004_v31 = vpop.permute.xlu1 %2607  ;;  %v9006_v40 = vpop.permute.xlu0 %2609 }
 0x792   : > { %12581 = vst [vmem:[#allocation117_spill] sm:$0xff] %v9004_v31  ;;  %12582 = vst [vmem:[#allocation119_spill] sm:$0xff] %v9006_v40 }
 0x793   : > { %2779 = vrot.lane.b32.xlu1 %v11715_v16, %s5114_s5  ;;  %2781 = vrot.lane.b32.xlu0 %v8703_v26, %s5114_s5 }
 0x795   : > { %v9012_v39 = vpop.permute.xlu1 %2611  ;;  %v9014_v50 = vpop.permute.xlu0 %2613 }
 0x796   : > { %12583 = vst [vmem:[#allocation132_spill] sm:$0xff] %v9012_v39  ;;  %12584 = vst [vmem:[#allocation129_spill] sm:$0xff] %v9014_v50 }
 0x797   : > { %2783 = vrot.lane.b32.xlu1 %v8706_v41, %s5114_s5  ;;  %2785 = vrot.lane.b32.xlu0 %v8713_v51, %s5114_s5 }
 0x799   : > { %v9020_v21 = vpop.permute.xlu1 %2623  ;;  %v9022_v54 = vpop.permute.xlu0 %2625 }
 0x79a   : > { %12585 = vst [vmem:[#allocation115_spill] sm:$0xff] %v9020_v21  ;;  %12586 = vst [vmem:[#allocation113_spill] sm:$0xff] %v9022_v54 }
 0x79b   : > { %2787 = vrot.lane.b32.xlu1 %v8716_v56, %s5114_s5  ;;  %2789 = vrot.lane.b32.xlu0 %v8723_v53, %s5114_s5 }
 0x79d   : > { %v9028_v16 = vpop.permute.xlu1 %2627  ;;  %v9030_v45 = vpop.permute.xlu0 %2629 }
 0x79e   : > { %12587 = vst [vmem:[#allocation114_spill] sm:$0xff] %v9028_v16  ;;  %12588 = vst [vmem:[#allocation128_spill] sm:$0xff] %v9030_v45 }
 0x79f   : > { %2791 = vrot.lane.b32.xlu1 %v8726_v10, %s5114_s5  ;;  %2793 = vrot.lane.b32.xlu0 %v8733_v23, %s5114_s5 }
 0x7a1   : > { %v9036_v0 = vpop.permute.xlu1 %2631  ;;  %v9038_v60 = vpop.permute.xlu0 %2633 }
 0x7a2   : > { %12589 = vst [vmem:[#allocation126_spill] sm:$0xff] %v9036_v0  ;;  %12590 = vst [vmem:[#allocation111_spill] sm:$0xff] %v9038_v60 }
 0x7a3   : > { %2795 = vrot.lane.b32.xlu1 %v8736_v20, %s5114_s5  ;;  %2805 = vrot.lane.b32.xlu0 %v8703_v26, %s5115_s6  ;;  %s11353_s5 = scalar_lea.vmem [#allocation10], %s4753_s29 }
 0x7a5   : > { %v9044_v58 = vpop.permute.xlu1 %2635  ;;  %v9046_v62 = vpop.permute.xlu0 %2637 }
 0x7a6   : > { %12591 = vst [vmem:[#allocation110_spill] sm:$0xff] %v9044_v58  ;;  %12592 = vst [vmem:[#allocation107_spill] sm:$0xff] %v9046_v62 }
 0x7a7   : > { %2807 = vrot.lane.b32.xlu1 %v8706_v41, %s5115_s6  ;;  %2809 = vrot.lane.b32.xlu0 %v8713_v51, %s5115_s6 }
 0x7a9   : > { %v9052_v25 = vpop.permute.xlu1 %2639  ;;  %v9054_v37 = vpop.permute.xlu0 %2649 }
 0x7aa   : > { %12593 = vst [vmem:[#allocation122_spill] sm:$0xff] %v9052_v25  ;;  %12594 = vst [vmem:[#allocation120_spill] sm:$0xff] %v9054_v37 }
 0x7ab   : > { %2811 = vrot.lane.b32.xlu1 %v8716_v56, %s5115_s6  ;;  %2813 = vrot.lane.b32.xlu0 %v8723_v53, %s5115_s6 }
 0x7ad   : > { %v9060_v61 = vpop.permute.xlu1 %2651  ;;  %v9062_v44 = vpop.permute.xlu0 %2653 }
 0x7ae   : > { %12595 = vst [vmem:[#allocation105_spill] sm:$0xff] %v9060_v61  ;;  %12596 = vst [vmem:[#allocation103_spill] sm:$0xff] %v9062_v44 }
 0x7af   : > { %2815 = vrot.lane.b32.xlu1 %v8726_v10, %s5115_s6  ;;  %2817 = vrot.lane.b32.xlu0 %v8733_v23, %s5115_s6 }
 0x7b1   : > { %v9068_v38 = vpop.permute.xlu1 %2655  ;;  %v9070_v12 = vpop.permute.xlu0 %2657 }
 0x7b2   : > { %12597 = vst [vmem:[#allocation104_spill] sm:$0xff] %v9068_v38  ;;  %12598 = vst [vmem:[#allocation118_spill] sm:$0xff] %v9070_v12 }
 0x7b3   : > { %2819 = vrot.lane.b32.xlu1 %v8736_v20, %s5115_s6  ;;  %2828 = vrot.lane.b32.xlu0 %v8703_v26, %s12599_s21  ;;  %s4643_s6 = sshll.u32 %s11353_s5, 4  ;;  %s11369_s6 = int_to_ptr.vmem [resolvable:$true] %s4643_s6 }
 0x7b5   : > { %v9076_v4 = vpop.permute.xlu1 %2659  ;;  %v9078_v63 = vpop.permute.xlu0 %2661 }
 0x7b6   : > { %12600 = vst [vmem:[#allocation116_spill] sm:$0xff] %v9076_v4  ;;  %12601 = vst [vmem:[#allocation101_spill] sm:$0xff] %v9078_v63 }
 0x7b7   : > { %2830 = vrot.lane.b32.xlu1 %v8706_v41, %s12599_s21  ;;  %2832 = vrot.lane.b32.xlu0 %v8713_v51, %s12599_s21 }
 0x7b9   : > { %v9084_v50 = vpop.permute.xlu1 %2663  ;;  %v9086_v32 = vpop.permute.xlu0 %2665 }
 0x7ba   : > { %12602 = vst [vmem:[#allocation98_spill] sm:$0xff] %v9084_v50  ;;  %12603 = vst [vmem:[#allocation99_spill] sm:$0xff] %v9086_v32  ;;  %v12608_v32 = vmov 0.0  }
 0x7bb   : > { %2834 = vrot.lane.b32.xlu1 %v8716_v56, %s12599_s21  ;;  %2836 = vrot.lane.b32.xlu0 %v8723_v53, %s12599_s21 }
 0x7bd   : > { %v9092_v24 = vpop.permute.xlu1 %2675  ;;  %v9094_v25 = vpop.permute.xlu0 %2677 }
 0x7be   : > { %12604 = vst [vmem:[#allocation112_spill] sm:$0xff] %v9092_v24  ;;  %12605 = vst [vmem:[#allocation109_spill] sm:$0xff] %v9094_v25 }
 0x7bf   : > { %2838 = vrot.lane.b32.xlu1 %v8726_v10, %s12599_s21  ;;  %2840 = vrot.lane.b32.xlu0 %v8733_v23, %s12599_s21 }
 0x7c1   : > { %v9100_v6 = vpop.permute.xlu1 %2679  ;;  %v9102_v5 = vpop.permute.xlu0 %2681 }
 0x7c2   : > { %12606 = vst [vmem:[#allocation97_spill] sm:$0xff] %v9100_v6  ;;  %12607 = vst [vmem:[#allocation95_spill] sm:$0xff] %v9102_v5 }
 0x7c3   : > { %2842 = vrot.lane.b32.xlu1 %v8736_v20, %s12599_s21  ;;  %2844 = vrot.lane.b32.xlu0 %v12608_v32, %s12599_s21  ;;  %s5025_s21 = scalar_lea.vmem %s11369_s6, 1024 }
 0x7c4   : > { %p5026_p12 = scmp.ne.s32.totalorder %s11369_s6, %s5025_s21 }
 0x7c5   : > { %v9108_v39 = vpop.permute.xlu1 %2683  ;;  %v9110_v40 = vpop.permute.xlu0 %2685 }
 0x7c6   : > { %12609 = vst [vmem:[#allocation91_spill] sm:$0xff] %v9108_v39  ;;  %12610 = vst [vmem:[#allocation108_spill] sm:$0xff] %v9110_v40  ;;  %p5027_p7 = pnand %p5026_p12, %p13017_p5 }
 0x7c7   : > { %2854 = vrot.lane.b32.xlu1 %v8703_v26, %s12611_s23  ;;  %2856 = vrot.lane.b32.xlu0 %v8706_v41, %s12611_s23 }
 0x7c8   : > { %p5028_p10 = pneg %p5027_p7 }
 0x7c9   : > { %v9116_v62 = vpop.permute.xlu1 %2687  ;;  %v9118_v58 = vpop.permute.xlu0 %2689 }
 0x7ca   : > { %12612 = vst [vmem:[#allocation106_spill] sm:$0xff] %v9116_v62  ;;  %12613 = vst [vmem:[#allocation93_spill] sm:$0xff] %v9118_v58 }
 0x7cb   : > { %2858 = vrot.lane.b32.xlu1 %v8713_v51, %s12611_s23  ;;  %2860 = vrot.lane.b32.xlu0 %v8716_v56, %s12611_s23 }
 0x7cd   : > { %v9124_v50 = vpop.permute.xlu1 %2691  ;;  %v9126_v63 = vpop.permute.xlu0 %2701 }
 0x7ce   : > { %12614 = vst [vmem:[#allocation85_spill] sm:$0xff] %v9124_v50 }
 0x7cf   : > { %2862 = vrot.lane.b32.xlu1 %v8723_v53, %s12611_s23  ;;  %2864 = vrot.lane.b32.xlu0 %v8726_v10, %s12611_s23 }
 0x7d1   : > { %v9132_v43 = vpop.permute.xlu1 %2703  ;;  %v9134_v62 = vpop.permute.xlu0 %2705 }
 0x7d3   : > { %2866 = vrot.lane.b32.xlu1 %v8733_v23, %s12611_s23  ;;  %2868 = vrot.lane.b32.xlu0 %v8736_v20, %s12611_s23 }
 0x7d5   : > { %v9140_v58 = vpop.permute.xlu1 %2707  ;;  %v9142_v50 = vpop.permute.xlu0 %2709 }
 0x7d7   : > { %2870 = vrot.lane.b32.xlu1 %v12608_v32, %s12611_s23  ;;  %2881 = vrot.lane.b32.xlu0 %v8703_v26, %s12615_s30  ;;  %s5128_s23 = smov [#allocation10]  }
 0x7d9   : > { %v9148_v15 = vpop.permute.xlu1 %2711  ;;  %v9150_v11 = vpop.permute.xlu0 %2713 }
 0x7db   : > { %2883 = vrot.lane.b32.xlu1 %v8706_v41, %s12615_s30  ;;  %2885 = vrot.lane.b32.xlu0 %v8713_v51, %s12615_s30 }
 0x7dd   : > { %v9156_v49 = vpop.permute.xlu1 %2715  ;;  %v9158_v27 = vpop.permute.xlu0 %2717 }
 0x7de   : > { %12616 = vst [vmem:[#allocation90_spill] sm:$0xff] %v9158_v27 }
 0x7df   : > { %2887 = vrot.lane.b32.xlu1 %v8716_v56, %s12615_s30  ;;  %2889 = vrot.lane.b32.xlu0 %v8723_v53, %s12615_s30 }
 0x7e1   : > { %v9164_v19 = vpop.permute.xlu1 %2727  ;;  %v9166_v47 = vpop.permute.xlu0 %2729 }
 0x7e3   : > { %2891 = vrot.lane.b32.xlu1 %v8726_v10, %s12615_s30  ;;  %2893 = vrot.lane.b32.xlu0 %v8733_v23, %s12615_s30 }
 0x7e5   : > { %v9172_v17 = vpop.permute.xlu1 %2731  ;;  %v9174_v14 = vpop.permute.xlu0 %2733 }
 0x7e7   : > { %2895 = vrot.lane.b32.xlu1 %v8736_v20, %s12615_s30  ;;  %2897 = vrot.lane.b32.xlu0 %v12608_v32, %s12615_s30  ;;  %s5029_s30 = sshll.u32 %s5128_s23, 4  ;;  %s5030_s30 = int_to_ptr.vmem [resolvable:$false] %s5029_s30 }
 0x7e8   : > { %p5032_p13 = scmp.lt.s32.totalorder %s11369_s6, %s5030_s30 }
 0x7e9   : > { %v9180_v31 = vpop.permute.xlu1 %2735  ;;  %v9182_v46 = vpop.permute.xlu0 %2737 }
 0x7eb   : > { %2907 = vrot.lane.b32.xlu1 %v8703_v26, %s12617_s7  ;;  %2909 = vrot.lane.b32.xlu0 %v8706_v41, %s12617_s7 }
 0x7ed   : > { %v9188_v18 = vpop.permute.xlu1 %2739  ;;  %v9190_v35 = vpop.permute.xlu0 %2741 }
 0x7ef   : > { %2911 = vrot.lane.b32.xlu1 %v8713_v51, %s12617_s7  ;;  %2913 = vrot.lane.b32.xlu0 %v8716_v56, %s12617_s7 }
 0x7f1   : > { %v9196_v3 = vpop.permute.xlu1 %2743  ;;  %v9198_v57 = vpop.permute.xlu0 %2753 }
 0x7f2   : > { %12618 = vst [vmem:[#allocation100_spill] sm:$0xff] %v9196_v3  ;;  %12619 = vst [vmem:[#allocation102_spill] sm:$0xff] %v9198_v57 }
 0x7f3   : > { %2915 = vrot.lane.b32.xlu1 %v8723_v53, %s12617_s7  ;;  %2917 = vrot.lane.b32.xlu0 %v8726_v10, %s12617_s7 }
 0x7f5   : > { %v9204_v60 = vpop.permute.xlu1 %2755  ;;  %v9206_v0 = vpop.permute.xlu0 %2757 }
 0x7f6   : > { %12620 = vst [vmem:[#allocation83_spill] sm:$0xff] %v9204_v60  ;;  %12621 = vst [vmem:[#allocation81_spill] sm:$0xff] %v9206_v0 }
 0x7f7   : > { %2919 = vrot.lane.b32.xlu1 %v8733_v23, %s12617_s7  ;;  %2921 = vrot.lane.b32.xlu0 %v8736_v20, %s12617_s7 }
 0x7f9   : > { %v9212_v42 = vpop.permute.xlu1 %2759  ;;  %v9214_v22 = vpop.permute.xlu0 %2761 }
 0x7fa   : > { %12622 = vst [vmem:[#allocation82_spill] sm:$0xff] %v9212_v42  ;;  %12623 = vst [vmem:[#allocation96_spill] sm:$0xff] %v9214_v22 }
 0x7fb   : > { %2923 = vrot.lane.b32.xlu1 %v12608_v32, %s12617_s7  ;;  %2933 = vrot.lane.b32.xlu0 %v8703_v26, %s12624_s9  ;;  %s5031_s7 = scalar_lea.vmem %s5030_s30, 2048 }
 0x7fc   : > { %p5033_p0 = scmp.lt.s32.totalorder %s5031_s7, %s5025_s21 }
 0x7fd   : > { %v9220_v9 = vpop.permute.xlu1 %2763  ;;  %v9222_v7 = vpop.permute.xlu0 %2765 }
 0x7fe   : > { %12625 = vst [vmem:[#allocation94_spill] sm:$0xff] %v9220_v9  ;;  %12626 = vst [vmem:[#allocation79_spill] sm:$0xff] %v9222_v7  ;;  %p5034_p1 = por %p5033_p0, %p5032_p13 }
 0x7ff   : > { %2935 = vrot.lane.b32.xlu1 %v8706_v41, %s12624_s9  ;;  %2937 = vrot.lane.b32.xlu0 %v8713_v51, %s12624_s9 }
 0x800   : > { %p5035_p3 = pnand %p5034_p1, %p5028_p10 }
 0x801   : > { %v9228_v4 = vpop.permute.xlu1 %2767  ;;  %v9230_v12 = vpop.permute.xlu0 %2769 }
 0x802   : > { %12627 = vst [vmem:[#allocation164_spill] sm:$0xff] %v9228_v4  ;;  %12628 = vst [vmem:[#allocation165_spill] sm:$0xff] %v9230_v12 }
 0x803   : > { %2939 = vrot.lane.b32.xlu1 %v8716_v56, %s12624_s9  ;;  %2941 = vrot.lane.b32.xlu0 %v8723_v53, %s12624_s9 }
 0x805   : > { %v9236_v48 = vpop.permute.xlu1 %2779  ;;  %v9238_v30 = vpop.permute.xlu0 %2781 }
 0x806   : > { %12629 = vst [vmem:[#allocation87_spill] sm:$0xff] %v9236_v48  ;;  %12630 = vst [vmem:[#allocation92_spill] sm:$0xff] %v9238_v30  ;;  %v4873_v30 = vpack.i.bf16 %v8838_v28, %v12608_v32 }
 0x807   : > { %2943 = vrot.lane.b32.xlu1 %v8726_v10, %s12624_s9  ;;  %2945 = vrot.lane.b32.xlu0 %v8733_v23, %s12624_s9 }
 0x809   : > { %v9244_v7 = vpop.permute.xlu1 %2783  ;;  %v9246_v4 = vpop.permute.xlu0 %2785 }
 0x80a   : > { %12631 = vst [vmem:[#allocation162_spill] sm:$0xff] %v9244_v7  ;;  %12632 = vst [vmem:[#allocation157_spill] sm:$0xff] %v9246_v4 }
 0x80b   : > { %2947 = vrot.lane.b32.xlu1 %v8736_v20, %s12624_s9  ;;  %2949 = vrot.lane.b32.xlu0 %v12608_v32, %s12624_s9 }
 0x80d   : > { %v9252_v12 = vpop.permute.xlu1 %2787  ;;  %v9254_v8 = vpop.permute.xlu0 %2789 }
 0x80e   : > { %12633 = vst [vmem:[#allocation155_spill] sm:$0xff] %v9252_v12  ;;  %12634 = vst [vmem:[#allocation86_spill] sm:$0xff] %v9254_v8 }
 0x80f   : > { %2959 = vrot.lane.b32.xlu1 %v8703_v26, %s12635_s10  ;;  %2961 = vrot.lane.b32.xlu0 %v8706_v41, %s12635_s10 }
 0x811   : > { %v9260_v21 = vpop.permute.xlu1 %2791  ;;  %v9262_v40 = vpop.permute.xlu0 %2793 }
 0x812   : > { %12636 = vst [vmem:[#allocation84_spill] sm:$0xff] %v9260_v21  ;;  %12637 = vst [vmem:[#allocation156_spill] sm:$0xff] %v9262_v40 }
 0x813   : > { %2963 = vrot.lane.b32.xlu1 %v8713_v51, %s12635_s10  ;;  %2965 = vrot.lane.b32.xlu0 %v8716_v56, %s12635_s10 }
 0x815   : > { %v9268_v39 = vpop.permute.xlu1 %2795  ;;  %v9270_v45 = vpop.permute.xlu0 %2805 }
 0x816   : > { %12638 = vst [vmem:[#allocation69_spill] sm:$0xff] %v9268_v39  ;;  %12639 = vst [vmem:[#allocation71_spill] sm:$0xff] %v9270_v45 }
 0x817   : > { %2967 = vrot.lane.b32.xlu1 %v8723_v53, %s12635_s10  ;;  %2969 = vrot.lane.b32.xlu0 %v8726_v10, %s12635_s10 }
 0x819   : > { %v9276_v54 = vpop.permute.xlu1 %2807  ;;  %v9278_v21 = vpop.permute.xlu0 %2809 }
 0x81a   : > { %12640 = vst [vmem:[#allocation75_spill] sm:$0xff] %v9276_v54  ;;  %12641 = vst [vmem:[#allocation76_spill] sm:$0xff] %v9278_v21  ;;  %v9435_v54 = vsel %vm294_vm0, %v8846_v2, %v8852_v59 }
 0x81b   : > { %2971 = vrot.lane.b32.xlu1 %v8733_v23, %s12635_s10  ;;  %2973 = vrot.lane.b32.xlu0 %v8736_v20, %s12635_s10 }
 0x81d   : > { %v9284_v40 = vpop.permute.xlu1 %2811  ;;  %v9286_v39 = vpop.permute.xlu0 %2813 }
 0x81e   : > { %12642 = vst [vmem:[#allocation67_spill] sm:$0xff] %v9284_v40  ;;  %12643 = vst [vmem:[#allocation66_spill] sm:$0xff] %v9286_v39 }
 0x81f   : > { %2975 = vrot.lane.b32.xlu1 %v12608_v32, %s12635_s10  ;;  %2985 = vrot.lane.b32.xlu0 %v8703_v26, %s12644_s20 }
 0x821   : > { %v9292_v16 = vpop.permute.xlu1 %2815  ;;  %v9294_v37 = vpop.permute.xlu0 %2817 }
 0x822   : > { %12645 = vst [vmem:[#allocation59_spill] sm:$0xff] %v9292_v16  ;;  %12646 = vst [vmem:[#allocation159_spill] sm:$0xff] %v9294_v37 }
 0x823   : > { %2987 = vrot.lane.b32.xlu1 %v8706_v41, %s12644_s20  ;;  %2989 = vrot.lane.b32.xlu0 %v8713_v51, %s12644_s20 }
 0x825   : > { %v9300_v38 = vpop.permute.xlu1 %2819  ;;  %v9302_v61 = vpop.permute.xlu0 %2828 }
 0x826   : > { %12647 = vst [vmem:[#allocation74_spill] sm:$0xff] %v9300_v38  ;;  %12648 = vst [vmem:[#allocation64_spill] sm:$0xff] %v9302_v61 }
 0x827   : > { %2991 = vrot.lane.b32.xlu1 %v8716_v56, %s12644_s20  ;;  %2993 = vrot.lane.b32.xlu0 %v8723_v53, %s12644_s20 }
 0x829   : > { %v9308_v44 = vpop.permute.xlu1 %2830  ;;  %v9310_v16 = vpop.permute.xlu0 %2832 }
 0x82a   : > { %12649 = vst [vmem:[#allocation51_spill] sm:$0xff] %v9308_v44  ;;  %12650 = vst [vmem:[#allocation53_spill] sm:$0xff] %v9310_v16  ;;  %v9440_v16 = vsel %vm294_vm0, %v8852_v59, %v8854_v55  ;;  %v9458_v59 = vsel %vm294_vm0, %v8860_v36, %v8862_v52 }
 0x82b   : > { %2995 = vrot.lane.b32.xlu1 %v8726_v10, %s12644_s20  ;;  %2997 = vrot.lane.b32.xlu0 %v8733_v23, %s12644_s20  ;;  %12669 = vst [vmem:[#allocation70_spill] sm:$0xff] %v9458_v59 }
 0x82d   : > { %v9316_v37 = vpop.permute.xlu1 %2834  ;;  %v9318_v38 = vpop.permute.xlu0 %2836 }
 0x82e   : > { %12651 = vst [vmem:[#allocation73_spill] sm:$0xff] %v9316_v37  ;;  %12652 = vst [vmem:[#allocation150_spill] sm:$0xff] %v9318_v38 }
 0x82f   : > { %2999 = vrot.lane.b32.xlu1 %v8736_v20, %s12644_s20  ;;  %3001 = vrot.lane.b32.xlu0 %v12608_v32, %s12644_s20 }
 0x831   : > { %v9324_v24 = vpop.permute.xlu1 %2838  ;;  %v9326_v5 = vpop.permute.xlu0 %2840 }
 0x832   : > { %12653 = vst [vmem:[#allocation49_spill] sm:$0xff] %v9324_v24  ;;  %12654 = vst [vmem:[#allocation68_spill] sm:$0xff] %v9326_v5 }
 0x833   : > { %3011 = vrot.lane.b32.xlu1 %v8703_v26, %s12655_s24  ;;  %3013 = vrot.lane.b32.xlu0 %v8706_v41, %s12655_s24 }
 0x835   : > { %v9332_v25 = vpop.permute.xlu1 %2842  ;;  %v9334_v6 = vpop.permute.xlu0 %2844 }
 0x836   : > { %12656 = vst [vmem:[#allocation61_spill] sm:$0xff] %v9332_v25  ;;  %12657 = vst [vmem:[#allocation149_spill] sm:$0xff] %v9334_v6 }
 0x837   : > { %3015 = vrot.lane.b32.xlu1 %v8713_v51, %s12655_s24  ;;  %3017 = vrot.lane.b32.xlu0 %v8716_v56, %s12655_s24 }
 0x839   : > { %v9340_v9 = vpop.permute.xlu1 %2854  ;;  %v9342_v24 = vpop.permute.xlu0 %2856 }
 0x83a   : > { %12658 = vst [vmem:[#allocation72_spill] sm:$0xff] %v9340_v9  ;;  %12659 = vst [vmem:[#allocation55_spill] sm:$0xff] %v9342_v24 }
 0x83b   : > { %3019 = vrot.lane.b32.xlu1 %v8723_v53, %s12655_s24  ;;  %3021 = vrot.lane.b32.xlu0 %v8726_v10, %s12655_s24 }
 0x83d   : > { %v9348_v5 = vpop.permute.xlu1 %2858  ;;  %v9350_v25 = vpop.permute.xlu0 %2860 }
 0x83e   : > { %12660 = vst [vmem:[#allocation56_spill] sm:$0xff] %v9348_v5  ;;  %12661 = vst [vmem:[#allocation153_spill] sm:$0xff] %v9350_v25  ;;  %v9423_v25 = vsel %vm294_vm0, %v8844_v33, %v8846_v2  ;;  %v9453_v2 = vsel %vm294_vm0, %v8854_v55, %v8860_v36  ;;  %v9471_v55 = vsel %vm294_vm0, %v8862_v52, %v8868_v29 }
 0x83f   : > { %3023 = vrot.lane.b32.xlu1 %v8733_v23, %s12655_s24  ;;  %3025 = vrot.lane.b32.xlu0 %v8736_v20, %s12655_s24  ;;  %12668 = vst [vmem:[#allocation65_spill] sm:$0xff] %v9453_v2  ;;  %12670 = vst [vmem:[#allocation47_spill] sm:$0xff] %v9471_v55  ;;  %v9476_v36 = vsel %vm294_vm0, %v8868_v29, %v8870_v34  ;;  %v2880_v52 = vsel %vm294_vm0, %v8870_v34, %v8838_v28 }
 0x840   : > { %12671 = vst [vmem:[#allocation52_spill] sm:$0xff] %v9476_v36 }
 0x841   : > { %v9356_v6 = vpop.permute.xlu1 %2862  ;;  %v9358_v22 = vpop.permute.xlu0 %2864 }
 0x842   : > { %12662 = vst [vmem:[#allocation60_spill] sm:$0xff] %v9356_v6  ;;  %12663 = vst [vmem:[#allocation62_spill] sm:$0xff] %v9358_v22 }
 0x843   : > { %3027 = vrot.lane.b32.xlu1 %v12608_v32, %s12655_s24  ;;  %3037 = vrot.lane.b32.xlu0 %v8703_v26, %s12664_s28 }
 0x845   : > { %v9364_v8 = vpop.permute.xlu1 %2866  ;;  %v9366_v12 = vpop.permute.xlu0 %2868 }
 0x846   : > { %12665 = vst [vmem:[#allocation16_spill] sm:$0xff] %v9364_v8  ;;  %12666 = vst [vmem:[#allocation18_spill] sm:$0xff] %v9366_v12 }
 0x847   : > { %3039 = vrot.lane.b32.xlu1 %v8706_v41, %s12664_s28  ;;  %3041 = vrot.lane.b32.xlu0 %v8713_v51, %s12664_s28 }
 0x849   : > { %v9372_v57 = vpop.permute.xlu1 %2870  ;;  %v2882_v39 = vpop.permute.xlu0 %2881 }
 0x84a   : > { %12667 = vst [vmem:[#allocation45_spill] sm:$0xff] %v9372_v57 }
 0x84b   : > { %3043 = vrot.lane.b32.xlu1 %v8716_v56, %s12664_s28  ;;  %3045 = vrot.lane.b32.xlu0 %v8723_v53, %s12664_s28 }
 0x84d   : > { %v2884_v22 = vpop.permute.xlu1 %2883  ;;  %v2886_v40 = vpop.permute.xlu0 %2885 }
 0x84e   : > { %v2899_v13 = vsel %vm700_vm1, %v2882_v39, %v2884_v22 }
 0x84f   : > { %3047 = vrot.lane.b32.xlu1 %v8726_v10, %s12664_s28  ;;  %3049 = vrot.lane.b32.xlu0 %v8733_v23, %s12664_s28 }
 0x851   : > { %v2888_v12 = vpop.permute.xlu1 %2887  ;;  %v2890_v8 = vpop.permute.xlu0 %2889 }
 0x853   : > { %3051 = vrot.lane.b32.xlu1 %v8736_v20, %s12664_s28  ;;  %3053 = vrot.lane.b32.xlu0 %v12608_v32, %s12664_s28 }
 0x855   : > { %v2892_v57 = vpop.permute.xlu1 %2891  ;;  %v2894_v42 = vpop.permute.xlu0 %2893 }
 0x856   : > { %v2903_v39 = vsel %vm700_vm1, %v2890_v8, %v2892_v57 }
 0x857   : > { %3065 = vrot.lane.b32.xlu1 %v8703_v26, %s5125_s12  ;;  %3067 = vrot.lane.b32.xlu0 %v8706_v41, %s5125_s12 }
 0x859   : > { %v9390_v60 = vpop.permute.xlu1 %2895  ;;  %v9392_v0 = vpop.permute.xlu0 %2897 }
 0x85b   : > { %3069 = vrot.lane.b32.xlu1 %v8713_v51, %s5125_s12  ;;  %3071 = vrot.lane.b32.xlu0 %v8716_v56, %s5125_s12 }
 0x85d   : > { %v9398_v48 = vpop.permute.xlu1 %2907  ;;  %v9400_v38 = vpop.permute.xlu0 %2909 }
 0x85f   : > { %3073 = vrot.lane.b32.xlu1 %v8723_v53, %s5125_s12  ;;  %3075 = vrot.lane.b32.xlu0 %v8726_v10, %s5125_s12 }
 0x861   : > { %v9406_v37 = vpop.permute.xlu1 %2911  ;;  %v9408_v4 = vpop.permute.xlu0 %2913 }
 0x863   : > { %3077 = vrot.lane.b32.xlu1 %v8733_v23, %s5125_s12  ;;  %3079 = vrot.lane.b32.xlu0 %v8736_v20, %s5125_s12 }
 0x865   : > { %v9416_v7 = vpop.permute.xlu1 %2915  ;;  %v9418_v6 = vpop.permute.xlu0 %2917 }
 0x867   : > { %4874 = vrot.lane.b32.xlu1 %v4873_v30, %s5125_s12  ;;  %3083 = vrot.lane.b32.xlu0 %v9423_v25, %s5125_s12 }
 0x869   : > { %v9428_v21 = vpop.permute.xlu1 %2919  ;;  %v9430_v45 = vpop.permute.xlu0 %2921 }
 0x86b   : > { %3085 = vrot.lane.b32.xlu1 %v9435_v54, %s5125_s12  ;;  %3087 = vrot.lane.b32.xlu0 %v9440_v16, %s5125_s12 }
 0x86d   : > { %v9446_v30 = vpop.permute.xlu1 %2923  ;;  %v9448_v61 = vpop.permute.xlu0 %2933 }
 0x86f   : > { %3089 = vrot.lane.b32.xlu1 %v9453_v2, %s5125_s12  ;;  %3091 = vrot.lane.b32.xlu0 %v9458_v59, %s5125_s12 }
 0x871   : > { %v9464_v44 = vpop.permute.xlu1 %2935  ;;  %v9466_v5 = vpop.permute.xlu0 %2937 }
 0x873   : > { %3093 = vrot.lane.b32.xlu1 %v9471_v55, %s5125_s12  ;;  %3095 = vrot.lane.b32.xlu0 %v9476_v36, %s5125_s12  ;;  %v2901_v36 = vsel %vm700_vm1, %v2886_v40, %v2888_v12  ;;  %v2900_v55 = vsel %vm700_vm1, %v2884_v22, %v2886_v40  ;;  %v2905_v22 = vsel %vm700_vm1, %v2894_v42, %v9390_v60 }
 0x874   : > { %v2904_v40 = vsel %vm700_vm1, %v2892_v57, %v2894_v42 }
 0x875   : > { %v9482_v9 = vpop.permute.xlu1 %2939  ;;  %v9484_v24 = vpop.permute.xlu0 %2941 }
 0x877   : > { %3097 = vrot.lane.b32.xlu1 %v2880_v52, %s5125_s12  ;;  %3101 = vrot.lane.b32.xlu0 %v2899_v13, %s5125_s12  ;;  %v2902_v13 = vsel %vm700_vm1, %v2888_v12, %v2890_v8  ;;  %v4878_v12 = vpack.i.bf16 %v9446_v30, %v9392_v0 }
 0x879   : > { %v9492_v29 = vpop.permute.xlu1 %2943  ;;  %v9494_v1 = vpop.permute.xlu0 %2945 }
 0x87b   : > { %3105 = vrot.lane.b32.xlu0 %v2901_v36, %s5125_s12  ;;  %3103 = vrot.lane.b32.xlu1 %v2900_v55, %s5125_s12  ;;  %v2906_v36 = vsel %vm700_vm1, %v9390_v60, %v9392_v0 }
 0x87d   : > { %v9500_v59 = vpop.permute.xlu1 %2947  ;;  %v9502_v34 = vpop.permute.xlu0 %2949 }
 0x87f   : > { %3109 = vrot.lane.b32.xlu0 %v2903_v39, %s5125_s12  ;;  %3107 = vrot.lane.b32.xlu1 %v2902_v13, %s5125_s12  ;;  %v2926_v39 = vsel %vm727_vm2, %v9400_v38, %v9406_v37  ;;  %v2925_v13 = vsel %vm727_vm2, %v9398_v48, %v9400_v38 }
 0x881   : > { %v9508_v52 = vpop.permute.xlu1 %2959  ;;  %v9510_v2 = vpop.permute.xlu0 %2961 }
 0x883   : > { %3113 = vrot.lane.b32.xlu0 %v2905_v22, %s5125_s12  ;;  %3111 = vrot.lane.b32.xlu1 %v2904_v40, %s5125_s12  ;;  %v2928_v22 = vsel %vm727_vm2, %v9408_v4, %v9416_v7  ;;  %v2927_v40 = vsel %vm727_vm2, %v9406_v37, %v9408_v4 }
 0x885   : > { %v9519_v8 = vpop.permute.xlu1 %2963  ;;  %v9521_v55 = vpop.permute.xlu0 %2965 }
 0x887   : > { %3115 = vrot.lane.b32.xlu1 %v2906_v36, %s5125_s12  ;;  %4879 = vrot.lane.b32.xlu0 %v4878_v12, %s5125_s12  ;;  %v2930_v12 = vsel %vm727_vm2, %v9418_v6, %v9428_v21  ;;  %v2929_v36 = vsel %vm727_vm2, %v9416_v7, %v9418_v6 }
 0x889   : > { %v9528_v57 = vpop.permute.xlu1 %2967  ;;  %v9530_v42 = vpop.permute.xlu0 %2969 }
 0x88b   : > { %3121 = vrot.lane.b32.xlu0 %v2926_v39, %s5125_s12  ;;  %3119 = vrot.lane.b32.xlu1 %v2925_v13, %s5125_s12  ;;  %v2932_v39 = vsel %vm727_vm2, %v9430_v45, %v9446_v30  ;;  %v2931_v13 = vsel %vm727_vm2, %v9428_v21, %v9430_v45  ;;  %v2952_v30 = vsel %vm754_vm3, %v9464_v44, %v9466_v5  ;;  %vm12737_vm2 = vcmask 146432  }
 0x88d   : > { %v9540_v60 = vpop.permute.xlu1 %2971  ;;  %v9542_v0 = vpop.permute.xlu0 %2973 }
 0x88f   : > { %3125 = vrot.lane.b32.xlu0 %v2928_v22, %s5125_s12  ;;  %3123 = vrot.lane.b32.xlu1 %v2927_v40, %s5125_s12  ;;  %v2951_v22 = vsel %vm754_vm3, %v9448_v61, %v9464_v44  ;;  %v2953_v40 = vsel %vm754_vm3, %v9466_v5, %v9482_v9  ;;  %v2954_v61 = vsel %vm754_vm3, %v9482_v9, %v9484_v24 }
 0x890   : > { %v2956_v5 = vsel %vm754_vm3, %v9492_v29, %v9494_v1 }
 0x891   : > { %v9552_v38 = vpop.permute.xlu1 %2975  ;;  %v9554_v48 = vpop.permute.xlu0 %2985 }
 0x893   : > { %3129 = vrot.lane.b32.xlu0 %v2930_v12, %s5125_s12  ;;  %3127 = vrot.lane.b32.xlu1 %v2929_v36, %s5125_s12  ;;  %v2955_v36 = vsel %vm754_vm3, %v9484_v24, %v9492_v29  ;;  %v2958_v24 = vsel %vm754_vm3, %v9500_v59, %v9502_v34  ;;  %v4883_v29 = vpack.i.bf16 %v9552_v38, %v9502_v34 }
 0x894   : > { %v2979_v34 = vsel %vm781_vm4, %v9519_v8, %v9521_v55 }
 0x895   : > { %v9564_v37 = vpop.permute.xlu1 %2987  ;;  %v9566_v4 = vpop.permute.xlu0 %2989 }
 0x897   : > { %3133 = vrot.lane.b32.xlu0 %v2932_v39, %s5125_s12  ;;  %3131 = vrot.lane.b32.xlu1 %v2931_v13, %s5125_s12  ;;  %v2957_v13 = vsel %vm754_vm3, %v9494_v1, %v9500_v59  ;;  %vm12739_vm3 = vmmov %vm12737_vm2 }
 0x899   : > { %v9576_v6 = vpop.permute.xlu1 %2991  ;;  %v9578_v7 = vpop.permute.xlu0 %2993 }
 0x89b   : > { %3137 = vrot.lane.b32.xlu1 %v2951_v22, %s5125_s12  ;;  %3139 = vrot.lane.b32.xlu0 %v2952_v30, %s5125_s12 }
 0x89d   : > { %v9588_v45 = vpop.permute.xlu1 %2995  ;;  %v9590_v21 = vpop.permute.xlu0 %2997 }
 0x89f   : > { %3141 = vrot.lane.b32.xlu1 %v2953_v40, %s5125_s12  ;;  %3143 = vrot.lane.b32.xlu0 %v2954_v61, %s5125_s12  ;;  %v2977_v40 = vsel %vm781_vm4, %v9508_v52, %v9510_v2  ;;  %v2978_v61 = vsel %vm781_vm4, %v9510_v2, %v9519_v8  ;;  %v2981_v2 = vsel %vm781_vm4, %v9528_v57, %v9530_v42 }
 0x8a1   : > { %v9600_v44 = vpop.permute.xlu1 %2999  ;;  %v9602_v12 = vpop.permute.xlu0 %3001 }
 0x8a3   : > { %3145 = vrot.lane.b32.xlu1 %v2955_v36, %s5125_s12  ;;  %3147 = vrot.lane.b32.xlu0 %v2956_v5, %s5125_s12  ;;  %v2980_v5 = vsel %vm781_vm4, %v9521_v55, %v9528_v57 }
 0x8a5   : > { %v9612_v9 = vpop.permute.xlu1 %3011  ;;  %v9614_v39 = vpop.permute.xlu0 %3013 }
 0x8a7   : > { %3149 = vrot.lane.b32.xlu1 %v2957_v13, %s5125_s12  ;;  %3151 = vrot.lane.b32.xlu0 %v2958_v24, %s5125_s12  ;;  %v2982_v24 = vsel %vm781_vm4, %v9530_v42, %v9540_v60 }
 0x8a9   : > { %v9626_v22 = vpop.permute.xlu1 %3015  ;;  %v3018_v30 = vpop.permute.xlu0 %3017 }
 0x8ab   : > { %4884 = vrot.lane.b32.xlu1 %v4883_v29, %s5125_s12  ;;  %3155 = vrot.lane.b32.xlu0 %v2977_v40, %s5125_s12  ;;  %v2983_v29 = vsel %vm781_vm4, %v9540_v60, %v9542_v0  ;;  %v2984_v40 = vsel %vm781_vm4, %v9542_v0, %v9552_v38  ;;  %vm12743_vm4 = vmmov %vm12737_vm2 }
 0x8ad   : > { %v9633_v1 = vpop.permute.xlu1 %3019  ;;  %v9635_v59 = vpop.permute.xlu0 %3021 }
 0x8af   : > { %3157 = vrot.lane.b32.xlu1 %v2978_v61, %s5125_s12  ;;  %3159 = vrot.lane.b32.xlu0 %v2979_v34, %s5125_s12  ;;  %v3003_v61 = vsel %vm808_vm5, %v9554_v48, %v9564_v37  ;;  %v3005_v34 = vsel %vm808_vm5, %v9566_v4, %v9576_v6  ;;  %v3007_v48 = vsel %vm808_vm5, %v9578_v7, %v9588_v45 }
 0x8b1   : > { %v9645_v52 = vpop.permute.xlu1 %3023  ;;  %v9647_v36 = vpop.permute.xlu0 %3025 }
 0x8b3   : > { %3161 = vrot.lane.b32.xlu1 %v2980_v5, %s5125_s12  ;;  %3163 = vrot.lane.b32.xlu0 %v2981_v2, %s5125_s12  ;;  %v3004_v5 = vsel %vm808_vm5, %v9564_v37, %v9566_v4  ;;  %v3006_v2 = vsel %vm808_vm5, %v9576_v6, %v9578_v7  ;;  %v3009_v4 = vsel %vm808_vm5, %v9590_v21, %v9600_v44 }
 0x8b5   : > { %v3028_v8 = vpop.permute.xlu1 %3027  ;;  %v3038_v13 = vpop.permute.xlu0 %3037 }
 0x8b6   : > { %v4888_v6 = vpack.i.bf16 %v3028_v8, %v9602_v12 }
 0x8b7   : > { %3165 = vrot.lane.b32.xlu1 %v2982_v24, %s5125_s12  ;;  %3167 = vrot.lane.b32.xlu0 %v2983_v29, %s5125_s12  ;;  %v3008_v29 = vsel %vm808_vm5, %v9588_v45, %v9590_v21  ;;  %v3030_v21 = vsel %vm835_vm6, %v9614_v39, %v9626_v22 }
 0x8b9   : > { %v3040_v55 = vpop.permute.xlu1 %3039  ;;  %v3042_v57 = vpop.permute.xlu0 %3041 }
 0x8bb   : > { %3169 = vrot.lane.b32.xlu1 %v2984_v40, %s5125_s12  ;;  %3173 = vrot.lane.b32.xlu0 %v3003_v61, %s5125_s12  ;;  %v3010_v61 = vsel %vm808_vm5, %v9600_v44, %v9602_v12  ;;  %vm12746_vm5 = vcmask 211968  }
 0x8bd   : > { %v3044_v42 = vpop.permute.xlu1 %3043  ;;  %v3046_v60 = vpop.permute.xlu0 %3045 }
 0x8bf   : > { %3177 = vrot.lane.b32.xlu0 %v3005_v34, %s5125_s12  ;;  %3175 = vrot.lane.b32.xlu1 %v3004_v5, %s5125_s12  ;;  %v3029_v5 = vsel %vm835_vm6, %v9612_v9, %v9614_v39  ;;  %v3034_v39 = vsel %vm835_vm6, %v9635_v59, %v9645_v52 }
 0x8c1   : > { %v3048_v0 = vpop.permute.xlu1 %3047  ;;  %v3050_v38 = vpop.permute.xlu0 %3049 }
 0x8c3   : > { %3181 = vrot.lane.b32.xlu0 %v3007_v48, %s5125_s12  ;;  %3179 = vrot.lane.b32.xlu1 %v3006_v2, %s5125_s12  ;;  %v3032_v48 = vsel %vm835_vm6, %v3018_v30, %v9633_v1  ;;  %v3031_v2 = vsel %vm835_vm6, %v9626_v22, %v3018_v30 }
 0x8c5   : > { %v3052_v24 = vpop.permute.xlu1 %3051  ;;  %v9689_v37 = vpop.permute.xlu0 %3053 }
 0x8c7   : > { %3185 = vrot.lane.b32.xlu0 %v3009_v4, %s5125_s12  ;;  %3183 = vrot.lane.b32.xlu1 %v3008_v29, %s5125_s12  ;;  %v3033_v29 = vsel %vm835_vm6, %v9633_v1, %v9635_v59 }
 0x8c9   : > { %v9700_v7 = vpop.permute.xlu1 %3065  ;;  %v9702_v40 = vpop.permute.xlu0 %3067 }
 0x8ca   : > { %12672 = vst [vmem:[#allocation77_spill] sm:$0xff] %v9700_v7  ;;  %12673 = vst [vmem:[#allocation154_spill] sm:$0xff] %v9702_v40  ;;  %v12849_v40 = vld [vmem:[#allocation32_spill] sm:$0xff] }
 0x8cb   : > { %3187 = vrot.lane.b32.xlu1 %v3010_v61, %s5125_s12  ;;  %4889 = vrot.lane.b32.xlu0 %v4888_v6, %s5125_s12  ;;  %v3036_v6 = vsel %vm835_vm6, %v9647_v36, %v3028_v8  ;;  %v3035_v61 = vsel %vm835_vm6, %v9645_v52, %v9647_v36  ;;  %v3057_v52 = vsel %vm862_vm7, %v3042_v57, %v3044_v42  ;;  %vm12749_vm6 = vmmov %vm12746_vm5 }
 0x8cc   : > { %v3058_v36 = vsel %vm862_vm7, %v3044_v42, %v3046_v60  ;;  %v3061_v42 = vsel %vm862_vm7, %v3050_v38, %v3052_v24 }
 0x8cd   : > { %v9709_v34 = vpop.permute.xlu1 %3069  ;;  %v9711_v45 = vpop.permute.xlu0 %3071 }
 0x8ce   : > { %12674 = vst [vmem:[#allocation58_spill] sm:$0xff] %v9709_v34  ;;  %12675 = vst [vmem:[#allocation15_spill] sm:$0xff] %v9711_v45  ;;  %v12738_v45 = vld [vmem:[#allocation157_spill] sm:$0xff]  ;;  %v12755_v34 = vld [vmem:[#allocation102_spill] sm:$0xff] }
 0x8cf   : > { %3193 = vrot.lane.b32.xlu0 %v3030_v21, %s5125_s12  ;;  %3191 = vrot.lane.b32.xlu1 %v3029_v5, %s5125_s12  ;;  %v3055_v21 = vsel %vm862_vm7, %v3038_v13, %v3040_v55  ;;  %v3056_v5 = vsel %vm862_vm7, %v3040_v55, %v3042_v57  ;;  %v3059_v55 = vsel %vm862_vm7, %v3046_v60, %v3048_v0 }
 0x8d0   : > { %v4893_v60 = vpack.i.bf16 %v9126_v63, %v9689_v37 }
 0x8d1   : > { %v9721_v44 = vpop.permute.xlu1 %3073  ;;  %v9723_v12 = vpop.permute.xlu0 %3075 }
 0x8d2   : > { %12676 = vst [vmem:[#allocation161_spill] sm:$0xff] %v9721_v44  ;;  %12677 = vst [vmem:[#allocation88_spill] sm:$0xff] %v9723_v12  ;;  %v12736_v44 = vld [vmem:[#allocation92_spill] sm:$0xff] }
 0x8d3   : > { %3197 = vrot.lane.b32.xlu0 %v3032_v48, %s5125_s12  ;;  %3195 = vrot.lane.b32.xlu1 %v3031_v2, %s5125_s12 }
 0x8d5   : > { %v9731_v4 = vpop.permute.xlu1 %3077  ;;  %v9733_v9 = vpop.permute.xlu0 %3079 }
 0x8d6   : > { %12678 = vst [vmem:[#allocation163_spill] sm:$0xff] %v9731_v4  ;;  %12679 = vst [vmem:[#allocation63_spill] sm:$0xff] %v9733_v9  ;;  %v9895_v4 = vsel %vm537_vm9, %v9182_v46, %v9188_v18 }
 0x8d7   : > { %3201 = vrot.lane.b32.xlu0 %v3034_v39, %s5125_s12  ;;  %3199 = vrot.lane.b32.xlu1 %v3033_v29, %s5125_s12  ;;  %v3060_v39 = vsel %vm862_vm7, %v3048_v0, %v3050_v38  ;;  %12696 = vst [vmem:[#allocation158_spill] sm:$0xff] %v9895_v4 }
 0x8d9   : > { %v9743_v22 = vpop.permute.xlu1 %4874  ;;  %v9745_v30 = vpop.permute.xlu0 %3083 }
 0x8da   : > { %12680 = vst [vmem:[#allocation80_spill] sm:$0xff] %v9743_v22  ;;  %v9877_v22 = vsel %vm537_vm9, %v9174_v14, %v9180_v31 }
 0x8db   : > { %3205 = vrot.lane.b32.xlu0 %v3036_v6, %s5125_s12  ;;  %3203 = vrot.lane.b32.xlu1 %v3035_v61, %s5125_s12  ;;  %v3062_v6 = vsel %vm862_vm7, %v3052_v24, %v9689_v37  ;;  %v9808_v37 = vsel %vm510_vm8, %v9140_v58, %v9142_v50 }
 0x8dd   : > { %v9754_v1 = vpop.permute.xlu1 %3085  ;;  %v9756_v59 = vpop.permute.xlu0 %3087 }
 0x8df   : > { %3209 = vrot.lane.b32.xlu1 %v3055_v21, %s5125_s12  ;;  %3211 = vrot.lane.b32.xlu0 %v3056_v5, %s5125_s12  ;;  %v9796_v21 = vsel %vm510_vm8, %v9132_v43, %v9134_v62  ;;  %v9813_v5 = vsel %vm510_vm8, %v9134_v62, %v9140_v58  ;;  %v9831_v62 = vsel %vm510_vm8, %v9142_v50, %v9148_v15 }
 0x8e1   : > { %v9762_v8 = vpop.permute.xlu1 %3089  ;;  %v9764_v48 = vpop.permute.xlu0 %3091 }
 0x8e2   : > { %12681 = vst [vmem:[#allocation78_spill] sm:$0xff] %v9762_v8  ;;  %12682 = vst [vmem:[#allocation152_spill] sm:$0xff] %v9764_v48 }
 0x8e3   : > { %3213 = vrot.lane.b32.xlu1 %v3057_v52, %s5125_s12  ;;  %3215 = vrot.lane.b32.xlu0 %v3058_v36, %s5125_s12 }
 0x8e5   : > { %v9770_v2 = vpop.permute.xlu1 %3093  ;;  %v9772_v13 = vpop.permute.xlu0 %3095 }
 0x8e6   : > { %12683 = vst [vmem:[#allocation151_spill] sm:$0xff] %v9770_v2  ;;  %12684 = vst [vmem:[#allocation143_spill] sm:$0xff] %v9772_v13 }
 0x8e7   : > { %3217 = vrot.lane.b32.xlu1 %v3059_v55, %s5125_s12  ;;  %3219 = vrot.lane.b32.xlu0 %v3060_v39, %s5125_s12  ;;  %v9826_v55 = vsel %vm510_vm8, %v9148_v15, %v9150_v11  ;;  %v9849_v15 = vsel %vm510_vm8, %v9150_v11, %v9156_v49 }
 0x8e8   : > { %12690 = vst [vmem:[#allocation160_spill] sm:$0xff] %v9826_v55  ;;  %12694 = vst [vmem:[#allocation147_spill] sm:$0xff] %v9849_v15 }
 0x8e9   : > { %v9778_v29 = vpop.permute.xlu1 %3097  ;;  %v9780_v57 = vpop.permute.xlu0 %3101 }
 0x8ea   : > { %12685 = vst [vmem:[#allocation144_spill] sm:$0xff] %v9778_v29  ;;  %v9882_v29 = vsel %vm537_vm9, %v9172_v17, %v9174_v14 }
 0x8eb   : > { %3221 = vrot.lane.b32.xlu1 %v3061_v42, %s5125_s12  ;;  %3223 = vrot.lane.b32.xlu0 %v3062_v6, %s5125_s12  ;;  %v9844_v42 = vsel %vm510_vm8, %v9156_v49, %v9158_v27  ;;  %v3063_v49 = vsel %vm510_vm8, %v9158_v27, %v9126_v63 }
 0x8ec   : > { %12693 = vst [vmem:[#allocation138_spill] sm:$0xff] %v9844_v42 }
 0x8ed   : > { %v9789_v0 = vpop.permute.xlu1 %3103  ;;  %v9791_v61 = vpop.permute.xlu0 %3105 }
 0x8ef   : > { %3227 = vrot.lane.b32.xlu0 %v9796_v21, %s5125_s12  ;;  %4894 = vrot.lane.b32.xlu1 %v4893_v60, %s5125_s12  ;;  %v9862_v60 = vsel %vm537_vm9, %v9166_v47, %v9172_v17  ;;  %v9900_v17 = vsel %vm537_vm9, %v9180_v31, %v9182_v46  ;;  %v9918_v46 = vsel %vm537_vm9, %v9188_v18, %v9190_v35 }
 0x8f0   : > { %12700 = vst [vmem:[#allocation140_spill] sm:$0xff] %v9918_v46 }
 0x8f1   : > { %v9801_v38 = vpop.permute.xlu1 %3107  ;;  %v9803_v24 = vpop.permute.xlu0 %3109 }
 0x8f2   : > { %12686 = vst [vmem:[#allocation148_spill] sm:$0xff] %v9801_v38  ;;  %12687 = vst [vmem:[#allocation146_spill] sm:$0xff] %v9803_v24  ;;  %v12745_v24 = vld [vmem:[#allocation83_spill] sm:$0xff] }
 0x8f3   : > { %3231 = vrot.lane.b32.xlu0 %v9808_v37, %s5125_s12  ;;  %3229 = vrot.lane.b32.xlu1 %v9813_v5, %s5125_s12  ;;  %v12750_v38 = vld [vmem:[#allocation67_spill] sm:$0xff] }
 0x8f5   : > { %v9819_v52 = vpop.permute.xlu1 %3111  ;;  %v9821_v36 = vpop.permute.xlu0 %3113 }
 0x8f6   : > { %12688 = vst [vmem:[#allocation139_spill] sm:$0xff] %v9819_v52  ;;  %12689 = vst [vmem:[#allocation137_spill] sm:$0xff] %v9821_v36 }
 0x8f7   : > { %3235 = vrot.lane.b32.xlu0 %v9826_v55, %s5125_s12  ;;  %3233 = vrot.lane.b32.xlu1 %v9831_v62, %s5125_s12 }
 0x8f9   : > { %v9837_v58 = vpop.permute.xlu1 %3115  ;;  %v9839_v39 = vpop.permute.xlu0 %4879 }
 0x8fa   : > { %12691 = vst [vmem:[#allocation89_spill] sm:$0xff] %v9837_v58  ;;  %12692 = vst [vmem:[#allocation133_spill] sm:$0xff] %v9839_v39  ;;  %v9913_v39 = vsel %vm537_vm9, %v9190_v35, %v9196_v3 }
 0x8fb   : > { %3239 = vrot.lane.b32.xlu0 %v9844_v42, %s5125_s12  ;;  %3237 = vrot.lane.b32.xlu1 %v9849_v15, %s5125_s12  ;;  %12699 = vst [vmem:[#allocation135_spill] sm:$0xff] %v9913_v39  ;;  %v12730_v15 = vld [vmem:[#allocation153_spill] sm:$0xff] }
 0x8fd   : > { %v9855_v50 = vpop.permute.xlu1 %3119  ;;  %v9857_v6 = vpop.permute.xlu0 %3121 }
 0x8ff   : > { %3245 = vrot.lane.b32.xlu0 %v9862_v60, %s5125_s12  ;;  %3241 = vrot.lane.b32.xlu1 %v3063_v49, %s5125_s12 }
 0x901   : > { %v9870_v11 = vpop.permute.xlu1 %3123  ;;  %v9872_v9 = vpop.permute.xlu0 %3125 }
 0x903   : > { %3249 = vrot.lane.b32.xlu0 %v9877_v22, %s5125_s12  ;;  %3247 = vrot.lane.b32.xlu1 %v9882_v29, %s5125_s12 }
 0x905   : > { %v9888_v49 = vpop.permute.xlu1 %3127  ;;  %v9890_v58 = vpop.permute.xlu0 %3129 }
 0x906   : > { %12695 = vst [vmem:[#allocation145_spill] sm:$0xff] %v9890_v58  ;;  %v12713_v58 = vld [vmem:[#allocation30_spill] sm:$0xff] }
 0x907   : > { %3253 = vrot.lane.b32.xlu0 %v9895_v4, %s5125_s12  ;;  %3251 = vrot.lane.b32.xlu1 %v9900_v17, %s5125_s12 }
 0x909   : > { %v9906_v14 = vpop.permute.xlu1 %3131  ;;  %v9908_v12 = vpop.permute.xlu0 %3133 }
 0x90a   : > { %12697 = vst [vmem:[#allocation141_spill] sm:$0xff] %v9906_v14  ;;  %12698 = vst [vmem:[#allocation142_spill] sm:$0xff] %v9908_v12  ;;  %v3064_v12 = vsel %vm537_vm9, %v9196_v3, %v9164_v19  ;;  %v12711_v14 = vld [vmem:[#allocation52_spill] sm:$0xff] }
 0x90b   : > { %3257 = vrot.lane.b32.xlu0 %v9913_v39, %s5125_s12  ;;  %3255 = vrot.lane.b32.xlu1 %v9918_v46, %s5125_s12  ;;  %v12723_v3 = vld [vmem:[#allocation64_spill] sm:$0xff] }
 0x90d   : > { %v9924_v31 = vpop.permute.xlu1 %3137  ;;  %v9926_v13 = vpop.permute.xlu0 %3139 }
 0x90f   : > { %3261 = vrot.lane.b32.xlu0 %v9164_v19, %s5125_s12  ;;  %3259 = vrot.lane.b32.xlu1 %v3064_v12, %s5125_s12  ;;  %s11367_s12 = scalar_lea.hbm %s11422_s4, %s4767_s27 }
 0x911   : > { %v9934_v35 = vpop.permute.xlu1 %3141  ;;  %v9936_v18 = vpop.permute.xlu0 %3143 }
 0x913   : > { %3353 = vrot.lane.b32.xlu0 %v8703_v26, %s5126_s11  ;;  %3351 = vrot.lane.b32.xlu1 %v12608_v32, %s5126_s11 }
 0x915   : > { %v9942_v2 = vpop.permute.xlu1 %3145  ;;  %v9944_v36 = vpop.permute.xlu0 %3147 }
 0x916   : > { %12701 = vst [vmem:[#allocation166_spill] sm:$0xff] %v9944_v36  ;;  %v12715_v36 = vld [vmem:[#allocation55_spill] sm:$0xff] }
 0x917   : > { %3357 = vrot.lane.b32.xlu0 %v8713_v51, %s5126_s11  ;;  %3355 = vrot.lane.b32.xlu1 %v8706_v41, %s5126_s11 }
 0x919   : > { %v9950_v12 = vpop.permute.xlu1 %3149  ;;  %v9952_v52 = vpop.permute.xlu0 %3151 }
 0x91a   : > { %12702 = vst [vmem:[#allocation167_spill] sm:$0xff] %v9950_v12  ;;  %12703 = vst [vmem:[#allocation168_spill] sm:$0xff] %v9952_v52  ;;  %v12714_v12 = vld [vmem:[#allocation21_spill] sm:$0xff] }
 0x91b   : > { %3359 = vrot.lane.b32.xlu1 %v8716_v56, %s5126_s11  ;;  %3361 = vrot.lane.b32.xlu0 %v8723_v53, %s5126_s11  ;;  %v2511_v56 = vsel %vm294_vm0, %v8838_v28, %v8844_v33  ;;  %vm12727_vm0 = vcmask 138240  }
 0x91c   : > { %vm12729_vm1 = vmmov %vm12727_vm0 }
 0x91d   : > { %v9958_v26 = vpop.permute.xlu1 %4884  ;;  %v9960_v32 = vpop.permute.xlu0 %3155  ;;  %vm12751_vm7 = vmmov %vm12727_vm0 }
 0x91e   : > { %12704 = vst [vmem:[#allocation169_spill] sm:$0xff] %v9958_v26 }
 0x91f   : > { %3363 = vrot.lane.b32.xlu1 %v8726_v10, %s5126_s11  ;;  %3365 = vrot.lane.b32.xlu0 %v8733_v23, %s5126_s11 }
 0x921   : > { %v9966_v41 = vpop.permute.xlu1 %3157  ;;  %v9968_v51 = vpop.permute.xlu0 %3159 }
 0x923   : > { %3367 = vrot.lane.b32.xlu1 %v8736_v20, %s5126_s11  ;;  %3369 = vrot.lane.b32.xlu0 %v2511_v56, %s5126_s11  ;;  %v12707_v20 = vld [vmem:[#allocation65_spill] sm:$0xff]  ;;  %v12709_v56 = vld [vmem:[#allocation70_spill] sm:$0xff] }
 0x925   : > { %v9976_v53 = vpop.permute.xlu1 %3161  ;;  %v9978_v52 = vpop.permute.xlu0 %3163 }
 0x927   : > { %3371 = vrot.lane.b32.xlu1 %v9423_v25, %s5126_s11  ;;  %3373 = vrot.lane.b32.xlu0 %v9435_v54, %s5126_s11  ;;  %v12710_v25 = vld [vmem:[#allocation47_spill] sm:$0xff] }
 0x929   : > { %v9984_v10 = vpop.permute.xlu1 %3165  ;;  %v9986_v23 = vpop.permute.xlu0 %3167 }
 0x92a   : > { %12705 = vst [vmem:[#allocation170_spill] sm:$0xff] %v9984_v10  ;;  %12706 = vst [vmem:[#allocation171_spill] sm:$0xff] %v9986_v23 }
 0x92b   : > { %3375 = vrot.lane.b32.xlu1 %v9440_v16, %s5126_s11  ;;  %3377 = vrot.lane.b32.xlu0 %v12707_v20, %s5126_s11  ;;  %v12712_v16 = vld [vmem:[#allocation28_spill] sm:$0xff] }
 0x92d   : > { %v9992_v28 = vpop.permute.xlu1 %3169  ;;  %v9994_v33 = vpop.permute.xlu0 %3173 }
 0x92e   : > { %12708 = vst [vmem:[#allocation65_spill] sm:$0xff] %v9992_v28 }
 0x92f   : > { %3379 = vrot.lane.b32.xlu1 %v12709_v56, %s5126_s11  ;;  %3381 = vrot.lane.b32.xlu0 %v12710_v25, %s5126_s11  ;;  %v2537_v56 = vsel %vm321_vm10, %v12714_v12, %v12713_v58  ;;  %v12716_v25 = vld [vmem:[#allocation72_spill] sm:$0xff] }
 0x930   : > { %v2872_v23 = vsel %vm670_vm11, %v12716_v25, %v12715_v36 }
 0x931   : > { %v10000_v54 = vpop.permute.xlu1 %3175  ;;  %v10002_v26 = vpop.permute.xlu0 %3177 }
 0x933   : > { %3383 = vrot.lane.b32.xlu1 %v12711_v14, %s5126_s11  ;;  %3385 = vrot.lane.b32.xlu0 %v12712_v16, %s5126_s11  ;;  %v12719_v16 = vld [vmem:[#allocation56_spill] sm:$0xff] }
 0x934   : > { %v2873_v27 = vsel %vm670_vm11, %v12715_v36, %v12719_v16  ;;  %v2874_v55 = vsel %vm670_vm11, %v12719_v16, %v12730_v15 }
 0x935   : > { %v10008_v20 = vpop.permute.xlu1 %3179  ;;  %v10010_v28 = vpop.permute.xlu0 %3181 }
 0x937   : > { %3387 = vrot.lane.b32.xlu1 %v2537_v56, %s5126_s11  ;;  %3623 = vrot.lane.b32.xlu0 %v2872_v23, %s5126_s11  ;;  %v12722_v56 = vld [vmem:[#allocation51_spill] sm:$0xff] }
 0x938   : > { %v2846_v23 = vsel %vm643_vm15, %v12723_v3, %v12722_v56 }
 0x939   : > { %v10020_v14 = vpop.permute.xlu1 %3183  ;;  %v10022_v10 = vpop.permute.xlu0 %3185 }
 0x93a   : > { %12717 = vst [vmem:[#allocation70_spill] sm:$0xff] %v10020_v14  ;;  %12718 = vst [vmem:[#allocation47_spill] sm:$0xff] %v10022_v10  ;;  %v12724_v14 = vld [vmem:[#allocation53_spill] sm:$0xff] }
 0x93b   : > { %3625 = vrot.lane.b32.xlu1 %v2873_v27, %s5126_s11  ;;  %3621 = vrot.lane.b32.xlu0 %v12716_v25, %s5126_s11  ;;  %v2847_v10 = vsel %vm643_vm15, %v12722_v56, %v12724_v14  ;;  %v12725_v25 = vld [vmem:[#allocation75_spill] sm:$0xff] }
 0x93d   : > { %v10030_v12 = vpop.permute.xlu1 %3187  ;;  %v10032_v42 = vpop.permute.xlu0 %4889 }
 0x93e   : > { %12720 = vst [vmem:[#allocation52_spill] sm:$0xff] %v10030_v12  ;;  %12721 = vst [vmem:[#allocation28_spill] sm:$0xff] %v10032_v42  ;;  %v12726_v12 = vld [vmem:[#allocation71_spill] sm:$0xff] }
 0x93f   : > { %3605 = vrot.lane.b32.xlu1 %v2846_v23, %s5126_s11  ;;  %3607 = vrot.lane.b32.xlu0 %v2847_v10, %s5126_s11  ;;  %v2821_v42 = vsel %vm12727_vm0, %v12726_v12, %v12725_v25  ;;  %v12728_v23 = vld [vmem:[#allocation76_spill] sm:$0xff] }
 0x940   : > { %v2822_v10 = vsel %vm12729_vm1, %v12725_v25, %v12728_v23  ;;  %vm12756_vm1 = vmmov %vm12746_vm5 }
 0x941   : > { %v10042_v27 = vpop.permute.xlu1 %3191  ;;  %v10044_v36 = vpop.permute.xlu0 %3193 }
 0x943   : > { %3603 = vrot.lane.b32.xlu1 %v12723_v3, %s5126_s11  ;;  %3587 = vrot.lane.b32.xlu0 %v2821_v42, %s5126_s11  ;;  %v12732_v42 = vld [vmem:[#allocation60_spill] sm:$0xff] }
 0x944   : > { %v2875_v4 = vsel %vm670_vm11, %v12730_v15, %v12732_v42  ;;  %v12744_v42 = vld [vmem:[#allocation81_spill] sm:$0xff] }
 0x945   : > { %v10052_v39 = vpop.permute.xlu1 %3195  ;;  %v10054_v56 = vpop.permute.xlu0 %3197 }
 0x947   : > { %3589 = vrot.lane.b32.xlu1 %v2822_v10, %s5126_s11  ;;  %3627 = vrot.lane.b32.xlu0 %v2874_v55, %s5126_s11  ;;  %v12735_v10 = vld [vmem:[#allocation162_spill] sm:$0xff] }
 0x948   : > { %v2798_v55 = vsel %vm12737_vm2, %v12736_v44, %v12735_v10 }
 0x949   : > { %v10064_v46 = vpop.permute.xlu1 %3199  ;;  %v10066_v3 = vpop.permute.xlu0 %3201 }
 0x94a   : > { %12731 = vst [vmem:[#allocation30_spill] sm:$0xff] %v10066_v3  ;;  %v2799_v3 = vsel %vm12739_vm3, %v12735_v10, %v12738_v45  ;;  %vm12760_vm3 = vmmov %vm12737_vm2 }
 0x94b   : > { %3629 = vrot.lane.b32.xlu1 %v2875_v4, %s5126_s11  ;;  %3585 = vrot.lane.b32.xlu0 %v12726_v12, %s5126_s11  ;;  %v12740_v12 = vld [vmem:[#allocation73_spill] sm:$0xff] }
 0x94d   : > { %v10074_v25 = vpop.permute.xlu1 %3203  ;;  %v10076_v16 = vpop.permute.xlu0 %3205 }
 0x94e   : > { %12733 = vst [vmem:[#allocation21_spill] sm:$0xff] %v10074_v25  ;;  %12734 = vst [vmem:[#allocation55_spill] sm:$0xff] %v10076_v16  ;;  %v2848_v16 = vsel %vm643_vm15, %v12724_v14, %v12740_v12  ;;  %v12741_v25 = vld [vmem:[#allocation150_spill] sm:$0xff]  ;;  %v2772_v14 = vsel %vm12746_vm5, %v12745_v24, %v12744_v42  ;;  %vm12770_vm5 = vcmask 867328  }
 0x94f   : > { %3569 = vrot.lane.b32.xlu1 %v2798_v55, %s5126_s11  ;;  %3571 = vrot.lane.b32.xlu0 %v2799_v3, %s5126_s11  ;;  %v2849_v48 = vsel %vm643_vm15, %v12740_v12, %v12741_v25  ;;  %v12742_v3 = vld [vmem:[#allocation87_spill] sm:$0xff] }
 0x950   : > { %v2797_v8 = vsel %vm12743_vm4, %v12742_v3, %v12736_v44  ;;  %v2823_v44 = vsel %vm12751_vm7, %v12728_v23, %v12750_v38  ;;  %vm12764_vm4 = vmmov %vm12756_vm1  ;;  %vm12779_vm7 = vcmask 875520  }
 0x951   : > { %v10086_v4 = vpop.permute.xlu1 %3209  ;;  %v10088_v15 = vpop.permute.xlu0 %3211 }
 0x953   : > { %3609 = vrot.lane.b32.xlu1 %v2848_v16, %s5126_s11  ;;  %3611 = vrot.lane.b32.xlu0 %v2849_v48, %s5126_s11  ;;  %v12748_v48 = vld [vmem:[#allocation82_spill] sm:$0xff] }
 0x954   : > { %v2773_v25 = vsel %vm12749_vm6, %v12744_v42, %v12748_v48  ;;  %v2771_v42 = vsel %vm12756_vm1, %v12755_v34, %v12745_v24  ;;  %v12759_v24 = vld [vmem:[#allocation86_spill] sm:$0xff]  ;;  %vm12772_vm6 = vmmov %vm12770_vm5 }
 0x955   : > { %v10098_v10 = vpop.permute.xlu1 %3213  ;;  %v10100_v55 = vpop.permute.xlu0 %3215 }
 0x957   : > { %3567 = vrot.lane.b32.xlu1 %v2797_v8, %s5126_s11  ;;  %3551 = vrot.lane.b32.xlu0 %v2772_v14, %s5126_s11  ;;  %v12754_v14 = vld [vmem:[#allocation66_spill] sm:$0xff] }
 0x959   : > { %v10110_v12 = vpop.permute.xlu1 %3217  ;;  %v10112_v16 = vpop.permute.xlu0 %3219 }
 0x95a   : > { %12747 = vst [vmem:[#allocation72_spill] sm:$0xff] %v10112_v16  ;;  %v2824_v16 = vsel %vm12727_vm0, %v12750_v38, %v12754_v14  ;;  %vm12783_vm0 = vmmov %vm12779_vm7 }
 0x95b   : > { %3553 = vrot.lane.b32.xlu1 %v2773_v25, %s5126_s11  ;;  %3591 = vrot.lane.b32.xlu0 %v2823_v44, %s5126_s11 }
 0x95d   : > { %v10122_v3 = vpop.permute.xlu1 %3221  ;;  %v10124_v8 = vpop.permute.xlu0 %3223 }
 0x95e   : > { %12752 = vst [vmem:[#allocation56_spill] sm:$0xff] %v10122_v3  ;;  %12753 = vst [vmem:[#allocation51_spill] sm:$0xff] %v10124_v8  ;;  %v12758_v8 = vld [vmem:[#allocation155_spill] sm:$0xff] }
 0x95f   : > { %3593 = vrot.lane.b32.xlu1 %v2824_v16, %s5126_s11  ;;  %3549 = vrot.lane.b32.xlu0 %v2771_v42, %s5126_s11  ;;  %v2800_v34 = vsel %vm12737_vm2, %v12738_v45, %v12758_v8  ;;  %v2801_v16 = vsel %vm12760_vm3, %v12758_v8, %v12759_v24  ;;  %vm12792_vm2 = vcmask 883712  }
 0x960   : > { %vm12794_vm3 = vmmov %vm12792_vm2 }
 0x961   : > { %v10134_v23 = vpop.permute.xlu1 %4894  ;;  %v10136_v25 = vpop.permute.xlu0 %3227 }
 0x962   : > { %12757 = vst [vmem:[#allocation64_spill] sm:$0xff] %v10134_v23 }
 0x963   : > { %3533 = vrot.lane.b32.xlu1 %v9862_v60, %s5126_s11  ;;  %3535 = vrot.lane.b32.xlu0 %v9882_v29, %s5126_s11  ;;  %v2745_v29 = vsel %vm537_vm9, %v9164_v19, %v9166_v47  ;;  %v12766_v19 = vld [vmem:[#allocation94_spill] sm:$0xff]  ;;  %vm12767_vm9 = vmmov %vm12756_vm1 }
 0x964   : > { %vm12787_vm1 = vmmov %vm12783_vm0 }
 0x965   : > { %v10142_v44 = vpop.permute.xlu1 %3229  ;;  %v10144_v38 = vpop.permute.xlu0 %3231 }
 0x967   : > { %3573 = vrot.lane.b32.xlu1 %v2800_v34, %s5126_s11  ;;  %3575 = vrot.lane.b32.xlu0 %v2801_v16, %s5126_s11  ;;  %v12763_v34 = vld [vmem:[#allocation96_spill] sm:$0xff] }
 0x968   : > { %v2774_v16 = vsel %vm12764_vm4, %v12748_v48, %v12763_v34  ;;  %vm12798_vm4 = vmmov %vm12770_vm5 }
 0x969   : > { %v10154_v60 = vpop.permute.xlu1 %3233  ;;  %v10156_v42 = vpop.permute.xlu0 %3235 }
 0x96b   : > { %3531 = vrot.lane.b32.xlu1 %v2745_v29, %s5126_s11  ;;  %3515 = vrot.lane.b32.xlu0 %v9796_v21, %s5126_s11  ;;  %v2775_v21 = vsel %vm12767_vm9, %v12763_v34, %v12766_v19  ;;  %v2719_v29 = vsel %vm510_vm8, %v9126_v63, %v9132_v43  ;;  %vm12776_vm8 = vmmov %vm12770_vm5 }
 0x96c   : > { %vm12800_vm9 = vmmov %vm12798_vm4 }
 0x96d   : > { %v10164_v45 = vpop.permute.xlu1 %3237  ;;  %v10166_v8 = vpop.permute.xlu0 %3239 }
 0x96e   : > { %12761 = vst [vmem:[#allocation53_spill] sm:$0xff] %v10164_v45  ;;  %12762 = vst [vmem:[#allocation75_spill] sm:$0xff] %v10166_v8  ;;  %v12771_v8 = vld [vmem:[#allocation95_spill] sm:$0xff] }
 0x96f   : > { %3517 = vrot.lane.b32.xlu1 %v9813_v5, %s5126_s11  ;;  %3555 = vrot.lane.b32.xlu0 %v2774_v16, %s5126_s11  ;;  %v12768_v16 = vld [vmem:[#allocation97_spill] sm:$0xff]  ;;  %v12777_v45 = vld [vmem:[#allocation103_spill] sm:$0xff] }
 0x970   : > { %v2695_v34 = vsel %vm12772_vm6, %v12768_v16, %v12771_v8  ;;  %vm12807_vm6 = vcmask 949248  }
 0x971   : > { %v10174_v23 = vpop.permute.xlu1 %3241  ;;  %v10176_v47 = vpop.permute.xlu0 %3245 }
 0x972   : > { %12765 = vst [vmem:[#allocation71_spill] sm:$0xff] %v10174_v23  ;;  %v12769_v23 = vld [vmem:[#allocation109_spill] sm:$0xff] }
 0x973   : > { %3557 = vrot.lane.b32.xlu1 %v2775_v21, %s5126_s11  ;;  %3513 = vrot.lane.b32.xlu0 %v2719_v29, %s5126_s11  ;;  %v2694_v3 = vsel %vm12770_vm5, %v12769_v23, %v12768_v16  ;;  %v12775_v16 = vld [vmem:[#allocation112_spill] sm:$0xff]  ;;  %vm12804_vm5 = vmmov %vm12792_vm2 }
 0x975   : > { %v10186_v48 = vpop.permute.xlu1 %3247  ;;  %v10188_v5 = vpop.permute.xlu0 %3249 }
 0x977   : > { %3497 = vrot.lane.b32.xlu1 %v2694_v3, %s5126_s11  ;;  %3499 = vrot.lane.b32.xlu0 %v2695_v34, %s5126_s11  ;;  %v2693_v3 = vsel %vm12776_vm8, %v12775_v16, %v12769_v23  ;;  %v12778_v34 = vld [vmem:[#allocation105_spill] sm:$0xff]  ;;  %vm12811_vm8 = vmmov %vm12807_vm6 }
 0x978   : > { %v2668_v19 = vsel %vm12779_vm7, %v12778_v34, %v12777_v45  ;;  %vm12813_vm7 = vmmov %vm12783_vm0 }
 0x979   : > { %v10198_v43 = vpop.permute.xlu1 %3251  ;;  %v10200_v63 = vpop.permute.xlu0 %3253 }
 0x97b   : > { %3537 = vrot.lane.b32.xlu1 %v9877_v22, %s5126_s11  ;;  %3539 = vrot.lane.b32.xlu0 %v9900_v17, %s5126_s11  ;;  %v12782_v17 = vld [vmem:[#allocation104_spill] sm:$0xff] }
 0x97d   : > { %v10206_v21 = vpop.permute.xlu1 %3255  ;;  %v10208_v29 = vpop.permute.xlu0 %3257 }
 0x97e   : > { %12773 = vst [vmem:[#allocation76_spill] sm:$0xff] %v10206_v21  ;;  %12774 = vst [vmem:[#allocation153_spill] sm:$0xff] %v10208_v29  ;;  %v2669_v29 = vsel %vm12783_vm0, %v12777_v45, %v12782_v17  ;;  %v12793_v21 = vld [vmem:[#allocation128_spill] sm:$0xff] }
 0x97f   : > { %3495 = vrot.lane.b32.xlu1 %v2693_v3, %s5126_s11  ;;  %3479 = vrot.lane.b32.xlu0 %v2668_v19, %s5126_s11  ;;  %v12786_v3 = vld [vmem:[#allocation120_spill] sm:$0xff] }
 0x980   : > { %v2667_v19 = vsel %vm12787_vm1, %v12786_v3, %v12778_v34  ;;  %v12797_v3 = vld [vmem:[#allocation91_spill] sm:$0xff]  ;;  %vm12818_vm1 = vmmov %vm12807_vm6 }
 0x981   : > { %v10218_v22 = vpop.permute.xlu1 %3259  ;;  %v10220_v24 = vpop.permute.xlu0 %3261 }
 0x982   : > { %12780 = vst [vmem:[#allocation162_spill] sm:$0xff] %v10218_v22  ;;  %12781 = vst [vmem:[#allocation92_spill] sm:$0xff] %v10220_v24  ;;  %v12791_v22 = vld [vmem:[#allocation113_spill] sm:$0xff] }
 0x983   : > { %3481 = vrot.lane.b32.xlu1 %v2669_v29, %s5126_s11  ;;  %3519 = vrot.lane.b32.xlu0 %v9808_v37, %s5126_s11  ;;  %v12790_v29 = vld [vmem:[#allocation114_spill] sm:$0xff] }
 0x984   : > { %v2642_v37 = vsel %vm12792_vm2, %v12791_v22, %v12790_v29  ;;  %v2643_v14 = vsel %vm12794_vm3, %v12790_v29, %v12793_v21  ;;  %vm12823_vm2 = vcmask 957440  }
 0x985   : > { %v10228_v23 = vpop.permute.xlu1 %3351  ;;  %v10230_v16 = vpop.permute.xlu0 %3353  ;;  %vm12825_vm3 = vmmov %vm12823_vm2 }
 0x986   : > { %12784 = vst [vmem:[#allocation157_spill] sm:$0xff] %v10228_v23  ;;  %12785 = vst [vmem:[#allocation73_spill] sm:$0xff] %v10230_v16  ;;  %v12806_v16 = vld [vmem:[#allocation124_spill] sm:$0xff] }
 0x987   : > { %3521 = vrot.lane.b32.xlu1 %v9831_v62, %s5126_s11  ;;  %3477 = vrot.lane.b32.xlu0 %v2667_v19, %s5126_s11  ;;  %v2696_v19 = vsel %vm12798_vm4, %v12771_v8, %v12797_v3  ;;  %vm12829_vm4 = vmmov %vm12804_vm5 }
 0x989   : > { %v10238_v24 = vpop.permute.xlu1 %3355  ;;  %v10240_v45 = vpop.permute.xlu0 %3357 }
 0x98a   : > { %12788 = vst [vmem:[#allocation87_spill] sm:$0xff] %v10238_v24  ;;  %12789 = vst [vmem:[#allocation81_spill] sm:$0xff] %v10240_v45  ;;  %v12799_v45 = vld [vmem:[#allocation108_spill] sm:$0xff] }
 0x98b   : > { %3461 = vrot.lane.b32.xlu1 %v2642_v37, %s5126_s11  ;;  %3463 = vrot.lane.b32.xlu0 %v2643_v14, %s5126_s11  ;;  %v2697_v23 = vsel %vm12800_vm9, %v12797_v3, %v12799_v45  ;;  %v12803_v14 = vld [vmem:[#allocation115_spill] sm:$0xff]  ;;  %v12822_v24 = vld [vmem:[#allocation48_spill] sm:$0xff]  ;;  %vm12831_vm9 = vmmov %vm12829_vm4 }
 0x98c   : > { %v12817_v45 = vld [vmem:[#allocation123_spill] sm:$0xff] }
 0x98d   : > { %v10250_v34 = vpop.permute.xlu1 %3359  ;;  %v10252_v62 = vpop.permute.xlu0 %3361 }
 0x98e   : > { %12795 = vst [vmem:[#allocation83_spill] sm:$0xff] %v10250_v34  ;;  %12796 = vst [vmem:[#allocation82_spill] sm:$0xff] %v10252_v62  ;;  %v2641_v62 = vsel %vm12804_vm5, %v12803_v14, %v12791_v22  ;;  %v12805_v34 = vld [vmem:[#allocation134_spill] sm:$0xff] }
 0x98f   : > { %3501 = vrot.lane.b32.xlu1 %v2696_v19, %s5126_s11  ;;  %3503 = vrot.lane.b32.xlu0 %v2697_v23, %s5126_s11  ;;  %v2616_v8 = vsel %vm12807_vm6, %v12806_v16, %v12805_v34  ;;  %v12810_v23 = vld [vmem:[#allocation131_spill] sm:$0xff]  ;;  %vm12835_vm5 = vmmov %vm12823_vm2  ;;  %vm12838_vm6 = vcmask 965632  }
 0x991   : > { %v10262_v29 = vpop.permute.xlu1 %3363  ;;  %v10264_v37 = vpop.permute.xlu0 %3365 }
 0x992   : > { %12801 = vst [vmem:[#allocation67_spill] sm:$0xff] %v10262_v29  ;;  %12802 = vst [vmem:[#allocation102_spill] sm:$0xff] %v10264_v37  ;;  %v2617_v37 = vsel %vm12811_vm8, %v12805_v34, %v12810_v23  ;;  %v12812_v29 = vld [vmem:[#allocation118_spill] sm:$0xff]  ;;  %v2615_v34 = vsel %vm12818_vm1, %v12817_v45, %v12806_v16 }
 0x993   : > { %3459 = vrot.lane.b32.xlu1 %v2641_v62, %s5126_s11  ;;  %3443 = vrot.lane.b32.xlu0 %v2616_v8, %s5126_s11  ;;  %v2670_v22 = vsel %vm12813_vm7, %v12782_v17, %v12812_v29  ;;  %v12816_v8 = vld [vmem:[#allocation116_spill] sm:$0xff]  ;;  %vm12841_vm8 = vmmov %vm12838_vm6 }
 0x994   : > { %vm12843_vm7 = vmmov %vm12818_vm1 }
 0x995   : > { %v10274_v3 = vpop.permute.xlu1 %3367  ;;  %v10276_v19 = vpop.permute.xlu0 %3369 }
 0x996   : > { %12808 = vst [vmem:[#allocation155_spill] sm:$0xff] %v10274_v3  ;;  %12809 = vst [vmem:[#allocation96_spill] sm:$0xff] %v10276_v19  ;;  %v2671_v3 = vsel %vm12783_vm0, %v12812_v29, %v12816_v8  ;;  %v12830_v8 = vld [vmem:[#allocation111_spill] sm:$0xff] }
 0x997   : > { %3445 = vrot.lane.b32.xlu1 %v2617_v37, %s5126_s11  ;;  %3483 = vrot.lane.b32.xlu0 %v2670_v22, %s5126_s11  ;;  %v12821_v22 = vld [vmem:[#allocation41_spill] sm:$0xff]  ;;  %vm12845_vm0 = vmmov %vm12818_vm1 }
 0x998   : > { %v2590_v19 = vsel %vm12823_vm2, %v12822_v24, %v12821_v22  ;;  %vm12847_vm1 = vmmov %vm12838_vm6 }
 0x999   : > { %v10286_v14 = vpop.permute.xlu1 %3371  ;;  %v10288_v62 = vpop.permute.xlu0 %3373 }
 0x99a   : > { %12814 = vst [vmem:[#allocation97_spill] sm:$0xff] %v10286_v14  ;;  %12815 = vst [vmem:[#allocation109_spill] sm:$0xff] %v10288_v62  ;;  %v12824_v14 = vld [vmem:[#allocation50_spill] sm:$0xff] }
 0x99b   : > { %3485 = vrot.lane.b32.xlu1 %v2671_v3, %s5126_s11  ;;  %3441 = vrot.lane.b32.xlu0 %v2615_v34, %s5126_s11  ;;  %v2591_v29 = vsel %vm12825_vm3, %v12821_v22, %v12824_v14  ;;  %v12828_v3 = vld [vmem:[#allocation126_spill] sm:$0xff]  ;;  %vm12852_vm3 = vmmov %vm12823_vm2 }
 0x99c   : > { %v2644_v34 = vsel %vm12829_vm4, %v12793_v21, %v12828_v3  ;;  %vm12854_vm4 = vmmov %vm12847_vm1 }
 0x99d   : > { %v10298_v17 = vpop.permute.xlu1 %3375  ;;  %v10300_v37 = vpop.permute.xlu0 %3377 }
 0x99e   : > { %12819 = vst [vmem:[#allocation95_spill] sm:$0xff] %v10298_v17  ;;  %12820 = vst [vmem:[#allocation112_spill] sm:$0xff] %v10300_v37  ;;  %v2645_v17 = vsel %vm12831_vm9, %v12828_v3, %v12830_v8  ;;  %v12837_v37 = vld [vmem:[#allocation31_spill] sm:$0xff] }
 0x99f   : > { %3425 = vrot.lane.b32.xlu1 %v2590_v19, %s5126_s11  ;;  %3427 = vrot.lane.b32.xlu0 %v2591_v29, %s5126_s11  ;;  %v12834_v29 = vld [vmem:[#allocation39_spill] sm:$0xff]  ;;  %vm12856_vm9 = vmmov %vm12847_vm1 }
 0x9a1   : > { %v10310_v16 = vpop.permute.xlu1 %3379  ;;  %v10312_v45 = vpop.permute.xlu0 %3381 }
 0x9a2   : > { %12826 = vst [vmem:[#allocation103_spill] sm:$0xff] %v10310_v16  ;;  %12827 = vst [vmem:[#allocation105_spill] sm:$0xff] %v10312_v45  ;;  %v2589_v16 = vsel %vm12835_vm5, %v12834_v29, %v12822_v24  ;;  %v12836_v45 = vld [vmem:[#allocation38_spill] sm:$0xff]  ;;  %vm12885_vm5 = vcmask 138240  }
 0x9a3   : > { %3465 = vrot.lane.b32.xlu1 %v2644_v34, %s5126_s11  ;;  %3467 = vrot.lane.b32.xlu0 %v2645_v17, %s5126_s11  ;;  %v2564_v21 = vsel %vm12838_vm6, %v12837_v37, %v12836_v45  ;;  %v12840_v17 = vld [vmem:[#allocation33_spill] sm:$0xff]  ;;  %vm12889_vm6 = vmmov %vm12885_vm5 }
 0x9a5   : > { %v10322_v22 = vpop.permute.xlu1 %3383  ;;  %v10324_v19 = vpop.permute.xlu0 %3385 }
 0x9a6   : > { %12832 = vst [vmem:[#allocation104_spill] sm:$0xff] %v10322_v22  ;;  %12833 = vst [vmem:[#allocation120_spill] sm:$0xff] %v10324_v19  ;;  %v2565_v22 = vsel %vm12841_vm8, %v12836_v45, %v12840_v17  ;;  %v12842_v19 = vld [vmem:[#allocation121_spill] sm:$0xff]  ;;  %vm12894_vm8 = vcmask 146432  }
 0x9a7   : > { %3423 = vrot.lane.b32.xlu1 %v2589_v16, %s5126_s11  ;;  %3407 = vrot.lane.b32.xlu0 %v2564_v21, %s5126_s11  ;;  %v2618_v8 = vsel %vm12843_vm7, %v12810_v23, %v12842_v19  ;;  %v12844_v21 = vld [vmem:[#allocation117_spill] sm:$0xff]  ;;  %vm12896_vm7 = vmmov %vm12894_vm8 }
 0x9a8   : > { %v2619_v62 = vsel %vm12845_vm0, %v12842_v19, %v12844_v21  ;;  %vm12905_vm0 = vmmov %vm12885_vm5 }
 0x9a9   : > { %v10334_v3 = vpop.permute.xlu1 %3387  ;;  %v3624_v34 = vpop.permute.xlu0 %3623 }
 0x9aa   : > { %12839 = vst [vmem:[#allocation114_spill] sm:$0xff] %v10334_v3  ;;  %v12846_v3 = vld [vmem:[#allocation35_spill] sm:$0xff] }
 0x9ab   : > { %3409 = vrot.lane.b32.xlu1 %v2565_v22, %s5126_s11  ;;  %3447 = vrot.lane.b32.xlu0 %v2618_v8, %s5126_s11  ;;  %v2563_v45 = vsel %vm12847_vm1, %v12846_v3, %v12837_v37  ;;  %v12848_v22 = vld [vmem:[#allocation23_spill] sm:$0xff]  ;;  %vm12909_vm1 = vmmov %vm12896_vm7 }
 0x9ac   : > { %v2539_v19 = vsel %vm321_vm10, %v12848_v22, %v12849_v40 }
 0x9ad   : > { %v3626_v24 = vpop.permute.xlu1 %3625  ;;  %v3622_v29 = vpop.permute.xlu0 %3621 }
 0x9ae   : > { %v3957_v16 = vsel %vm1650_vm13, %v3622_v29, %v3624_v34  ;;  %v3958_v7 = vsel %vm1650_vm13, %v3624_v34, %v3626_v24  ;;  %v2538_v29 = vsel %vm321_vm10, %v12713_v58, %v12848_v22  ;;  %v12850_v34 = vld [vmem:[#allocation43_spill] sm:$0xff]  ;;  %v12851_v58 = vld [vmem:[#allocation136_spill] sm:$0xff] }
 0x9af   : > { %3449 = vrot.lane.b32.xlu1 %v2619_v62, %s5126_s11  ;;  %3405 = vrot.lane.b32.xlu0 %v2563_v45, %s5126_s11  ;;  %v2593_v45 = vsel %vm12852_vm3, %v12850_v34, %v12851_v58  ;;  %v12858_v58 = vld [vmem:[#allocation34_spill] sm:$0xff]  ;;  %vm12916_vm3 = vcmask 867328  }
 0x9b0   : > { %4272 = vmatprep.subr.mxu0 %v3958_v7 }
 0x9b1   : > { %4273 = vmatpush1.msra.mxu0 %v3957_v16  ;;  %v3606_v23 = vpop.permute.xlu1 %3605  ;;  %v3608_v8 = vpop.permute.xlu0 %3607  ;;  %v2592_v16 = vsel %vm12823_vm2, %v12824_v14, %v12850_v34 }
 0x9b2   : > { %v3950_v37 = vsel %vm1650_vm13, %v3606_v23, %v3608_v8 }
 0x9b3   : > { %3389 = vrot.lane.b32.xlu1 %v2538_v29, %s5126_s11  ;;  %3391 = vrot.lane.b32.xlu0 %v2539_v19, %s5126_s11  ;;  %v12853_v19 = vld [vmem:[#allocation42_spill] sm:$0xff] }
 0x9b4   : > { %4274 = vmatprep.subr.mxu0 %v3950_v37  ;;  %v12855_v37 = vld [vmem:[#allocation37_spill] sm:$0xff] }
 0x9b5   : > { %v3604_v62 = vpop.permute.xlu1 %3603  ;;  %v3588_v7 = vpop.permute.xlu0 %3587  ;;  %v2567_v14 = vsel %vm12856_vm9, %v12853_v19, %v12855_v37  ;;  %vm12923_vm9 = vcmask 875520  }
 0x9b6   : > { %v3949_v3 = vsel %vm1650_vm13, %v3604_v62, %v3606_v23  ;;  %v2566_v23 = vsel %vm12854_vm4, %v12840_v17, %v12853_v19  ;;  %vm12918_vm4 = vmmov %vm12916_vm3 }
 0x9b7   : > { %3429 = vrot.lane.b32.xlu1 %v2592_v16, %s5126_s11  ;;  %3431 = vrot.lane.b32.xlu0 %v2593_v45, %s5126_s11  ;;  %v12857_v45 = vld [vmem:[#allocation25_spill] sm:$0xff] }
 0x9b8   : > { %4275 = vmatpush1.msra.mxu0 %v3949_v3  ;;  %v2540_v17 = vsel %vm321_vm10, %v12849_v40, %v12857_v45  ;;  %v2541_v19 = vsel %vm321_vm10, %v12857_v45, %v12858_v58  ;;  %v3343_v40 = vsel %vm1075_vm12, %v10176_v47, %v10186_v48 }
 0x9b9   : > { %v10372_v22 = vpop.permute.xlu1 %3589  ;;  %v3628_v29 = vpop.permute.xlu0 %3627 }
 0x9ba   : > { %v3942_v62 = vsel %vm1650_vm13, %v3588_v7, %v10372_v22 }
 0x9bb   : > { %3411 = vrot.lane.b32.xlu1 %v2566_v23, %s5126_s11  ;;  %3413 = vrot.lane.b32.xlu0 %v2567_v14, %s5126_s11  ;;  %v3959_v23 = vsel %vm1650_vm13, %v3626_v24, %v3628_v29 }
 0x9bc   : > { %4276 = vmatprep.subr.mxu0 %v3942_v62  ;;  %v3344_v62 = vsel %vm1075_vm12, %v10186_v48, %v10188_v5 }
 0x9bd   : > { %v10384_v3 = vpop.permute.xlu1 %3629  ;;  %v3586_v34 = vpop.permute.xlu0 %3585 }
 0x9be   : > { %v3941_v16 = vsel %vm1650_vm13, %v3586_v34, %v3588_v7  ;;  %v3960_v37 = vsel %vm1650_vm13, %v3628_v29, %v10384_v3  ;;  %v3335_v29 = vsel %vm1075_vm12, %v10136_v25, %v10142_v44 }
 0x9bf   : > { %3393 = vrot.lane.b32.xlu1 %v2540_v17, %s5126_s11  ;;  %3395 = vrot.lane.b32.xlu0 %v2541_v19, %s5126_s11 }
 0x9c0   : > { %4277 = vmatpush1.msra.mxu0 %v3941_v16  ;;  %4343 = vmatprep.subr.mxu1 %v3960_v37 }
 0x9c1   : > { %4344 = vmatpush1.msra.mxu1 %v3959_v23  ;;  %v3570_v7 = vpop.permute.xlu1 %3569  ;;  %v3572_v14 = vpop.permute.xlu0 %3571  ;;  %v3336_v23 = vsel %vm1075_vm12, %v10142_v44, %v10144_v38 }
 0x9c2   : > { %v3934_v34 = vsel %vm1650_vm13, %v3570_v7, %v3572_v14 }
 0x9c3   : > { %3821 = vrot.lane.b32.xlu1 %v3343_v40, %s5126_s11  ;;  %3823 = vrot.lane.b32.xlu0 %v3344_v62, %s5126_s11  ;;  %v3327_v40 = vsel %vm1075_vm12, %v10086_v4, %v10088_v15 }
 0x9c4   : > { %4278 = vmatprep.subr.mxu0 %v3934_v34 }
 0x9c5   : > { %v3610_v37 = vpop.permute.xlu1 %3609  ;;  %v10407_v24 = vpop.permute.xlu0 %3611 }
 0x9c6   : > { %v3952_v16 = vsel %vm1650_vm13, %v3610_v37, %v10407_v24  ;;  %v3951_v45 = vsel %vm1650_vm13, %v3608_v8, %v3610_v37  ;;  %v3345_v37 = vsel %vm1075_vm12, %v10188_v5, %v10198_v43  ;;  %v3319_v5 = vsel %vm1075_vm12, %v10042_v27, %v10044_v36 }
 0x9c7   : > { %3819 = vrot.lane.b32.xlu1 %v10176_v47, %s5126_s11  ;;  %3803 = vrot.lane.b32.xlu0 %v3335_v29, %s5126_s11 }
 0x9c8   : > { %4345 = vmatprep.subr.mxu1 %v3952_v16 }
 0x9c9   : > { %4346 = vmatpush1.msra.mxu1 %v3951_v45  ;;  %v3568_v48 = vpop.permute.xlu1 %3567  ;;  %v3552_v17 = vpop.permute.xlu0 %3551 }
 0x9ca   : > { %v3933_v19 = vsel %vm1650_vm13, %v3568_v48, %v3570_v7  ;;  %v3328_v7 = vsel %vm1075_vm12, %v10088_v15, %v10098_v10  ;;  %v3346_v15 = vsel %vm1075_vm12, %v10198_v43, %v10200_v63 }
 0x9cb   : > { %3805 = vrot.lane.b32.xlu1 %v3336_v23, %s5126_s11  ;;  %3801 = vrot.lane.b32.xlu0 %v10136_v25, %s5126_s11  ;;  %v3337_v23 = vsel %vm1075_vm12, %v10144_v38, %v10154_v60 }
 0x9cc   : > { %4279 = vmatpush1.msra.mxu0 %v3933_v19 }
 0x9cd   : > { %v10425_v8 = vpop.permute.xlu1 %3553  ;;  %v3592_v47 = vpop.permute.xlu0 %3591 }
 0x9ce   : > { %v3926_v44 = vsel %vm1650_vm13, %v3552_v17, %v10425_v8  ;;  %v3943_v16 = vsel %vm1650_vm13, %v10372_v22, %v3592_v47  ;;  %v3320_v22 = vsel %vm1075_vm12, %v10044_v36, %v10052_v39  ;;  %v3338_v36 = vsel %vm1075_vm12, %v10154_v60, %v10156_v42 }
 0x9cf   : > { %3785 = vrot.lane.b32.xlu1 %v3327_v40, %s5126_s11  ;;  %3787 = vrot.lane.b32.xlu0 %v3328_v7, %s5126_s11 }
 0x9d0   : > { %4280 = vmatprep.subr.mxu0 %v3926_v44 }
 0x9d1   : > { %v10437_v25 = vpop.permute.xlu1 %3593  ;;  %v3550_v62 = vpop.permute.xlu0 %3549 }
 0x9d2   : > { %v3925_v34 = vsel %vm1650_vm13, %v3550_v62, %v3552_v17  ;;  %v3944_v29 = vsel %vm1650_vm13, %v3592_v47, %v10437_v25  ;;  %v3311_v62 = vsel %vm1075_vm12, %v9994_v33, %v10000_v54 }
 0x9d3   : > { %3825 = vrot.lane.b32.xlu1 %v3345_v37, %s5126_s11  ;;  %3827 = vrot.lane.b32.xlu0 %v3346_v15, %s5126_s11 }
 0x9d4   : > { %4281 = vmatpush1.msra.mxu0 %v3925_v34  ;;  %4347 = vmatprep.subr.mxu1 %v3944_v29  ;;  %v3312_v34 = vsel %vm1075_vm12, %v10000_v54, %v10002_v26  ;;  %v3329_v29 = vsel %vm1075_vm12, %v10098_v10, %v10100_v55  ;;  %v3330_v54 = vsel %vm1075_vm12, %v10100_v55, %v10110_v12 }
 0x9d5   : > { %4348 = vmatpush1.msra.mxu1 %v3943_v16  ;;  %v3534_v45 = vpop.permute.xlu1 %3533  ;;  %v3536_v48 = vpop.permute.xlu0 %3535  ;;  %v3303_v10 = vsel %vm1075_vm12, %v9960_v32, %v9966_v41 }
 0x9d6   : > { %v3918_v43 = vsel %vm1650_vm13, %v3534_v45, %v3536_v48 }
 0x9d7   : > { %3783 = vrot.lane.b32.xlu1 %v10086_v4, %s5126_s11  ;;  %3767 = vrot.lane.b32.xlu0 %v3319_v5, %s5126_s11 }
 0x9d8   : > { %4282 = vmatprep.subr.mxu0 %v3918_v43 }
 0x9d9   : > { %v3574_v17 = vpop.permute.xlu1 %3573  ;;  %v10459_v19 = vpop.permute.xlu0 %3575 }
 0x9da   : > { %v3936_v47 = vsel %vm1650_vm13, %v3574_v17, %v10459_v19  ;;  %v3935_v40 = vsel %vm1650_vm13, %v3572_v14, %v3574_v17 }
 0x9db   : > { %3769 = vrot.lane.b32.xlu1 %v3320_v22, %s5126_s11  ;;  %3807 = vrot.lane.b32.xlu0 %v3337_v23, %s5126_s11  ;;  %v3321_v23 = vsel %vm1075_vm12, %v10052_v39, %v10054_v56 }
 0x9dc   : > { %4349 = vmatprep.subr.mxu1 %v3936_v47 }
 0x9dd   : > { %4350 = vmatpush1.msra.mxu1 %v3935_v40  ;;  %v3532_v4 = vpop.permute.xlu1 %3531  ;;  %v3516_v7 = vpop.permute.xlu0 %3515 }
 0x9de   : > { %v3917_v44 = vsel %vm1650_vm13, %v3532_v4, %v3534_v45 }
 0x9df   : > { %3809 = vrot.lane.b32.xlu1 %v3338_v36, %s5126_s11  ;;  %3765 = vrot.lane.b32.xlu0 %v10042_v27, %s5126_s11  ;;  %v3296_v36 = vsel %vm1075_vm12, %v9926_v13, %v9934_v35 }
 0x9e0   : > { %4283 = vmatpush1.msra.mxu0 %v3917_v44  ;;  %v3295_v44 = vsel %vm1075_vm12, %v9924_v31, %v9926_v13  ;;  %v3314_v13 = vsel %vm1075_vm12, %v10008_v20, %v10010_v28 }
 0x9e1   : > { %v10479_v38 = vpop.permute.xlu1 %3517  ;;  %v3556_v14 = vpop.permute.xlu0 %3555 }
 0x9e2   : > { %v3910_v60 = vsel %vm1650_vm13, %v3516_v7, %v10479_v38  ;;  %v3927_v45 = vsel %vm1650_vm13, %v10425_v8, %v3556_v14  ;;  %v3304_v8 = vsel %vm1075_vm12, %v9966_v41, %v9968_v51  ;;  %v3322_v41 = vsel %vm1075_vm12, %v10054_v56, %v10064_v46 }
 0x9e3   : > { %3749 = vrot.lane.b32.xlu1 %v3311_v62, %s5126_s11  ;;  %3751 = vrot.lane.b32.xlu0 %v3312_v34, %s5126_s11  ;;  %v3313_v34 = vsel %vm1075_vm12, %v10002_v26, %v10008_v20  ;;  %v3287_v26 = vsel %vm1075_vm12, %v9855_v50, %v9857_v6 }
 0x9e4   : > { %4284 = vmatprep.subr.mxu0 %v3910_v60 }
 0x9e5   : > { %v10491_v27 = vpop.permute.xlu1 %3557  ;;  %v3514_v37 = vpop.permute.xlu0 %3513 }
 0x9e6   : > { %v3909_v15 = vsel %vm1650_vm13, %v3514_v37, %v3516_v7  ;;  %v3928_v16 = vsel %vm1650_vm13, %v3556_v14, %v10491_v27 }
 0x9e7   : > { %3789 = vrot.lane.b32.xlu1 %v3329_v29, %s5126_s11  ;;  %3791 = vrot.lane.b32.xlu0 %v3330_v54, %s5126_s11 }
 0x9e8   : > { %4285 = vmatpush1.msra.mxu0 %v3909_v15  ;;  %4351 = vmatprep.subr.mxu1 %v3928_v16 }
 0x9e9   : > { %4352 = vmatpush1.msra.mxu1 %v3927_v45  ;;  %v3498_v5 = vpop.permute.xlu1 %3497  ;;  %v3500_v43 = vpop.permute.xlu0 %3499  ;;  %v3305_v45 = vsel %vm1075_vm12, %v9968_v51, %v9976_v53 }
 0x9ea   : > { %v3902_v55 = vsel %vm1650_vm13, %v3498_v5, %v3500_v43 }
 0x9eb   : > { %3747 = vrot.lane.b32.xlu1 %v9994_v33, %s5126_s11  ;;  %3731 = vrot.lane.b32.xlu0 %v3303_v10, %s5126_s11 }
 0x9ec   : > { %4286 = vmatprep.subr.mxu0 %v3902_v55 }
 0x9ed   : > { %v3538_v17 = vpop.permute.xlu1 %3537  ;;  %v10513_v22 = vpop.permute.xlu0 %3539 }
 0x9ee   : > { %v3920_v47 = vsel %vm1650_vm13, %v3538_v17, %v10513_v22  ;;  %v3919_v40 = vsel %vm1650_vm13, %v3536_v48, %v3538_v17 }
 0x9ef   : > { %3733 = vrot.lane.b32.xlu1 %v3304_v8, %s5126_s11  ;;  %3771 = vrot.lane.b32.xlu0 %v3321_v23, %s5126_s11  ;;  %v3279_v8 = vsel %vm1075_vm12, %v9780_v57, %v9789_v0  ;;  %v3280_v23 = vsel %vm1075_vm12, %v9789_v0, %v9791_v61  ;;  %v3298_v0 = vsel %vm1075_vm12, %v9936_v18, %v9942_v2 }
 0x9f0   : > { %4353 = vmatprep.subr.mxu1 %v3920_v47 }
 0x9f1   : > { %4354 = vmatpush1.msra.mxu1 %v3919_v40  ;;  %v3496_v33 = vpop.permute.xlu1 %3495  ;;  %v3480_v4 = vpop.permute.xlu0 %3479 }
 0x9f2   : > { %v3901_v7 = vsel %vm1650_vm13, %v3496_v33, %v3498_v5  ;;  %v3297_v33 = vsel %vm1075_vm12, %v9934_v35, %v9936_v18  ;;  %v3271_v35 = vsel %vm1075_vm12, %v9745_v30, %v9754_v1 }
 0x9f3   : > { %3773 = vrot.lane.b32.xlu1 %v3322_v41, %s5126_s11  ;;  %3729 = vrot.lane.b32.xlu0 %v9960_v32, %s5126_s11 }
 0x9f4   : > { %4287 = vmatpush1.msra.mxu0 %v3901_v7 }
 0x9f5   : > { %v10533_v39 = vpop.permute.xlu1 %3481  ;;  %v3520_v48 = vpop.permute.xlu0 %3519 }
 0x9f6   : > { %v3894_v56 = vsel %vm1650_vm13, %v3480_v4, %v10533_v39  ;;  %v3911_v37 = vsel %vm1650_vm13, %v10479_v38, %v3520_v48  ;;  %v3288_v38 = vsel %vm1075_vm12, %v9857_v6, %v9870_v11  ;;  %v3306_v6 = vsel %vm1075_vm12, %v9976_v53, %v9978_v52 }
 0x9f7   : > { %3713 = vrot.lane.b32.xlu1 %v3295_v44, %s5126_s11  ;;  %3715 = vrot.lane.b32.xlu0 %v3296_v36, %s5126_s11 }
 0x9f8   : > { %4288 = vmatprep.subr.mxu0 %v3894_v56  ;;  %v3289_v56 = vsel %vm1075_vm12, %v9870_v11, %v9872_v9 }
 0x9f9   : > { %v10545_v32 = vpop.permute.xlu1 %3521  ;;  %v3478_v14 = vpop.permute.xlu0 %3477 }
 0x9fa   : > { %v3893_v62 = vsel %vm1650_vm13, %v3478_v14, %v3480_v4  ;;  %v3912_v60 = vsel %vm1650_vm13, %v3520_v48, %v10545_v32 }
 0x9fb   : > { %3753 = vrot.lane.b32.xlu1 %v3313_v34, %s5126_s11  ;;  %3755 = vrot.lane.b32.xlu0 %v3314_v13, %s5126_s11 }
 0x9fc   : > { %4289 = vmatpush1.msra.mxu0 %v3893_v62  ;;  %4355 = vmatprep.subr.mxu1 %v3912_v60 }
 0x9fd   : > { %4356 = vmatpush1.msra.mxu1 %v3911_v37  ;;  %v3462_v15 = vpop.permute.xlu1 %3461  ;;  %v3464_v29 = vpop.permute.xlu0 %3463  ;;  %v12859_v37 = vld [vmem:[#allocation154_spill] sm:$0xff] }
 0x9fe   : > { %v3886_v20 = vsel %vm1650_vm13, %v3462_v15, %v3464_v29 }
 0x9ff   : > { %3711 = vrot.lane.b32.xlu1 %v9924_v31, %s5126_s11  ;;  %3695 = vrot.lane.b32.xlu0 %v3287_v26, %s5126_s11  ;;  %v12861_v26 = vld [vmem:[#allocation58_spill] sm:$0xff] }
 0xa00   : > { %4290 = vmatprep.subr.mxu0 %v3886_v20  ;;  %v3264_v20 = vsel %vm1075_vm12, %v12859_v37, %v12861_v26 }
 0xa01   : > { %v3502_v54 = vpop.permute.xlu1 %3501  ;;  %v10567_v16 = vpop.permute.xlu0 %3503 }
 0xa02   : > { %v3904_v5 = vsel %vm1650_vm13, %v3502_v54, %v10567_v16  ;;  %v3903_v10 = vsel %vm1650_vm13, %v3500_v43, %v3502_v54 }
 0xa03   : > { %3697 = vrot.lane.b32.xlu1 %v3288_v38, %s5126_s11  ;;  %3735 = vrot.lane.b32.xlu0 %v3305_v45, %s5126_s11  ;;  %v10651_v38 = vld [vmem:[#allocation7 + $0x8] sm:$0xff] }
 0xa04   : > { %4357 = vmatprep.subr.mxu1 %v3904_v5  ;;  %4758 = vmatprep.mubr.msk.f32.mxu0 %vm2083_vm14, %v10651_v38  ;;  %v12862_v5 = vld [vmem:[#allocation148_spill] sm:$0xff] }
 0xa05   : > { %4358 = vmatpush1.msra.mxu1 %v3903_v10  ;;  %v3460_v31 = vpop.permute.xlu1 %3459  ;;  %v3444_v55 = vpop.permute.xlu0 %3443  ;;  %4759 = vmatprep.mubr.msk.f32.mxu1 %vm2083_vm14, %v10651_v38  ;;  %v3281_v10 = vsel %vm1075_vm12, %v9791_v61, %v12862_v5  ;;  %v12864_v61 = vld [vmem:[#allocation62_spill] sm:$0xff] }
 0xa06   : > { %v3885_v17 = vsel %vm1650_vm13, %v3460_v31, %v3462_v15  ;;  %v12860_v15 = vld [vmem:[#allocation77_spill] sm:$0xff]  ;;  %v12863_v31 = vld [vmem:[#allocation146_spill] sm:$0xff] }
 0xa07   : > { %3737 = vrot.lane.b32.xlu1 %v3306_v6, %s5126_s11  ;;  %3693 = vrot.lane.b32.xlu0 %v9855_v50, %s5126_s11 }
 0xa08   : > { %4291 = vmatpush1.msra.mxu0 %v3885_v17 }
 0xa09   : > { %v10587_v51 = vpop.permute.xlu1 %3445  ;;  %v3484_v43 = vpop.permute.xlu0 %3483 }
 0xa0a   : > { %v3878_v53 = vsel %vm1650_vm13, %v3444_v55, %v10587_v51  ;;  %v3895_v7 = vsel %vm1650_vm13, %v10533_v39, %v3484_v43  ;;  %v3272_v39 = vsel %vm1075_vm12, %v9754_v1, %v9756_v59  ;;  %v3290_v1 = vsel %vm1075_vm12, %v9872_v9, %v9888_v49 }
 0xa0b   : > { %3677 = vrot.lane.b32.xlu1 %v3279_v8, %s5126_s11  ;;  %3679 = vrot.lane.b32.xlu0 %v3280_v23, %s5126_s11  ;;  %v12865_v23 = vld [vmem:[#allocation60_spill] sm:$0xff] }
 0xa0c   : > { %4292 = vmatprep.subr.mxu0 %v3878_v53  ;;  %v2876_v53 = vsel %vm670_vm11, %v12865_v23, %v12864_v61 }
 0xa0d   : > { %v10599_v50 = vpop.permute.xlu1 %3485  ;;  %v3442_v47 = vpop.permute.xlu0 %3441 }
 0xa0e   : > { %v3877_v40 = vsel %vm1650_vm13, %v3442_v47, %v3444_v55  ;;  %v3896_v4 = vsel %vm1650_vm13, %v3484_v43, %v10599_v50  ;;  %v3282_v55 = vsel %vm1075_vm12, %v12862_v5, %v12863_v31 }
 0xa0f   : > { %3717 = vrot.lane.b32.xlu1 %v3297_v33, %s5126_s11  ;;  %3719 = vrot.lane.b32.xlu0 %v3298_v0, %s5126_s11  ;;  %v12867_v0 = vld [vmem:[#allocation109_spill] sm:$0xff] }
 0xa10   : > { %4293 = vmatpush1.msra.mxu0 %v3877_v40  ;;  %4359 = vmatprep.subr.mxu1 %v3896_v4  ;;  %v12866_v40 = vld [vmem:[#allocation114_spill] sm:$0xff]  ;;  %v12868_v4 = vld [vmem:[#allocation97_spill] sm:$0xff] }
 0xa11   : > { %4360 = vmatpush1.msra.mxu1 %v3895_v7  ;;  %v3426_v41 = vpop.permute.xlu1 %3425  ;;  %v10614_v48 = vpop.permute.xlu0 %3427  ;;  %v3846_v7 = vsel %vm1650_vm13, %v12868_v4, %v12867_v0 }
 0xa12   : > { %v3870_v18 = vsel %vm1650_vm13, %v3426_v41, %v10614_v48 }
 0xa13   : > { %3675 = vrot.lane.b32.xlu1 %v9780_v57, %s5126_s11  ;;  %3659 = vrot.lane.b32.xlu0 %v3271_v35, %s5126_s11  ;;  %v12869_v35 = vld [vmem:[#allocation96_spill] sm:$0xff] }
 0xa14   : > { %4294 = vmatprep.subr.mxu0 %v3870_v18  ;;  %v3845_v18 = vsel %vm1650_vm13, %v12869_v35, %v12868_v4  ;;  %v12882_v4 = vld [vmem:[#allocation161_spill] sm:$0xff]  ;;  %v12883_v35 = vld [vmem:[#allocation59_spill] sm:$0xff] }
 0xa15   : > { %v3466_v44 = vpop.permute.xlu1 %3465  ;;  %v10624_v36 = vpop.permute.xlu0 %3467 }
 0xa16   : > { %v3888_v14 = vsel %vm1650_vm13, %v3466_v44, %v10624_v36  ;;  %v3887_v62 = vsel %vm1650_vm13, %v3464_v29, %v3466_v44  ;;  %v3263_v29 = vsel %vm1075_vm12, %v12860_v15, %v12859_v37  ;;  %v12870_v44 = vld [vmem:[#allocation16_spill] sm:$0xff] }
 0xa17   : > { %3661 = vrot.lane.b32.xlu1 %v3272_v39, %s5126_s11  ;;  %3699 = vrot.lane.b32.xlu0 %v3289_v56, %s5126_s11  ;;  %v2877_v39 = vsel %vm670_vm11, %v12864_v61, %v12870_v44  ;;  %v12879_v61 = vld [vmem:[#allocation15_spill] sm:$0xff] }
 0xa18   : > { %4361 = vmatprep.subr.mxu1 %v3888_v14  ;;  %v12871_v14 = vld [vmem:[#allocation78_spill] sm:$0xff]  ;;  %v3265_v23 = vsel %vm1075_vm12, %v12861_v26, %v12879_v61  ;;  %v3266_v26 = vsel %vm1075_vm12, %v12879_v61, %v12882_v4  ;;  %v12895_v61 = vld [vmem:[#allocation156_spill] sm:$0xff] }
 0xa19   : > { %4362 = vmatpush1.msra.mxu1 %v3887_v62  ;;  %v3424_v57 = vpop.permute.xlu1 %3423  ;;  %v3408_v34 = vpop.permute.xlu0 %3407  ;;  %v3273_v62 = vsel %vm1075_vm12, %v9756_v59, %v12871_v14  ;;  %v12875_v59 = vld [vmem:[#allocation152_spill] sm:$0xff] }
 0xa1a   : > { %v3869_v13 = vsel %vm1650_vm13, %v3424_v57, %v3426_v41  ;;  %v12872_v57 = vld [vmem:[#allocation87_spill] sm:$0xff] }
 0xa1b   : > { %3701 = vrot.lane.b32.xlu1 %v3290_v1, %s5126_s11  ;;  %3657 = vrot.lane.b32.xlu0 %v9745_v30, %s5126_s11 }
 0xa1c   : > { %4295 = vmatpush1.msra.mxu0 %v3869_v13 }
 0xa1d   : > { %v3410_v11 = vpop.permute.xlu1 %3409  ;;  %v3448_v60 = vpop.permute.xlu0 %3447 }
 0xa1e   : > { %v3862_v54 = vsel %vm1650_vm13, %v3408_v34, %v3410_v11  ;;  %v3879_v6 = vsel %vm1650_vm13, %v10587_v51, %v3448_v60 }
 0xa1f   : > { %3641 = vrot.lane.b32.xlu1 %v3263_v29, %s5126_s11  ;;  %3643 = vrot.lane.b32.xlu0 %v3264_v20, %s5126_s11  ;;  %v3274_v20 = vsel %vm1075_vm12, %v12871_v14, %v12875_v59  ;;  %v12887_v14 = vld [vmem:[#allocation81_spill] sm:$0xff] }
 0xa20   : > { %4296 = vmatprep.subr.mxu0 %v3862_v54 }
 0xa21   : > { %v10657_v9 = vpop.permute.xlu1 %3449  ;;  %v3406_v30 = vpop.permute.xlu0 %3405 }
 0xa22   : > { %v3861_v45 = vsel %vm1650_vm13, %v3406_v30, %v3408_v34  ;;  %v3880_v17 = vsel %vm1650_vm13, %v3448_v60, %v10657_v9  ;;  %v12873_v34 = vld [vmem:[#allocation73_spill] sm:$0xff] }
 0xa23   : > { %3681 = vrot.lane.b32.xlu1 %v3281_v10, %s5126_s11  ;;  %3683 = vrot.lane.b32.xlu0 %v3282_v55, %s5126_s11  ;;  %v3838_v13 = vsel %vm1650_vm13, %v12873_v34, %v12872_v57  ;;  %v12874_v60 = vld [vmem:[#allocation157_spill] sm:$0xff] }
 0xa24   : > { %4297 = vmatpush1.msra.mxu0 %v3861_v45  ;;  %4363 = vmatprep.subr.mxu1 %v3880_v17  ;;  %v3837_v37 = vsel %vm1650_vm13, %v12874_v60, %v12873_v34  ;;  %v12876_v30 = vld [vmem:[#allocation49_spill] sm:$0xff]  ;;  %v12877_v45 = vld [vmem:[#allocation150_spill] sm:$0xff]  ;;  %v12878_v17 = vld [vmem:[#allocation68_spill] sm:$0xff] }
 0xa25   : > { %4364 = vmatpush1.msra.mxu1 %v3879_v6  ;;  %v3390_v43 = vpop.permute.xlu1 %3389  ;;  %v3392_v8 = vpop.permute.xlu0 %3391  ;;  %v2850_v5 = vsel %vm643_vm15, %v12877_v45, %v12876_v30  ;;  %v2851_v6 = vsel %vm643_vm15, %v12876_v30, %v12878_v17  ;;  %v12888_v60 = vld [vmem:[#allocation159_spill] sm:$0xff] }
 0xa26   : > { %v3854_v47 = vsel %vm1650_vm13, %v3390_v43, %v3392_v8  ;;  %v3853_v33 = vsel %vm1650_vm13, %v12866_v40, %v3390_v43 }
 0xa27   : > { %3639 = vrot.lane.b32.xlu1 %v12860_v15, %s5126_s11  ;;  %3631 = vrot.lane.b32.xlu0 %v2876_v53, %s5126_s11  ;;  %v12880_v53 = vld [vmem:[#allocation112_spill] sm:$0xff] }
 0xa28   : > { %4298 = vmatprep.subr.mxu0 %v3854_v47  ;;  %v12881_v47 = vld [vmem:[#allocation95_spill] sm:$0xff] }
 0xa29   : > { %4299 = vmatpush1.msra.mxu0 %v3853_v33  ;;  %v3430_v51 = vpop.permute.xlu1 %3429  ;;  %v10686_v41 = vpop.permute.xlu0 %3431  ;;  %v3848_v40 = vsel %vm1650_vm13, %v12881_v47, %v12880_v53 }
 0xa2a   : > { %4300 = vmatprep.subr.mxu0 %v3846_v7  ;;  %v3872_v56 = vsel %vm1650_vm13, %v3430_v51, %v10686_v41  ;;  %v3871_v1 = vsel %vm1650_vm13, %v10614_v48, %v3430_v51 }
 0xa2b   : > { %4301 = vmatpush1.msra.mxu0 %v3845_v18  ;;  %3633 = vrot.lane.b32.xlu1 %v2877_v39, %s5126_s11  ;;  %v12884_v18 = vld [vmem:[#allocation66_spill] sm:$0xff] }
 0xa2c   : > { %3663 = vrot.lane.b32.xlu0 %v3273_v62, %s5126_s11  ;;  %4302 = vmatprep.subr.mxu0 %v3838_v13  ;;  %v2825_v39 = vsel %vm12885_vm5, %v12884_v18, %v12883_v35  ;;  %vm12925_vm5 = vmmov %vm12923_vm9 }
 0xa2d   : > { %4365 = vmatprep.subr.mxu1 %v3872_v56  ;;  %4303 = vmatpush1.msra.mxu0 %v3837_v37  ;;  %v3412_v15 = vpop.permute.xlu1 %3411  ;;  %v10709_v29 = vpop.permute.xlu0 %3413  ;;  %v12886_v56 = vld [vmem:[#allocation83_spill] sm:$0xff]  ;;  %v2826_v37 = vsel %vm12889_vm6, %v12883_v35, %v12888_v60  ;;  %vm12930_vm6 = vcmask 883712  }
 0xa2e   : > { %4366 = vmatpush1.msra.mxu1 %v3871_v1  ;;  %v3864_v48 = vsel %vm1650_vm13, %v3412_v15, %v10709_v29  ;;  %v3863_v54 = vsel %vm1650_vm13, %v3410_v11, %v3412_v15  ;;  %v3840_v62 = vsel %vm1650_vm13, %v12887_v14, %v12886_v56  ;;  %v12890_v15 = vld [vmem:[#allocation18_spill] sm:$0xff] }
 0xa2f   : > { %3665 = vrot.lane.b32.xlu1 %v3274_v20, %s5126_s11  ;;  %4367 = vmatprep.subr.mxu1 %v3864_v48  ;;  %v2878_v20 = vsel %vm670_vm11, %v12870_v44, %v12890_v15 }
 0xa30   : > { %3613 = vrot.lane.b32.xlu0 %v2850_v5, %s5126_s11  ;;  %4368 = vmatpush1.msra.mxu1 %v3863_v54  ;;  %v12891_v54 = vld [vmem:[#allocation45_spill] sm:$0xff] }
 0xa31   : > { %v3394_v10 = vpop.permute.xlu1 %3393  ;;  %v10722_v55 = vpop.permute.xlu0 %3395  ;;  %v2879_v30 = vsel %vm670_vm11, %v12890_v15, %v12891_v54  ;;  %vm12901_vm11 = vcmask 211968  }
 0xa32   : > { %v3856_v11 = vsel %vm1650_vm13, %v3394_v10, %v10722_v55  ;;  %v3855_v43 = vsel %vm1650_vm13, %v3392_v8, %v3394_v10  ;;  %v3847_v8 = vsel %vm1650_vm13, %v12867_v0, %v12881_v47  ;;  %v3839_v0 = vsel %vm1650_vm13, %v12872_v57, %v12887_v14  ;;  %v12892_v10 = vld [vmem:[#allocation84_spill] sm:$0xff]  ;;  %v12899_v14 = vld [vmem:[#allocation79_spill] sm:$0xff]  ;;  %vm12913_vm2 = vmmov %vm12901_vm11 }
 0xa33   : > { %3615 = vrot.lane.b32.xlu1 %v2851_v6, %s5126_s11  ;;  %4369 = vmatprep.subr.mxu1 %v3856_v11  ;;  %v12893_v6 = vld [vmem:[#allocation86_spill] sm:$0xff] }
 0xa34   : > { %3645 = vrot.lane.b32.xlu0 %v3265_v23, %s5126_s11  ;;  %4370 = vmatpush1.msra.mxu1 %v3855_v43  ;;  %v2802_v11 = vsel %vm12894_vm8, %v12893_v6, %v12892_v10  ;;  %v2803_v23 = vsel %vm12896_vm7, %v12892_v10, %v12895_v61  ;;  %v12907_v6 = vld [vmem:[#allocation140_spill] sm:$0xff]  ;;  %vm12932_vm8 = vmmov %vm12930_vm6 }
 0xa35   : > { %v3822_v33 = vpop.permute.xlu1 %3821  ;;  %4371 = vmatprep.subr.mxu1 %v3848_v40  ;;  %v3824_v51 = vpop.permute.xlu0 %3823  ;;  %v12897_v40 = vld [vmem:[#allocation61_spill] sm:$0xff]  ;;  %vm12934_vm7 = vmmov %vm12916_vm3 }
 0xa36   : > { %4372 = vmatpush1.msra.mxu1 %v3847_v8  ;;  %v4046_v7 = vsel %vm1650_vm13, %v3822_v33, %v3824_v51 }
 0xa37   : > { %3647 = vrot.lane.b32.xlu1 %v3266_v26, %s5126_s11  ;;  %4314 = vmatprep.subr.mxu0 %v4046_v7  ;;  %v12898_v7 = vld [vmem:[#allocation149_spill] sm:$0xff] }
 0xa38   : > { %3595 = vrot.lane.b32.xlu0 %v2825_v39, %s5126_s11  ;;  %4373 = vmatprep.subr.mxu1 %v3840_v62  ;;  %v2853_v35 = vsel %vm643_vm15, %v12897_v40, %v12898_v7  ;;  %v12900_v62 = vld [vmem:[#allocation94_spill] sm:$0xff] }
 0xa39   : > { %4374 = vmatpush1.msra.mxu1 %v3839_v0  ;;  %v3820_v34 = vpop.permute.xlu1 %3819  ;;  %v3804_v13 = vpop.permute.xlu0 %3803 }
 0xa3a   : > { %v4045_v1 = vsel %vm1650_vm13, %v3820_v34, %v3822_v33  ;;  %v2852_v33 = vsel %vm643_vm15, %v12878_v17, %v12897_v40  ;;  %v2776_v17 = vsel %vm12901_vm11, %v12900_v62, %v12899_v14  ;;  %vm12903_vm15 = vmmov %vm12901_vm11  ;;  %vm12936_vm11 = vcmask 949248  }
 0xa3b   : > { %3597 = vrot.lane.b32.xlu1 %v2826_v37, %s5126_s11  ;;  %4315 = vmatpush2.msra.mxu0 %v4045_v1  ;;  %v12902_v1 = vld [vmem:[#allocation164_spill] sm:$0xff] }
 0xa3c   : > { %3635 = vrot.lane.b32.xlu0 %v2878_v20, %s5126_s11  ;;  %v2777_v37 = vsel %vm12903_vm15, %v12899_v14, %v12902_v1  ;;  %vm12938_vm15 = vmmov %vm12936_vm11 }
 0xa3d   : > { %v3806_v48 = vpop.permute.xlu1 %3805  ;;  %v3802_v57 = vpop.permute.xlu0 %3801 }
 0xa3e   : > { %v4037_v45 = vsel %vm1650_vm13, %v3802_v57, %v3804_v13  ;;  %v4038_v5 = vsel %vm1650_vm13, %v3804_v13, %v3806_v48 }
 0xa3f   : > { %3637 = vrot.lane.b32.xlu1 %v2879_v30, %s5126_s11  ;;  %4316 = vmatprep.subr.mxu0 %v4038_v5  ;;  %v12906_v30 = vld [vmem:[#allocation158_spill] sm:$0xff] }
 0xa40   : > { %3577 = vrot.lane.b32.xlu0 %v2802_v11, %s5126_s11  ;;  %4317 = vmatpush2.msra.mxu0 %v4037_v45  ;;  %v12908_v11 = vld [vmem:[#allocation69_spill] sm:$0xff] }
 0xa41   : > { %v3786_v44 = vpop.permute.xlu1 %3785  ;;  %v3788_v43 = vpop.permute.xlu0 %3787 }
 0xa42   : > { %v4030_v47 = vsel %vm1650_vm13, %v3786_v44, %v3788_v43 }
 0xa43   : > { %3579 = vrot.lane.b32.xlu1 %v2803_v23, %s5126_s11  ;;  %4318 = vmatprep.subr.mxu0 %v4030_v47 }
 0xa44   : > { %3617 = vrot.lane.b32.xlu0 %v2852_v33, %s5126_s11 }
 0xa45   : > { %v3826_v8 = vpop.permute.xlu1 %3825  ;;  %v10784_v26 = vpop.permute.xlu0 %3827 }
 0xa46   : > { %v4048_v18 = vsel %vm1650_vm13, %v3826_v8, %v10784_v26  ;;  %v4047_v39 = vsel %vm1650_vm13, %v3824_v51, %v3826_v8  ;;  %v12904_v51 = vld [vmem:[#allocation74_spill] sm:$0xff]  ;;  %v12910_v8 = vld [vmem:[#allocation160_spill] sm:$0xff] }
 0xa47   : > { %3619 = vrot.lane.b32.xlu1 %v2853_v35, %s5126_s11  ;;  %4385 = vmatprep.subr.mxu1 %v4048_v18  ;;  %v2827_v15 = vsel %vm12905_vm0, %v12888_v60, %v12904_v51  ;;  %v12911_v18 = vld [vmem:[#allocation147_spill] sm:$0xff]  ;;  %vm12940_vm0 = vmmov %vm12925_vm5 }
 0xa48   : > { %3559 = vrot.lane.b32.xlu0 %v2776_v17, %s5126_s11  ;;  %4386 = vmatpush2.msra.mxu1 %v4047_v39  ;;  %v12912_v39 = vld [vmem:[#allocation165_spill] sm:$0xff] }
 0xa49   : > { %v3784_v0 = vpop.permute.xlu1 %3783  ;;  %v3768_v34 = vpop.permute.xlu0 %3767  ;;  %v2778_v14 = vsel %vm12913_vm2, %v12902_v1, %v12912_v39 }
 0xa4a   : > { %v4029_v13 = vsel %vm1650_vm13, %v3784_v0, %v3786_v44  ;;  %v2804_v44 = vsel %vm12909_vm1, %v12895_v61, %v12908_v11  ;;  %vm12943_vm1 = vcmask 957440  }
 0xa4b   : > { %3561 = vrot.lane.b32.xlu1 %v2777_v37, %s5126_s11  ;;  %4319 = vmatpush2.msra.mxu0 %v4029_v13  ;;  %vm12945_vm2 = vmmov %vm12943_vm1 }
 0xa4c   : > { %3599 = vrot.lane.b32.xlu0 %v2827_v15, %s5126_s11 }
 0xa4d   : > { %v3770_v20 = vpop.permute.xlu1 %3769  ;;  %v3808_v57 = vpop.permute.xlu0 %3807 }
 0xa4e   : > { %v4022_v54 = vsel %vm1650_vm13, %v3768_v34, %v3770_v20  ;;  %v4039_v23 = vsel %vm1650_vm13, %v3806_v48, %v3808_v57 }
 0xa4f   : > { %3601 = vrot.lane.b32.xlu1 %v12904_v51, %s5126_s11  ;;  %4320 = vmatprep.subr.mxu0 %v4022_v54  ;;  %v12917_v51 = vld [vmem:[#allocation93_spill] sm:$0xff]  ;;  %v12919_v54 = vld [vmem:[#allocation135_spill] sm:$0xff] }
 0xa50   : > { %3541 = vrot.lane.b32.xlu0 %v12906_v30, %s5126_s11 }
 0xa51   : > { %v10811_v45 = vpop.permute.xlu1 %3809  ;;  %v3766_v5 = vpop.permute.xlu0 %3765 }
 0xa52   : > { %v4021_v10 = vsel %vm1650_vm13, %v3766_v5, %v3768_v34  ;;  %v4040_v60 = vsel %vm1650_vm13, %v3808_v57, %v10811_v45  ;;  %v12914_v34 = vld [vmem:[#allocation106_spill] sm:$0xff] }
 0xa53   : > { %3543 = vrot.lane.b32.xlu1 %v12907_v6, %s5126_s11  ;;  %4321 = vmatpush2.msra.mxu0 %v4021_v10  ;;  %v2699_v15 = vsel %vm12918_vm4, %v12914_v34, %v12917_v51  ;;  %v12920_v6 = vld [vmem:[#allocation100_spill] sm:$0xff]  ;;  %vm12950_vm4 = vcmask 965632  }
 0xa54   : > { %3581 = vrot.lane.b32.xlu0 %v2804_v44, %s5126_s11  ;;  %4387 = vmatprep.subr.mxu1 %v4040_v60  ;;  %v12922_v44 = vld [vmem:[#allocation116_spill] sm:$0xff] }
 0xa55   : > { %4388 = vmatpush2.msra.mxu1 %v4039_v23  ;;  %v3750_v47 = vpop.permute.xlu1 %3749  ;;  %v3752_v40 = vpop.permute.xlu0 %3751 }
 0xa56   : > { %v4014_v33 = vsel %vm1650_vm13, %v3750_v47, %v3752_v40 }
 0xa57   : > { %3583 = vrot.lane.b32.xlu1 %v12908_v11, %s5126_s11  ;;  %4322 = vmatprep.subr.mxu0 %v4014_v33  ;;  %v12921_v11 = vld [vmem:[#allocation101_spill] sm:$0xff] }
 0xa58   : > { %3523 = vrot.lane.b32.xlu0 %v12910_v8, %s5126_s11  ;;  %v2672_v23 = vsel %vm12923_vm9, %v12922_v44, %v12921_v11  ;;  %vm12952_vm9 = vmmov %vm12950_vm4 }
 0xa59   : > { %v3790_v7 = vpop.permute.xlu1 %3789  ;;  %v10828_v61 = vpop.permute.xlu0 %3791 }
 0xa5a   : > { %v4032_v35 = vsel %vm1650_vm13, %v3790_v7, %v10828_v61  ;;  %v4031_v48 = vsel %vm1650_vm13, %v3788_v43, %v3790_v7  ;;  %v12915_v43 = vld [vmem:[#allocation108_spill] sm:$0xff]  ;;  %v12924_v7 = vld [vmem:[#allocation98_spill] sm:$0xff] }
 0xa5b   : > { %3525 = vrot.lane.b32.xlu1 %v12911_v18, %s5126_s11  ;;  %4389 = vmatprep.subr.mxu1 %v4032_v35  ;;  %v2698_v13 = vsel %vm12916_vm3, %v12915_v43, %v12914_v34  ;;  %v2673_v35 = vsel %vm12925_vm5, %v12921_v11, %v12924_v7  ;;  %v12926_v18 = vld [vmem:[#allocation138_spill] sm:$0xff]  ;;  %v12929_v34 = vld [vmem:[#allocation111_spill] sm:$0xff]  ;;  %vm12947_vm3 = vmmov %vm12930_vm6 }
 0xa5c   : > { %3563 = vrot.lane.b32.xlu0 %v2778_v14, %s5126_s11  ;;  %4390 = vmatpush2.msra.mxu1 %v4031_v48  ;;  %v12935_v11 = vld [vmem:[#allocation119_spill] sm:$0xff]  ;;  %vm12954_vm5 = vmmov %vm12936_vm11 }
 0xa5d   : > { %v3748_v62 = vpop.permute.xlu1 %3747  ;;  %v3732_v17 = vpop.permute.xlu0 %3731  ;;  %v2620_v44 = vsel %vm12936_vm11, %v12844_v21, %v12935_v11 }
 0xa5e   : > { %v4013_v0 = vsel %vm1650_vm13, %v3748_v62, %v3750_v47 }
 0xa5f   : > { %3565 = vrot.lane.b32.xlu1 %v12912_v39, %s5126_s11  ;;  %4323 = vmatpush2.msra.mxu0 %v4013_v0  ;;  %v12928_v0 = vld [vmem:[#allocation110_spill] sm:$0xff] }
 0xa60   : > { %3505 = vrot.lane.b32.xlu0 %v2698_v13, %s5126_s11  ;;  %v2646_v43 = vsel %vm12930_vm6, %v12929_v34, %v12928_v0  ;;  %v12942_v34 = vld [vmem:[#allocation136_spill] sm:$0xff]  ;;  %vm12958_vm6 = vmmov %vm12943_vm1 }
 0xa61   : > { %v3734_v37 = vpop.permute.xlu1 %3733  ;;  %v3772_v1 = vpop.permute.xlu0 %3771 }
 0xa62   : > { %v4006_v57 = vsel %vm1650_vm13, %v3732_v17, %v3734_v37  ;;  %v4023_v47 = vsel %vm1650_vm13, %v3770_v20, %v3772_v1 }
 0xa63   : > { %3507 = vrot.lane.b32.xlu1 %v2699_v15, %s5126_s11  ;;  %4324 = vmatprep.subr.mxu0 %v4006_v57  ;;  %v12931_v57 = vld [vmem:[#allocation107_spill] sm:$0xff] }
 0xa64   : > { %3545 = vrot.lane.b32.xlu0 %v12919_v54, %s5126_s11  ;;  %v2647_v54 = vsel %vm12932_vm8, %v12928_v0, %v12931_v57  ;;  %v12941_v0 = vld [vmem:[#allocation130_spill] sm:$0xff]  ;;  %vm12960_vm8 = vmmov %vm12950_vm4 }
 0xa65   : > { %v10853_v30 = vpop.permute.xlu1 %3773  ;;  %v3730_v5 = vpop.permute.xlu0 %3729 }
 0xa66   : > { %v4005_v10 = vsel %vm1650_vm13, %v3730_v5, %v3732_v17  ;;  %v4024_v60 = vsel %vm1650_vm13, %v3772_v1, %v10853_v30  ;;  %v12927_v17 = vld [vmem:[#allocation90_spill] sm:$0xff] }
 0xa67   : > { %3547 = vrot.lane.b32.xlu1 %v12920_v6, %s5126_s11  ;;  %4325 = vmatpush2.msra.mxu0 %v4005_v10 }
 0xa68   : > { %3487 = vrot.lane.b32.xlu0 %v2672_v23, %s5126_s11  ;;  %4391 = vmatprep.subr.mxu1 %v4024_v60 }
 0xa69   : > { %4392 = vmatpush2.msra.mxu1 %v4023_v47  ;;  %v3714_v33 = vpop.permute.xlu1 %3713  ;;  %v3716_v8 = vpop.permute.xlu0 %3715 }
 0xa6a   : > { %v3998_v48 = vsel %vm1650_vm13, %v3714_v33, %v3716_v8 }
 0xa6b   : > { %3489 = vrot.lane.b32.xlu1 %v2673_v35, %s5126_s11  ;;  %4326 = vmatprep.subr.mxu0 %v3998_v48 }
 0xa6c   : > { %3527 = vrot.lane.b32.xlu0 %v12926_v18, %s5126_s11  ;;  %v12939_v18 = vld [vmem:[#allocation99_spill] sm:$0xff] }
 0xa6d   : > { %v3754_v39 = vpop.permute.xlu1 %3753  ;;  %v10872_v14 = vpop.permute.xlu0 %3755  ;;  %v2674_v21 = vsel %vm12940_vm0, %v12924_v7, %v12939_v18 }
 0xa6e   : > { %v4016_v20 = vsel %vm1650_vm13, %v3754_v39, %v10872_v14  ;;  %v4015_v62 = vsel %vm1650_vm13, %v3752_v40, %v3754_v39  ;;  %v12933_v40 = vld [vmem:[#allocation85_spill] sm:$0xff] }
 0xa6f   : > { %3529 = vrot.lane.b32.xlu1 %v12927_v17, %s5126_s11  ;;  %4393 = vmatprep.subr.mxu1 %v4016_v20  ;;  %v2700_v5 = vsel %vm12934_vm7, %v12917_v51, %v12933_v40 }
 0xa70   : > { %3469 = vrot.lane.b32.xlu0 %v2646_v43, %s5126_s11  ;;  %4394 = vmatpush2.msra.mxu1 %v4015_v62  ;;  %v2594_v43 = vsel %vm12943_vm1, %v12942_v34, %v12941_v0 }
 0xa71   : > { %v3712_v13 = vpop.permute.xlu1 %3711  ;;  %v3696_v1 = vpop.permute.xlu0 %3695 }
 0xa72   : > { %v3997_v15 = vsel %vm1650_vm13, %v3712_v13, %v3714_v33  ;;  %v12937_v33 = vld [vmem:[#allocation132_spill] sm:$0xff] }
 0xa73   : > { %3471 = vrot.lane.b32.xlu1 %v2647_v54, %s5126_s11  ;;  %4327 = vmatpush2.msra.mxu0 %v3997_v15  ;;  %v2621_v35 = vsel %vm12938_vm15, %v12935_v11, %v12937_v33 }
 0xa74   : > { %3509 = vrot.lane.b32.xlu0 %v2700_v5, %s5126_s11 }
 0xa75   : > { %v3698_v10 = vpop.permute.xlu1 %3697  ;;  %v3736_v60 = vpop.permute.xlu0 %3735 }
 0xa76   : > { %v3990_v6 = vsel %vm1650_vm13, %v3696_v1, %v3698_v10  ;;  %v4007_v39 = vsel %vm1650_vm13, %v3734_v37, %v3736_v60 }
 0xa77   : > { %3511 = vrot.lane.b32.xlu1 %v12933_v40, %s5126_s11  ;;  %4328 = vmatprep.subr.mxu0 %v3990_v6  ;;  %v12946_v40 = vld [vmem:[#allocation122_spill] sm:$0xff] }
 0xa78   : > { %3451 = vrot.lane.b32.xlu0 %v2620_v44, %s5126_s11  ;;  %v2648_v5 = vsel %vm12947_vm3, %v12931_v57, %v12946_v40  ;;  %v12948_v44 = vld [vmem:[#allocation44_spill] sm:$0xff] }
 0xa79   : > { %v10899_v23 = vpop.permute.xlu1 %3737  ;;  %v3694_v51 = vpop.permute.xlu0 %3693 }
 0xa7a   : > { %v3989_v47 = vsel %vm1650_vm13, %v3694_v51, %v3696_v1  ;;  %v4008_v48 = vsel %vm1650_vm13, %v3736_v60, %v10899_v23  ;;  %v12944_v1 = vld [vmem:[#allocation127_spill] sm:$0xff]  ;;  %v12949_v51 = vld [vmem:[#allocation37_spill] sm:$0xff] }
 0xa7b   : > { %3453 = vrot.lane.b32.xlu1 %v2621_v35, %s5126_s11  ;;  %4329 = vmatpush2.msra.mxu0 %v3989_v47  ;;  %v2595_v37 = vsel %vm12945_vm2, %v12941_v0, %v12944_v1  ;;  %v12951_v35 = vld [vmem:[#allocation40_spill] sm:$0xff] }
 0xa7c   : > { %3491 = vrot.lane.b32.xlu0 %v2674_v21, %s5126_s11  ;;  %4395 = vmatprep.subr.mxu1 %v4008_v48  ;;  %v2569_v48 = vsel %vm12952_vm9, %v12948_v44, %v12951_v35  ;;  %v12953_v21 = vld [vmem:[#allocation129_spill] sm:$0xff] }
 0xa7d   : > { %4396 = vmatpush2.msra.mxu1 %v4007_v39  ;;  %v3678_v20 = vpop.permute.xlu1 %3677  ;;  %v3680_v62 = vpop.permute.xlu0 %3679  ;;  %v2622_v39 = vsel %vm12954_vm5, %v12937_v33, %v12953_v21 }
 0xa7e   : > { %v3982_v17 = vsel %vm1650_vm13, %v3678_v20, %v3680_v62 }
 0xa7f   : > { %3493 = vrot.lane.b32.xlu1 %v12939_v18, %s5126_s11  ;;  %4330 = vmatprep.subr.mxu0 %v3982_v17 }
 0xa80   : > { %3433 = vrot.lane.b32.xlu0 %v2594_v43, %s5126_s11  ;;  %v12955_v43 = vld [vmem:[#allocation27_spill] sm:$0xff] }
 0xa81   : > { %v3718_v7 = vpop.permute.xlu1 %3717  ;;  %v10920_v13 = vpop.permute.xlu0 %3719 }
 0xa82   : > { %v4000_v15 = vsel %vm1650_vm13, %v3718_v7, %v10920_v13  ;;  %v3999_v54 = vsel %vm1650_vm13, %v3716_v8, %v3718_v7  ;;  %v2568_v8 = vsel %vm12950_vm4, %v12949_v51, %v12948_v44  ;;  %v2542_v7 = vsel %vm321_vm10, %v12858_v58, %v12955_v43  ;;  %v12957_v58 = vld [vmem:[#allocation125_spill] sm:$0xff]  ;;  %v12959_v51 = vld [vmem:[#allocation46_spill] sm:$0xff] }
 0xa83   : > { %3435 = vrot.lane.b32.xlu1 %v2595_v37, %s5126_s11  ;;  %4397 = vmatprep.subr.mxu1 %v4000_v15 }
 0xa84   : > { %3473 = vrot.lane.b32.xlu0 %v2648_v5, %s5126_s11  ;;  %4398 = vmatpush2.msra.mxu1 %v3999_v54  ;;  %v12956_v54 = vld [vmem:[#allocation36_spill] sm:$0xff] }
 0xa85   : > { %v3676_v60 = vpop.permute.xlu1 %3675  ;;  %v3660_v6 = vpop.permute.xlu0 %3659 }
 0xa86   : > { %v3981_v11 = vsel %vm1650_vm13, %v3676_v60, %v3678_v20  ;;  %v2596_v60 = vsel %vm12958_vm6, %v12944_v1, %v12957_v58 }
 0xa87   : > { %3475 = vrot.lane.b32.xlu1 %v12946_v40, %s5126_s11  ;;  %4331 = vmatpush2.msra.mxu0 %v3981_v11  ;;  %v2543_v40 = vsel %vm321_vm10, %v12955_v43, %v12956_v54 }
 0xa88   : > { %3415 = vrot.lane.b32.xlu0 %v2568_v8, %s5126_s11  ;;  %v2570_v8 = vsel %vm12960_vm8, %v12951_v35, %v12959_v51 }
 0xa89   : > { %v10940_v47 = vpop.permute.xlu1 %3661  ;;  %v3700_v57 = vpop.permute.xlu0 %3699 }
 0xa8a   : > { %v3974_v18 = vsel %vm1650_vm13, %v3660_v6, %v10940_v47  ;;  %v3991_v33 = vsel %vm1650_vm13, %v3698_v10, %v3700_v57 }
 0xa8b   : > { %3417 = vrot.lane.b32.xlu1 %v2569_v48, %s5126_s11  ;;  %4332 = vmatprep.subr.mxu0 %v3974_v18  ;;  %v10987_v48 = vld [vmem:[#allocation7] sm:$0xff] }
 0xa8c   : > { %3455 = vrot.lane.b32.xlu0 %v2622_v39, %s5126_s11 }
 0xa8d   : > { %v10952_v20 = vpop.permute.xlu1 %3701  ;;  %v3658_v17 = vpop.permute.xlu0 %3657 }
 0xa8e   : > { %v3973_v0 = vsel %vm1650_vm13, %v3658_v17, %v3660_v6  ;;  %v3992_v34 = vsel %vm1650_vm13, %v3700_v57, %v10952_v20 }
 0xa8f   : > { %3457 = vrot.lane.b32.xlu1 %v12953_v21, %s5126_s11  ;;  %4333 = vmatpush2.msra.mxu0 %v3973_v0  ;;  %v12962_v0 = vld [vmem:[#allocation76_spill] sm:$0xff] }
 0xa90   : > { %3397 = vrot.lane.b32.xlu0 %v2542_v7, %s5126_s11  ;;  %4399 = vmatprep.subr.mxu1 %v3992_v34  ;;  %v3347_v34 = vsel %vm1075_vm12, %v10200_v63, %v12962_v0  ;;  %v12964_v63 = vld [vmem:[#allocation53_spill] sm:$0xff] }
 0xa91   : > { %4400 = vmatpush2.msra.mxu1 %v3991_v33  ;;  %v3642_v37 = vpop.permute.xlu1 %3641  ;;  %v10964_v15 = vpop.permute.xlu0 %3643 }
 0xa92   : > { %v3966_v5 = vsel %vm1650_vm13, %v3642_v37, %v10964_v15 }
 0xa93   : > { %3399 = vrot.lane.b32.xlu1 %v2543_v40, %s5126_s11  ;;  %4334 = vmatprep.subr.mxu0 %v3966_v5  ;;  %v3339_v5 = vsel %vm1075_vm12, %v10156_v42, %v12964_v63 }
 0xa94   : > { %3437 = vrot.lane.b32.xlu0 %v2596_v60, %s5126_s11 }
 0xa95   : > { %v3682_v10 = vpop.permute.xlu1 %3681  ;;  %v10976_v6 = vpop.permute.xlu0 %3683 }
 0xa96   : > { %v3984_v11 = vsel %vm1650_vm13, %v3682_v10, %v10976_v6  ;;  %v3983_v44 = vsel %vm1650_vm13, %v3680_v62, %v3682_v10  ;;  %v12961_v62 = vld [vmem:[#allocation29_spill] sm:$0xff]  ;;  %v12965_v10 = vld [vmem:[#allocation75_spill] sm:$0xff] }
 0xa97   : > { %3439 = vrot.lane.b32.xlu1 %v12957_v58, %s5126_s11  ;;  %4401 = vmatprep.subr.mxu1 %v3984_v11  ;;  %v2544_v21 = vsel %vm321_vm10, %v12956_v54, %v12961_v62  ;;  %v3340_v11 = vsel %vm1075_vm12, %v12964_v63, %v12965_v10  ;;  %v12971_v63 = vld [vmem:[#allocation21_spill] sm:$0xff] }
 0xa98   : > { %3419 = vrot.lane.b32.xlu0 %v2570_v8, %s5126_s11  ;;  %4402 = vmatpush2.msra.mxu1 %v3983_v44 }
 0xa99   : > { %v3640_v1 = vpop.permute.xlu1 %3639  ;;  %v3632_v57 = vpop.permute.xlu0 %3631 }
 0xa9a   : > { %v3965_v18 = vsel %vm1650_vm13, %v3640_v1, %v3642_v37  ;;  %v3961_v43 = vsel %vm1650_vm13, %v10384_v3, %v3632_v57  ;;  %v12963_v37 = vld [vmem:[#allocation153_spill] sm:$0xff] }
 0xa9b   : > { %3421 = vrot.lane.b32.xlu1 %v12959_v51, %s5126_s11  ;;  %4335 = vmatpush2.msra.mxu0 %v3965_v18  ;;  %v3348_v54 = vsel %vm1075_vm12, %v12962_v0, %v12963_v37  ;;  %v12966_v51 = vld [vmem:[#allocation72_spill] sm:$0xff] }
 0xa9c   : > { %3401 = vrot.lane.b32.xlu0 %v2544_v21, %s5126_s11  ;;  %4337 = vmatmul.mubr.f32.vlgmr.msra.gmra.mxu0 %v10987_v48  ;;  %v3331_v42 = vsel %vm1075_vm12, %v10110_v12, %v12966_v51  ;;  %v12968_v12 = vld [vmem:[#allocation162_spill] sm:$0xff] }
 0xa9d   : > { %v3634_v35 = vpop.permute.xlu1 %3633  ;;  %4760 = vmatprep.mubr.msk.f32.mxu0 %vm2083_vm14, %v10651_v38  ;;  %v3349_v21 = vsel %vm1075_vm12, %v12963_v37, %v12968_v12 }
 0xa9e   : > { %v3664_v39 = vpop.permute.xlu0 %3663  ;;  %v3962_v17 = vsel %vm1650_vm13, %v3632_v57, %v3634_v35  ;;  %v12967_v57 = vld [vmem:[#allocation56_spill] sm:$0xff] }
 0xa9f   : > { %3403 = vrot.lane.b32.xlu1 %v12961_v62, %s5126_s11  ;;  %4414 = vmatprep.subr.mxu0 %v3962_v17  ;;  %v3975_v3 = vsel %vm1650_vm13, %v10940_v47, %v3664_v39  ;;  %v3332_v18 = vsel %vm1075_vm12, %v12966_v51, %v12967_v57  ;;  %v12969_v17 = vld [vmem:[#allocation92_spill] sm:$0xff] }
 0xaa0   : > { %3829 = vrot.lane.b32.xlu0 %v3347_v34, %s5126_s11  ;;  %4415 = vmatpush1.msra.mxu0 %v3961_v43  ;;  %v3350_v0 = vsel %vm1075_vm12, %v12968_v12, %v12969_v17 }
 0xaa1   : > { %v11008_v7 = vpop.permute.xlu1 %3665 }
 0xaa2   : > { %v3614_v33 = vpop.permute.xlu0 %3613  ;;  %v3976_v40 = vsel %vm1650_vm13, %v3664_v39, %v11008_v7 }
 0xaa3   : > { %3831 = vrot.lane.b32.xlu1 %v3348_v54, %s5126_s11  ;;  %4403 = vmatprep.subr.mxu1 %v3976_v40  ;;  %v3953_v47 = vsel %vm1650_vm13, %v10407_v24, %v3614_v33 }
 0xaa4   : > { %3811 = vrot.lane.b32.xlu0 %v3339_v5, %s5126_s11  ;;  %4404 = vmatpush2.msra.mxu1 %v3975_v3  ;;  %v12972_v3 = vld [vmem:[#allocation71_spill] sm:$0xff] }
 0xaa5   : > { %v3616_v58 = vpop.permute.xlu1 %3615 }
 0xaa6   : > { %v3646_v60 = vpop.permute.xlu0 %3645  ;;  %v3954_v44 = vsel %vm1650_vm13, %v3614_v33, %v3616_v58 }
 0xaa7   : > { %3813 = vrot.lane.b32.xlu1 %v3340_v11, %s5126_s11  ;;  %4416 = vmatprep.subr.mxu0 %v3954_v44  ;;  %v3967_v24 = vsel %vm1650_vm13, %v10964_v15, %v3646_v60  ;;  %v12970_v15 = vld [vmem:[#allocation30_spill] sm:$0xff] }
 0xaa8   : > { %3793 = vrot.lane.b32.xlu0 %v3331_v42, %s5126_s11  ;;  %4417 = vmatpush1.msra.mxu0 %v3953_v47  ;;  %v3323_v37 = vsel %vm1075_vm12, %v10064_v46, %v12970_v15  ;;  %v3324_v5 = vsel %vm1075_vm12, %v12970_v15, %v12971_v63  ;;  %v3341_v46 = vsel %vm1075_vm12, %v12965_v10, %v12972_v3 }
 0xaa9   : > { %v11033_v8 = vpop.permute.xlu1 %3647 }
 0xaaa   : > { %v3596_v1 = vpop.permute.xlu0 %3595  ;;  %v3968_v62 = vsel %vm1650_vm13, %v3646_v60, %v11033_v8  ;;  %v12973_v60 = vld [vmem:[#allocation64_spill] sm:$0xff] }
 0xaab   : > { %3795 = vrot.lane.b32.xlu1 %v3332_v18, %s5126_s11  ;;  %4405 = vmatprep.subr.mxu1 %v3968_v62  ;;  %v3945_v33 = vsel %vm1650_vm13, %v10437_v25, %v3596_v1  ;;  %v4897_v11 = vunpack.i.h.bf16 %v12973_v60  ;;  %v4896_v62 = vunpack.i.l.bf16 %v12973_v60 }
 0xaac   : > { %3833 = vrot.lane.b32.xlu0 %v3349_v21, %s5126_s11  ;;  %4406 = vmatpush2.msra.mxu1 %v3967_v24  ;;  %v12975_v21 = vld [vmem:[#allocation47_spill] sm:$0xff] }
 0xaad   : > { %v3598_v39 = vpop.permute.xlu1 %3597  ;;  %4408 = vmatmul.mubr.f32.vlgmr.msra.gmra.mxu1 %v10987_v48  ;;  %v3342_v42 = vsel %vm1075_vm12, %v12972_v3, %v4897_v11  ;;  %v12979_v3 = vld [vmem:[#allocation55_spill] sm:$0xff] }
 0xaae   : > { %v3636_v34 = vpop.permute.xlu0 %3635  ;;  %v3946_v43 = vsel %vm1650_vm13, %v3596_v1, %v3598_v39  ;;  %4761 = vmatprep.mubr.msk.f32.mxu1 %vm2083_vm14, %v10651_v38  ;;  %v12974_v1 = vld [vmem:[#allocation70_spill] sm:$0xff] }
 0xaaf   : > { %3835 = vrot.lane.b32.xlu1 %v3350_v0, %s5126_s11  ;;  %4418 = vmatprep.subr.mxu0 %v3946_v43  ;;  %v3963_v25 = vsel %vm1650_vm13, %v3634_v35, %v3636_v34  ;;  %v3315_v10 = vsel %vm1075_vm12, %v10010_v28, %v12974_v1  ;;  %v3316_v24 = vsel %vm1075_vm12, %v12974_v1, %v12975_v21  ;;  %v12976_v0 = vld [vmem:[#allocation51_spill] sm:$0xff] }
 0xab0   : > { %3775 = vrot.lane.b32.xlu0 %v3323_v37, %s5126_s11  ;;  %4419 = vmatpush1.msra.mxu0 %v3945_v33  ;;  %v3333_v28 = vsel %vm1075_vm12, %v12967_v57, %v12976_v0  ;;  %v3334_v33 = vsel %vm1075_vm12, %v12976_v0, %v4896_v62  ;;  %v12977_v37 = vld [vmem:[#allocation170_spill] sm:$0xff] }
 0xab1   : > { %v3638_v54 = vpop.permute.xlu1 %3637  ;;  %v3307_v57 = vsel %vm1075_vm12, %v9978_v52, %v12977_v37  ;;  %v3325_v52 = vsel %vm1075_vm12, %v12971_v63, %v12979_v3 }
 0xab2   : > { %v3578_v40 = vpop.permute.xlu0 %3577  ;;  %v3964_v38 = vsel %vm1650_vm13, %v3636_v34, %v3638_v54 }
 0xab3   : > { %3777 = vrot.lane.b32.xlu1 %v3324_v5, %s5126_s11  ;;  %4485 = vmatprep.subr.mxu1 %v3964_v38  ;;  %v3937_v35 = vsel %vm1650_vm13, %v10459_v19, %v3578_v40  ;;  %v12978_v5 = vld [vmem:[#allocation171_spill] sm:$0xff] }
 0xab4   : > { %3815 = vrot.lane.b32.xlu0 %v3341_v46, %s5126_s11  ;;  %4486 = vmatpush1.msra.mxu1 %v3963_v25  ;;  %v3308_v38 = vsel %vm1075_vm12, %v12977_v37, %v12978_v5  ;;  %v12980_v46 = vld [vmem:[#allocation28_spill] sm:$0xff] }
 0xab5   : > { %v3580_v44 = vpop.permute.xlu1 %3579  ;;  %v4892_v60 = vunpack.i.h.bf16 %v12980_v46 }
 0xab6   : > { %v3618_v51 = vpop.permute.xlu0 %3617  ;;  %v3938_v47 = vsel %vm1650_vm13, %v3578_v40, %v3580_v44 }
 0xab7   : > { %3817 = vrot.lane.b32.xlu1 %v3342_v42, %s5126_s11  ;;  %4420 = vmatprep.subr.mxu0 %v3938_v47  ;;  %v3955_v17 = vsel %vm1650_vm13, %v3616_v58, %v3618_v51  ;;  %v3326_v47 = vsel %vm1075_vm12, %v12979_v3, %v4892_v60  ;;  %v12988_v60 = vld [vmem:[#allocation139_spill] sm:$0xff] }
 0xab8   : > { %3757 = vrot.lane.b32.xlu0 %v3315_v10, %s5126_s11  ;;  %4421 = vmatpush1.msra.mxu0 %v3937_v35  ;;  %v12981_v35 = vld [vmem:[#allocation166_spill] sm:$0xff]  ;;  %v4891_v10 = vunpack.i.l.bf16 %v12980_v46 }
 0xab9   : > { %v3620_v18 = vpop.permute.xlu1 %3619  ;;  %v3299_v63 = vsel %vm1075_vm12, %v9942_v2, %v12981_v35 }
 0xaba   : > { %v3560_v12 = vpop.permute.xlu0 %3559  ;;  %v3956_v19 = vsel %vm1650_vm13, %v3618_v51, %v3620_v18 }
 0xabb   : > { %3759 = vrot.lane.b32.xlu1 %v3316_v24, %s5126_s11  ;;  %4487 = vmatprep.subr.mxu1 %v3956_v19  ;;  %v3929_v58 = vsel %vm1650_vm13, %v10491_v27, %v3560_v12  ;;  %v12983_v19 = vld [vmem:[#allocation52_spill] sm:$0xff] }
 0xabc   : > { %3797 = vrot.lane.b32.xlu0 %v3333_v28, %s5126_s11  ;;  %4488 = vmatpush1.msra.mxu1 %v3955_v17  ;;  %v3317_v2 = vsel %vm1075_vm12, %v12975_v21, %v12983_v19 }
 0xabd   : > { %v3562_v34 = vpop.permute.xlu1 %3561 }
 0xabe   : > { %v3600_v43 = vpop.permute.xlu0 %3599  ;;  %v3930_v15 = vsel %vm1650_vm13, %v3560_v12, %v3562_v34  ;;  %v12982_v12 = vld [vmem:[#allocation167_spill] sm:$0xff] }
 0xabf   : > { %3799 = vrot.lane.b32.xlu1 %v3334_v33, %s5126_s11  ;;  %4422 = vmatprep.subr.mxu0 %v3930_v15  ;;  %v3947_v27 = vsel %vm1650_vm13, %v3598_v39, %v3600_v43  ;;  %v12984_v33 = vld [vmem:[#allocation145_spill] sm:$0xff] }
 0xac0   : > { %3739 = vrot.lane.b32.xlu0 %v3307_v57, %s5126_s11  ;;  %4423 = vmatpush1.msra.mxu0 %v3929_v58  ;;  %v3291_v21 = vsel %vm1075_vm12, %v9888_v49, %v12984_v33  ;;  %v12985_v57 = vld [vmem:[#allocation141_spill] sm:$0xff] }
 0xac1   : > { %v3602_v54 = vpop.permute.xlu1 %3601 }
 0xac2   : > { %v3542_v40 = vpop.permute.xlu0 %3541  ;;  %v3948_v25 = vsel %vm1650_vm13, %v3600_v43, %v3602_v54  ;;  %v3318_v43 = vsel %vm1075_vm12, %v12983_v19, %v4891_v10  ;;  %v3292_v54 = vsel %vm1075_vm12, %v12984_v33, %v12985_v57  ;;  %v12994_v33 = vld [vmem:[#allocation133_spill] sm:$0xff] }
 0xac3   : > { %3741 = vrot.lane.b32.xlu1 %v3308_v38, %s5126_s11  ;;  %4489 = vmatprep.subr.mxu1 %v3948_v25  ;;  %v3921_v39 = vsel %vm1650_vm13, %v10513_v22, %v3542_v40  ;;  %v3300_v22 = vsel %vm1075_vm12, %v12981_v35, %v12982_v12  ;;  %v12987_v38 = vld [vmem:[#allocation169_spill] sm:$0xff] }
 0xac4   : > { %3779 = vrot.lane.b32.xlu0 %v3325_v52, %s5126_s11  ;;  %4490 = vmatpush1.msra.mxu1 %v3947_v27  ;;  %v4887_v25 = vunpack.i.h.bf16 %v12987_v38  ;;  %v12989_v35 = vld [vmem:[#allocation137_spill] sm:$0xff] }
 0xac5   : > { %v3544_v11 = vpop.permute.xlu1 %3543 }
 0xac6   : > { %v3582_v51 = vpop.permute.xlu0 %3581  ;;  %v3922_v42 = vsel %vm1650_vm13, %v3542_v40, %v3544_v11  ;;  %v12986_v40 = vld [vmem:[#allocation65_spill] sm:$0xff] }
 0xac7   : > { %4424 = vmatprep.subr.mxu0 %v3922_v42  ;;  %3781 = vrot.lane.b32.xlu1 %v3326_v47, %s5126_s11  ;;  %v3939_v24 = vsel %vm1650_vm13, %v3580_v44, %v3582_v51  ;;  %v3309_v49 = vsel %vm1075_vm12, %v12978_v5, %v12986_v40  ;;  %v3310_v46 = vsel %vm1075_vm12, %v12986_v40, %v4887_v25  ;;  %v4886_v42 = vunpack.i.l.bf16 %v12987_v38 }
 0xac8   : > { %3721 = vrot.lane.b32.xlu0 %v3299_v63, %s5126_s11  ;;  %4425 = vmatpush1.msra.mxu0 %v3921_v39  ;;  %v3283_v5 = vsel %vm1075_vm12, %v12863_v31, %v12988_v60 }
 0xac9   : > { %v3584_v1 = vpop.permute.xlu1 %3583 }
 0xaca   : > { %v3524_v18 = vpop.permute.xlu0 %3523  ;;  %v3940_v62 = vsel %vm1650_vm13, %v3582_v51, %v3584_v1  ;;  %v12990_v1 = vld [vmem:[#allocation168_spill] sm:$0xff] }
 0xacb   : > { %4491 = vmatprep.subr.mxu1 %v3940_v62  ;;  %3723 = vrot.lane.b32.xlu1 %v3300_v22, %s5126_s11  ;;  %v3913_v44 = vsel %vm1650_vm13, %v10545_v32, %v3524_v18  ;;  %v3301_v31 = vsel %vm1075_vm12, %v12982_v12, %v12990_v1  ;;  %v3302_v22 = vsel %vm1075_vm12, %v12990_v1, %v4886_v42  ;;  %v12998_v42 = vld [vmem:[#allocation144_spill] sm:$0xff] }
 0xacc   : > { %3761 = vrot.lane.b32.xlu0 %v3317_v2, %s5126_s11  ;;  %4492 = vmatpush1.msra.mxu1 %v3939_v24  ;;  %v12991_v24 = vld [vmem:[#allocation151_spill] sm:$0xff] }
 0xacd   : > { %v3526_v17 = vpop.permute.xlu1 %3525  ;;  %v3275_v12 = vsel %vm1075_vm12, %v12875_v59, %v12991_v24 }
 0xace   : > { %v3564_v0 = vpop.permute.xlu0 %3563  ;;  %v3914_v28 = vsel %vm1650_vm13, %v3524_v18, %v3526_v17 }
 0xacf   : > { %4426 = vmatprep.subr.mxu0 %v3914_v28  ;;  %3763 = vrot.lane.b32.xlu1 %v3318_v43, %s5126_s11  ;;  %v3931_v32 = vsel %vm1650_vm13, %v3562_v34, %v3564_v0  ;;  %v12992_v28 = vld [vmem:[#allocation143_spill] sm:$0xff] }
 0xad0   : > { %3703 = vrot.lane.b32.xlu0 %v3291_v21, %s5126_s11  ;;  %4427 = vmatpush1.msra.mxu0 %v3913_v44  ;;  %v3276_v43 = vsel %vm1075_vm12, %v12991_v24, %v12992_v28  ;;  %v12993_v44 = vld [vmem:[#allocation142_spill] sm:$0xff]  ;;  %v4882_v21 = vunpack.i.h.bf16 %v12994_v33 }
 0xad1   : > { %v3566_v15 = vpop.permute.xlu1 %3565  ;;  %v3293_v59 = vsel %vm1075_vm12, %v12985_v57, %v12993_v44 }
 0xad2   : > { %v3506_v58 = vpop.permute.xlu0 %3505  ;;  %v3932_v37 = vsel %vm1650_vm13, %v3564_v0, %v3566_v15 }
 0xad3   : > { %4493 = vmatprep.subr.mxu1 %v3932_v37  ;;  %3705 = vrot.lane.b32.xlu1 %v3292_v54, %s5126_s11  ;;  %v3905_v34 = vsel %vm1650_vm13, %v10567_v16, %v3506_v58  ;;  %v3284_v16 = vsel %vm1075_vm12, %v12988_v60, %v12989_v35  ;;  %v3294_v54 = vsel %vm1075_vm12, %v12993_v44, %v4882_v21 }
 0xad4   : > { %3743 = vrot.lane.b32.xlu0 %v3309_v49, %s5126_s11  ;;  %4494 = vmatpush1.msra.mxu1 %v3931_v32  ;;  %v12995_v32 = vld [vmem:[#allocation88_spill] sm:$0xff]  ;;  %v4881_v49 = vunpack.i.l.bf16 %v12994_v33 }
 0xad5   : > { %v3508_v27 = vpop.permute.xlu1 %3507  ;;  %v3267_v57 = vsel %vm1075_vm12, %v12882_v4, %v12995_v32 }
 0xad6   : > { %v3546_v3 = vpop.permute.xlu0 %3545  ;;  %v3906_v52 = vsel %vm1650_vm13, %v3506_v58, %v3508_v27 }
 0xad7   : > { %4428 = vmatprep.subr.mxu0 %v3906_v52  ;;  %3745 = vrot.lane.b32.xlu1 %v3310_v46, %s5126_s11  ;;  %v3923_v63 = vsel %vm1650_vm13, %v3544_v11, %v3546_v3  ;;  %v12997_v46 = vld [vmem:[#allocation89_spill] sm:$0xff] }
 0xad8   : > { %3685 = vrot.lane.b32.xlu0 %v3283_v5, %s5126_s11  ;;  %4429 = vmatpush1.msra.mxu0 %v3905_v34  ;;  %v3285_v4 = vsel %vm1075_vm12, %v12989_v35, %v12997_v46 }
 0xad9   : > { %v3548_v51 = vpop.permute.xlu1 %3547 }
 0xada   : > { %v3488_v47 = vpop.permute.xlu0 %3487  ;;  %v3924_v39 = vsel %vm1650_vm13, %v3546_v3, %v3548_v51  ;;  %v12996_v3 = vld [vmem:[#allocation163_spill] sm:$0xff]  ;;  %v3286_v51 = vsel %vm1075_vm12, %v12997_v46, %v4881_v49 }
 0xadb   : > { %4495 = vmatprep.subr.mxu1 %v3924_v39  ;;  %3687 = vrot.lane.b32.xlu1 %v3284_v16, %s5126_s11  ;;  %v3897_v11 = vsel %vm1650_vm13, %v10599_v50, %v3488_v47  ;;  %v12999_v39 = vld [vmem:[#allocation80_spill] sm:$0xff] }
 0xadc   : > { %3725 = vrot.lane.b32.xlu0 %v3301_v31, %s5126_s11  ;;  %4496 = vmatpush1.msra.mxu1 %v3923_v63  ;;  %v4877_v35 = vunpack.i.h.bf16 %v12999_v39  ;;  %v4876_v63 = vunpack.i.l.bf16 %v12999_v39  ;;  %v13005_v39 = vld [vmem:[#allocation120_spill] sm:$0xff] }
 0xadd   : > { %v3490_v10 = vpop.permute.xlu1 %3489 }
 0xade   : > { %v3528_v18 = vpop.permute.xlu0 %3527  ;;  %v3898_v62 = vsel %vm1650_vm13, %v3488_v47, %v3490_v10  ;;  %v3277_v47 = vsel %vm1075_vm12, %v12992_v28, %v12998_v42 }
 0xadf   : > { %4430 = vmatprep.subr.mxu0 %v3898_v62  ;;  %3727 = vrot.lane.b32.xlu1 %v3302_v22, %s5126_s11  ;;  %v3915_v50 = vsel %vm1650_vm13, %v3526_v17, %v3528_v18  ;;  %v13000_v62 = vld [vmem:[#allocation63_spill] sm:$0xff] }
 0xae0   : > { %3667 = vrot.lane.b32.xlu0 %v3275_v12, %s5126_s11  ;;  %4431 = vmatpush1.msra.mxu0 %v3897_v11  ;;  %v3269_v22 = vsel %vm1075_vm12, %v12996_v3, %v13000_v62 }
 0xae1   : > { %v3530_v19 = vpop.permute.xlu1 %3529 }
 0xae2   : > { %v3470_v2 = vpop.permute.xlu0 %3469  ;;  %v3916_v0 = vsel %vm1650_vm13, %v3528_v18, %v3530_v19  ;;  %v3270_v19 = vsel %vm1075_vm12, %v13000_v62, %v4876_v63 }
 0xae3   : > { %4497 = vmatprep.subr.mxu1 %v3916_v0  ;;  %3669 = vrot.lane.b32.xlu1 %v3276_v43, %s5126_s11  ;;  %v3889_v17 = vsel %vm1650_vm13, %v10624_v36, %v3470_v2  ;;  %v3268_v36 = vsel %vm1075_vm12, %v12995_v32, %v12996_v3  ;;  %v13003_v3 = vld [vmem:[#allocation67_spill] sm:$0xff] }
 0xae4   : > { %3707 = vrot.lane.b32.xlu0 %v3293_v59, %s5126_s11  ;;  %4498 = vmatpush1.msra.mxu1 %v3915_v50 }
 0xae5   : > { %v3472_v15 = vpop.permute.xlu1 %3471 }
 0xae6   : > { %v3510_v58 = vpop.permute.xlu0 %3509  ;;  %v3890_v37 = vsel %vm1650_vm13, %v3470_v2, %v3472_v15 }
 0xae7   : > { %4432 = vmatprep.subr.mxu0 %v3890_v37  ;;  %3709 = vrot.lane.b32.xlu1 %v3294_v54, %s5126_s11  ;;  %v3907_v52 = vsel %vm1650_vm13, %v3508_v27, %v3510_v58 }
 0xae8   : > { %3649 = vrot.lane.b32.xlu0 %v3267_v57, %s5126_s11  ;;  %4433 = vmatpush1.msra.mxu0 %v3889_v17  ;;  %v13002_v57 = vld [vmem:[#allocation103_spill] sm:$0xff] }
 0xae9   : > { %v3512_v40 = vpop.permute.xlu1 %3511 }
 0xaea   : > { %v3452_v38 = vpop.permute.xlu0 %3451  ;;  %v3908_v25 = vsel %vm1650_vm13, %v3510_v58, %v3512_v40 }
 0xaeb   : > { %4499 = vmatprep.subr.mxu1 %v3908_v25  ;;  %3651 = vrot.lane.b32.xlu1 %v3268_v36, %s5126_s11  ;;  %v3881_v27 = vsel %vm1650_vm13, %v10657_v9, %v3452_v38  ;;  %v3278_v9 = vsel %vm1075_vm12, %v12998_v42, %v4877_v35  ;;  %v13004_v36 = vld [vmem:[#allocation82_spill] sm:$0xff] }
 0xaec   : > { %3689 = vrot.lane.b32.xlu0 %v3285_v4, %s5126_s11  ;;  %4500 = vmatpush1.msra.mxu1 %v3907_v52  ;;  %v3842_v52 = vsel %vm1650_vm13, %v13004_v36, %v13003_v3  ;;  %v3841_v4 = vsel %vm1650_vm13, %v12886_v56, %v13004_v36  ;;  %v13006_v56 = vld [vmem:[#allocation104_spill] sm:$0xff] }
 0xaed   : > { %v3454_v34 = vpop.permute.xlu1 %3453  ;;  %v3852_v35 = vsel %vm1650_vm13, %v13006_v56, %v13005_v39 }
 0xaee   : > { %v3492_v60 = vpop.permute.xlu0 %3491  ;;  %v3882_v5 = vsel %vm1650_vm13, %v3452_v38, %v3454_v34  ;;  %v3849_v38 = vsel %vm1650_vm13, %v12880_v53, %v13002_v57 }
 0xaef   : > { %4434 = vmatprep.subr.mxu0 %v3882_v5  ;;  %3691 = vrot.lane.b32.xlu1 %v3286_v51, %s5126_s11  ;;  %v3899_v18 = vsel %vm1650_vm13, %v3490_v10, %v3492_v60 }
 0xaf0   : > { %3671 = vrot.lane.b32.xlu0 %v3277_v47, %s5126_s11  ;;  %4435 = vmatpush1.msra.mxu0 %v3881_v27 }
 0xaf1   : > { %v3494_v16 = vpop.permute.xlu1 %3493 }
 0xaf2   : > { %v3434_v1 = vpop.permute.xlu0 %3433  ;;  %v3900_v31 = vsel %vm1650_vm13, %v3492_v60, %v3494_v16 }
 0xaf3   : > { %4501 = vmatprep.subr.mxu1 %v3900_v31  ;;  %3673 = vrot.lane.b32.xlu1 %v3278_v9, %s5126_s11  ;;  %v3873_v10 = vsel %vm1650_vm13, %v10686_v41, %v3434_v1  ;;  %v13007_v9 = vld [vmem:[#allocation155_spill] sm:$0xff] }
 0xaf4   : > { %3653 = vrot.lane.b32.xlu0 %v3269_v22, %s5126_s11  ;;  %4502 = vmatpush1.msra.mxu1 %v3899_v18  ;;  %v13008_v18 = vld [vmem:[#allocation102_spill] sm:$0xff] }
 0xaf5   : > { %v3436_v11 = vpop.permute.xlu1 %3435  ;;  %v3844_v62 = vsel %vm1650_vm13, %v13008_v18, %v13007_v9 }
 0xaf6   : > { %v3474_v24 = vpop.permute.xlu0 %3473  ;;  %v3874_v12 = vsel %vm1650_vm13, %v3434_v1, %v3436_v11 }
 0xaf7   : > { %4436 = vmatprep.subr.mxu0 %v3874_v12  ;;  %3655 = vrot.lane.b32.xlu1 %v3270_v19, %s5126_s11  ;;  %v3891_v43 = vsel %vm1650_vm13, %v3472_v15, %v3474_v24 }
 0xaf8   : > { %4437 = vmatpush1.msra.mxu0 %v3873_v10 }
 0xaf9   : > { %v3476_v2 = vpop.permute.xlu1 %3475 }
 0xafa   : > { %v3416_v0 = vpop.permute.xlu0 %3415  ;;  %v3892_v28 = vsel %vm1650_vm13, %v3474_v24, %v3476_v2 }
 0xafb   : > { %4503 = vmatprep.subr.mxu1 %v3892_v28  ;;  %v3865_v33 = vsel %vm1650_vm13, %v10709_v29, %v3416_v0  ;;  %v13001_v29 = vld [vmem:[#allocation105_spill] sm:$0xff] }
 0xafc   : > { %4504 = vmatpush1.msra.mxu1 %v3891_v43  ;;  %v3850_v40 = vsel %vm1650_vm13, %v13002_v57, %v13001_v29  ;;  %v3851_v63 = vsel %vm1650_vm13, %v13001_v29, %v13006_v56 }
 0xafd   : > { %v3418_v50 = vpop.permute.xlu1 %3417 }
 0xafe   : > { %v3456_v44 = vpop.permute.xlu0 %3455  ;;  %v3866_v59 = vsel %vm1650_vm13, %v3416_v0, %v3418_v50 }
 0xaff   : > { %4438 = vmatprep.subr.mxu0 %v3866_v59  ;;  %v3883_v37 = vsel %vm1650_vm13, %v3454_v34, %v3456_v44 }
 0xb00   : > { %4439 = vmatpush1.msra.mxu0 %v3865_v33 }
 0xb01   : > { %v3458_v41 = vpop.permute.xlu1 %3457 }
 0xb02   : > { %v3398_v21 = vpop.permute.xlu0 %3397  ;;  %v3884_v58 = vsel %vm1650_vm13, %v3456_v44, %v3458_v41 }
 0xb03   : > { %4505 = vmatprep.subr.mxu1 %v3884_v58  ;;  %v3857_v32 = vsel %vm1650_vm13, %v10722_v55, %v3398_v21 }
 0xb04   : > { %4506 = vmatpush1.msra.mxu1 %v3883_v37 }
 0xb05   : > { %v3400_v15 = vpop.permute.xlu1 %3399 }
 0xb06   : > { %v3438_v54 = vpop.permute.xlu0 %3437  ;;  %v3858_v17 = vsel %vm1650_vm13, %v3398_v21, %v3400_v15 }
 0xb07   : > { %4440 = vmatprep.subr.mxu0 %v3858_v17  ;;  %v3875_v46 = vsel %vm1650_vm13, %v3436_v11, %v3438_v54  ;;  %v3843_v11 = vsel %vm1650_vm13, %v13003_v3, %v13008_v18 }
 0xb08   : > { %4441 = vmatpush1.msra.mxu0 %v3857_v32 }
 0xb09   : > { %v3440_v49 = vpop.permute.xlu1 %3439  ;;  %4442 = vmatprep.subr.mxu0 %v3850_v40 }
 0xb0a   : > { %v3420_v25 = vpop.permute.xlu0 %3419  ;;  %4443 = vmatpush1.msra.mxu0 %v3849_v38  ;;  %v3876_v55 = vsel %vm1650_vm13, %v3438_v54, %v3440_v49 }
 0xb0b   : > { %4444 = vmatprep.subr.mxu0 %v3842_v52  ;;  %4507 = vmatprep.subr.mxu1 %v3876_v55  ;;  %v3867_v5 = vsel %vm1650_vm13, %v3418_v50, %v3420_v25 }
 0xb0c   : > { %4445 = vmatpush1.msra.mxu0 %v3841_v4  ;;  %4508 = vmatpush1.msra.mxu1 %v3875_v46 }
 0xb0d   : > { %v3422_v34 = vpop.permute.xlu1 %3421 }
 0xb0e   : > { %v3402_v53 = vpop.permute.xlu0 %3401  ;;  %v3868_v60 = vsel %vm1650_vm13, %v3420_v25, %v3422_v34 }
 0xb0f   : > { %4509 = vmatprep.subr.mxu1 %v3868_v60  ;;  %v3859_v47 = vsel %vm1650_vm13, %v3400_v15, %v3402_v53 }
 0xb10   : > { %4510 = vmatpush1.msra.mxu1 %v3867_v5 }
 0xb11   : > { %v3404_v51 = vpop.permute.xlu1 %3403 }
 0xb12   : > { %v3830_v27 = vpop.permute.xlu0 %3829  ;;  %v3860_v42 = vsel %vm1650_vm13, %v3402_v53, %v3404_v51 }
 0xb13   : > { %4511 = vmatprep.subr.mxu1 %v3860_v42  ;;  %v4049_v22 = vsel %vm1650_vm13, %v10784_v26, %v3830_v27 }
 0xb14   : > { %4512 = vmatpush1.msra.mxu1 %v3859_v47 }
 0xb15   : > { %v3832_v16 = vpop.permute.xlu1 %3831  ;;  %4513 = vmatprep.subr.mxu1 %v3852_v35 }
 0xb16   : > { %v3812_v1 = vpop.permute.xlu0 %3811  ;;  %4514 = vmatpush1.msra.mxu1 %v3851_v63  ;;  %v4050_v31 = vsel %vm1650_vm13, %v3830_v27, %v3832_v16 }
 0xb17   : > { %4456 = vmatprep.subr.mxu0 %v4050_v31  ;;  %4515 = vmatprep.subr.mxu1 %v3844_v62  ;;  %v4041_v10 = vsel %vm1650_vm13, %v10811_v45, %v3812_v1 }
 0xb18   : > { %4457 = vmatpush2.msra.mxu0 %v4049_v22  ;;  %4516 = vmatpush1.msra.mxu1 %v3843_v11 }
 0xb19   : > { %v3814_v24 = vpop.permute.xlu1 %3813 }
 0xb1a   : > { %v3794_v12 = vpop.permute.xlu0 %3793  ;;  %v4042_v19 = vsel %vm1650_vm13, %v3812_v1, %v3814_v24 }
 0xb1b   : > { %4458 = vmatprep.subr.mxu0 %v4042_v19  ;;  %v4033_v28 = vsel %vm1650_vm13, %v10828_v61, %v3794_v12 }
 0xb1c   : > { %4459 = vmatpush2.msra.mxu0 %v4041_v10 }
 0xb1d   : > { %v3796_v2 = vpop.permute.xlu1 %3795 }
 0xb1e   : > { %v3834_v0 = vpop.permute.xlu0 %3833  ;;  %v4034_v26 = vsel %vm1650_vm13, %v3794_v12, %v3796_v2 }
 0xb1f   : > { %4460 = vmatprep.subr.mxu0 %v4034_v26  ;;  %v4051_v59 = vsel %vm1650_vm13, %v3832_v16, %v3834_v0 }
 0xb20   : > { %4461 = vmatpush2.msra.mxu0 %v4033_v28 }
 0xb21   : > { %v3836_v43 = vpop.permute.xlu1 %3835 }
 0xb22   : > { %v3776_v50 = vpop.permute.xlu0 %3775  ;;  %v4052_v44 = vsel %vm1650_vm13, %v3834_v0, %v3836_v43 }
 0xb23   : > { %4527 = vmatprep.subr.mxu1 %v4052_v44  ;;  %v4025_v21 = vsel %vm1650_vm13, %v10853_v30, %v3776_v50 }
 0xb24   : > { %4528 = vmatpush2.msra.mxu1 %v4051_v59 }
 0xb25   : > { %v3778_v45 = vpop.permute.xlu1 %3777 }
 0xb26   : > { %v3816_v33 = vpop.permute.xlu0 %3815  ;;  %v4026_v41 = vsel %vm1650_vm13, %v3776_v50, %v3778_v45 }
 0xb27   : > { %4462 = vmatprep.subr.mxu0 %v4026_v41  ;;  %v4043_v15 = vsel %vm1650_vm13, %v3814_v24, %v3816_v33 }
 0xb28   : > { %4463 = vmatpush2.msra.mxu0 %v4025_v21 }
 0xb29   : > { %v3818_v61 = vpop.permute.xlu1 %3817 }
 0xb2a   : > { %v3758_v58 = vpop.permute.xlu0 %3757  ;;  %v4044_v37 = vsel %vm1650_vm13, %v3816_v33, %v3818_v61 }
 0xb2b   : > { %4529 = vmatprep.subr.mxu1 %v4044_v37  ;;  %v4017_v29 = vsel %vm1650_vm13, %v10872_v14, %v3758_v58 }
 0xb2c   : > { %4530 = vmatpush2.msra.mxu1 %v4043_v15 }
 0xb2d   : > { %v3760_v54 = vpop.permute.xlu1 %3759 }
 0xb2e   : > { %v3798_v17 = vpop.permute.xlu0 %3797  ;;  %v4018_v32 = vsel %vm1650_vm13, %v3758_v58, %v3760_v54 }
 0xb2f   : > { %4464 = vmatprep.subr.mxu0 %v4018_v32  ;;  %v4035_v49 = vsel %vm1650_vm13, %v3796_v2, %v3798_v17  ;;  %v13009_v32 = vld [vmem:[#allocation54_spill] sm:$0xff] }
 0xb30   : > { %4465 = vmatpush2.msra.mxu0 %v4017_v29 }
 0xb31   : > { %v3800_v30 = vpop.permute.xlu1 %3799 }
 0xb32   : > { %v3740_v57 = vpop.permute.xlu0 %3739  ;;  %v4036_v40 = vsel %vm1650_vm13, %v3798_v17, %v3800_v30  ;;  %v13010_v30 = vld [vmem:[#allocation57_spill] sm:$0xff] }
 0xb33   : > { %4531 = vmatprep.subr.mxu1 %v4036_v40  ;;  %v4009_v36 = vsel %vm1650_vm13, %v10899_v23, %v3740_v57 }
 0xb34   : > { %4532 = vmatpush2.msra.mxu1 %v4035_v49 }
 0xb35   : > { %v3742_v38 = vpop.permute.xlu1 %3741 }
 0xb36   : > { %v3780_v25 = vpop.permute.xlu0 %3779  ;;  %v4010_v3 = vsel %vm1650_vm13, %v3740_v57, %v3742_v38 }
 0xb37   : > { %4466 = vmatprep.subr.mxu0 %v4010_v3  ;;  %v4027_v46 = vsel %vm1650_vm13, %v3778_v45, %v3780_v25 }
 0xb38   : > { %4467 = vmatpush2.msra.mxu0 %v4009_v36 }
 0xb39   : > { %v3782_v14 = vpop.permute.xlu1 %3781 }
 0xb3a   : > { %v3722_v52 = vpop.permute.xlu0 %3721  ;;  %v4028_v55 = vsel %vm1650_vm13, %v3780_v25, %v3782_v14  ;;  %v13011_v25 = vld [vmem:[#allocation20_spill] sm:$0xff] }
 0xb3b   : > { %4533 = vmatprep.subr.mxu1 %v4028_v55  ;;  %v4001_v60 = vsel %vm1650_vm13, %v10920_v13, %v3722_v52 }
 0xb3c   : > { %4534 = vmatpush2.msra.mxu1 %v4027_v46 }
 0xb3d   : > { %v3724_v4 = vpop.permute.xlu1 %3723 }
 0xb3e   : > { %v3762_v34 = vpop.permute.xlu0 %3761  ;;  %v4002_v53 = vsel %vm1650_vm13, %v3722_v52, %v3724_v4 }
 0xb3f   : > { %4468 = vmatprep.subr.mxu0 %v4002_v53  ;;  %v4019_v27 = vsel %vm1650_vm13, %v3760_v54, %v3762_v34 }
 0xb40   : > { %4469 = vmatpush2.msra.mxu0 %v4001_v60 }
 0xb41   : > { %v3764_v23 = vpop.permute.xlu1 %3763 }
 0xb42   : > { %v3704_v5 = vpop.permute.xlu0 %3703  ;;  %v4020_v51 = vsel %vm1650_vm13, %v3762_v34, %v3764_v23 }
 0xb43   : > { %4535 = vmatprep.subr.mxu1 %v4020_v51  ;;  %v3993_v56 = vsel %vm1650_vm13, %v10952_v20, %v3704_v5 }
 0xb44   : > { %4536 = vmatpush2.msra.mxu1 %v4019_v27 }
 0xb45   : > { %v3706_v42 = vpop.permute.xlu1 %3705 }
 0xb46   : > { %v3744_v47 = vpop.permute.xlu0 %3743  ;;  %v3994_v39 = vsel %vm1650_vm13, %v3704_v5, %v3706_v42 }
 0xb47   : > { %4470 = vmatprep.subr.mxu0 %v3994_v39  ;;  %v4011_v63 = vsel %vm1650_vm13, %v3742_v38, %v3744_v47 }
 0xb48   : > { %4471 = vmatpush2.msra.mxu0 %v3993_v56 }
 0xb49   : > { %v3746_v13 = vpop.permute.xlu1 %3745 }
 0xb4a   : > { %v3686_v35 = vpop.permute.xlu0 %3685  ;;  %v4012_v16 = vsel %vm1650_vm13, %v3744_v47, %v3746_v13  ;;  %v13014_v47 = vld [vmem:[#allocation19_spill] sm:$0xff] }
 0xb4b   : > { %4537 = vmatprep.subr.mxu1 %v4012_v16  ;;  %v3985_v18 = vsel %vm1650_vm13, %v10976_v6, %v3686_v35 }
 0xb4c   : > { %4538 = vmatpush2.msra.mxu1 %v4011_v63 }
 0xb4d   : > { %v3688_v1 = vpop.permute.xlu1 %3687 }
 0xb4e   : > { %v3726_v31 = vpop.permute.xlu0 %3725  ;;  %v3986_v9 = vsel %vm1650_vm13, %v3686_v35, %v3688_v1 }
 0xb4f   : > { %4472 = vmatprep.subr.mxu0 %v3986_v9  ;;  %v4003_v11 = vsel %vm1650_vm13, %v3724_v4, %v3726_v31  ;;  %v13012_v4 = vld [vmem:[#allocation17_spill] sm:$0xff] }
 0xb50   : > { %4473 = vmatpush2.msra.mxu0 %v3985_v18 }
 0xb51   : > { %v3728_v20 = vpop.permute.xlu1 %3727 }
 0xb52   : > { %v3668_v62 = vpop.permute.xlu0 %3667  ;;  %v4004_v22 = vsel %vm1650_vm13, %v3726_v31, %v3728_v20  ;;  %v13015_v31 = vld [vmem:[#allocation26_spill] sm:$0xff] }
 0xb53   : > { %4539 = vmatprep.subr.mxu1 %v4004_v22  ;;  %v3977_v10 = vsel %vm1650_vm13, %v11008_v7, %v3668_v62 }
 0xb54   : > { %4540 = vmatpush2.msra.mxu1 %v4003_v11  ;;  %v13016_v11 = vld [vmem:[#allocation22_spill] sm:$0xff] }
 0xb55   : > { %v3670_v24 = vpop.permute.xlu1 %3669 }
 0xb56   : > { %v3708_v12 = vpop.permute.xlu0 %3707  ;;  %v3978_v19 = vsel %vm1650_vm13, %v3668_v62, %v3670_v24 }
 0xb57   : > { %4474 = vmatprep.subr.mxu0 %v3978_v19  ;;  %v3995_v26 = vsel %vm1650_vm13, %v3706_v42, %v3708_v12 }
 0xb58   : > { %4475 = vmatpush2.msra.mxu0 %v3977_v10 }
 0xb59   : > { %v3710_v6 = vpop.permute.xlu1 %3709 }
 0xb5a   : > { %v3650_v2 = vpop.permute.xlu0 %3649  ;;  %v3996_v0 = vsel %vm1650_vm13, %v3708_v12, %v3710_v6 }
 0xb5b   : > { %4541 = vmatprep.subr.mxu1 %v3996_v0  ;;  %v3969_v44 = vsel %vm1650_vm13, %v11033_v8, %v3650_v2 }
 0xb5c   : > { %4542 = vmatpush2.msra.mxu1 %v3995_v26  ;;  %v4338_v54 = vpop.f32.mrf.mxu0 }
 0xb5d   : > { %v3652_v28 = vpop.permute.xlu1 %3651  ;;  %v4556_v29 = vmul.f32 %v4338_v54, %v13009_v32 }
 0xb5e   : > { %v3690_v43 = vpop.permute.xlu0 %3689  ;;  %v3970_v50 = vsel %vm1650_vm13, %v3650_v2, %v3652_v28  ;;  %v4340_v17 = vpop.f32.mrf.mxu0 }
 0xb5f   : > { %4476 = vmatprep.subr.mxu0 %v3970_v50  ;;  %v3987_v33 = vsel %vm1650_vm13, %v3688_v1, %v3690_v43  ;;  %v4557_v57 = vmul.f32 %v4340_v17, %v13010_v30  ;;  %v4573_v49 = vmul.f32 %v4556_v29, %v4338_v54 }
 0xb60   : > { %4477 = vmatpush2.msra.mxu0 %v3969_v44 }
 0xb61   : > { %4479 = vmatmul.mubr.f32.vlgmr.msra.gmra.mxu0 %v10987_v48  ;;  %v3692_v7 = vpop.permute.xlu1 %3691  ;;  %v4574_v38 = vmul.f32 %v4557_v57, %v4340_v17  ;;  %v4564_v14 = vadd.f32 %v4557_v57, %v4556_v29 }
 0xb62   : > { %v3672_v59 = vpop.permute.xlu0 %3671  ;;  %v3988_v45 = vsel %vm1650_vm13, %v3690_v43, %v3692_v7 }
 0xb63   : > { %4543 = vmatprep.subr.mxu1 %v3988_v45  ;;  %v3979_v61 = vsel %vm1650_vm13, %v3670_v24, %v3672_v59  ;;  %v4581_v55 = vadd.f32 %v4574_v38, %v4573_v49  ;;  %v4912_v38 = vld [vmem:[%s5291_s13 + $0x10] sm:$0xff] }
 0xb64   : > { %4544 = vmatpush2.msra.mxu1 %v3987_v33 }
 0xb65   : > { %v3674_v41 = vpop.permute.xlu1 %3673 }
 0xb66   : > { %v3980_v21 = vsel %vm1650_vm13, %v3672_v59, %v3674_v41  ;;  %v3654_v58 = vpop.permute.xlu0 %3653 }
 0xb67   : > { %4545 = vmatprep.subr.mxu1 %v3980_v21  ;;  %v3971_v15 = vsel %vm1650_vm13, %v3652_v28, %v3654_v58 }
 0xb68   : > { %4546 = vmatpush2.msra.mxu1 %v3979_v61 }
 0xb69   : > { %v3656_v8 = vpop.permute.xlu1 %3655 }
 0xb6a   : > { %v3972_v37 = vsel %vm1650_vm13, %v3654_v58, %v3656_v8 }
 0xb6b   : > { %4547 = vmatprep.subr.mxu1 %v3972_v37 }
 0xb6c   : > { %4548 = vmatpush2.msra.mxu1 %v3971_v15 }
 0xb6d   : > { %4550 = vmatmul.mubr.f32.vlgmr.msra.gmra.mxu1 %v10987_v48  ;;  %v4409_v40 = vpop.f32.mrf.mxu1  ;;  %v13013_v48 = vld [vmem:[#allocation24_spill] sm:$0xff] }
 0xb6e   : > { %v4558_v3 = vmul.f32 %v4409_v40, %v13011_v25 }
 0xb6f   : > { %v4411_v36 = vpop.f32.mrf.mxu1 }
 0xb70   : > { %v4575_v46 = vmul.f32 %v4558_v3, %v4409_v40  ;;  %v4559_v34 = vmul.f32 %v4411_v36, %v13012_v4  ;;  %v4565_v53 = vadd.f32 %v4564_v14, %v4558_v3  ;;  %v4913_v3 = vld [vmem:[%s5291_s13 + $0x18] sm:$0xff]  ;;  %v4914_v14 = vld [vmem:[%s5291_s13 + $0x20] sm:$0xff]  ;;  %v4916_v4 = vld [vmem:[%s5291_s13 + $0x30] sm:$0xff] }
 0xb72   : > { %v4582_v5 = vadd.f32 %v4581_v55, %v4575_v46  ;;  %v4576_v51 = vmul.f32 %v4559_v34, %v4411_v36  ;;  %v4566_v27 = vadd.f32 %v4565_v53, %v4559_v34  ;;  %v4915_v55 = vld [vmem:[%s5291_s13 + $0x28] sm:$0xff]  ;;  %v4917_v53 = vld [vmem:[%s5291_s13 + $0x38] sm:$0xff] }
 0xb74   : > { %v4583_v56 = vadd.f32 %v4582_v5, %v4576_v51 }
 0xc21   : > { %v4480_v52 = vpop.f32.mrf.mxu0 }
 0xc22   : > { %v4560_v60 = vmul.f32 %v4480_v52, %v13013_v48 }
 0xc23   : > { %v4482_v23 = vpop.f32.mrf.mxu0 }
 0xc24   : > { %v4577_v42 = vmul.f32 %v4560_v60, %v4480_v52  ;;  %v4561_v39 = vmul.f32 %v4482_v23, %v13014_v47  ;;  %v4567_v13 = vadd.f32 %v4566_v27, %v4560_v60  ;;  %v4918_v60 = vld [vmem:[%s5291_s13 + $0x40] sm:$0xff] }
 0xc26   : > { %v4584_v35 = vadd.f32 %v4583_v56, %v4577_v42  ;;  %v4578_v16 = vmul.f32 %v4561_v39, %v4482_v23  ;;  %v4568_v1 = vadd.f32 %v4567_v13, %v4561_v39 }
 0xc28   : > { %v4585_v20 = vadd.f32 %v4584_v35, %v4578_v16 }
 0xc2d   : > { %v4551_v63 = vpop.f32.mrf.mxu1 }
 0xc2e   : > { %v4562_v9 = vmul.f32 %v4551_v63, %v13015_v31 }
 0xc2f   : > { %v4553_v18 = vpop.f32.mrf.mxu1 }
 0xc30   : > { %v4569_v62 = vadd.f32 %v4568_v1, %v4562_v9  ;;  %v4579_v22 = vmul.f32 %v4562_v9, %v4551_v63  ;;  %v4563_v24 = vmul.f32 %v4553_v18, %v13016_v11 }
 0xc32   : > { %v4586_v12 = vadd.f32 %v4585_v20, %v4579_v22  ;;  %v4570_v19 = vadd.f32 %v4569_v62, %v4563_v24  ;;  %v4580_v10 = vmul.f32 %v4563_v24, %v4553_v18 }
 0xc34   : > { %v4587_v6 = vadd.f32 %v4586_v12, %v4580_v10  ;;  %4571 = vadd.xlane.f32.xlu0 %v4570_v19 }
 0xc36   : > { %4588 = vadd.xlane.f32.xlu1 %v4587_v6 }
 0xcbd   : > { %v4572_v2 = vpop.xlane.xlu0 %4571 }
 0xcbe   : > { %v4590_v0 = vmul.f32 0.001953125, %v4572_v2 }
 0xcbf   : > { %v4589_v26 = vpop.xlane.xlu1 %4588 }
 0xcc0   : > { %v4591_v28 = vmul.f32 0.001953125, %v4589_v26  ;;  %v4592_v43 = vmul.f32 %v4590_v0, %v4590_v0  ;;  %v4594_v7 = vsub.f32 %v4338_v54, %v4590_v0  ;;  %v4595_v59 = vsub.f32 %v4340_v17, %v4590_v0 }
 0xcc1   : > { %v4596_v45 = vsub.f32 %v4409_v40, %v4590_v0  ;;  %v4597_v33 = vsub.f32 %v4411_v36, %v4590_v0  ;;  %v4598_v21 = vsub.f32 %v4480_v52, %v4590_v0  ;;  %v4599_v61 = vsub.f32 %v4482_v23, %v4590_v0  ;;  %v4911_v40 = vld [vmem:[%s5291_s13 + $0x8] sm:$0xff]  ;;  %s4629_s13 = scalar_lea.sflag [#allocation4], %s5287_s8 }
 0xcc2   : > { %v4593_v50 = vsub.f32 %v4591_v28, %v4592_v43  ;;  %v4600_v58 = vsub.f32 %v4551_v63, %v4590_v0  ;;  %v4601_v8 = vsub.f32 %v4553_v18, %v4590_v0 }
 0xcc4   : > { %v4602_v44 = vadd.f32 1e-05, %v4593_v50 }
 0xcc6   : > { %4900 = vrsqrt.f32 %v4602_v44 }
 0xcd3   : > { %v4901_v41 = vpop.eup %4900 }
 0xcd4   : > { %v4604_v37 = vmul.f32 %v4901_v41, %v4594_v7  ;;  %v4605_v15 = vmul.f32 %v4901_v41, %v4595_v59  ;;  %v4606_v32 = vmul.f32 %v4901_v41, %v4596_v45  ;;  %v4607_v29 = vmul.f32 %v4901_v41, %v4597_v33 }
 0xcd5   : > { %v4608_v54 = vmul.f32 %v4901_v41, %v4598_v21  ;;  %v4609_v17 = vmul.f32 %v4901_v41, %v4599_v61  ;;  %v4610_v30 = vmul.f32 %v4901_v41, %v4600_v58  ;;  %v4611_v57 = vmul.f32 %v4901_v41, %v4601_v8 }
 0xcd6   : > { %v4612_v49 = vadd.f32 %v4911_v40, %v4604_v37  ;;  %v4613_v25 = vadd.f32 %v4912_v38, %v4605_v15  ;;  %v4614_v36 = vadd.f32 %v4913_v3, %v4606_v32  ;;  %v4615_v52 = vadd.f32 %v4914_v14, %v4607_v29 }
 0xcd7   : > { %v4616_v46 = vadd.f32 %v4915_v55, %v4608_v54  ;;  %v4617_v34 = vadd.f32 %v4916_v4, %v4609_v17  ;;  %v4618_v48 = vadd.f32 %v4917_v53, %v4610_v30  ;;  %v4619_v23 = vadd.f32 %v4918_v60, %v4611_v57 }
 0xcd8   : > { %4620 = vst [vmem:[%s11353_s5] sm:$0xff] %v4612_v49  ;;  %4621 = vst [vmem:[%s11353_s5 + $0x8] sm:$0xff] %v4613_v25 }
 0xcd9   : > { %4622 = vst [vmem:[%s11353_s5 + $0x10] sm:$0xff] %v4614_v36  ;;  %4623 = vst [vmem:[%s11353_s5 + $0x18] sm:$0xff] %v4615_v52 }
 0xcda   : > { %4624 = vst [vmem:[%s11353_s5 + $0x20] sm:$0xff] %v4616_v46  ;;  %4625 = vst [vmem:[%s11353_s5 + $0x28] sm:$0xff] %v4617_v34 }
 0xcdb   : > { %4626 = vst [vmem:[%s11353_s5 + $0x30] sm:$0xff] %v4618_v48  ;;  %4627 = vst [vmem:[%s11353_s5 + $0x38] sm:$0xff] %v4619_v23 }
 0xcdc   : > { %5038 = shalt.err (!%p5035_p3)
}
 0xcdd   : > { %s5039_s9 = scalar_lea.hbm %s11367_s12, 1024  ;;  %s5043_s20 = scalar_lea.hbm %s11422_s4, 2048 }
 0xcde   : > { %p5040_p4 = scmp.ne.s32.totalorder %s11367_s12, %s5039_s9  ;;  %p5044_p11 = scmp.lt.s32.totalorder %s11367_s12, %s11422_s4 }
 0xcdf   : > { %p5045_p6 = scmp.lt.s32.totalorder %s5043_s20, %s5039_s9 }
 0xce0   : > { %p5041_p2 = pnand %p5040_p4, %p13017_p5 }
 0xce1   : > { %p5046_p8 = por %p5045_p6, %p5044_p11 }
 0xce2   : > { %p5042_p9 = pneg %p5041_p2 }
 0xce4   : > { %p5047_p12 = pnand %p5046_p8, %p5042_p9 }
 0xce6   : > { %5050 = shalt.err (!%p5047_p12)
}
 0xce7   : > { %4785 = dma.vmem_to_hbm [thread:$0]  (%p13017_p5), %s11369_s6, 1024, %s11367_s12, %s4629_s13  }
 0xce8 PF: > { %s4655_s29 = sand.u32 1, %s5085_s15   ;;  %p13018_p7 = scmp.ne.s32.totalorder %s11896_s22, 0 }
 0xce9   : > { %p13019_p10 = scmp.ge.s32.totalorder %s5097_s18, 2  ;;  %s4656_s27 = scalar_lea.sflag [#allocation4], %s4655_s29 }
 0xceb   : > { %p4802_p13 = pnand %p13019_p10, %p13018_p7 }
 0xced   : > { %p4803_p0 = pneg %p4802_p13 }
 0xcef   : > { %5080 = dma.done.wait (%p4803_p0), %s4656_s27, 1024  }
 0xcf0   : > { %5082 = vsyncadd (%p4803_p0), %s4656_s27, 4294966272  ;;  %p19_p1 = scmp.ge.s32.totalorder %s5241_s14, 4   ;;  %s13020_s15 = smov %s5089_s16 }
 0xcf1   : > { %s13021_s16 = smov %s5093_s17  ;;  %s13022_s17 = smov %s5251_s25 }
 0xcf2   : > { %s13023_s18 = smov %s5241_s14  ;;  %21 = sbr.rel (!%p19_p1) target bundleno = 7 (0x7), region = 93 }
 0xcf7   :  { %4661 = vsyncpa [#allocation3], 1 }
 0xcf8   :  { %4663 = vsyncpa [#allocation3 + $0x1], 1 }
 0xcf9   :  { %4664 = vsyncpa [#allocation6], 1 }
 0xcfa   :  { %4665 = vsyncpa [#allocation9], 1 }
 0xcfb   :  { %4666 = vsyncpa [#allocation4], 1 }
 0xcfc   :  { %4668 = vsyncpa [#allocation4 + $0x1], 1 }

</bundles_post_ra>
